<compile_context>
chip_gen: v7x
topology: tpu7x:2x2x1
jax: 0.10.0
libtpu: 0.0.40
codegen_flags: <defaults>
</compile_context>

<pallas_src>
import functools
import math

import jax
import jax.numpy as jnp
from jax.experimental import pallas as pl
from jax.experimental.pallas import tpu as pltpu

LN_EPS = 1e-5
NEG_SLOPE = 0.01  # nn.LeakyReLU default


# ------------------------------------------------------------------ in-kernel helpers

def _dot(a, b, mxu_dtype):
    """MXU matmul with f32 accumulation; full-precision f32 passes on the f32 path."""
    prec = (jax.lax.Precision.HIGHEST
            if jnp.dtype(mxu_dtype) == jnp.dtype(jnp.float32) else None)
    return jnp.dot(a.astype(mxu_dtype), b, preferred_element_type=jnp.float32,
                   precision=prec)


def _layer_norm(x, gamma, beta):
    """Channel LayerNorm over the last (lane) axis of a (T, C) f32 tile."""
    mean = jnp.mean(x, axis=-1, keepdims=True)
    var = jnp.mean(jnp.square(x - mean), axis=-1, keepdims=True)
    return (x - mean) * jax.lax.rsqrt(var + LN_EPS) * gamma + beta


def _conv1d_same(h, w_flat, b, *, ksize, pad, mxu_dtype, use_im2col):
    """'same' Conv1d of a (T, Cin) f32 tile.

    w_flat is (ksize*Cin, Cout), already scaled / cast in the wrapper; b is (1, Cout)
    f32.  Zero halos are built at value level (no scratch) and the K taps are fused
    into ONE (T, K*Cin) @ (K*Cin, Cout) MXU matmul (im2col) when supported.
    """
    T, Cin = h.shape
    if pad > 0:
        z = jnp.zeros((pad, Cin), h.dtype)
        hp = jnp.concatenate([z, h, z], axis=0)          # (T + 2*pad, Cin)
    else:
        hp = h
    if ksize == 1:
        out = _dot(hp, w_flat, mxu_dtype)
    elif use_im2col:
        # Single fat matmul: lhs[:, k*Cin + c] = padded[t + k, c].
        lhs = jnp.concatenate([hp[k:k + T, :] for k in range(ksize)], axis=-1)
        out = _dot(lhs, w_flat, mxu_dtype)
    else:
        # Fallback: K shifted skinny matmuls (same math, used only if the Mosaic build
        # rejects unaligned minor-dim concatenation; see _im2col_supported()).
        out = _dot(hp[0:T, :], w_flat[0:Cin, :], mxu_dtype)
        for k in range(1, ksize):
            out = out + _dot(hp[k:k + T, :], w_flat[k * Cin:(k + 1) * Cin, :], mxu_dtype)
    return out + b


def _residual_block(x, gamma, beta, wk_flat, bk, w1x1, b1x1, *, ksize, pad, mxu_dtype,
                    use_im2col):
    """x + Conv1x1(LeakyReLU(ConvK(LN_C(x)))), masked by nonpadding.

    The LambdaLayer K**-0.5 scale is pre-folded into wk_flat/bk by the wrapper.  The
    nonpadding mask is rows of x that are exactly zero (matches the reference module).
    """
    nonpad = (jnp.sum(jnp.abs(x), axis=-1, keepdims=True) > 0).astype(jnp.float32)
    h = _layer_norm(x, gamma, beta)
    h = _conv1d_same(h, wk_flat, bk, ksize=ksize, pad=pad, mxu_dtype=mxu_dtype,
                     use_im2col=use_im2col)
    h = jnp.where(h > 0, h, NEG_SLOPE * h)               # LeakyReLU (f32, VPU)
    h = _dot(h, w1x1, mxu_dtype) + b1x1
    return (x + h) * nonpad


# ----------------------------------------------------------------------------- kernels

def _down_layer_kernel(x_ref,
                       g1_ref, be1_ref, w1a_ref, b1a_ref, w1b_ref, b1b_ref,
                       wm_ref, bm_ref,
                       g2_ref, be2_ref, w2a_ref, b2a_ref, w2b_ref, b2b_ref,
                       skip_ref, down_ref, pool_scr,
                       *, ksize, pad, rate, mxu_dtype, use_im2col):
    x = x_ref[...].astype(jnp.float32)                   # (T, Cin)

    # ResidualBlock(Cin)
    h = _residual_block(x, g1_ref[...], be1_ref[...], w1a_ref[...], b1a_ref[...],
                        w1b_ref[...], b1b_ref[...], ksize=ksize, pad=pad,
                        mxu_dtype=mxu_dtype, use_im2col=use_im2col)
    # mid Conv1d(Cin, Cout, K, padding=(K-1)//2)
    h = _conv1d_same(h, wm_ref[...], bm_ref[...], ksize=ksize, pad=pad,
                     mxu_dtype=mxu_dtype, use_im2col=use_im2col)
    # ResidualBlock(Cout)
    skip = _residual_block(h, g2_ref[...], be2_ref[...], w2a_ref[...], b2a_ref[...],
                           w2b_ref[...], b2b_ref[...], ksize=ksize, pad=pad,
                           mxu_dtype=mxu_dtype, use_im2col=use_im2col)
    skip_ref[...] = skip.astype(skip_ref.dtype)

    # AvgPool1d(rate): strided 32-bit VPU reduction from an f32 staging copy of the
    # in-register skip value (decoupled from the skip output store and its dtype).
    if rate == 1:
        down_ref[...] = skip.astype(down_ref.dtype)
    else:
        pool_scr[...] = skip
        To = down_ref.shape[0]
        acc = pool_scr[pl.ds(0, To, stride=rate), :]
        for r in range(1, rate):
            acc = acc + pool_scr[pl.ds(r, To, stride=rate), :]
        down_ref[...] = (acc * (1.0 / rate)).astype(down_ref.dtype)


def _post_kernel(x_ref, g_ref, be_ref, w_ref, b_ref, o_ref,
                 *, ksize, pad, mxu_dtype, use_im2col):
    x = x_ref[...].astype(jnp.float32)                   # (T, C)
    h = _layer_norm(x, g_ref[...], be_ref[...])
    out = _conv1d_same(h, w_ref[...], b_ref[...], ksize=ksize, pad=pad,
                       mxu_dtype=mxu_dtype, use_im2col=use_im2col)
    o_ref[...] = out.astype(o_ref.dtype)


# -------------------------------------------------------------------- feature probes

@functools.lru_cache(maxsize=None)
def _im2col_supported():
    """Probe unaligned minor-dim concatenation (the only non-vanilla op in the im2col
    conv).  Falls back to the per-tap formulation if the Mosaic build rejects it."""
    def kern(x_ref, w_ref, b_ref, o_ref):
        o_ref[...] = _conv1d_same(x_ref[...].astype(jnp.float32), w_ref[...], b_ref[...],
                                  ksize=3, pad=1, mxu_dtype=jnp.float32, use_im2col=True)
    try:
        out = pl.pallas_call(
            kern, out_shape=jax.ShapeDtypeStruct((16, 16), jnp.float32),
        )(jnp.ones((16, 80), jnp.float32), jnp.ones((240, 16), jnp.float32),
          jnp.zeros((1, 16), jnp.float32))
        jax.block_until_ready(out)
        return True
    except Exception:
        return False


@functools.lru_cache(maxsize=None)
def _buffered_weight_kwargs():
    """Probe single-buffering for constant-index operands (pipeline_mode=pl.Buffered(1));
    frees the redundant second VMEM buffer of every weight/bias operand when supported."""
    try:
        kwargs = {"pipeline_mode": pl.Buffered(1)}

        def kern(x_ref, o_ref):
            o_ref[...] = x_ref[...] * 2.0

        out = pl.pallas_call(
            kern, grid=(2,),
            in_specs=[pl.BlockSpec((8, 128), lambda i: (0, 0), **kwargs)],
            out_specs=pl.BlockSpec((8, 128), lambda i: (0, 0)),
            out_shape=jax.ShapeDtypeStruct((8, 128), jnp.float32),
        )(jnp.ones((8, 128), jnp.float32))
        jax.block_until_ready(out)
        return kwargs
    except Exception:
        return {}


# ----------------------------------------------------------------------------- wrappers

def _flatten_conv_w(w, scale, mxu_dtype):
    """(K, Cin, Cout) conv weight -> (K*Cin, Cout) im2col layout, scaled, MXU dtype."""
    K, Cin, Cout = w.shape
    return (w * scale).reshape(K * Cin, Cout).astype(mxu_dtype)


def _const_spec(shape, extra):
    """Whole-array block replicated across the batch grid (constant index map)."""
    nd = len(shape)

    def index_map(b):
        return (0,) * nd

    return pl.BlockSpec(shape, index_map, **extra)


def _bytes(shape, dtype):
    return math.prod(shape) * jnp.dtype(dtype).itemsize


def _compiler_params(per_step_bytes):
    # Scoped-VMEM limit derived from the real per-step working set (double buffered +
    # headroom); raises v5e's 16 MiB default, stays within v7x's 64 MiB physical VMEM.
    limit = int(min(64 << 20, max(32 << 20, 2 * per_step_bytes + (2 << 20))))
    return pltpu.CompilerParams(dimension_semantics=("parallel",),
                                vmem_limit_bytes=limit)


def down_layer(x, rb1, mid, rb2, *, ksize, rate, mxu_dtype, skip_dtype=None):
    """Fused ResidualBlock -> Conv1d -> ResidualBlock -> AvgPool1d (one pallas_call)."""
    B, T, Cin = x.shape
    Cout = mid["w"].shape[-1]
    assert ksize % 2 == 1, "odd kernel_size required for 'same' residual convs"
    assert T >= rate, "AvgPool1d needs at least one full window"
    # Trailing T % rate frames are dropped, matching nn.AvgPool1d's floor semantics.
    pad = (ksize - 1) // 2
    To = T // rate
    skip_dtype = x.dtype if skip_dtype is None else skip_dtype

    # One-time (per forward call, outside the Pallas grid) weight prep: fold the
    # K**-0.5 LambdaLayer scale, flatten to im2col layout, cast to the MXU dtype.
    scale = ksize ** -0.5
    consts = [
        rb1["gamma"], rb1["beta"],
        _flatten_conv_w(rb1["w1"], scale, mxu_dtype), rb1["b1"] * scale,
        rb1["w2"].astype(mxu_dtype), rb1["b2"],
        _flatten_conv_w(mid["w"], 1.0, mxu_dtype), mid["b"],
        rb2["gamma"], rb2["beta"],
        _flatten_conv_w(rb2["w1"], scale, mxu_dtype), rb2["b1"] * scale,
        rb2["w2"].astype(mxu_dtype), rb2["b2"],
    ]

    kern = functools.partial(_down_layer_kernel, ksize=ksize, pad=pad, rate=rate,
                             mxu_dtype=mxu_dtype, use_im2col=_im2col_supported())
    wkw = _buffered_weight_kwargs()
    in_specs = ([pl.BlockSpec((None, T, Cin), lambda b: (b, 0, 0))]
                + [_const_spec(c.shape, wkw) for c in consts])
    out_specs = (pl.BlockSpec((None, T, Cout), lambda b: (b, 0, 0)),
                 pl.BlockSpec((None, To, Cout), lambda b: (b, 0, 0)))

    per_step = (_bytes((T, Cin), x.dtype) + _bytes((T, Cout), skip_dtype)
                + _bytes((To, Cout), x.dtype) + _bytes((T, Cout), jnp.float32)
                + sum(_bytes(c.shape, c.dtype) for c in consts))

    skip, down = pl.pallas_call(
        kern,
        grid=(B,),
        in_specs=in_specs,
        out_specs=out_specs,
        out_shape=(jax.ShapeDtypeStruct((B, T, Cout), skip_dtype),
                   jax.ShapeDtypeStruct((B, To, Cout), x.dtype)),
        scratch_shapes=[pltpu.VMEM((T, Cout), jnp.float32)],   # AvgPool staging (f32)
        compiler_params=_compiler_params(per_step),
    )(x, *consts)
    return skip, down


def post_net(x, gamma, beta, w, b, *, ksize, mxu_dtype):
    """Fused channel-LayerNorm + Conv1d tail (one pallas_call)."""
    B, T, C = x.shape
    Cout = w.shape[-1]
    assert ksize % 2 == 1
    pad = ksize // 2
    consts = [gamma, beta, _flatten_conv_w(w, 1.0, mxu_dtype), b]

    kern = functools.partial(_post_kernel, ksize=ksize, pad=pad, mxu_dtype=mxu_dtype,
                             use_im2col=_im2col_supported())
    wkw = _buffered_weight_kwargs()
    per_step = (_bytes((T, C), x.dtype) + _bytes((T, Cout), x.dtype)
                + sum(_bytes(c.shape, c.dtype) for c in consts))
    return pl.pallas_call(
        kern,
        grid=(B,),
        in_specs=([pl.BlockSpec((None, T, C), lambda bi: (bi, 0, 0))]
                  + [_const_spec(c.shape, wkw) for c in consts]),
        out_specs=pl.BlockSpec((None, T, Cout), lambda bi: (bi, 0, 0)),
        out_shape=jax.ShapeDtypeStruct((B, T, Cout), x.dtype),
        compiler_params=_compiler_params(per_step),
    )(x, *consts)


# ----------------------------------------------------------------------------- params / forward

def _init_rb(key, ch, ksize):
    k = jax.random.split(key, 6)
    return {
        "gamma": 1.0 + 0.1 * jax.random.normal(k[0], (1, ch), jnp.float32),
        "beta": 0.05 * jax.random.normal(k[1], (1, ch), jnp.float32),
        "w1": 0.1 * jax.random.normal(k[2], (ksize, ch, ch), jnp.float32),
        "b1": 0.02 * jax.random.normal(k[3], (1, ch), jnp.float32),
        "w2": 0.1 * jax.random.normal(k[4], (ch, ch), jnp.float32),
        "b2": 0.02 * jax.random.normal(k[5], (1, ch), jnp.float32),
    }


def init_unet_down_params(key, hidden_size, n_layers, ksize, down_rates,
                          channel_multiples=None, constant_channels=False):
    cm = channel_multiples if channel_multiples is not None else down_rates
    params = {"layers": []}
    in_ch = hidden_size
    for i in range(n_layers):
        out_ch = in_ch if constant_channels else int(in_ch * cm[i])
        key, k1, k2, k3, k4 = jax.random.split(key, 5)
        params["layers"].append({
            "rb1": _init_rb(k1, in_ch, ksize),
            "mid": {"w": 0.1 * jax.random.normal(k2, (ksize, in_ch, out_ch), jnp.float32),
                    "b": 0.02 * jax.random.normal(k3, (1, out_ch), jnp.float32)},
            "rb2": _init_rb(k4, out_ch, ksize),
        })
        in_ch = out_ch
    key, k1, k2, k3, k4 = jax.random.split(key, 5)
    params["last_norm"] = {"gamma": 1.0 + 0.1 * jax.random.normal(k3, (1, in_ch), jnp.float32),
                           "beta": 0.05 * jax.random.normal(k4, (1, in_ch), jnp.float32)}
    params["post"] = {"w": 0.1 * jax.random.normal(k1, (ksize, in_ch, in_ch), jnp.float32),
                      "b": 0.02 * jax.random.normal(k2, (1, in_ch), jnp.float32)}
    return params


def unet_down_forward(params, x, down_rates, ksize, mxu_dtype=jnp.bfloat16,
                      skip_dtype=None):
    """x: (B, T, H) channel-last (is_BTC=True).  Returns (x_down, skip_xs)."""
    skip_xs = []
    for i, layer in enumerate(params["layers"]):
        skip, x = down_layer(x, layer["rb1"], layer["mid"], layer["rb2"],
                             ksize=ksize, rate=down_rates[i],
                             mxu_dtype=mxu_dtype, skip_dtype=skip_dtype)
        skip_xs.append(skip)
    x = post_net(x, params["last_norm"]["gamma"], params["last_norm"]["beta"],
                 params["post"]["w"], params["post"]["b"],
                 ksize=ksize, mxu_dtype=mxu_dtype)
    return x, skip_xs


# ----------------------------------------------------------------------------- pure-JAX reference

_HI = jax.lax.Precision.HIGHEST


def _ref_conv1d(x, w, b, pad):
    K = w.shape[0]
    xp = jnp.pad(x, ((0, 0), (pad, pad), (0, 0)))
    T = x.shape[1] + 2 * pad - (K - 1)
    acc = sum(jnp.einsum("btc,cd->btd", xp[:, k:k + T, :], w[k], precision=_HI)
              for k in range(K))
    return acc + b[0]


def _ref_ln(x, gamma, beta):
    mean = x.mean(-1, keepdims=True)
    var = ((x - mean) ** 2).mean(-1, keepdims=True)
    return (x - mean) / jnp.sqrt(var + LN_EPS) * gamma[0] + beta[0]


def _ref_rb(x, p, ksize):
    nonpad = (jnp.abs(x).sum(-1, keepdims=True) > 0).astype(x.dtype)
    h = _ref_ln(x, p["gamma"], p["beta"])
    h = _ref_conv1d(h, p["w1"], p["b1"], (ksize - 1) // 2) * (ksize ** -0.5)
    h = jnp.where(h > 0, h, NEG_SLOPE * h)
    h = jnp.einsum("btc,cd->btd", h, p["w2"], precision=_HI) + p["b2"][0]
    return (x + h) * nonpad


def ref_forward(params, x, down_rates, ksize):
    skips = []
    for i, layer in enumerate(params["layers"]):
        h = _ref_rb(x, layer["rb1"], ksize)
        h = _ref_conv1d(h, layer["mid"]["w"], layer["mid"]["b"], (ksize - 1) // 2)
        skip = _ref_rb(h, layer["rb2"], ksize)
        B, T, C = skip.shape
        To = T // down_rates[i]
        x = skip[:, :To * down_rates[i], :].reshape(B, To, down_rates[i], C).mean(2)
        skips.append(skip)
    h = _ref_ln(x, params["last_norm"]["gamma"], params["last_norm"]["beta"])
    x = _ref_conv1d(h, params["post"]["w"], params["post"]["b"], ksize // 2)
    return x, skips


# ----------------------------------------------------------------------------- main

if __name__ == "__main__":
    B, T, H = 2, 16, 16
    n_layers, ksize, down_rates = 2, 3, [2, 2]

    key = jax.random.PRNGKey(0)
    kp, kx = jax.random.split(key)
    params = init_unet_down_params(kp, H, n_layers, ksize, down_rates)
    x = jax.random.normal(kx, (B, T, H), jnp.float32)

    # Resolve feature probes once, eagerly (outside any jit trace).
    _im2col_supported()
    _buffered_weight_kwargs()

    ref_out, ref_skips = ref_forward(params, x, down_rates, ksize)

    # f32 MXU path (full-precision passes): tight check against the pure-JAX reference.
    fwd_f32 = jax.jit(lambda p, xx: unet_down_forward(p, xx, down_rates, ksize,
                                                      mxu_dtype=jnp.float32))
    out, skips = fwd_f32(params, x)
    out = jax.block_until_ready(out)
    skips = [jax.block_until_ready(s) for s in skips]
    assert out.shape == (B, T // 4, H * 4), out.shape
    assert jnp.allclose(out, ref_out, atol=1e-3, rtol=1e-3)
    for s, rs in zip(skips, ref_skips):
        assert s.shape == rs.shape
        assert jnp.allclose(s, rs, atol=1e-3, rtol=1e-3)

    # bf16 MXU path with bf16 skip writeback (fast path on v6e/v7x); looser tolerance.
    fwd_bf16 = jax.jit(lambda p, xx: unet_down_forward(p, xx, down_rates, ksize,
                                                       mxu_dtype=jnp.bfloat16,
                                                       skip_dtype=jnp.bfloat16))
    out_bf, skips_bf = fwd_bf16(params, x)
    out_bf = jax.block_until_ready(out_bf)
    skips_bf = [jax.block_until_ready(s) for s in skips_bf]
    assert out_bf.shape == ref_out.shape
    assert jnp.allclose(out_bf, ref_out, atol=1.5e-1, rtol=1.5e-1)
    for s, rs in zip(skips_bf, ref_skips):
        assert s.shape == rs.shape
        assert jnp.allclose(s.astype(jnp.float32), rs, atol=1.5e-1, rtol=1.5e-1)

    print("KERNEL_OK")
</pallas_src>

<mosaic_0001>
module attributes {stable_mosaic.version = 11 : i64} {
  func.func @kern(%arg0: memref<16x80xf32, #tpu.memory_space<vmem>>, %arg1: memref<240x16xf32, #tpu.memory_space<vmem>>, %arg2: memref<1x16xf32, #tpu.memory_space<vmem>>, %arg3: memref<16x16xf32, #tpu.memory_space<vmem>>) attributes {dimension_semantics = [], scalar_prefetch = 0 : i64, scratch_operands = 0 : i64, tpu.core_type = #tpu.core_type<tc>} {
    %c0 = arith.constant 0 : index
    %c0_0 = arith.constant 0 : index
    %0 = vector.load %arg0[%c0, %c0_0] : memref<16x80xf32, #tpu.memory_space<vmem>>, vector<16x80xf32>
    %c0_1 = arith.constant 0 : index
    %c0_2 = arith.constant 0 : index
    %1 = vector.load %arg1[%c0_1, %c0_2] : memref<240x16xf32, #tpu.memory_space<vmem>>, vector<240x16xf32>
    %c0_3 = arith.constant 0 : index
    %c0_4 = arith.constant 0 : index
    %2 = vector.load %arg2[%c0_3, %c0_4] : memref<1x16xf32, #tpu.memory_space<vmem>>, vector<1x16xf32>
    %cst = arith.constant 0.000000e+00 : f32
    %3 = vector.broadcast %cst : f32 to vector<1x80xf32>
    %4 = tpu.concatenate %3, %0, %3 in 0 : vector<1x80xf32>, vector<16x80xf32>, vector<1x80xf32> -> vector<18x80xf32>
    %5 = vector.extract_strided_slice %4 {offsets = [0, 0], sizes = [16, 80], strides = [1, 1]} : vector<18x80xf32> to vector<16x80xf32>
    %6 = vector.extract_strided_slice %4 {offsets = [1, 0], sizes = [16, 80], strides = [1, 1]} : vector<18x80xf32> to vector<16x80xf32>
    %7 = vector.extract_strided_slice %4 {offsets = [2, 0], sizes = [16, 80], strides = [1, 1]} : vector<18x80xf32> to vector<16x80xf32>
    %8 = tpu.concatenate %5, %6, %7 in 1 : vector<16x80xf32>, vector<16x80xf32>, vector<16x80xf32> -> vector<16x240xf32>
    %cst_5 = arith.constant dense<0.000000e+00> : vector<16x16xf32>
    %9 = tpu.matmul %8, %1, %cst_5 {dimension_numbers = #tpu.dot_dimension_numbers<[1], [0], [0], [1], [0, 0, 1, 1], [], []>, precision = #tpu.contract_precision<fp32>} : vector<16x240xf32>, vector<240x16xf32>, vector<16x16xf32> -> vector<16x16xf32>
    %10 = vector.broadcast %2 : vector<1x16xf32> to vector<16x16xf32>
    %11 = arith.addf %9, %10 : vector<16x16xf32>
    %c0_6 = arith.constant 0 : index
    %c0_7 = arith.constant 0 : index
    %12 = vector.load %arg3[%c0_6, %c0_7] : memref<16x16xf32, #tpu.memory_space<vmem>>, vector<16x16xf32>
    tpu.vector_store %arg3[%c0_6, %c0_7], %11 {strides = array<i32>} : memref<16x16xf32, #tpu.memory_space<vmem>>, vector<16x16xf32>,
    return
  }
}

module attributes {stable_mosaic.version = 11 : i64} {
  func.func @kern(%arg0: i32, %arg1: memref<8x128xf32, #tpu.memory_space<vmem>>, %arg2: memref<8x128xf32, #tpu.memory_space<vmem>>) attributes {dimension_semantics = [#tpu.dimension_semantics<arbitrary>], iteration_bounds = array<i64: 2>, scalar_prefetch = 0 : i64, scratch_operands = 0 : i64, tpu.core_type = #tpu.core_type<tc>, window_params = [{pipeline_mode = #tpu.pipeline_mode<synchronous>, transform_indices = @transform_0, window_bounds = array<i64: 8, 128>}, {pipeline_mode = #tpu.pipeline_mode<synchronous>, transform_indices = @transform_1, window_bounds = array<i64: 8, 128>}]} {
    %c0 = arith.constant 0 : index
    %c0_0 = arith.constant 0 : index
    %0 = vector.load %arg1[%c0, %c0_0] : memref<8x128xf32, #tpu.memory_space<vmem>>, vector<8x128xf32>
    %cst = arith.constant 2.000000e+00 : f32
    %1 = vector.broadcast %cst : f32 to vector<8x128xf32>
    %2 = arith.mulf %0, %1 : vector<8x128xf32>
    %c0_1 = arith.constant 0 : index
    %c0_2 = arith.constant 0 : index
    %3 = vector.load %arg2[%c0_1, %c0_2] : memref<8x128xf32, #tpu.memory_space<vmem>>, vector<8x128xf32>
    tpu.vector_store %arg2[%c0_1, %c0_2], %2 {strides = array<i32>} : memref<8x128xf32, #tpu.memory_space<vmem>>, vector<8x128xf32>,
    return
  }
  func.func @transform_0(%arg0: i32) -> (i32, i32) {
    %c0_i32 = arith.constant 0 : i32
    %c0_i32_0 = arith.constant 0 : i32
    %c0_i32_1 = arith.constant 0 : i32
    return %c0_i32, %c0_i32_0 : i32, i32
  }
  func.func @transform_1(%arg0: i32) -> (i32, i32) {
    %c0_i32 = arith.constant 0 : i32
    %c0_i32_0 = arith.constant 0 : i32
    %c0_i32_1 = arith.constant 0 : i32
    return %c0_i32, %c0_i32_0 : i32, i32
  }
}

module attributes {stable_mosaic.version = 11 : i64} {
  func.func @_post_kernel(%arg0: i32, %arg1: memref<1x4x64xf32, #tpu.memory_space<vmem>>, %arg2: memref<1x64xf32, #tpu.memory_space<vmem>>, %arg3: memref<1x64xf32, #tpu.memory_space<vmem>>, %arg4: memref<192x64xf32, #tpu.memory_space<vmem>>, %arg5: memref<1x64xf32, #tpu.memory_space<vmem>>, %arg6: memref<1x4x64xf32, #tpu.memory_space<vmem>>) attributes {dimension_semantics = [#tpu.dimension_semantics<parallel>], iteration_bounds = array<i64: 2>, scalar_prefetch = 0 : i64, scratch_operands = 0 : i64, tpu.core_type = #tpu.core_type<tc>, window_params = [{transform_indices = @transform_0, window_bounds = array<i64: 1, 4, 64>}, {pipeline_mode = #tpu.pipeline_mode<synchronous>, transform_indices = @transform_1, window_bounds = array<i64: 1, 64>}, {pipeline_mode = #tpu.pipeline_mode<synchronous>, transform_indices = @transform_2, window_bounds = array<i64: 1, 64>}, {pipeline_mode = #tpu.pipeline_mode<synchronous>, transform_indices = @transform_3, window_bounds = array<i64: 192, 64>}, {pipeline_mode = #tpu.pipeline_mode<synchronous>, transform_indices = @transform_4, window_bounds = array<i64: 1, 64>}, {transform_indices = @transform_5, window_bounds = array<i64: 1, 4, 64>}]} {
    %c0 = arith.constant 0 : index
    %c0_0 = arith.constant 0 : index
    %c0_1 = arith.constant 0 : index
    %0 = vector.load %arg1[%c0, %c0_0, %c0_1] : memref<1x4x64xf32, #tpu.memory_space<vmem>>, vector<1x4x64xf32>
    %1 = vector.shape_cast %0 : vector<1x4x64xf32> to vector<4x64xf32>
    %c0_2 = arith.constant 0 : index
    %c0_3 = arith.constant 0 : index
    %2 = vector.load %arg2[%c0_2, %c0_3] : memref<1x64xf32, #tpu.memory_space<vmem>>, vector<1x64xf32>
    %c0_4 = arith.constant 0 : index
    %c0_5 = arith.constant 0 : index
    %3 = vector.load %arg3[%c0_4, %c0_5] : memref<1x64xf32, #tpu.memory_space<vmem>>, vector<1x64xf32>
    %cst = arith.constant dense<0.000000e+00> : vector<4xf32>
    %4 = vector.multi_reduction <add>, %1, %cst [1] : vector<4x64xf32> to vector<4xf32>
    %5 = vector.shape_cast %4 : vector<4xf32> to vector<4x1xf32>
    %cst_6 = arith.constant 6.400000e+01 : f32
    %6 = vector.broadcast %cst_6 : f32 to vector<4x1xf32>
    %7 = arith.divf %5, %6 : vector<4x1xf32>
    %8 = vector.broadcast %7 : vector<4x1xf32> to vector<4x64xf32>
    %9 = arith.subf %1, %8 : vector<4x64xf32>
    %10 = arith.mulf %9, %9 : vector<4x64xf32>
    %cst_7 = arith.constant dense<0.000000e+00> : vector<4xf32>
    %11 = vector.multi_reduction <add>, %10, %cst_7 [1] : vector<4x64xf32> to vector<4xf32>
    %12 = vector.shape_cast %11 : vector<4xf32> to vector<4x1xf32>
    %cst_8 = arith.constant 6.400000e+01 : f32
    %13 = vector.broadcast %cst_8 : f32 to vector<4x1xf32>
    %14 = arith.divf %12, %13 : vector<4x1xf32>
    %15 = vector.broadcast %7 : vector<4x1xf32> to vector<4x64xf32>
    %16 = arith.subf %1, %15 : vector<4x64xf32>
    %cst_9 = arith.constant 9.99999974E-6 : f32
    %17 = vector.broadcast %cst_9 : f32 to vector<4x1xf32>
    %18 = arith.addf %14, %17 : vector<4x1xf32>
    %19 = math.rsqrt %18 : vector<4x1xf32>
    %20 = vector.broadcast %19 : vector<4x1xf32> to vector<4x64xf32>
    %21 = arith.mulf %16, %20 : vector<4x64xf32>
    %22 = vector.broadcast %2 : vector<1x64xf32> to vector<4x64xf32>
    %23 = arith.mulf %21, %22 : vector<4x64xf32>
    %24 = vector.broadcast %3 : vector<1x64xf32> to vector<4x64xf32>
    %25 = arith.addf %23, %24 : vector<4x64xf32>
    %c0_10 = arith.constant 0 : index
    %c0_11 = arith.constant 0 : index
    %26 = vector.load %arg4[%c0_10, %c0_11] : memref<192x64xf32, #tpu.memory_space<vmem>>, vector<192x64xf32>
    %c0_12 = arith.constant 0 : index
    %c0_13 = arith.constant 0 : index
    %27 = vector.load %arg5[%c0_12, %c0_13] : memref<1x64xf32, #tpu.memory_space<vmem>>, vector<1x64xf32>
    %cst_14 = arith.constant 0.000000e+00 : f32
    %28 = vector.broadcast %cst_14 : f32 to vector<1x64xf32>
    %29 = tpu.concatenate %28, %25, %28 in 0 : vector<1x64xf32>, vector<4x64xf32>, vector<1x64xf32> -> vector<6x64xf32>
    %30 = vector.extract_strided_slice %29 {offsets = [0, 0], sizes = [4, 64], strides = [1, 1]} : vector<6x64xf32> to vector<4x64xf32>
    %31 = vector.extract_strided_slice %26 {offsets = [0, 0], sizes = [64, 64], strides = [1, 1]} : vector<192x64xf32> to vector<64x64xf32>
    %cst_15 = arith.constant dense<0.000000e+00> : vector<4x64xf32>
    %32 = tpu.matmul %30, %31, %cst_15 {dimension_numbers = #tpu.dot_dimension_numbers<[1], [0], [0], [1], [0, 0, 1, 1], [], []>, precision = #tpu.contract_precision<fp32>} : vector<4x64xf32>, vector<64x64xf32>, vector<4x64xf32> -> vector<4x64xf32>
    %33 = vector.extract_strided_slice %29 {offsets = [1, 0], sizes = [4, 64], strides = [1, 1]} : vector<6x64xf32> to vector<4x64xf32>
    %34 = vector.extract_strided_slice %26 {offsets = [64, 0], sizes = [64, 64], strides = [1, 1]} : vector<192x64xf32> to vector<64x64xf32>
    %cst_16 = arith.constant dense<0.000000e+00> : vector<4x64xf32>
    %35 = tpu.matmul %33, %34, %cst_16 {dimension_numbers = #tpu.dot_dimension_numbers<[1], [0], [0], [1], [0, 0, 1, 1], [], []>, precision = #tpu.contract_precision<fp32>} : vector<4x64xf32>, vector<64x64xf32>, vector<4x64xf32> -> vector<4x64xf32>
    %36 = arith.addf %32, %35 : vector<4x64xf32>
    %37 = vector.extract_strided_slice %29 {offsets = [2, 0], sizes = [4, 64], strides = [1, 1]} : vector<6x64xf32> to vector<4x64xf32>
    %38 = vector.extract_strided_slice %26 {offsets = [128, 0], sizes = [64, 64], strides = [1, 1]} : vector<192x64xf32> to vector<64x64xf32>
    %cst_17 = arith.constant dense<0.000000e+00> : vector<4x64xf32>
    %39 = tpu.matmul %37, %38, %cst_17 {dimension_numbers = #tpu.dot_dimension_numbers<[1], [0], [0], [1], [0, 0, 1, 1], [], []>, precision = #tpu.contract_precision<fp32>} : vector<4x64xf32>, vector<64x64xf32>, vector<4x64xf32> -> vector<4x64xf32>
    %40 = arith.addf %36, %39 : vector<4x64xf32>
    %41 = vector.broadcast %27 : vector<1x64xf32> to vector<4x64xf32>
    %42 = arith.addf %40, %41 : vector<4x64xf32>
    %c0_18 = arith.constant 0 : index
    %c0_19 = arith.constant 0 : index
    %c0_20 = arith.constant 0 : index
    %43 = vector.load %arg6[%c0_18, %c0_19, %c0_20] : memref<1x4x64xf32, #tpu.memory_space<vmem>>, vector<1x4x64xf32>
    %44 = vector.shape_cast %43 : vector<1x4x64xf32> to vector<4x64xf32>
    %45 = vector.shape_cast %42 : vector<4x64xf32> to vector<1x4x64xf32>
    tpu.vector_store %arg6[%c0_18, %c0_19, %c0_20], %45 {strides = array<i32>} : memref<1x4x64xf32, #tpu.memory_space<vmem>>, vector<1x4x64xf32>,
    return
  }
  func.func @transform_0(%arg0: i32) -> (i32, i32, i32) {
    %c0_i32 = arith.constant 0 : i32
    %c0_i32_0 = arith.constant 0 : i32
    %c0_i32_1 = arith.constant 0 : i32
    return %arg0, %c0_i32, %c0_i32_0 : i32, i32, i32
  }
  func.func @transform_1(%arg0: i32) -> (i32, i32) {
    %c0_i32 = arith.constant 0 : i32
    %c0_i32_0 = arith.constant 0 : i32
    %c0_i32_1 = arith.constant 0 : i32
    return %c0_i32, %c0_i32_0 : i32, i32
  }
  func.func @transform_2(%arg0: i32) -> (i32, i32) {
    %c0_i32 = arith.constant 0 : i32
    %c0_i32_0 = arith.constant 0 : i32
    %c0_i32_1 = arith.constant 0 : i32
    return %c0_i32, %c0_i32_0 : i32, i32
  }
  func.func @transform_3(%arg0: i32) -> (i32, i32) {
    %c0_i32 = arith.constant 0 : i32
    %c0_i32_0 = arith.constant 0 : i32
    %c0_i32_1 = arith.constant 0 : i32
    return %c0_i32, %c0_i32_0 : i32, i32
  }
  func.func @transform_4(%arg0: i32) -> (i32, i32) {
    %c0_i32 = arith.constant 0 : i32
    %c0_i32_0 = arith.constant 0 : i32
    %c0_i32_1 = arith.constant 0 : i32
    return %c0_i32, %c0_i32_0 : i32, i32
  }
  func.func @transform_5(%arg0: i32) -> (i32, i32, i32) {
    %c0_i32 = arith.constant 0 : i32
    %c0_i32_0 = arith.constant 0 : i32
    %c0_i32_1 = arith.constant 0 : i32
    return %arg0, %c0_i32, %c0_i32_0 : i32, i32, i32
  }
}

module attributes {stable_mosaic.version = 11 : i64} {
  func.func @_down_layer_kernel(%arg0: i32, %arg1: memref<1x16x16xf32, #tpu.memory_space<vmem>>, %arg2: memref<1x16xf32, #tpu.memory_space<vmem>>, %arg3: memref<1x16xf32, #tpu.memory_space<vmem>>, %arg4: memref<48x16xf32, #tpu.memory_space<vmem>>, %arg5: memref<1x16xf32, #tpu.memory_space<vmem>>, %arg6: memref<16x16xf32, #tpu.memory_space<vmem>>, %arg7: memref<1x16xf32, #tpu.memory_space<vmem>>, %arg8: memref<48x32xf32, #tpu.memory_space<vmem>>, %arg9: memref<1x32xf32, #tpu.memory_space<vmem>>, %arg10: memref<1x32xf32, #tpu.memory_space<vmem>>, %arg11: memref<1x32xf32, #tpu.memory_space<vmem>>, %arg12: memref<96x32xf32, #tpu.memory_space<vmem>>, %arg13: memref<1x32xf32, #tpu.memory_space<vmem>>, %arg14: memref<32x32xf32, #tpu.memory_space<vmem>>, %arg15: memref<1x32xf32, #tpu.memory_space<vmem>>, %arg16: memref<1x16x32xf32, #tpu.memory_space<vmem>>, %arg17: memref<1x8x32xf32, #tpu.memory_space<vmem>>, %arg18: memref<16x32xf32, #tpu.memory_space<vmem>>) attributes {dimension_semantics = [#tpu.dimension_semantics<parallel>], iteration_bounds = array<i64: 2>, scalar_prefetch = 0 : i64, scratch_operands = 1 : i64, tpu.core_type = #tpu.core_type<tc>, window_params = [{transform_indices = @transform_0, window_bounds = array<i64: 1, 16, 16>}, {pipeline_mode = #tpu.pipeline_mode<synchronous>, transform_indices = @transform_1, window_bounds = array<i64: 1, 16>}, {pipeline_mode = #tpu.pipeline_mode<synchronous>, transform_indices = @transform_2, window_bounds = array<i64: 1, 16>}, {pipeline_mode = #tpu.pipeline_mode<synchronous>, transform_indices = @transform_3, window_bounds = array<i64: 48, 16>}, {pipeline_mode = #tpu.pipeline_mode<synchronous>, transform_indices = @transform_4, window_bounds = array<i64: 1, 16>}, {pipeline_mode = #tpu.pipeline_mode<synchronous>, transform_indices = @transform_5, window_bounds = array<i64: 16, 16>}, {pipeline_mode = #tpu.pipeline_mode<synchronous>, transform_indices = @transform_6, window_bounds = array<i64: 1, 16>}, {pipeline_mode = #tpu.pipeline_mode<synchronous>, transform_indices = @transform_7, window_bounds = array<i64: 48, 32>}, {pipeline_mode = #tpu.pipeline_mode<synchronous>, transform_indices = @transform_8, window_bounds = array<i64: 1, 32>}, {pipeline_mode = #tpu.pipeline_mode<synchronous>, transform_indices = @transform_9, window_bounds = array<i64: 1, 32>}, {pipeline_mode = #tpu.pipeline_mode<synchronous>, transform_indices = @transform_10, window_bounds = array<i64: 1, 32>}, {pipeline_mode = #tpu.pipeline_mode<synchronous>, transform_indices = @transform_11, window_bounds = array<i64: 96, 32>}, {pipeline_mode = #tpu.pipeline_mode<synchronous>, transform_indices = @transform_12, window_bounds = array<i64: 1, 32>}, {pipeline_mode = #tpu.pipeline_mode<synchronous>, transform_indices = @transform_13, window_bounds = array<i64: 32, 32>}, {pipeline_mode = #tpu.pipeline_mode<synchronous>, transform_indices = @transform_14, window_bounds = array<i64: 1, 32>}, {transform_indices = @transform_15, window_bounds = array<i64: 1, 16, 32>}, {transform_indices = @transform_16, window_bounds = array<i64: 1, 8, 32>}]} {
    %c0 = arith.constant 0 : index
    %c0_0 = arith.constant 0 : index
    %c0_1 = arith.constant 0 : index
    %0 = vector.load %arg1[%c0, %c0_0, %c0_1] : memref<1x16x16xf32, #tpu.memory_space<vmem>>, vector<1x16x16xf32>
    %1 = vector.shape_cast %0 : vector<1x16x16xf32> to vector<16x16xf32>
    %c0_2 = arith.constant 0 : index
    %c0_3 = arith.constant 0 : index
    %2 = vector.load %arg2[%c0_2, %c0_3] : memref<1x16xf32, #tpu.memory_space<vmem>>, vector<1x16xf32>
    %c0_4 = arith.constant 0 : index
    %c0_5 = arith.constant 0 : index
    %3 = vector.load %arg3[%c0_4, %c0_5] : memref<1x16xf32, #tpu.memory_space<vmem>>, vector<1x16xf32>
    %c0_6 = arith.constant 0 : index
    %c0_7 = arith.constant 0 : index
    %4 = vector.load %arg4[%c0_6, %c0_7] : memref<48x16xf32, #tpu.memory_space<vmem>>, vector<48x16xf32>
    %c0_8 = arith.constant 0 : index
    %c0_9 = arith.constant 0 : index
    %5 = vector.load %arg5[%c0_8, %c0_9] : memref<1x16xf32, #tpu.memory_space<vmem>>, vector<1x16xf32>
    %c0_10 = arith.constant 0 : index
    %c0_11 = arith.constant 0 : index
    %6 = vector.load %arg6[%c0_10, %c0_11] : memref<16x16xf32, #tpu.memory_space<vmem>>, vector<16x16xf32>
    %c0_12 = arith.constant 0 : index
    %c0_13 = arith.constant 0 : index
    %7 = vector.load %arg7[%c0_12, %c0_13] : memref<1x16xf32, #tpu.memory_space<vmem>>, vector<1x16xf32>
    %8 = math.absf %1 : vector<16x16xf32>
    %cst = arith.constant dense<0.000000e+00> : vector<16xf32>
    %9 = vector.multi_reduction <add>, %8, %cst [1] : vector<16x16xf32> to vector<16xf32>
    %10 = vector.shape_cast %9 : vector<16xf32> to vector<16x1xf32>
    %cst_14 = arith.constant 0.000000e+00 : f32
    %11 = vector.broadcast %cst_14 : f32 to vector<16x1xf32>
    %12 = arith.cmpf ogt, %10, %11 : vector<16x1xf32>
    %13 = arith.extui %12 : vector<16x1xi1> to vector<16x1xi32>
    %14 = arith.sitofp %13 : vector<16x1xi32> to vector<16x1xf32>
    %cst_15 = arith.constant dense<0.000000e+00> : vector<16xf32>
    %15 = vector.multi_reduction <add>, %1, %cst_15 [1] : vector<16x16xf32> to vector<16xf32>
    %16 = vector.shape_cast %15 : vector<16xf32> to vector<16x1xf32>
    %cst_16 = arith.constant 1.600000e+01 : f32
    %17 = vector.broadcast %cst_16 : f32 to vector<16x1xf32>
    %18 = arith.divf %16, %17 : vector<16x1xf32>
    %19 = vector.broadcast %18 : vector<16x1xf32> to vector<16x16xf32>
    %20 = arith.subf %1, %19 : vector<16x16xf32>
    %21 = arith.mulf %20, %20 : vector<16x16xf32>
    %cst_17 = arith.constant dense<0.000000e+00> : vector<16xf32>
    %22 = vector.multi_reduction <add>, %21, %cst_17 [1] : vector<16x16xf32> to vector<16xf32>
    %23 = vector.shape_cast %22 : vector<16xf32> to vector<16x1xf32>
    %cst_18 = arith.constant 1.600000e+01 : f32
    %24 = vector.broadcast %cst_18 : f32 to vector<16x1xf32>
    %25 = arith.divf %23, %24 : vector<16x1xf32>
    %26 = vector.broadcast %18 : vector<16x1xf32> to vector<16x16xf32>
    %27 = arith.subf %1, %26 : vector<16x16xf32>
    %cst_19 = arith.constant 9.99999974E-6 : f32
    %28 = vector.broadcast %cst_19 : f32 to vector<16x1xf32>
    %29 = arith.addf %25, %28 : vector<16x1xf32>
    %30 = math.rsqrt %29 : vector<16x1xf32>
    %31 = vector.broadcast %30 : vector<16x1xf32> to vector<16x16xf32>
    %32 = arith.mulf %27, %31 : vector<16x16xf32>
    %33 = vector.broadcast %2 : vector<1x16xf32> to vector<16x16xf32>
    %34 = arith.mulf %32, %33 : vector<16x16xf32>
    %35 = vector.broadcast %3 : vector<1x16xf32> to vector<16x16xf32>
    %36 = arith.addf %34, %35 : vector<16x16xf32>
    %cst_20 = arith.constant 0.000000e+00 : f32
    %37 = vector.broadcast %cst_20 : f32 to vector<1x16xf32>
    %38 = tpu.concatenate %37, %36, %37 in 0 : vector<1x16xf32>, vector<16x16xf32>, vector<1x16xf32> -> vector<18x16xf32>
    %39 = vector.extract_strided_slice %38 {offsets = [0, 0], sizes = [16, 16], strides = [1, 1]} : vector<18x16xf32> to vector<16x16xf32>
    %40 = vector.extract_strided_slice %4 {offsets = [0, 0], sizes = [16, 16], strides = [1, 1]} : vector<48x16xf32> to vector<16x16xf32>
    %cst_21 = arith.constant dense<0.000000e+00> : vector<16x16xf32>
    %41 = tpu.matmul %39, %40, %cst_21 {dimension_numbers = #tpu.dot_dimension_numbers<[1], [0], [0], [1], [0, 0, 1, 1], [], []>, precision = #tpu.contract_precision<fp32>} : vector<16x16xf32>, vector<16x16xf32>, vector<16x16xf32> -> vector<16x16xf32>
    %42 = vector.extract_strided_slice %38 {offsets = [1, 0], sizes = [16, 16], strides = [1, 1]} : vector<18x16xf32> to vector<16x16xf32>
    %43 = vector.extract_strided_slice %4 {offsets = [16, 0], sizes = [16, 16], strides = [1, 1]} : vector<48x16xf32> to vector<16x16xf32>
    %cst_22 = arith.constant dense<0.000000e+00> : vector<16x16xf32>
    %44 = tpu.matmul %42, %43, %cst_22 {dimension_numbers = #tpu.dot_dimension_numbers<[1], [0], [0], [1], [0, 0, 1, 1], [], []>, precision = #tpu.contract_precision<fp32>} : vector<16x16xf32>, vector<16x16xf32>, vector<16x16xf32> -> vector<16x16xf32>
    %45 = arith.addf %41, %44 : vector<16x16xf32>
    %46 = vector.extract_strided_slice %38 {offsets = [2, 0], sizes = [16, 16], strides = [1, 1]} : vector<18x16xf32> to vector<16x16xf32>
    %47 = vector.extract_strided_slice %4 {offsets = [32, 0], sizes = [16, 16], strides = [1, 1]} : vector<48x16xf32> to vector<16x16xf32>
    %cst_23 = arith.constant dense<0.000000e+00> : vector<16x16xf32>
    %48 = tpu.matmul %46, %47, %cst_23 {dimension_numbers = #tpu.dot_dimension_numbers<[1], [0], [0], [1], [0, 0, 1, 1], [], []>, precision = #tpu.contract_precision<fp32>} : vector<16x16xf32>, vector<16x16xf32>, vector<16x16xf32> -> vector<16x16xf32>
    %49 = arith.addf %45, %48 : vector<16x16xf32>
    %50 = vector.broadcast %5 : vector<1x16xf32> to vector<16x16xf32>
    %51 = arith.addf %49, %50 : vector<16x16xf32>
    %cst_24 = arith.constant 0.000000e+00 : f32
    %52 = vector.broadcast %cst_24 : f32 to vector<16x16xf32>
    %53 = arith.cmpf ogt, %51, %52 : vector<16x16xf32>
    %cst_25 = arith.constant 0.00999999977 : f32
    %54 = vector.broadcast %cst_25 : f32 to vector<16x16xf32>
    %55 = arith.mulf %54, %51 : vector<16x16xf32>
    %56 = arith.select %53, %51, %55 : vector<16x16xi1>, vector<16x16xf32>
    %cst_26 = arith.constant dense<0.000000e+00> : vector<16x16xf32>
    %57 = tpu.matmul %56, %6, %cst_26 {dimension_numbers = #tpu.dot_dimension_numbers<[1], [0], [0], [1], [0, 0, 1, 1], [], []>, precision = #tpu.contract_precision<fp32>} : vector<16x16xf32>, vector<16x16xf32>, vector<16x16xf32> -> vector<16x16xf32>
    %58 = vector.broadcast %7 : vector<1x16xf32> to vector<16x16xf32>
    %59 = arith.addf %57, %58 : vector<16x16xf32>
    %60 = arith.addf %1, %59 : vector<16x16xf32>
    %61 = vector.broadcast %14 : vector<16x1xf32> to vector<16x16xf32>
    %62 = arith.mulf %60, %61 : vector<16x16xf32>
    %c0_27 = arith.constant 0 : index
    %c0_28 = arith.constant 0 : index
    %63 = vector.load %arg8[%c0_27, %c0_28] : memref<48x32xf32, #tpu.memory_space<vmem>>, vector<48x32xf32>
    %c0_29 = arith.constant 0 : index
    %c0_30 = arith.constant 0 : index
    %64 = vector.load %arg9[%c0_29, %c0_30] : memref<1x32xf32, #tpu.memory_space<vmem>>, vector<1x32xf32>
    %cst_31 = arith.constant 0.000000e+00 : f32
    %65 = vector.broadcast %cst_31 : f32 to vector<1x16xf32>
    %66 = tpu.concatenate %65, %62, %65 in 0 : vector<1x16xf32>, vector<16x16xf32>, vector<1x16xf32> -> vector<18x16xf32>
    %67 = vector.extract_strided_slice %66 {offsets = [0, 0], sizes = [16, 16], strides = [1, 1]} : vector<18x16xf32> to vector<16x16xf32>
    %68 = vector.extract_strided_slice %63 {offsets = [0, 0], sizes = [16, 32], strides = [1, 1]} : vector<48x32xf32> to vector<16x32xf32>
    %cst_32 = arith.constant dense<0.000000e+00> : vector<16x32xf32>
    %69 = tpu.matmul %67, %68, %cst_32 {dimension_numbers = #tpu.dot_dimension_numbers<[1], [0], [0], [1], [0, 0, 1, 1], [], []>, precision = #tpu.contract_precision<fp32>} : vector<16x16xf32>, vector<16x32xf32>, vector<16x32xf32> -> vector<16x32xf32>
    %70 = vector.extract_strided_slice %66 {offsets = [1, 0], sizes = [16, 16], strides = [1, 1]} : vector<18x16xf32> to vector<16x16xf32>
    %71 = vector.extract_strided_slice %63 {offsets = [16, 0], sizes = [16, 32], strides = [1, 1]} : vector<48x32xf32> to vector<16x32xf32>
    %cst_33 = arith.constant dense<0.000000e+00> : vector<16x32xf32>
    %72 = tpu.matmul %70, %71, %cst_33 {dimension_numbers = #tpu.dot_dimension_numbers<[1], [0], [0], [1], [0, 0, 1, 1], [], []>, precision = #tpu.contract_precision<fp32>} : vector<16x16xf32>, vector<16x32xf32>, vector<16x32xf32> -> vector<16x32xf32>
    %73 = arith.addf %69, %72 : vector<16x32xf32>
    %74 = vector.extract_strided_slice %66 {offsets = [2, 0], sizes = [16, 16], strides = [1, 1]} : vector<18x16xf32> to vector<16x16xf32>
    %75 = vector.extract_strided_slice %63 {offsets = [32, 0], sizes = [16, 32], strides = [1, 1]} : vector<48x32xf32> to vector<16x32xf32>
    %cst_34 = arith.constant dense<0.000000e+00> : vector<16x32xf32>
    %76 = tpu.matmul %74, %75, %cst_34 {dimension_numbers = #tpu.dot_dimension_numbers<[1], [0], [0], [1], [0, 0, 1, 1], [], []>, precision = #tpu.contract_precision<fp32>} : vector<16x16xf32>, vector<16x32xf32>, vector<16x32xf32> -> vector<16x32xf32>
    %77 = arith.addf %73, %76 : vector<16x32xf32>
    %78 = vector.broadcast %64 : vector<1x32xf32> to vector<16x32xf32>
    %79 = arith.addf %77, %78 : vector<16x32xf32>
    %c0_35 = arith.constant 0 : index
    %c0_36 = arith.constant 0 : index
    %80 = vector.load %arg10[%c0_35, %c0_36] : memref<1x32xf32, #tpu.memory_space<vmem>>, vector<1x32xf32>
    %c0_37 = arith.constant 0 : index
    %c0_38 = arith.constant 0 : index
    %81 = vector.load %arg11[%c0_37, %c0_38] : memref<1x32xf32, #tpu.memory_space<vmem>>, vector<1x32xf32>
    %c0_39 = arith.constant 0 : index
    %c0_40 = arith.constant 0 : index
    %82 = vector.load %arg12[%c0_39, %c0_40] : memref<96x32xf32, #tpu.memory_space<vmem>>, vector<96x32xf32>
    %c0_41 = arith.constant 0 : index
    %c0_42 = arith.constant 0 : index
    %83 = vector.load %arg13[%c0_41, %c0_42] : memref<1x32xf32, #tpu.memory_space<vmem>>, vector<1x32xf32>
    %c0_43 = arith.constant 0 : index
    %c0_44 = arith.constant 0 : index
    %84 = vector.load %arg14[%c0_43, %c0_44] : memref<32x32xf32, #tpu.memory_space<vmem>>, vector<32x32xf32>
    %c0_45 = arith.constant 0 : index
    %c0_46 = arith.constant 0 : index
    %85 = vector.load %arg15[%c0_45, %c0_46] : memref<1x32xf32, #tpu.memory_space<vmem>>, vector<1x32xf32>
    %86 = math.absf %79 : vector<16x32xf32>
    %cst_47 = arith.constant dense<0.000000e+00> : vector<16xf32>
    %87 = vector.multi_reduction <add>, %86, %cst_47 [1] : vector<16x32xf32> to vector<16xf32>
    %88 = vector.shape_cast %87 : vector<16xf32> to vector<16x1xf32>
    %cst_48 = arith.constant 0.000000e+00 : f32
    %89 = vector.broadcast %cst_48 : f32 to vector<16x1xf32>
    %90 = arith.cmpf ogt, %88, %89 : vector<16x1xf32>
    %91 = arith.extui %90 : vector<16x1xi1> to vector<16x1xi32>
    %92 = arith.sitofp %91 : vector<16x1xi32> to vector<16x1xf32>
    %cst_49 = arith.constant dense<0.000000e+00> : vector<16xf32>
    %93 = vector.multi_reduction <add>, %79, %cst_49 [1] : vector<16x32xf32> to vector<16xf32>
    %94 = vector.shape_cast %93 : vector<16xf32> to vector<16x1xf32>
    %cst_50 = arith.constant 3.200000e+01 : f32
    %95 = vector.broadcast %cst_50 : f32 to vector<16x1xf32>
    %96 = arith.divf %94, %95 : vector<16x1xf32>
    %97 = vector.broadcast %96 : vector<16x1xf32> to vector<16x32xf32>
    %98 = arith.subf %79, %97 : vector<16x32xf32>
    %99 = arith.mulf %98, %98 : vector<16x32xf32>
    %cst_51 = arith.constant dense<0.000000e+00> : vector<16xf32>
    %100 = vector.multi_reduction <add>, %99, %cst_51 [1] : vector<16x32xf32> to vector<16xf32>
    %101 = vector.shape_cast %100 : vector<16xf32> to vector<16x1xf32>
    %cst_52 = arith.constant 3.200000e+01 : f32
    %102 = vector.broadcast %cst_52 : f32 to vector<16x1xf32>
    %103 = arith.divf %101, %102 : vector<16x1xf32>
    %104 = vector.broadcast %96 : vector<16x1xf32> to vector<16x32xf32>
    %105 = arith.subf %79, %104 : vector<16x32xf32>
    %cst_53 = arith.constant 9.99999974E-6 : f32
    %106 = vector.broadcast %cst_53 : f32 to vector<16x1xf32>
    %107 = arith.addf %103, %106 : vector<16x1xf32>
    %108 = math.rsqrt %107 : vector<16x1xf32>
    %109 = vector.broadcast %108 : vector<16x1xf32> to vector<16x32xf32>
    %110 = arith.mulf %105, %109 : vector<16x32xf32>
    %111 = vector.broadcast %80 : vector<1x32xf32> to vector<16x32xf32>
    %112 = arith.mulf %110, %111 : vector<16x32xf32>
    %113 = vector.broadcast %81 : vector<1x32xf32> to vector<16x32xf32>
    %114 = arith.addf %112, %113 : vector<16x32xf32>
    %cst_54 = arith.constant 0.000000e+00 : f32
    %115 = vector.broadcast %cst_54 : f32 to vector<1x32xf32>
    %116 = tpu.concatenate %115, %114, %115 in 0 : vector<1x32xf32>, vector<16x32xf32>, vector<1x32xf32> -> vector<18x32xf32>
    %117 = vector.extract_strided_slice %116 {offsets = [0, 0], sizes = [16, 32], strides = [1, 1]} : vector<18x32xf32> to vector<16x32xf32>
    %118 = vector.extract_strided_slice %82 {offsets = [0, 0], sizes = [32, 32], strides = [1, 1]} : vector<96x32xf32> to vector<32x32xf32>
    %cst_55 = arith.constant dense<0.000000e+00> : vector<16x32xf32>
    %119 = tpu.matmul %117, %118, %cst_55 {dimension_numbers = #tpu.dot_dimension_numbers<[1], [0], [0], [1], [0, 0, 1, 1], [], []>, precision = #tpu.contract_precision<fp32>} : vector<16x32xf32>, vector<32x32xf32>, vector<16x32xf32> -> vector<16x32xf32>
    %120 = vector.extract_strided_slice %116 {offsets = [1, 0], sizes = [16, 32], strides = [1, 1]} : vector<18x32xf32> to vector<16x32xf32>
    %121 = vector.extract_strided_slice %82 {offsets = [32, 0], sizes = [32, 32], strides = [1, 1]} : vector<96x32xf32> to vector<32x32xf32>
    %cst_56 = arith.constant dense<0.000000e+00> : vector<16x32xf32>
    %122 = tpu.matmul %120, %121, %cst_56 {dimension_numbers = #tpu.dot_dimension_numbers<[1], [0], [0], [1], [0, 0, 1, 1], [], []>, precision = #tpu.contract_precision<fp32>} : vector<16x32xf32>, vector<32x32xf32>, vector<16x32xf32> -> vector<16x32xf32>
    %123 = arith.addf %119, %122 : vector<16x32xf32>
    %124 = vector.extract_strided_slice %116 {offsets = [2, 0], sizes = [16, 32], strides = [1, 1]} : vector<18x32xf32> to vector<16x32xf32>
    %125 = vector.extract_strided_slice %82 {offsets = [64, 0], sizes = [32, 32], strides = [1, 1]} : vector<96x32xf32> to vector<32x32xf32>
    %cst_57 = arith.constant dense<0.000000e+00> : vector<16x32xf32>
    %126 = tpu.matmul %124, %125, %cst_57 {dimension_numbers = #tpu.dot_dimension_numbers<[1], [0], [0], [1], [0, 0, 1, 1], [], []>, precision = #tpu.contract_precision<fp32>} : vector<16x32xf32>, vector<32x32xf32>, vector<16x32xf32> -> vector<16x32xf32>
    %127 = arith.addf %123, %126 : vector<16x32xf32>
    %128 = vector.broadcast %83 : vector<1x32xf32> to vector<16x32xf32>
    %129 = arith.addf %127, %128 : vector<16x32xf32>
    %cst_58 = arith.constant 0.000000e+00 : f32
    %130 = vector.broadcast %cst_58 : f32 to vector<16x32xf32>
    %131 = arith.cmpf ogt, %129, %130 : vector<16x32xf32>
    %cst_59 = arith.constant 0.00999999977 : f32
    %132 = vector.broadcast %cst_59 : f32 to vector<16x32xf32>
    %133 = arith.mulf %132, %129 : vector<16x32xf32>
    %134 = arith.select %131, %129, %133 : vector<16x32xi1>, vector<16x32xf32>
    %cst_60 = arith.constant dense<0.000000e+00> : vector<16x32xf32>
    %135 = tpu.matmul %134, %84, %cst_60 {dimension_numbers = #tpu.dot_dimension_numbers<[1], [0], [0], [1], [0, 0, 1, 1], [], []>, precision = #tpu.contract_precision<fp32>} : vector<16x32xf32>, vector<32x32xf32>, vector<16x32xf32> -> vector<16x32xf32>
    %136 = vector.broadcast %85 : vector<1x32xf32> to vector<16x32xf32>
    %137 = arith.addf %135, %136 : vector<16x32xf32>
    %138 = arith.addf %79, %137 : vector<16x32xf32>
    %139 = vector.broadcast %92 : vector<16x1xf32> to vector<16x32xf32>
    %140 = arith.mulf %138, %139 : vector<16x32xf32>
    %c0_61 = arith.constant 0 : index
    %c0_62 = arith.constant 0 : index
    %c0_63 = arith.constant 0 : index
    %141 = vector.load %arg16[%c0_61, %c0_62, %c0_63] : memref<1x16x32xf32, #tpu.memory_space<vmem>>, vector<1x16x32xf32>
    %142 = vector.shape_cast %141 : vector<1x16x32xf32> to vector<16x32xf32>
    %143 = vector.shape_cast %140 : vector<16x32xf32> to vector<1x16x32xf32>
    tpu.vector_store %arg16[%c0_61, %c0_62, %c0_63], %143 {strides = array<i32>} : memref<1x16x32xf32, #tpu.memory_space<vmem>>, vector<1x16x32xf32>,
    %c0_64 = arith.constant 0 : index
    %c0_65 = arith.constant 0 : index
    %144 = vector.load %arg18[%c0_64, %c0_65] : memref<16x32xf32, #tpu.memory_space<vmem>>, vector<16x32xf32>
    tpu.vector_store %arg18[%c0_64, %c0_65], %140 {strides = array<i32>} : memref<16x32xf32, #tpu.memory_space<vmem>>, vector<16x32xf32>,
    %c0_66 = arith.constant 0 : index
    %c0_67 = arith.constant 0 : index
    %145 = tpu.strided_load %arg18[%c0_66, %c0_67] {strides = array<i32: 2, 1>} : memref<16x32xf32, #tpu.memory_space<vmem>>, vector<8x32xf32>
    %c1 = arith.constant 1 : index
    %c0_68 = arith.constant 0 : index
    %146 = tpu.strided_load %arg18[%c1, %c0_68] {strides = array<i32: 2, 1>} : memref<16x32xf32, #tpu.memory_space<vmem>>, vector<8x32xf32>
    %147 = arith.addf %145, %146 : vector<8x32xf32>
    %cst_69 = arith.constant 5.000000e-01 : f32
    %148 = vector.broadcast %cst_69 : f32 to vector<8x32xf32>
    %149 = arith.mulf %147, %148 : vector<8x32xf32>
    %c0_70 = arith.constant 0 : index
    %c0_71 = arith.constant 0 : index
    %c0_72 = arith.constant 0 : index
    %150 = vector.load %arg17[%c0_70, %c0_71, %c0_72] : memref<1x8x32xf32, #tpu.memory_space<vmem>>, vector<1x8x32xf32>
    %151 = vector.shape_cast %150 : vector<1x8x32xf32> to vector<8x32xf32>
    %152 = vector.shape_cast %149 : vector<8x32xf32> to vector<1x8x32xf32>
    tpu.vector_store %arg17[%c0_70, %c0_71, %c0_72], %152 {strides = array<i32>} : memref<1x8x32xf32, #tpu.memory_space<vmem>>, vector<1x8x32xf32>,
    return
  }
  func.func @transform_0(%arg0: i32) -> (i32, i32, i32) {
    %c0_i32 = arith.constant 0 : i32
    %c0_i32_0 = arith.constant 0 : i32
    %c0_i32_1 = arith.constant 0 : i32
    return %arg0, %c0_i32, %c0_i32_0 : i32, i32, i32
  }
  func.func @transform_1(%arg0: i32) -> (i32, i32) {
    %c0_i32 = arith.constant 0 : i32
    %c0_i32_0 = arith.constant 0 : i32
    %c0_i32_1 = arith.constant 0 : i32
    return %c0_i32, %c0_i32_0 : i32, i32
  }
  func.func @transform_2(%arg0: i32) -> (i32, i32) {
    %c0_i32 = arith.constant 0 : i32
    %c0_i32_0 = arith.constant 0 : i32
    %c0_i32_1 = arith.constant 0 : i32
    return %c0_i32, %c0_i32_0 : i32, i32
  }
  func.func @transform_3(%arg0: i32) -> (i32, i32) {
    %c0_i32 = arith.constant 0 : i32
    %c0_i32_0 = arith.constant 0 : i32
    %c0_i32_1 = arith.constant 0 : i32
    return %c0_i32, %c0_i32_0 : i32, i32
  }
  func.func @transform_4(%arg0: i32) -> (i32, i32) {
    %c0_i32 = arith.constant 0 : i32
    %c0_i32_0 = arith.constant 0 : i32
    %c0_i32_1 = arith.constant 0 : i32
    return %c0_i32, %c0_i32_0 : i32, i32
  }
  func.func @transform_5(%arg0: i32) -> (i32, i32) {
    %c0_i32 = arith.constant 0 : i32
    %c0_i32_0 = arith.constant 0 : i32
    %c0_i32_1 = arith.constant 0 : i32
    return %c0_i32, %c0_i32_0 : i32, i32
  }
  func.func @transform_6(%arg0: i32) -> (i32, i32) {
    %c0_i32 = arith.constant 0 : i32
    %c0_i32_0 = arith.constant 0 : i32
    %c0_i32_1 = arith.constant 0 : i32
    return %c0_i32, %c0_i32_0 : i32, i32
  }
  func.func @transform_7(%arg0: i32) -> (i32, i32) {
    %c0_i32 = arith.constant 0 : i32
    %c0_i32_0 = arith.constant 0 : i32
    %c0_i32_1 = arith.constant 0 : i32
    return %c0_i32, %c0_i32_0 : i32, i32
  }
  func.func @transform_8(%arg0: i32) -> (i32, i32) {
    %c0_i32 = arith.constant 0 : i32
    %c0_i32_0 = arith.constant 0 : i32
    %c0_i32_1 = arith.constant 0 : i32
    return %c0_i32, %c0_i32_0 : i32, i32
  }
  func.func @transform_9(%arg0: i32) -> (i32, i32) {
    %c0_i32 = arith.constant 0 : i32
    %c0_i32_0 = arith.constant 0 : i32
    %c0_i32_1 = arith.constant 0 : i32
    return %c0_i32, %c0_i32_0 : i32, i32
  }
  func.func @transform_10(%arg0: i32) -> (i32, i32) {
    %c0_i32 = arith.constant 0 : i32
    %c0_i32_0 = arith.constant 0 : i32
    %c0_i32_1 = arith.constant 0 : i32
    return %c0_i32, %c0_i32_0 : i32, i32
  }
  func.func @transform_11(%arg0: i32) -> (i32, i32) {
    %c0_i32 = arith.constant 0 : i32
    %c0_i32_0 = arith.constant 0 : i32
    %c0_i32_1 = arith.constant 0 : i32
    return %c0_i32, %c0_i32_0 : i32, i32
  }
  func.func @transform_12(%arg0: i32) -> (i32, i32) {
    %c0_i32 = arith.constant 0 : i32
    %c0_i32_0 = arith.constant 0 : i32
    %c0_i32_1 = arith.constant 0 : i32
    return %c0_i32, %c0_i32_0 : i32, i32
  }
  func.func @transform_13(%arg0: i32) -> (i32, i32) {
    %c0_i32 = arith.constant 0 : i32
    %c0_i32_0 = arith.constant 0 : i32
    %c0_i32_1 = arith.constant 0 : i32
    return %c0_i32, %c0_i32_0 : i32, i32
  }
  func.func @transform_14(%arg0: i32) -> (i32, i32) {
    %c0_i32 = arith.constant 0 : i32
    %c0_i32_0 = arith.constant 0 : i32
    %c0_i32_1 = arith.constant 0 : i32
    return %c0_i32, %c0_i32_0 : i32, i32
  }
  func.func @transform_15(%arg0: i32) -> (i32, i32, i32) {
    %c0_i32 = arith.constant 0 : i32
    %c0_i32_0 = arith.constant 0 : i32
    %c0_i32_1 = arith.constant 0 : i32
    return %arg0, %c0_i32, %c0_i32_0 : i32, i32, i32
  }
  func.func @transform_16(%arg0: i32) -> (i32, i32, i32) {
    %c0_i32 = arith.constant 0 : i32
    %c0_i32_0 = arith.constant 0 : i32
    %c0_i32_1 = arith.constant 0 : i32
    return %arg0, %c0_i32, %c0_i32_0 : i32, i32, i32
  }
}

module attributes {stable_mosaic.version = 11 : i64} {
  func.func @_down_layer_kernel(%arg0: i32, %arg1: memref<1x8x32xf32, #tpu.memory_space<vmem>>, %arg2: memref<1x32xf32, #tpu.memory_space<vmem>>, %arg3: memref<1x32xf32, #tpu.memory_space<vmem>>, %arg4: memref<96x32xf32, #tpu.memory_space<vmem>>, %arg5: memref<1x32xf32, #tpu.memory_space<vmem>>, %arg6: memref<32x32xf32, #tpu.memory_space<vmem>>, %arg7: memref<1x32xf32, #tpu.memory_space<vmem>>, %arg8: memref<96x64xf32, #tpu.memory_space<vmem>>, %arg9: memref<1x64xf32, #tpu.memory_space<vmem>>, %arg10: memref<1x64xf32, #tpu.memory_space<vmem>>, %arg11: memref<1x64xf32, #tpu.memory_space<vmem>>, %arg12: memref<192x64xf32, #tpu.memory_space<vmem>>, %arg13: memref<1x64xf32, #tpu.memory_space<vmem>>, %arg14: memref<64x64xf32, #tpu.memory_space<vmem>>, %arg15: memref<1x64xf32, #tpu.memory_space<vmem>>, %arg16: memref<1x8x64xf32, #tpu.memory_space<vmem>>, %arg17: memref<1x4x64xf32, #tpu.memory_space<vmem>>, %arg18: memref<8x64xf32, #tpu.memory_space<vmem>>) attributes {dimension_semantics = [#tpu.dimension_semantics<parallel>], iteration_bounds = array<i64: 2>, scalar_prefetch = 0 : i64, scratch_operands = 1 : i64, tpu.core_type = #tpu.core_type<tc>, window_params = [{transform_indices = @transform_0, window_bounds = array<i64: 1, 8, 32>}, {pipeline_mode = #tpu.pipeline_mode<synchronous>, transform_indices = @transform_1, window_bounds = array<i64: 1, 32>}, {pipeline_mode = #tpu.pipeline_mode<synchronous>, transform_indices = @transform_2, window_bounds = array<i64: 1, 32>}, {pipeline_mode = #tpu.pipeline_mode<synchronous>, transform_indices = @transform_3, window_bounds = array<i64: 96, 32>}, {pipeline_mode = #tpu.pipeline_mode<synchronous>, transform_indices = @transform_4, window_bounds = array<i64: 1, 32>}, {pipeline_mode = #tpu.pipeline_mode<synchronous>, transform_indices = @transform_5, window_bounds = array<i64: 32, 32>}, {pipeline_mode = #tpu.pipeline_mode<synchronous>, transform_indices = @transform_6, window_bounds = array<i64: 1, 32>}, {pipeline_mode = #tpu.pipeline_mode<synchronous>, transform_indices = @transform_7, window_bounds = array<i64: 96, 64>}, {pipeline_mode = #tpu.pipeline_mode<synchronous>, transform_indices = @transform_8, window_bounds = array<i64: 1, 64>}, {pipeline_mode = #tpu.pipeline_mode<synchronous>, transform_indices = @transform_9, window_bounds = array<i64: 1, 64>}, {pipeline_mode = #tpu.pipeline_mode<synchronous>, transform_indices = @transform_10, window_bounds = array<i64: 1, 64>}, {pipeline_mode = #tpu.pipeline_mode<synchronous>, transform_indices = @transform_11, window_bounds = array<i64: 192, 64>}, {pipeline_mode = #tpu.pipeline_mode<synchronous>, transform_indices = @transform_12, window_bounds = array<i64: 1, 64>}, {pipeline_mode = #tpu.pipeline_mode<synchronous>, transform_indices = @transform_13, window_bounds = array<i64: 64, 64>}, {pipeline_mode = #tpu.pipeline_mode<synchronous>, transform_indices = @transform_14, window_bounds = array<i64: 1, 64>}, {transform_indices = @transform_15, window_bounds = array<i64: 1, 8, 64>}, {transform_indices = @transform_16, window_bounds = array<i64: 1, 4, 64>}]} {
    %c0 = arith.constant 0 : index
    %c0_0 = arith.constant 0 : index
    %c0_1 = arith.constant 0 : index
    %0 = vector.load %arg1[%c0, %c0_0, %c0_1] : memref<1x8x32xf32, #tpu.memory_space<vmem>>, vector<1x8x32xf32>
    %1 = vector.shape_cast %0 : vector<1x8x32xf32> to vector<8x32xf32>
    %c0_2 = arith.constant 0 : index
    %c0_3 = arith.constant 0 : index
    %2 = vector.load %arg2[%c0_2, %c0_3] : memref<1x32xf32, #tpu.memory_space<vmem>>, vector<1x32xf32>
    %c0_4 = arith.constant 0 : index
    %c0_5 = arith.constant 0 : index
    %3 = vector.load %arg3[%c0_4, %c0_5] : memref<1x32xf32, #tpu.memory_space<vmem>>, vector<1x32xf32>
    %c0_6 = arith.constant 0 : index
    %c0_7 = arith.constant 0 : index
    %4 = vector.load %arg4[%c0_6, %c0_7] : memref<96x32xf32, #tpu.memory_space<vmem>>, vector<96x32xf32>
    %c0_8 = arith.constant 0 : index
    %c0_9 = arith.constant 0 : index
    %5 = vector.load %arg5[%c0_8, %c0_9] : memref<1x32xf32, #tpu.memory_space<vmem>>, vector<1x32xf32>
    %c0_10 = arith.constant 0 : index
    %c0_11 = arith.constant 0 : index
    %6 = vector.load %arg6[%c0_10, %c0_11] : memref<32x32xf32, #tpu.memory_space<vmem>>, vector<32x32xf32>
    %c0_12 = arith.constant 0 : index
    %c0_13 = arith.constant 0 : index
    %7 = vector.load %arg7[%c0_12, %c0_13] : memref<1x32xf32, #tpu.memory_space<vmem>>, vector<1x32xf32>
    %8 = math.absf %1 : vector<8x32xf32>
    %cst = arith.constant dense<0.000000e+00> : vector<8xf32>
    %9 = vector.multi_reduction <add>, %8, %cst [1] : vector<8x32xf32> to vector<8xf32>
    %10 = vector.shape_cast %9 : vector<8xf32> to vector<8x1xf32>
    %cst_14 = arith.constant 0.000000e+00 : f32
    %11 = vector.broadcast %cst_14 : f32 to vector<8x1xf32>
    %12 = arith.cmpf ogt, %10, %11 : vector<8x1xf32>
    %13 = arith.extui %12 : vector<8x1xi1> to vector<8x1xi32>
    %14 = arith.sitofp %13 : vector<8x1xi32> to vector<8x1xf32>
    %cst_15 = arith.constant dense<0.000000e+00> : vector<8xf32>
    %15 = vector.multi_reduction <add>, %1, %cst_15 [1] : vector<8x32xf32> to vector<8xf32>
    %16 = vector.shape_cast %15 : vector<8xf32> to vector<8x1xf32>
    %cst_16 = arith.constant 3.200000e+01 : f32
    %17 = vector.broadcast %cst_16 : f32 to vector<8x1xf32>
    %18 = arith.divf %16, %17 : vector<8x1xf32>
    %19 = vector.broadcast %18 : vector<8x1xf32> to vector<8x32xf32>
    %20 = arith.subf %1, %19 : vector<8x32xf32>
    %21 = arith.mulf %20, %20 : vector<8x32xf32>
    %cst_17 = arith.constant dense<0.000000e+00> : vector<8xf32>
    %22 = vector.multi_reduction <add>, %21, %cst_17 [1] : vector<8x32xf32> to vector<8xf32>
    %23 = vector.shape_cast %22 : vector<8xf32> to vector<8x1xf32>
    %cst_18 = arith.constant 3.200000e+01 : f32
    %24 = vector.broadcast %cst_18 : f32 to vector<8x1xf32>
    %25 = arith.divf %23, %24 : vector<8x1xf32>
    %26 = vector.broadcast %18 : vector<8x1xf32> to vector<8x32xf32>
    %27 = arith.subf %1, %26 : vector<8x32xf32>
    %cst_19 = arith.constant 9.99999974E-6 : f32
    %28 = vector.broadcast %cst_19 : f32 to vector<8x1xf32>
    %29 = arith.addf %25, %28 : vector<8x1xf32>
    %30 = math.rsqrt %29 : vector<8x1xf32>
    %31 = vector.broadcast %30 : vector<8x1xf32> to vector<8x32xf32>
    %32 = arith.mulf %27, %31 : vector<8x32xf32>
    %33 = vector.broadcast %2 : vector<1x32xf32> to vector<8x32xf32>
    %34 = arith.mulf %32, %33 : vector<8x32xf32>
    %35 = vector.broadcast %3 : vector<1x32xf32> to vector<8x32xf32>
    %36 = arith.addf %34, %35 : vector<8x32xf32>
    %cst_20 = arith.constant 0.000000e+00 : f32
    %37 = vector.broadcast %cst_20 : f32 to vector<1x32xf32>
    %38 = tpu.concatenate %37, %36, %37 in 0 : vector<1x32xf32>, vector<8x32xf32>, vector<1x32xf32> -> vector<10x32xf32>
    %39 = vector.extract_strided_slice %38 {offsets = [0, 0], sizes = [8, 32], strides = [1, 1]} : vector<10x32xf32> to vector<8x32xf32>
    %40 = vector.extract_strided_slice %4 {offsets = [0, 0], sizes = [32, 32], strides = [1, 1]} : vector<96x32xf32> to vector<32x32xf32>
    %cst_21 = arith.constant dense<0.000000e+00> : vector<8x32xf32>
    %41 = tpu.matmul %39, %40, %cst_21 {dimension_numbers = #tpu.dot_dimension_numbers<[1], [0], [0], [1], [0, 0, 1, 1], [], []>, precision = #tpu.contract_precision<fp32>} : vector<8x32xf32>, vector<32x32xf32>, vector<8x32xf32> -> vector<8x32xf32>
    %42 = vector.extract_strided_slice %38 {offsets = [1, 0], sizes = [8, 32], strides = [1, 1]} : vector<10x32xf32> to vector<8x32xf32>
    %43 = vector.extract_strided_slice %4 {offsets = [32, 0], sizes = [32, 32], strides = [1, 1]} : vector<96x32xf32> to vector<32x32xf32>
    %cst_22 = arith.constant dense<0.000000e+00> : vector<8x32xf32>
    %44 = tpu.matmul %42, %43, %cst_22 {dimension_numbers = #tpu.dot_dimension_numbers<[1], [0], [0], [1], [0, 0, 1, 1], [], []>, precision = #tpu.contract_precision<fp32>} : vector<8x32xf32>, vector<32x32xf32>, vector<8x32xf32> -> vector<8x32xf32>
    %45 = arith.addf %41, %44 : vector<8x32xf32>
    %46 = vector.extract_strided_slice %38 {offsets = [2, 0], sizes = [8, 32], strides = [1, 1]} : vector<10x32xf32> to vector<8x32xf32>
    %47 = vector.extract_strided_slice %4 {offsets = [64, 0], sizes = [32, 32], strides = [1, 1]} : vector<96x32xf32> to vector<32x32xf32>
    %cst_23 = arith.constant dense<0.000000e+00> : vector<8x32xf32>
    %48 = tpu.matmul %46, %47, %cst_23 {dimension_numbers = #tpu.dot_dimension_numbers<[1], [0], [0], [1], [0, 0, 1, 1], [], []>, precision = #tpu.contract_precision<fp32>} : vector<8x32xf32>, vector<32x32xf32>, vector<8x32xf32> -> vector<8x32xf32>
    %49 = arith.addf %45, %48 : vector<8x32xf32>
    %50 = vector.broadcast %5 : vector<1x32xf32> to vector<8x32xf32>
    %51 = arith.addf %49, %50 : vector<8x32xf32>
    %cst_24 = arith.constant 0.000000e+00 : f32
    %52 = vector.broadcast %cst_24 : f32 to vector<8x32xf32>
    %53 = arith.cmpf ogt, %51, %52 : vector<8x32xf32>
    %cst_25 = arith.constant 0.00999999977 : f32
    %54 = vector.broadcast %cst_25 : f32 to vector<8x32xf32>
    %55 = arith.mulf %54, %51 : vector<8x32xf32>
    %56 = arith.select %53, %51, %55 : vector<8x32xi1>, vector<8x32xf32>
    %cst_26 = arith.constant dense<0.000000e+00> : vector<8x32xf32>
    %57 = tpu.matmul %56, %6, %cst_26 {dimension_numbers = #tpu.dot_dimension_numbers<[1], [0], [0], [1], [0, 0, 1, 1], [], []>, precision = #tpu.contract_precision<fp32>} : vector<8x32xf32>, vector<32x32xf32>, vector<8x32xf32> -> vector<8x32xf32>
    %58 = vector.broadcast %7 : vector<1x32xf32> to vector<8x32xf32>
    %59 = arith.addf %57, %58 : vector<8x32xf32>
    %60 = arith.addf %1, %59 : vector<8x32xf32>
    %61 = vector.broadcast %14 : vector<8x1xf32> to vector<8x32xf32>
    %62 = arith.mulf %60, %61 : vector<8x32xf32>
    %c0_27 = arith.constant 0 : index
    %c0_28 = arith.constant 0 : index
    %63 = vector.load %arg8[%c0_27, %c0_28] : memref<96x64xf32, #tpu.memory_space<vmem>>, vector<96x64xf32>
    %c0_29 = arith.constant 0 : index
    %c0_30 = arith.constant 0 : index
    %64 = vector.load %arg9[%c0_29, %c0_30] : memref<1x64xf32, #tpu.memory_space<vmem>>, vector<1x64xf32>
    %cst_31 = arith.constant 0.000000e+00 : f32
    %65 = vector.broadcast %cst_31 : f32 to vector<1x32xf32>
    %66 = tpu.concatenate %65, %62, %65 in 0 : vector<1x32xf32>, vector<8x32xf32>, vector<1x32xf32> -> vector<10x32xf32>
    %67 = vector.extract_strided_slice %66 {offsets = [0, 0], sizes = [8, 32], strides = [1, 1]} : vector<10x32xf32> to vector<8x32xf32>
    %68 = vector.extract_strided_slice %63 {offsets = [0, 0], sizes = [32, 64], strides = [1, 1]} : vector<96x64xf32> to vector<32x64xf32>
    %cst_32 = arith.constant dense<0.000000e+00> : vector<8x64xf32>
    %69 = tpu.matmul %67, %68, %cst_32 {dimension_numbers = #tpu.dot_dimension_numbers<[1], [0], [0], [1], [0, 0, 1, 1], [], []>, precision = #tpu.contract_precision<fp32>} : vector<8x32xf32>, vector<32x64xf32>, vector<8x64xf32> -> vector<8x64xf32>
    %70 = vector.extract_strided_slice %66 {offsets = [1, 0], sizes = [8, 32], strides = [1, 1]} : vector<10x32xf32> to vector<8x32xf32>
    %71 = vector.extract_strided_slice %63 {offsets = [32, 0], sizes = [32, 64], strides = [1, 1]} : vector<96x64xf32> to vector<32x64xf32>
    %cst_33 = arith.constant dense<0.000000e+00> : vector<8x64xf32>
    %72 = tpu.matmul %70, %71, %cst_33 {dimension_numbers = #tpu.dot_dimension_numbers<[1], [0], [0], [1], [0, 0, 1, 1], [], []>, precision = #tpu.contract_precision<fp32>} : vector<8x32xf32>, vector<32x64xf32>, vector<8x64xf32> -> vector<8x64xf32>
    %73 = arith.addf %69, %72 : vector<8x64xf32>
    %74 = vector.extract_strided_slice %66 {offsets = [2, 0], sizes = [8, 32], strides = [1, 1]} : vector<10x32xf32> to vector<8x32xf32>
    %75 = vector.extract_strided_slice %63 {offsets = [64, 0], sizes = [32, 64], strides = [1, 1]} : vector<96x64xf32> to vector<32x64xf32>
    %cst_34 = arith.constant dense<0.000000e+00> : vector<8x64xf32>
    %76 = tpu.matmul %74, %75, %cst_34 {dimension_numbers = #tpu.dot_dimension_numbers<[1], [0], [0], [1], [0, 0, 1, 1], [], []>, precision = #tpu.contract_precision<fp32>} : vector<8x32xf32>, vector<32x64xf32>, vector<8x64xf32> -> vector<8x64xf32>
    %77 = arith.addf %73, %76 : vector<8x64xf32>
    %78 = vector.broadcast %64 : vector<1x64xf32> to vector<8x64xf32>
    %79 = arith.addf %77, %78 : vector<8x64xf32>
    %c0_35 = arith.constant 0 : index
    %c0_36 = arith.constant 0 : index
    %80 = vector.load %arg10[%c0_35, %c0_36] : memref<1x64xf32, #tpu.memory_space<vmem>>, vector<1x64xf32>
    %c0_37 = arith.constant 0 : index
    %c0_38 = arith.constant 0 : index
    %81 = vector.load %arg11[%c0_37, %c0_38] : memref<1x64xf32, #tpu.memory_space<vmem>>, vector<1x64xf32>
    %c0_39 = arith.constant 0 : index
    %c0_40 = arith.constant 0 : index
    %82 = vector.load %arg12[%c0_39, %c0_40] : memref<192x64xf32, #tpu.memory_space<vmem>>, vector<192x64xf32>
    %c0_41 = arith.constant 0 : index
    %c0_42 = arith.constant 0 : index
    %83 = vector.load %arg13[%c0_41, %c0_42] : memref<1x64xf32, #tpu.memory_space<vmem>>, vector<1x64xf32>
    %c0_43 = arith.constant 0 : index
    %c0_44 = arith.constant 0 : index
    %84 = vector.load %arg14[%c0_43, %c0_44] : memref<64x64xf32, #tpu.memory_space<vmem>>, vector<64x64xf32>
    %c0_45 = arith.constant 0 : index
    %c0_46 = arith.constant 0 : index
    %85 = vector.load %arg15[%c0_45, %c0_46] : memref<1x64xf32, #tpu.memory_space<vmem>>, vector<1x64xf32>
    %86 = math.absf %79 : vector<8x64xf32>
    %cst_47 = arith.constant dense<0.000000e+00> : vector<8xf32>
    %87 = vector.multi_reduction <add>, %86, %cst_47 [1] : vector<8x64xf32> to vector<8xf32>
    %88 = vector.shape_cast %87 : vector<8xf32> to vector<8x1xf32>
    %cst_48 = arith.constant 0.000000e+00 : f32
    %89 = vector.broadcast %cst_48 : f32 to vector<8x1xf32>
    %90 = arith.cmpf ogt, %88, %89 : vector<8x1xf32>
    %91 = arith.extui %90 : vector<8x1xi1> to vector<8x1xi32>
    %92 = arith.sitofp %91 : vector<8x1xi32> to vector<8x1xf32>
    %cst_49 = arith.constant dense<0.000000e+00> : vector<8xf32>
    %93 = vector.multi_reduction <add>, %79, %cst_49 [1] : vector<8x64xf32> to vector<8xf32>
    %94 = vector.shape_cast %93 : vector<8xf32> to vector<8x1xf32>
    %cst_50 = arith.constant 6.400000e+01 : f32
    %95 = vector.broadcast %cst_50 : f32 to vector<8x1xf32>
    %96 = arith.divf %94, %95 : vector<8x1xf32>
    %97 = vector.broadcast %96 : vector<8x1xf32> to vector<8x64xf32>
    %98 = arith.subf %79, %97 : vector<8x64xf32>
    %99 = arith.mulf %98, %98 : vector<8x64xf32>
    %cst_51 = arith.constant dense<0.000000e+00> : vector<8xf32>
    %100 = vector.multi_reduction <add>, %99, %cst_51 [1] : vector<8x64xf32> to vector<8xf32>
    %101 = vector.shape_cast %100 : vector<8xf32> to vector<8x1xf32>
    %cst_52 = arith.constant 6.400000e+01 : f32
    %102 = vector.broadcast %cst_52 : f32 to vector<8x1xf32>
    %103 = arith.divf %101, %102 : vector<8x1xf32>
    %104 = vector.broadcast %96 : vector<8x1xf32> to vector<8x64xf32>
    %105 = arith.subf %79, %104 : vector<8x64xf32>
    %cst_53 = arith.constant 9.99999974E-6 : f32
    %106 = vector.broadcast %cst_53 : f32 to vector<8x1xf32>
    %107 = arith.addf %103, %106 : vector<8x1xf32>
    %108 = math.rsqrt %107 : vector<8x1xf32>
    %109 = vector.broadcast %108 : vector<8x1xf32> to vector<8x64xf32>
    %110 = arith.mulf %105, %109 : vector<8x64xf32>
    %111 = vector.broadcast %80 : vector<1x64xf32> to vector<8x64xf32>
    %112 = arith.mulf %110, %111 : vector<8x64xf32>
    %113 = vector.broadcast %81 : vector<1x64xf32> to vector<8x64xf32>
    %114 = arith.addf %112, %113 : vector<8x64xf32>
    %cst_54 = arith.constant 0.000000e+00 : f32
    %115 = vector.broadcast %cst_54 : f32 to vector<1x64xf32>
    %116 = tpu.concatenate %115, %114, %115 in 0 : vector<1x64xf32>, vector<8x64xf32>, vector<1x64xf32> -> vector<10x64xf32>
    %117 = vector.extract_strided_slice %116 {offsets = [0, 0], sizes = [8, 64], strides = [1, 1]} : vector<10x64xf32> to vector<8x64xf32>
    %118 = vector.extract_strided_slice %82 {offsets = [0, 0], sizes = [64, 64], strides = [1, 1]} : vector<192x64xf32> to vector<64x64xf32>
    %cst_55 = arith.constant dense<0.000000e+00> : vector<8x64xf32>
    %119 = tpu.matmul %117, %118, %cst_55 {dimension_numbers = #tpu.dot_dimension_numbers<[1], [0], [0], [1], [0, 0, 1, 1], [], []>, precision = #tpu.contract_precision<fp32>} : vector<8x64xf32>, vector<64x64xf32>, vector<8x64xf32> -> vector<8x64xf32>
    %120 = vector.extract_strided_slice %116 {offsets = [1, 0], sizes = [8, 64], strides = [1, 1]} : vector<10x64xf32> to vector<8x64xf32>
    %121 = vector.extract_strided_slice %82 {offsets = [64, 0], sizes = [64, 64], strides = [1, 1]} : vector<192x64xf32> to vector<64x64xf32>
    %cst_56 = arith.constant dense<0.000000e+00> : vector<8x64xf32>
    %122 = tpu.matmul %120, %121, %cst_56 {dimension_numbers = #tpu.dot_dimension_numbers<[1], [0], [0], [1], [0, 0, 1, 1], [], []>, precision = #tpu.contract_precision<fp32>} : vector<8x64xf32>, vector<64x64xf32>, vector<8x64xf32> -> vector<8x64xf32>
    %123 = arith.addf %119, %122 : vector<8x64xf32>
    %124 = vector.extract_strided_slice %116 {offsets = [2, 0], sizes = [8, 64], strides = [1, 1]} : vector<10x64xf32> to vector<8x64xf32>
    %125 = vector.extract_strided_slice %82 {offsets = [128, 0], sizes = [64, 64], strides = [1, 1]} : vector<192x64xf32> to vector<64x64xf32>
    %cst_57 = arith.constant dense<0.000000e+00> : vector<8x64xf32>
    %126 = tpu.matmul %124, %125, %cst_57 {dimension_numbers = #tpu.dot_dimension_numbers<[1], [0], [0], [1], [0, 0, 1, 1], [], []>, precision = #tpu.contract_precision<fp32>} : vector<8x64xf32>, vector<64x64xf32>, vector<8x64xf32> -> vector<8x64xf32>
    %127 = arith.addf %123, %126 : vector<8x64xf32>
    %128 = vector.broadcast %83 : vector<1x64xf32> to vector<8x64xf32>
    %129 = arith.addf %127, %128 : vector<8x64xf32>
    %cst_58 = arith.constant 0.000000e+00 : f32
    %130 = vector.broadcast %cst_58 : f32 to vector<8x64xf32>
    %131 = arith.cmpf ogt, %129, %130 : vector<8x64xf32>
    %cst_59 = arith.constant 0.00999999977 : f32
    %132 = vector.broadcast %cst_59 : f32 to vector<8x64xf32>
    %133 = arith.mulf %132, %129 : vector<8x64xf32>
    %134 = arith.select %131, %129, %133 : vector<8x64xi1>, vector<8x64xf32>
    %cst_60 = arith.constant dense<0.000000e+00> : vector<8x64xf32>
    %135 = tpu.matmul %134, %84, %cst_60 {dimension_numbers = #tpu.dot_dimension_numbers<[1], [0], [0], [1], [0, 0, 1, 1], [], []>, precision = #tpu.contract_precision<fp32>} : vector<8x64xf32>, vector<64x64xf32>, vector<8x64xf32> -> vector<8x64xf32>
    %136 = vector.broadcast %85 : vector<1x64xf32> to vector<8x64xf32>
    %137 = arith.addf %135, %136 : vector<8x64xf32>
    %138 = arith.addf %79, %137 : vector<8x64xf32>
    %139 = vector.broadcast %92 : vector<8x1xf32> to vector<8x64xf32>
    %140 = arith.mulf %138, %139 : vector<8x64xf32>
    %c0_61 = arith.constant 0 : index
    %c0_62 = arith.constant 0 : index
    %c0_63 = arith.constant 0 : index
    %141 = vector.load %arg16[%c0_61, %c0_62, %c0_63] : memref<1x8x64xf32, #tpu.memory_space<vmem>>, vector<1x8x64xf32>
    %142 = vector.shape_cast %141 : vector<1x8x64xf32> to vector<8x64xf32>
    %143 = vector.shape_cast %140 : vector<8x64xf32> to vector<1x8x64xf32>
    tpu.vector_store %arg16[%c0_61, %c0_62, %c0_63], %143 {strides = array<i32>} : memref<1x8x64xf32, #tpu.memory_space<vmem>>, vector<1x8x64xf32>,
    %c0_64 = arith.constant 0 : index
    %c0_65 = arith.constant 0 : index
    %144 = vector.load %arg18[%c0_64, %c0_65] : memref<8x64xf32, #tpu.memory_space<vmem>>, vector<8x64xf32>
    tpu.vector_store %arg18[%c0_64, %c0_65], %140 {strides = array<i32>} : memref<8x64xf32, #tpu.memory_space<vmem>>, vector<8x64xf32>,
    %c0_66 = arith.constant 0 : index
    %c0_67 = arith.constant 0 : index
    %145 = tpu.strided_load %arg18[%c0_66, %c0_67] {strides = array<i32: 2, 1>} : memref<8x64xf32, #tpu.memory_space<vmem>>, vector<4x64xf32>
    %c1 = arith.constant 1 : index
    %c0_68 = arith.constant 0 : index
    %146 = tpu.strided_load %arg18[%c1, %c0_68] {strides = array<i32: 2, 1>} : memref<8x64xf32, #tpu.memory_space<vmem>>, vector<4x64xf32>
    %147 = arith.addf %145, %146 : vector<4x64xf32>
    %cst_69 = arith.constant 5.000000e-01 : f32
    %148 = vector.broadcast %cst_69 : f32 to vector<4x64xf32>
    %149 = arith.mulf %147, %148 : vector<4x64xf32>
    %c0_70 = arith.constant 0 : index
    %c0_71 = arith.constant 0 : index
    %c0_72 = arith.constant 0 : index
    %150 = vector.load %arg17[%c0_70, %c0_71, %c0_72] : memref<1x4x64xf32, #tpu.memory_space<vmem>>, vector<1x4x64xf32>
    %151 = vector.shape_cast %150 : vector<1x4x64xf32> to vector<4x64xf32>
    %152 = vector.shape_cast %149 : vector<4x64xf32> to vector<1x4x64xf32>
    tpu.vector_store %arg17[%c0_70, %c0_71, %c0_72], %152 {strides = array<i32>} : memref<1x4x64xf32, #tpu.memory_space<vmem>>, vector<1x4x64xf32>,
    return
  }
  func.func @transform_0(%arg0: i32) -> (i32, i32, i32) {
    %c0_i32 = arith.constant 0 : i32
    %c0_i32_0 = arith.constant 0 : i32
    %c0_i32_1 = arith.constant 0 : i32
    return %arg0, %c0_i32, %c0_i32_0 : i32, i32, i32
  }
  func.func @transform_1(%arg0: i32) -> (i32, i32) {
    %c0_i32 = arith.constant 0 : i32
    %c0_i32_0 = arith.constant 0 : i32
    %c0_i32_1 = arith.constant 0 : i32
    return %c0_i32, %c0_i32_0 : i32, i32
  }
  func.func @transform_2(%arg0: i32) -> (i32, i32) {
    %c0_i32 = arith.constant 0 : i32
    %c0_i32_0 = arith.constant 0 : i32
    %c0_i32_1 = arith.constant 0 : i32
    return %c0_i32, %c0_i32_0 : i32, i32
  }
  func.func @transform_3(%arg0: i32) -> (i32, i32) {
    %c0_i32 = arith.constant 0 : i32
    %c0_i32_0 = arith.constant 0 : i32
    %c0_i32_1 = arith.constant 0 : i32
    return %c0_i32, %c0_i32_0 : i32, i32
  }
  func.func @transform_4(%arg0: i32) -> (i32, i32) {
    %c0_i32 = arith.constant 0 : i32
    %c0_i32_0 = arith.constant 0 : i32
    %c0_i32_1 = arith.constant 0 : i32
    return %c0_i32, %c0_i32_0 : i32, i32
  }
  func.func @transform_5(%arg0: i32) -> (i32, i32) {
    %c0_i32 = arith.constant 0 : i32
    %c0_i32_0 = arith.constant 0 : i32
    %c0_i32_1 = arith.constant 0 : i32
    return %c0_i32, %c0_i32_0 : i32, i32
  }
  func.func @transform_6(%arg0: i32) -> (i32, i32) {
    %c0_i32 = arith.constant 0 : i32
    %c0_i32_0 = arith.constant 0 : i32
    %c0_i32_1 = arith.constant 0 : i32
    return %c0_i32, %c0_i32_0 : i32, i32
  }
  func.func @transform_7(%arg0: i32) -> (i32, i32) {
    %c0_i32 = arith.constant 0 : i32
    %c0_i32_0 = arith.constant 0 : i32
    %c0_i32_1 = arith.constant 0 : i32
    return %c0_i32, %c0_i32_0 : i32, i32
  }
  func.func @transform_8(%arg0: i32) -> (i32, i32) {
    %c0_i32 = arith.constant 0 : i32
    %c0_i32_0 = arith.constant 0 : i32
    %c0_i32_1 = arith.constant 0 : i32
    return %c0_i32, %c0_i32_0 : i32, i32
  }
  func.func @transform_9(%arg0: i32) -> (i32, i32) {
    %c0_i32 = arith.constant 0 : i32
    %c0_i32_0 = arith.constant 0 : i32
    %c0_i32_1 = arith.constant 0 : i32
    return %c0_i32, %c0_i32_0 : i32, i32
  }
  func.func @transform_10(%arg0: i32) -> (i32, i32) {
    %c0_i32 = arith.constant 0 : i32
    %c0_i32_0 = arith.constant 0 : i32
    %c0_i32_1 = arith.constant 0 : i32
    return %c0_i32, %c0_i32_0 : i32, i32
  }
  func.func @transform_11(%arg0: i32) -> (i32, i32) {
    %c0_i32 = arith.constant 0 : i32
    %c0_i32_0 = arith.constant 0 : i32
    %c0_i32_1 = arith.constant 0 : i32
    return %c0_i32, %c0_i32_0 : i32, i32
  }
  func.func @transform_12(%arg0: i32) -> (i32, i32) {
    %c0_i32 = arith.constant 0 : i32
    %c0_i32_0 = arith.constant 0 : i32
    %c0_i32_1 = arith.constant 0 : i32
    return %c0_i32, %c0_i32_0 : i32, i32
  }
  func.func @transform_13(%arg0: i32) -> (i32, i32) {
    %c0_i32 = arith.constant 0 : i32
    %c0_i32_0 = arith.constant 0 : i32
    %c0_i32_1 = arith.constant 0 : i32
    return %c0_i32, %c0_i32_0 : i32, i32
  }
  func.func @transform_14(%arg0: i32) -> (i32, i32) {
    %c0_i32 = arith.constant 0 : i32
    %c0_i32_0 = arith.constant 0 : i32
    %c0_i32_1 = arith.constant 0 : i32
    return %c0_i32, %c0_i32_0 : i32, i32
  }
  func.func @transform_15(%arg0: i32) -> (i32, i32, i32) {
    %c0_i32 = arith.constant 0 : i32
    %c0_i32_0 = arith.constant 0 : i32
    %c0_i32_1 = arith.constant 0 : i32
    return %arg0, %c0_i32, %c0_i32_0 : i32, i32, i32
  }
  func.func @transform_16(%arg0: i32) -> (i32, i32, i32) {
    %c0_i32 = arith.constant 0 : i32
    %c0_i32_0 = arith.constant 0 : i32
    %c0_i32_1 = arith.constant 0 : i32
    return %arg0, %c0_i32, %c0_i32_0 : i32, i32, i32
  }
}

</mosaic_0001>

<bundles_post_ra>
// kernel: tpu_custom_call.1
= control target key start
LH: loop header
LB: loop body
LE: loop exit
PB: predicated region body
PF: predicated region fallthrough
CT: control target
= control target key end

     0   :  { %vm50_vm0 = vcmask 1040384   ;;  %vm61_vm1 = vcmask 1046528   ;;  %vm73_vm2 = vcmask 1045504   ;;  %v2089_v6 = vmov 0.0|0.0   ;;  %s1337_s6 = smov 80   ;;  %s1338_s19 = smov 32   ;;  %s2075_s0 = inlined_call_operand.vmem [shape: f32[16,80], index: 0, kind: input, shape index: {}]   ;;  %s2076_s1 = inlined_call_operand.vmem [shape: f32[240,16], index: 1, kind: input, shape index: {}]   ;;  %s2077_s2 = inlined_call_operand.vmem [shape: f32[1,16], index: 2, kind: input, shape index: {}]   ;;  %s2078_s3 = inlined_call_operand.hbm [shape: f32[16,16], index: 3, kind: output, shape index: {}]  }
   0x1   :  { %v15_v0 = vld [vmem:[%s2075_s0] sm:$0xff]  ;;  %v16_v1 = vld [vmem:[%s2075_s0 + $0x8] sm:$0xff]  ;;  %1151 = vmatprep.subr.bf16.mxu0 %v2089_v6  ;;  %1016 = vmatprep.subr.bf16.mxu1 %v2089_v6  ;;  %v19_v9 = vld [vmem:[%s2076_s1 + $0x10] sm:$0xff] }
   0x2   :  { %v51_v2 = vrot.slane %v15_v0, 7  ;;  %v52_v3 = vrot.slane %v16_v1, 7  ;;  %v17_v4 = vld [vmem:[%s2076_s1] sm:$0xff]  ;;  %v18_v5 = vld [vmem:[%s2076_s1 + $0x8] sm:$0xff]  ;;  %v20_v13 = vld [vmem:[%s2076_s1 + $0x18] sm:$0xff]  ;;  %v111_v14 = vand.u32 4294901760, %v19_v9 }
   0x3   :  { %v105_v7 = vand.u32 4294901760, %v17_v4  ;;  %v108_v8 = vand.u32 4294901760, %v18_v5  ;;  %v21_v19 = vld [vmem:[%s2076_s1 + $0x20] sm:$0xff]  ;;  %v22_v24 = vld [vmem:[%s2076_s1 + $0x28] sm:$0xff]  ;;  %v1403_v25 = vld [vmem:[%s2076_s1 + $0x30] sm:$0xff]  ;;  %v114_v29 = vand.u32 4294901760, %v20_v13 }
   0x4   :  { %v1379_v10 = vsel %vm50_vm0, %v51_v2, %v52_v3  ;;  %v1381_v11 = vsel %vm50_vm0, 0.0, %v51_v2  ;;  %v58_v12 = vsel %vm50_vm0, %v52_v3, 0.0  ;;  %v1412_v30 = vld [vmem:[%s2076_s1 + $0x38] sm:$0xff]  ;;  %v1417_v31 = vld [vmem:[%s2076_s1 + $0x40] sm:$0xff]  ;;  %v1421_v34 = vsub.f32 %v19_v9, %v111_v14  ;;  %v1426_v36 = vld [vmem:[%s2076_s1 + $0x48] sm:$0xff] }
   0x5   :  { %v62_v15 = vrot.slane %v1381_v11, 1  ;;  %v63_v16 = vrot.slane %v1379_v10, 1  ;;  %v65_v17 = vrot.slane %v58_v12, 1  ;;  %v74_v18 = vrot.slane %v1381_v11, 2  ;;  %v1431_v37 = vld [vmem:[%s2076_s1 + $0x50] sm:$0xff]  ;;  %v1443_v42 = vld [vmem:[%s2076_s1 + $0x58] sm:$0xff] }
   0x6   :  { %v75_v20 = vrot.slane %v1379_v10, 2  ;;  %v77_v21 = vrot.slane %v58_v12, 2  ;;  %v1393_v22 = vpack.c.bf16 %v108_v8, %v105_v7  ;;  %v1395_v23 = vsub.f32 %v17_v4, %v105_v7  ;;  %v1454_v46 = vld [vmem:[%s2076_s1 + $0x60] sm:$0xff]  ;;  %v1466_v51 = vld [vmem:[%s2076_s1 + $0x68] sm:$0xff]  ;;  %v1471_v52 = vld [vmem:[%s2076_s1 + $0x70] sm:$0xff] }
   0x7   :  { %v64_v26 = vsel %vm61_vm1, %v62_v15, %v63_v16  ;;  %v66_v27 = vsel %vm61_vm1, %v63_v16, %v65_v17  ;;  %v1407_v28 = vsub.f32 %v18_v5, %v108_v8  ;;  %v117_v35 = vand.u32 4294901760, %v21_v19  ;;  %v1482_v56 = vld [vmem:[%s2076_s1 + $0x78] sm:$0xff]  ;;  %v1487_v57 = vld [vmem:[%s2076_s1 + $0x80] sm:$0xff]  ;;  %v1506_v62 = vld [vmem:[%s2076_s1 + $0x88] sm:$0xff] }
   0x8   :  { %2114 = vst [vmem:[#allocation5_spill] sm:$0xff] %v1393_v22  ;;  %67 = vrot.lane.b32.xlu0 %v64_v26, %s1337_s6  ;;  %69 = vrot.lane.b32.xlu1 %v66_v27, %s1337_s6  ;;  %v76_v32 = vsel %vm73_vm2, %v74_v18, %v75_v20  ;;  %v78_v33 = vsel %vm73_vm2, %v75_v20, %v77_v21  ;;  %v120_v40 = vand.u32 4294901760, %v22_v24  ;;  %v123_v41 = vand.u32 4294901760, %v1403_v25  ;;  %v1511_v63 = vld [vmem:[%s2076_s1 + $0x90] sm:$0xff] }
   0x9   :  { %1153 = vmatpush1.bf16.msra.mxu0 %v1393_v22  ;;  %1018 = vmatpush1.bf16.msra.mxu1 %v1393_v22  ;;  %v1435_v38 = vpack.c.bf16 %v114_v29, %v111_v14  ;;  %v1437_v39 = vsub.f32 %v20_v13, %v114_v29  ;;  %v1447_v43 = vsub.f32 %v21_v19, %v117_v35  ;;  %v126_v44 = vand.u32 4294901760, %v1412_v30 }
   0xa   :  { %1154 = vmatprep.subr.bf16.mxu0 %v2089_v6  ;;  %1019 = vmatprep.subr.bf16.mxu1 %v2089_v6  ;;  %v129_v45 = vand.u32 4294901760, %v1417_v31  ;;  %v1456_v47 = vsub.f32 %v22_v24, %v120_v40  ;;  %v1459_v48 = vsub.f32 %v1403_v25, %v123_v41  ;;  %v132_v49 = vand.u32 4294901760, %v1426_v36 }
   0xb   :  { %2115 = vst [vmem:[#allocation6_spill] sm:$0xff] %v1435_v38  ;;  %v135_v50 = vand.u32 4294901760, %v1431_v37  ;;  %v1473_v53 = vpack.c.bf16 %v120_v40, %v117_v35  ;;  %v1476_v54 = vsub.f32 %v1412_v30, %v126_v44  ;;  %v138_v55 = vand.u32 4294901760, %v1443_v42 }
   0xc   :  { %79 = vrot.lane.b32.xlu0 %v76_v32, %s1338_s19  ;;  %81 = vrot.lane.b32.xlu1 %v78_v33, %s1338_s19  ;;  %v1492_v58 = vsub.f32 %v1417_v31, %v129_v45  ;;  %v1495_v59 = vsub.f32 %v1426_v36, %v132_v49  ;;  %v141_v61 = vand.u32 4294901760, %v1454_v46 }
   0xd   :  { %2116 = vst [vmem:[#allocation7_spill] sm:$0xff] %v1473_v53  ;;  %1156 = vmatpush1.bf16.msra.mxu0 %v1435_v38  ;;  %1021 = vmatpush1.bf16.msra.mxu1 %v1435_v38  ;;  %v1500_v60 = vsub.f32 %v1431_v37, %v135_v50 }
   0xe   :  { %8 = vsyncpa [#allocation3], 0  ;;  %1157 = vmatprep.subr.bf16.mxu0 %v2089_v6  ;;  %1022 = vmatprep.subr.bf16.mxu1 %v2089_v6  ;;  %v1516_v0 = vsub.f32 %v1443_v42, %v138_v55  ;;  %v144_v1 = vand.u32 4294901760, %v1466_v51  ;;  %v147_v2 = vand.u32 4294901760, %v1471_v52  ;;  %v1523_v3 = vld [vmem:[%s2076_s1 + $0x98] sm:$0xff]  ;;  %v1526_v4 = vsub.f32 %v1454_v46, %v141_v61  ;;  %v1533_v8 = vld [vmem:[%s2076_s1 + $0xa0] sm:$0xff] }
   0xf   :  { %v150_v5 = vand.u32 4294901760, %v1482_v56  ;;  %v153_v7 = vand.u32 4294901760, %v1487_v57  ;;  %v156_v13 = vand.u32 4294901760, %v1506_v62  ;;  %v2088_v14 = vand.u32 4294901760, %v1511_v63  ;;  %v1546_v15 = vld [vmem:[%s2076_s1 + $0xa8] sm:$0xff]  ;;  %v1551_v16 = vld [vmem:[%s2076_s1 + $0xb0] sm:$0xff] }
  0x10   :  { %v1536_v9 = vsub.f32 %v1466_v51, %v144_v1  ;;  %v1539_v12 = vsub.f32 %v1471_v52, %v147_v2  ;;  %v1555_v17 = vpack.c.bf16 %v126_v44, %v123_v41  ;;  %v2085_v19 = vand.u32 4294901760, %v1523_v3  ;;  %v1564_v20 = vld [vmem:[%s2076_s1 + $0xb8] sm:$0xff]  ;;  %v1583_v27 = vld [vmem:[%s2076_s1 + $0xc0] sm:$0xff]  ;;  %v1588_v29 = vld [vmem:[%s2076_s1 + $0xc8] sm:$0xff]  ;;  %s1339_s22 = smov [#allocation2]  }
  0x11   :  { %1159 = vmatpush1.bf16.msra.mxu0 %v1473_v53  ;;  %1024 = vmatpush1.bf16.msra.mxu1 %v1473_v53  ;;  %v1558_v18 = vsub.f32 %v1482_v56, %v150_v5  ;;  %v1569_v21 = vsub.f32 %v1487_v57, %v153_v7  ;;  %v1572_v24 = vsub.f32 %v1506_v62, %v156_v13  ;;  %v2084_v26 = vand.u32 4294901760, %v1533_v8  ;;  %v1608_v40 = vld [vmem:[%s2076_s1 + $0xd0] sm:$0xff]  ;;  %v1613_v41 = vld [vmem:[%s2076_s1 + $0xd8] sm:$0xff]  ;;  %v1637_v51 = vld [vmem:[%s2076_s1 + $0xe8] sm:$0xff]  ;;  %s1004_s23 = sshll.u32 %s1339_s22, 4  ;;  %s1005_s23 = int_to_ptr.vmem [resolvable:$true] %s1004_s23 }
  0x12   :  { %2117 = vst [vmem:[#allocation8_spill] sm:$0xff] %v1555_v17  ;;  %1160 = vmatprep.subr.bf16.mxu0 %v2089_v6  ;;  %1025 = vmatprep.subr.bf16.mxu1 %v2089_v6  ;;  %v1577_v25 = vsub.f32 %v1511_v63, %v2088_v14  ;;  %v1593_v30 = vsub.f32 %v1523_v3, %v2085_v19  ;;  %v2083_v31 = vand.u32 4294901760, %v1546_v15  ;;  %v2079_v32 = vand.u32 4294901760, %v1551_v16  ;;  %s1312_s24 = scalar_lea.vmem %s1005_s23, 256  ;;  %p1317_p1 = scmp.lt.s32.totalorder %s1005_s23, %s1005_s23 }
  0x13   :  { %v1597_v33 = vpack.c.bf16 %v132_v49, %v129_v45  ;;  %v1602_v35 = vsub.f32 %v1533_v8, %v2084_v26  ;;  %v2080_v36 = vand.u32 4294901760, %v1564_v20  ;;  %v2081_v45 = vand.u32 4294901760, %v1583_v27  ;;  %v1632_v49 = vld [vmem:[%s2076_s1 + $0xe0] sm:$0xff]  ;;  %p1313_p0 = scmp.ne.s32.totalorder %s1005_s23, %s1312_s24  ;;  %p1318_p2 = scmp.lt.s32.totalorder %s1312_s24, %s1312_s24 }
  0x14   :  { %2118 = vst [vmem:[#allocation9_spill] sm:$0xff] %v1593_v30  ;;  %v1620_v42 = vsub.f32 %v1546_v15, %v2083_v31  ;;  %v1625_v44 = vsub.f32 %v1551_v16, %v2079_v32  ;;  %v2082_v46 = vand.u32 4294901760, %v1588_v29  ;;  %v1643_v52 = vpack.c.bf16 %v138_v55, %v135_v50 }
  0x15   :  { %2119 = vst [vmem:[#allocation10_spill] sm:$0xff] %v1597_v33  ;;  %2120 = vst [vmem:[#allocation11_spill] sm:$0xff] %v1602_v35  ;;  %1162 = vmatpush1.bf16.msra.mxu0 %v1555_v17  ;;  %1027 = vmatpush1.bf16.msra.mxu1 %v1555_v17  ;;  %v1645_v56 = vpack.c.bf16 %v144_v1, %v141_v61  ;;  %v1650_v57 = vsub.f32 %v1564_v20, %v2080_v36  ;;  %v2087_v37 = vand.u32 4294901760, %v1608_v40  ;;  %vm85_vm3 = vcmask 654336   ;;  %p1319_p3 = por %p1318_p2, %p1317_p1 }
  0x16   :  { %2121 = vst [vmem:[#allocation12_spill] sm:$0xff] %v1620_v42  ;;  %2122 = vst [vmem:[#allocation13_spill] sm:$0xff] %v1625_v44  ;;  %1163 = vmatprep.subr.bf16.mxu0 %v2089_v6  ;;  %1028 = vmatprep.subr.bf16.mxu1 %v2089_v6  ;;  %v1655_v62 = vsub.f32 %v1583_v27, %v2081_v45  ;;  %v1660_v32 = vsub.f32 %v1588_v29, %v2082_v46  ;;  %v2086_v50 = vand.u32 4294901760, %v1613_v41  ;;  %vm88_vm4 = vcmask 261120  }
  0x17   :  { %2123 = vst [vmem:[#allocation14_spill] sm:$0xff] %v1643_v52  ;;  %2124 = vst [vmem:[#allocation15_spill] sm:$0xff] %v1645_v56  ;;  %v2091_v55 = vand.u32 4294901760, %v1632_v49  ;;  %v2094_v61 = vand.u32 4294901760, %v1637_v51  ;;  %v232_v1 = vand.u32 4294901760, %v1395_v23  ;;  %v239_v36 = vand.u32 4294901760, %v1407_v28  ;;  %p1320_p4 = pnand %p1319_p3, %p1313_p0 }
  0x18   :  { %2125 = vst [vmem:[#allocation16_spill] sm:$0xff] %v1650_v57  ;;  %2126 = vst [vmem:[#allocation17_spill] sm:$0xff] %v1655_v62  ;;  %v1670_v45 = vpack.c.bf16 %v150_v5, %v147_v2  ;;  %v1675_v46 = vsub.f32 %v1608_v40, %v2087_v37  ;;  %v1680_v31 = vsub.f32 %v1613_v41, %v2086_v50  ;;  %v246_v26 = vand.u32 4294901760, %v1421_v34 }
  0x19   :  { %2127 = vst [vmem:[#allocation18_spill] sm:$0xff] %v1660_v32  ;;  %1165 = vmatpush1.bf16.msra.mxu0 %v1597_v33  ;;  %1030 = vmatpush1.bf16.msra.mxu1 %v1597_v33  ;;  %v1685_v19 = vpack.c.bf16 %v156_v13, %v153_v7  ;;  %v1690_v2 = vsub.f32 %v1632_v49, %v2091_v55  ;;  %v253_v50 = vand.u32 4294901760, %v1437_v39  ;;  %v260_v33 = vand.u32 4294901760, %v1447_v43 }
  0x1a   :  { %2128 = vst [vmem:[#allocation19_spill] sm:$0xff] %v1670_v45  ;;  %2129 = vst [vmem:[#allocation20_spill] sm:$0xff] %v1675_v46  ;;  %1166 = vmatprep.subr.bf16.mxu0 %v2089_v6  ;;  %1031 = vmatprep.subr.bf16.mxu1 %v2089_v6  ;;  %v1695_v5 = vsub.f32 %v1637_v51, %v2094_v61  ;;  %v1698_v37 = vpack.c.bf16 %v239_v36, %v232_v1  ;;  %v267_v17 = vand.u32 4294901760, %v1456_v47  ;;  %vm97_vm5 = vcmask 916480  }
  0x1b   :  { %2130 = vst [vmem:[#allocation21_spill] sm:$0xff] %v1680_v31  ;;  %2131 = vst [vmem:[#allocation22_spill] sm:$0xff] %v1685_v19  ;;  %v233_v14 = vsub.f32 %v1395_v23, %v232_v1  ;;  %v240_v6 = vsub.f32 %v1407_v28, %v239_v36  ;;  %v247_v7 = vsub.f32 %v1421_v34, %v246_v26  ;;  %v274_v1 = vand.u32 4294901760, %v1459_v48 }
  0x1c   :  { %2132 = vst [vmem:[#allocation23_spill] sm:$0xff] %v1690_v2  ;;  %2133 = vst [vmem:[#allocation24_spill] sm:$0xff] %v1695_v5  ;;  %v1703_v13 = vpack.c.bf16 %v253_v50, %v246_v26  ;;  %v254_v55 = vsub.f32 %v1437_v39, %v253_v50  ;;  %v2134_v36 = vmov 0.0|0.0   ;;  %v1713_v22 = vpack.c.bf16 %v267_v17, %v260_v33 }
  0x1d   :  { %1168 = vmatpush1.bf16.msra.mxu0 %v1643_v52  ;;  %1033 = vmatpush1.bf16.msra.mxu1 %v1643_v52  ;;  %v234_v61 = vand.u32 4294901760, %v233_v14  ;;  %v241_v53 = vand.u32 4294901760, %v240_v6  ;;  %v248_v38 = vand.u32 4294901760, %v247_v7  ;;  %v261_v50 = vsub.f32 %v1447_v43, %v260_v33 }
  0x1e   :  { %1169 = vmatprep.subr.bf16.mxu0 %v2134_v36  ;;  %1034 = vmatprep.subr.bf16.mxu1 %v2134_v36  ;;  %v255_v26 = vand.u32 4294901760, %v254_v55  ;;  %v268_v5 = vsub.f32 %v1456_v47, %v267_v17  ;;  %v281_v52 = vand.u32 4294901760, %v1476_v54  ;;  %v275_v6 = vsub.f32 %v1459_v48, %v274_v1 }
  0x1f   :  { %v1717_v2 = vpack.c.bf16 %v241_v53, %v234_v61  ;;  %v288_v14 = vand.u32 4294901760, %v1492_v58  ;;  %v262_v31 = vand.u32 4294901760, %v261_v50  ;;  %v295_v55 = vand.u32 4294901760, %v1495_v59 }
  0x20   :  { %v1722_v7 = vpack.c.bf16 %v255_v26, %v248_v38  ;;  %v269_v46 = vand.u32 4294901760, %v268_v5  ;;  %v1727_v33 = vpack.c.bf16 %v281_v52, %v274_v1  ;;  %v276_v53 = vand.u32 4294901760, %v275_v6 }
  0x21   :  { %1171 = vmatpush1.bf16.msra.mxu0 %v1645_v56  ;;  %1036 = vmatpush1.bf16.msra.mxu1 %v1645_v56  ;;  %v282_v17 = vsub.f32 %v1476_v54, %v281_v52  ;;  %v289_v61 = vsub.f32 %v1492_v58, %v288_v14  ;;  %v1735_v5 = vpack.c.bf16 %v295_v55, %v288_v14  ;;  %v302_v50 = vand.u32 4294901760, %v1500_v60 }
  0x22   :  { %1172 = vmatprep.subr.bf16.mxu0 %v2134_v36  ;;  %1037 = vmatprep.subr.bf16.mxu1 %v2134_v36  ;;  %v1733_v38 = vpack.c.bf16 %v269_v46, %v262_v31  ;;  %v296_v26 = vsub.f32 %v1495_v59, %v295_v55  ;;  %v309_v6 = vand.u32 4294901760, %v1516_v0  ;;  %v316_v52 = vand.u32 4294901760, %v1526_v4 }
  0x23   :  { %v283_v56 = vand.u32 4294901760, %v282_v17  ;;  %v290_v1 = vand.u32 4294901760, %v289_v61  ;;  %v303_v62 = vsub.f32 %v1500_v60, %v302_v50  ;;  %v323_v57 = vand.u32 4294901760, %v1536_v9 }
  0x24   :  { %v297_v32 = vand.u32 4294901760, %v296_v26  ;;  %v330_v31 = vand.u32 4294901760, %v1539_v12  ;;  %v1748_v14 = vpack.c.bf16 %v309_v6, %v302_v50  ;;  %v310_v55 = vsub.f32 %v1516_v0, %v309_v6 }
  0x25   :  { %1174 = vmatpush1.bf16.msra.mxu0 %v1670_v45  ;;  %1039 = vmatpush1.bf16.msra.mxu1 %v1670_v45  ;;  %v1746_v46 = vpack.c.bf16 %v283_v56, %v276_v53  ;;  %v337_v17 = vand.u32 4294901760, %v1558_v18  ;;  %v304_v26 = vand.u32 4294901760, %v303_v62  ;;  %v1756_v44 = vpack.c.bf16 %v323_v57, %v316_v52 }
  0x26   :  { %1175 = vmatprep.subr.bf16.mxu0 %v2134_v36  ;;  %1040 = vmatprep.subr.bf16.mxu1 %v2134_v36  ;;  %v1754_v61 = vpack.c.bf16 %v297_v32, %v290_v1  ;;  %v317_v42 = vsub.f32 %v1526_v4, %v316_v52  ;;  %v311_v45 = vand.u32 4294901760, %v310_v55  ;;  %v324_v56 = vsub.f32 %v1536_v9, %v323_v57 }
  0x27   :  { %v1760_v53 = vpack.c.bf16 %v337_v17, %v330_v31  ;;  %v331_v50 = vsub.f32 %v1539_v12, %v330_v31  ;;  %v338_v35 = vsub.f32 %v1558_v18, %v337_v17  ;;  %v344_v30 = vand.u32 4294901760, %v1569_v21 }
  0x28   :  { %v318_v6 = vand.u32 4294901760, %v317_v42  ;;  %v351_v32 = vand.u32 4294901760, %v1572_v24  ;;  %v2136_v62 = vand.u32 4294901760, %v1511_v63  ;;  %v2137_v1 = vand.u32 4294901760, %v1523_v3 }
  0x29   :  { %2135 = vst [vmem:[#allocation25_spill] sm:$0xff] %v1760_v53  ;;  %1177 = vmatpush1.bf16.msra.mxu0 %v1685_v19  ;;  %1042 = vmatpush1.bf16.msra.mxu1 %v1685_v19  ;;  %v1774_v52 = vpack.c.bf16 %v311_v45, %v304_v26  ;;  %v325_v31 = vand.u32 4294901760, %v324_v56  ;;  %v332_v42 = vand.u32 4294901760, %v331_v50  ;;  %v339_v55 = vand.u32 4294901760, %v338_v35 }
  0x2a   :  { %v1772_v57 = vpack.c.bf16 %v2137_v1, %v2136_v62  ;;  %1178 = vmatprep.subr.bf16.mxu0 %v2134_v36  ;;  %1043 = vmatprep.subr.bf16.mxu1 %v2134_v36  ;;  %v1778_v17 = vpack.c.bf16 %v351_v32, %v344_v30  ;;  %v345_v53 = vsub.f32 %v1569_v21, %v344_v30  ;;  %v2138_v26 = vand.u32 4294901760, %v1533_v8 }
  0x2b   :  { %v352_v19 = vsub.f32 %v1572_v24, %v351_v32  ;;  %v1782_v63 = vpack.c.bf16 %v325_v31, %v318_v6  ;;  %v1784_v3 = vpack.c.bf16 %v339_v55, %v332_v42  ;;  %v2139_v35 = vand.u32 4294901760, %v1546_v15 }
  0x2c   :  { %v346_v62 = vand.u32 4294901760, %v345_v53  ;;  %v2141_v53 = vand.u32 4294901760, %v1564_v20  ;;  %v2142_v8 = vand.u32 4294901760, %v1583_v27  ;;  %v2143_v15 = vand.u32 4294901760, %v1588_v29 }
  0x2d   :  { %v353_v45 = vand.u32 4294901760, %v352_v19  ;;  %1180 = vmatpush1.bf16.msra.mxu0 %v1772_v57  ;;  %1045 = vmatpush1.bf16.msra.mxu1 %v1772_v57  ;;  %v1792_v56 = vpack.c.bf16 %v2139_v35, %v2138_v26  ;;  %v2140_v19 = vand.u32 4294901760, %v1551_v16  ;;  %v2144_v16 = vand.u32 4294901760, %v1608_v40 }
  0x2e   :  { %1181 = vmatprep.subr.bf16.mxu0 %v2134_v36  ;;  %1046 = vmatprep.subr.bf16.mxu1 %v2134_v36  ;;  %v1814_v6 = vpack.c.bf16 %v2143_v15, %v2142_v8  ;;  %v2145_v20 = vand.u32 4294901760, %v1613_v41  ;;  %v2146_v27 = vand.u32 4294901760, %v1632_v49  ;;  %v2147_v29 = vand.u32 4294901760, %v1637_v51 }
  0x2f   :  { %v1796_v30 = vpack.c.bf16 %v353_v45, %v346_v62  ;;  %v1804_v50 = vpack.c.bf16 %v2141_v53, %v2140_v19  ;;  %vm996_vm6 = vcmask 130048  }
  0x30   :  { %v1824_v32 = vpack.c.bf16 %v2145_v20, %v2144_v16  ;;  %v1834_v1 = vpack.c.bf16 %v2147_v29, %v2146_v27 }
  0x31   :  { %1183 = vmatpush1.bf16.msra.mxu0 %v1792_v56  ;;  %1048 = vmatpush1.bf16.msra.mxu1 %v1792_v56 }
  0x32   :  { %1184 = vmatprep.subr.bf16.mxu0 %v2134_v36  ;;  %1049 = vmatprep.subr.bf16.mxu1 %v2134_v36 }
  0x35   :  { %1186 = vmatpush1.bf16.msra.mxu0 %v1804_v50  ;;  %1051 = vmatpush1.bf16.msra.mxu1 %v1804_v50 }
  0x36   :  { %1187 = vmatprep.subr.bf16.mxu0 %v2134_v36  ;;  %1052 = vmatprep.subr.bf16.mxu1 %v2134_v36 }
  0x39   :  { %1189 = vmatpush1.bf16.msra.mxu0 %v1814_v6  ;;  %1054 = vmatpush1.bf16.msra.mxu1 %v1814_v6 }
  0x3a   :  { %1190 = vmatprep.subr.bf16.mxu0 %v2134_v36  ;;  %1055 = vmatprep.subr.bf16.mxu1 %v2134_v36 }
  0x3d   :  { %1192 = vmatpush1.bf16.msra.mxu0 %v1824_v32  ;;  %1057 = vmatpush1.bf16.msra.mxu1 %v1824_v32 }
  0x3e   :  { %1193 = vmatprep.subr.bf16.mxu0 %v2134_v36  ;;  %1058 = vmatprep.subr.bf16.mxu1 %v2134_v36 }
  0x41   :  { %1195 = vmatpush1.bf16.msra.mxu0 %v1834_v1  ;;  %1060 = vmatpush1.bf16.msra.mxu1 %v1834_v1 }
  0x42   :  { %1196 = vmatprep.subr.bf16.mxu0 %v2134_v36  ;;  %1061 = vmatprep.subr.bf16.mxu1 %v2134_v36 }
  0x7a   :  { %v68_v26 = vpop.permute.xlu0 %67  ;;  %v70_v35 = vpop.permute.xlu1 %69 }
  0x7b   :  { %v86_v19 = vsel %vm85_vm3, %v1381_v11, %v68_v26  ;;  %v87_v53 = vsel %vm85_vm3, %v1379_v10, %v70_v35 }
  0x7c   :  { %v1862_v8 = vand.u32 4294901760, %v86_v19  ;;  %v1864_v15 = vand.u32 4294901760, %v87_v53 }
  0x7e   :  { %v1867_v16 = vsub.f32 %v86_v19, %v1862_v8  ;;  %v80_v20 = vpop.permute.xlu0 %79  ;;  %v82_v27 = vpop.permute.xlu1 %81  ;;  %v1870_v62 = vsub.f32 %v87_v53, %v1864_v15 }
  0x7f   :  { %v89_v29 = vsel %vm88_vm4, %v68_v26, %v80_v20  ;;  %v90_v45 = vsel %vm88_vm4, %v70_v35, %v82_v27 }
  0x80   :  { %2148 = vst [vmem:[#allocation26_spill] sm:$0xff] %v1870_v62  ;;  %v99_v55 = vsel %vm97_vm5, %v89_v29, 0  ;;  %v102_v11 = vsel %vm97_vm5, %v90_v45, 0  ;;  %v206_v31 = vand.u32 4294901760, %v1867_v16  ;;  %v221_v26 = vand.u32 4294901760, %v1870_v62 }
  0x81   :  { %v1872_v42 = vand.u32 4294901760, %v99_v55  ;;  %v1874_v10 = vand.u32 4294901760, %v102_v11 }
  0x82   :  { %v207_v45 = vsub.f32 %v1867_v16, %v206_v31 }
  0x83   :  { %v1878_v51 = vsub.f32 %v99_v55, %v1872_v42  ;;  %v1881_v19 = vsub.f32 %v102_v11, %v1874_v10  ;;  %v222_v55 = vsub.f32 %v1870_v62, %v221_v26 }
  0x84   :  { %v208_v11 = vand.u32 4294901760, %v207_v45 }
  0x85   :  { %v200_v35 = vand.u32 4294901760, %v1878_v51  ;;  %v215_v53 = vand.u32 4294901760, %v1881_v19  ;;  %v223_v41 = vand.u32 4294901760, %v222_v55  ;;  %v2156_v55 = vld [vmem:[#allocation18_spill] sm:$0xff] }
  0x87   :  { %698 = vmatprep.mubr.f32.mxu0 %v200_v35  ;;  %v201_v20 = vsub.f32 %v1878_v51, %v200_v35  ;;  %v216_v27 = vsub.f32 %v1881_v19, %v215_v53 }
  0x88   :  { %702 = vmatmul.mubr.f32.vlgmr.msra.gmra.mrb[0].mxu0 %v206_v31 }
  0x89   :  { %1198 = vmatpush1.bf16.msra.mxu0 %v1698_v37  ;;  %v202_v29 = vand.u32 4294901760, %v201_v20  ;;  %709 = vmatprep.mubr.f32.mxu0 %v215_v53  ;;  %v217_v49 = vand.u32 4294901760, %v216_v27  ;;  %v2149_v37 = vld [vmem:[#allocation9_spill] sm:$0xff] }
  0x8a   :  { %1199 = vmatprep.subr.bf16.mxu0 %v2134_v36  ;;  %v2155_v20 = vld [vmem:[#allocation17_spill] sm:$0xff] }
  0x8b   :  { %203 = vmatprep.mubr.f32.mxu1 %v202_v29  ;;  %v400_v27 = vand.u32 4294901760, %v2155_v20 }
  0x8c   :  { %209 = vmatmul.mubr.f32.vlgmr.msra.gmra.mrb[0].mxu1 %v208_v11  ;;  %713 = vmatmul.mubr.f32.gmra.mrb[2].mxu0 %v221_v26 }
  0x8d   :  { %1063 = vmatpush1.bf16.msra.mxu1 %v1717_v2  ;;  %1201 = vmatpush1.bf16.msra.mxu0 %v1703_v13  ;;  %v365_v2 = vand.u32 4294901760, %v2149_v37  ;;  %v2150_v13 = vld [vmem:[#allocation25_spill] sm:$0xff] }
  0x8e   :  { %873 = vmatprep.mubr.f32.mxu0 %v1872_v42  ;;  %218 = vmatprep.mubr.f32.mxu1 %v217_v49 }
  0x8f   :  { %1064 = vmatprep.subr.bf16.mxu1 %v2134_v36  ;;  %1202 = vmatprep.subr.bf16.mxu0 %v2134_v36 }
  0x90   :  { %224 = vmatmul.mubr.f32.gmra.mrb[2].mxu1 %v223_v41  ;;  %v2154_v41 = vld [vmem:[#allocation16_spill] sm:$0xff] }
  0x91   :  { %1066 = vmatpush1.bf16.msra.mxu1 %v1722_v7  ;;  %1204 = vmatpush1.bf16.msra.mxu0 %v1713_v22  ;;  %v358_v22 = vand.u32 4294901760, %v1577_v25  ;;  %v393_v49 = vand.u32 4294901760, %v2154_v41 }
  0x92   :  { %444 = vmatprep.mubr.f32.mxu1 %v1872_v42  ;;  %1067 = vmatprep.subr.bf16.mxu1 %v2134_v36 }
  0x93   :  { %1205 = vmatprep.subr.bf16.mxu0 %v2134_v36  ;;  %v359_v7 = vsub.f32 %v1577_v25, %v358_v22  ;;  %v394_v45 = vsub.f32 %v2154_v41, %v393_v49 }
  0x95   :  { %1069 = vmatpush1.bf16.msra.mxu1 %v1733_v38  ;;  %1207 = vmatpush1.bf16.msra.mxu0 %v1727_v33  ;;  %v366_v33 = vsub.f32 %v2149_v37, %v365_v2  ;;  %v2151_v38 = vld [vmem:[#allocation11_spill] sm:$0xff] }
  0x96   :  { %1070 = vmatprep.subr.bf16.mxu1 %v2134_v36  ;;  %1208 = vmatprep.subr.bf16.mxu0 %v2134_v36 }
  0x97   :  { %v367_v31 = vand.u32 4294901760, %v366_v33 }
  0x99   :  { %1072 = vmatpush1.bf16.msra.mxu1 %v1746_v46  ;;  %1210 = vmatpush1.bf16.msra.mxu0 %v1735_v5  ;;  %v372_v5 = vand.u32 4294901760, %v2151_v38  ;;  %v2152_v46 = vld [vmem:[#allocation12_spill] sm:$0xff] }
  0x9a   :  { %1073 = vmatprep.subr.bf16.mxu1 %v2134_v36  ;;  %1211 = vmatprep.subr.bf16.mxu0 %v2134_v36 }
  0x9b   :  { %v373_v26 = vsub.f32 %v2151_v38, %v372_v5 }
  0x9d   :  { %1075 = vmatpush1.bf16.msra.mxu1 %v1754_v61  ;;  %1213 = vmatpush1.bf16.msra.mxu0 %v1748_v14  ;;  %v1224_v14 = vpack.c.bf16 %v365_v2, %v358_v22  ;;  %v2153_v61 = vld [vmem:[#allocation13_spill] sm:$0xff]  ;;  %v374_v11 = vand.u32 4294901760, %v373_v26 }
  0x9e   :  { %1076 = vmatprep.subr.bf16.mxu1 %v2134_v36  ;;  %1214 = vmatprep.subr.bf16.mxu0 %v2134_v36 }
  0xa1   :  { %1078 = vmatpush1.bf16.msra.mxu1 %v1774_v52  ;;  %1216 = vmatpush1.bf16.msra.mxu0 %v1756_v44  ;;  %v379_v44 = vand.u32 4294901760, %v2152_v46  ;;  %v386_v52 = vand.u32 4294901760, %v2153_v61 }
  0xa2   :  { %1079 = vmatprep.subr.bf16.mxu1 %v2134_v36  ;;  %1217 = vmatprep.subr.bf16.mxu0 %v2134_v36 }
  0xa3   :  { %v380_v35 = vsub.f32 %v2152_v46, %v379_v44  ;;  %v387_v53 = vsub.f32 %v2153_v61, %v386_v52  ;;  %v1227_v29 = vpack.c.bf16 %v379_v44, %v372_v5  ;;  %v1230_v62 = vpack.c.bf16 %v393_v49, %v386_v52  ;;  %v2160_v49 = vld [vmem:[#allocation24_spill] sm:$0xff] }
  0xa5   :  { %1081 = vmatpush1.bf16.msra.mxu1 %v1782_v63  ;;  %1219 = vmatpush1.bf16.msra.mxu0 %v2150_v13  ;;  %v360_v63 = vand.u32 4294901760, %v359_v7  ;;  %v381_v22 = vand.u32 4294901760, %v380_v35  ;;  %v388_v2 = vand.u32 4294901760, %v387_v53  ;;  %v395_v13 = vand.u32 4294901760, %v394_v45 }
  0xa6   :  { %1082 = vmatprep.subr.bf16.mxu1 %v2134_v36  ;;  %1220 = vmatprep.subr.bf16.mxu0 %v2134_v36  ;;  %v401_v7 = vsub.f32 %v2155_v20, %v400_v27 }
  0xa7   :  { %v1092_v40 = vpack.c.bf16 %v381_v22, %v374_v11  ;;  %v1095_v44 = vpack.c.bf16 %v395_v13, %v388_v2 }
  0xa8   :  { %v402_v26 = vand.u32 4294901760, %v401_v7 }
  0xa9   :  { %1084 = vmatpush1.bf16.msra.mxu1 %v1784_v3  ;;  %1222 = vmatpush1.bf16.msra.mxu0 %v1778_v17  ;;  %v407_v3 = vand.u32 4294901760, %v2156_v55  ;;  %v1089_v17 = vpack.c.bf16 %v367_v31, %v360_v63  ;;  %v2158_v63 = vld [vmem:[#allocation21_spill] sm:$0xff] }
  0xaa   :  { %1085 = vmatprep.subr.bf16.mxu1 %v2134_v36  ;;  %1223 = vmatprep.subr.bf16.mxu0 %v2134_v36  ;;  %v421_v5 = vand.u32 4294901760, %v2158_v63 }
  0xab   :  { %v408_v33 = vsub.f32 %v2156_v55, %v407_v3  ;;  %v1233_v31 = vpack.c.bf16 %v407_v3, %v400_v27 }
  0xac   :  { %v422_v45 = vsub.f32 %v2158_v63, %v421_v5 }
  0xad   :  { %1087 = vmatpush1.bf16.msra.mxu1 %v1796_v30  ;;  %1225 = vmatpush1.bf16.msra.mxu0 %v1224_v14  ;;  %v2157_v30 = vld [vmem:[#allocation20_spill] sm:$0xff]  ;;  %v409_v35 = vand.u32 4294901760, %v408_v33 }
  0xae   :  { %1088 = vmatprep.subr.bf16.mxu1 %v2134_v36  ;;  %1226 = vmatprep.subr.bf16.mxu0 %v2134_v36  ;;  %v414_v14 = vand.u32 4294901760, %v2157_v30  ;;  %v423_v3 = vand.u32 4294901760, %v422_v45 }
  0xaf   :  { %v1098_v11 = vpack.c.bf16 %v409_v35, %v402_v26  ;;  %v2164_v26 = vpack.c.bf16 %v1437_v39, %v1421_v34  ;;  %v2165_v35 = vld [vmem:[#allocation7_spill] sm:$0xff]  ;;  %v2168_v34 = vpack.c.bf16 %v1476_v54, %v1459_v48  ;;  %v2169_v39 = vld [vmem:[#allocation10_spill] sm:$0xff]  ;;  %v2172_v48 = vpack.c.bf16 %v1516_v0, %v1500_v60 }
  0xb0   :  { %v415_v53 = vsub.f32 %v2157_v30, %v414_v14  ;;  %v1236_v22 = vpack.c.bf16 %v421_v5, %v414_v14  ;;  %v2161_v5 = vld [vmem:[#allocation5_spill] sm:$0xff]  ;;  %v2173_v54 = vld [vmem:[#allocation15_spill] sm:$0xff]  ;;  %v2176_v60 = vpack.c.bf16 %v1558_v18, %v1539_v12  ;;  %v2177_v0 = vld [vmem:[#allocation22_spill] sm:$0xff]  ;;  %v1137_v12 = vpack.c.bf16 %v2152_v46, %v2151_v38 }
  0xb1   :  { %1090 = vmatpush1.bf16.msra.mxu1 %v1089_v17  ;;  %1228 = vmatpush1.bf16.msra.mxu0 %v1227_v29  ;;  %v2159_v17 = vld [vmem:[#allocation23_spill] sm:$0xff]  ;;  %v435_v29 = vand.u32 4294901760, %v2160_v49  ;;  %v1140_v18 = vpack.c.bf16 %v2154_v41, %v2153_v61 }
  0xb2   :  { %1091 = vmatprep.subr.bf16.mxu1 %v2134_v36  ;;  %1229 = vmatprep.subr.bf16.mxu0 %v2134_v36  ;;  %v428_v52 = vand.u32 4294901760, %v2159_v17  ;;  %v416_v27 = vand.u32 4294901760, %v415_v53 }
  0xb4   :  { %v1101_v2 = vpack.c.bf16 %v423_v3, %v416_v27  ;;  %v1239_v13 = vpack.c.bf16 %v435_v29, %v428_v52 }
  0xb5   :  { %1093 = vmatpush1.bf16.msra.mxu1 %v1092_v40  ;;  %1231 = vmatpush1.bf16.msra.mxu0 %v1230_v62  ;;  %v429_v40 = vsub.f32 %v2159_v17, %v428_v52  ;;  %v436_v62 = vsub.f32 %v2160_v49, %v435_v29 }
  0xb6   :  { %1094 = vmatprep.subr.bf16.mxu1 %v2134_v36  ;;  %1232 = vmatprep.subr.bf16.mxu0 %v2134_v36 }
  0xb7   :  { %v430_v7 = vand.u32 4294901760, %v429_v40  ;;  %v437_v33 = vand.u32 4294901760, %v436_v62 }
  0xb9   :  { %1096 = vmatpush1.bf16.msra.mxu1 %v1095_v44  ;;  %1234 = vmatpush1.bf16.msra.mxu0 %v1233_v31  ;;  %v1104_v14 = vpack.c.bf16 %v437_v33, %v430_v7  ;;  %v2162_v44 = vpack.c.bf16 %v1407_v28, %v1395_v23  ;;  %v2163_v31 = vld [vmem:[#allocation6_spill] sm:$0xff]  ;;  %v2166_v23 = vpack.c.bf16 %v1456_v47, %v1447_v43  ;;  %v2167_v28 = vld [vmem:[#allocation8_spill] sm:$0xff] }
  0xba   :  { %1097 = vmatprep.subr.bf16.mxu1 %v2134_v36  ;;  %1235 = vmatprep.subr.bf16.mxu0 %v2134_v36  ;;  %v2170_v43 = vpack.c.bf16 %v1495_v59, %v1492_v58  ;;  %v2171_v47 = vld [vmem:[#allocation14_spill] sm:$0xff]  ;;  %v2174_v58 = vpack.c.bf16 %v1536_v9, %v1526_v4  ;;  %v2175_v59 = vld [vmem:[#allocation19_spill] sm:$0xff]  ;;  %v2178_v4 = vpack.c.bf16 %v1572_v24, %v1569_v21 }
  0xbb   :  { %v1134_v9 = vpack.c.bf16 %v2149_v37, %v1577_v25  ;;  %v1143_v21 = vpack.c.bf16 %v2156_v55, %v2155_v20  ;;  %v1146_v24 = vpack.c.bf16 %v2158_v63, %v2157_v30  ;;  %v1149_v25 = vpack.c.bf16 %v2160_v49, %v2159_v17 }
  0xbd   :  { %1099 = vmatpush1.bf16.msra.mxu1 %v1098_v11  ;;  %1237 = vmatpush1.bf16.msra.mxu0 %v1236_v22 }
  0xbe   :  { %1100 = vmatprep.subr.bf16.mxu1 %v2134_v36  ;;  %1238 = vmatprep.subr.bf16.mxu0 %v2134_v36 }
  0xc1   :  { %1102 = vmatpush1.bf16.msra.mxu1 %v1101_v2  ;;  %1240 = vmatpush1.bf16.msra.mxu0 %v1239_v13 }
  0xc2   :  { %1103 = vmatprep.subr.bf16.mxu1 %v2134_v36  ;;  %1241 = vmatprep.subr.bf16.mxu0 %v2134_v36 }
  0xc4   :  { %875 = vmatmul.mubr.f32.vlgmr.msra.gmra.mrb[0].mxu0 %v1862_v8 }
  0xc5   :  { %1105 = vmatpush1.bf16.msra.mxu1 %v1104_v14  ;;  %880 = vmatprep.mubr.f32.mxu0 %v1874_v10 }
  0xc6   :  { %1243 = vmatpush1.bf16.msra.mxu0 %v2161_v5  ;;  %1106 = vmatprep.subr.bf16.mxu1 %v2134_v36 }
  0xc7   :  { %1244 = vmatprep.subr.bf16.mxu0 %v2134_v36 }
  0xc8   :  { %446 = vmatmul.mubr.f32.vlgmr.msra.gmra.mrb[0].mxu1 %v1862_v8  ;;  %882 = vmatmul.mubr.f32.gmra.mrb[2].mxu0 %v1864_v15 }
  0xc9   :  { %451 = vmatprep.mubr.f32.mxu1 %v1874_v10  ;;  %1108 = vmatpush1.bf16.msra.mxu1 %v2162_v44 }
  0xca   :  { %1246 = vmatpush1.bf16.msra.mxu0 %v2163_v31  ;;  %982 = vmatprep.mubr.f32.mxu0 %v1872_v42 }
  0xcb   :  { %1109 = vmatprep.subr.bf16.mxu1 %v2134_v36  ;;  %1247 = vmatprep.subr.bf16.mxu0 %v2134_v36 }
  0xcc   :  { %453 = vmatmul.mubr.f32.gmra.mrb[2].mxu1 %v1864_v15 }
  0xcd   :  { %1111 = vmatpush1.bf16.msra.mxu1 %v2164_v26  ;;  %584 = vmatprep.mubr.f32.mxu1 %v1878_v51 }
  0xce   :  { %1249 = vmatpush1.bf16.msra.mxu0 %v2165_v35  ;;  %1112 = vmatprep.subr.bf16.mxu1 %v2134_v36 }
  0xcf   :  { %1250 = vmatprep.subr.bf16.mxu0 %v2134_v36 }
  0xd1   :  { %1114 = vmatpush1.bf16.msra.mxu1 %v2166_v23 }
  0xd2   :  { %1252 = vmatpush1.bf16.msra.mxu0 %v2167_v28  ;;  %1115 = vmatprep.subr.bf16.mxu1 %v2134_v36 }
  0xd3   :  { %1253 = vmatprep.subr.bf16.mxu0 %v2134_v36 }
  0xd5   :  { %1117 = vmatpush1.bf16.msra.mxu1 %v2168_v34 }
  0xd6   :  { %1255 = vmatpush1.bf16.msra.mxu0 %v2169_v39  ;;  %1118 = vmatprep.subr.bf16.mxu1 %v2134_v36 }
  0xd7   :  { %1256 = vmatprep.subr.bf16.mxu0 %v2134_v36 }
  0xd9   :  { %1120 = vmatpush1.bf16.msra.mxu1 %v2170_v43 }
  0xda   :  { %1258 = vmatpush1.bf16.msra.mxu0 %v2171_v47  ;;  %1121 = vmatprep.subr.bf16.mxu1 %v2134_v36 }
  0xdb   :  { %1259 = vmatprep.subr.bf16.mxu0 %v2134_v36 }
  0xdd   :  { %1123 = vmatpush1.bf16.msra.mxu1 %v2172_v48 }
  0xde   :  { %1261 = vmatpush1.bf16.msra.mxu0 %v2173_v54  ;;  %1124 = vmatprep.subr.bf16.mxu1 %v2134_v36 }
  0xdf   :  { %1262 = vmatprep.subr.bf16.mxu0 %v2134_v36 }
  0xe1   :  { %1126 = vmatpush1.bf16.msra.mxu1 %v2174_v58 }
  0xe2   :  { %1264 = vmatpush1.bf16.msra.mxu0 %v2175_v59  ;;  %1127 = vmatprep.subr.bf16.mxu1 %v2134_v36 }
  0xe3   :  { %1265 = vmatprep.subr.bf16.mxu0 %v2134_v36 }
  0xe5   :  { %1129 = vmatpush1.bf16.msra.mxu1 %v2176_v60 }
  0xe6   :  { %1267 = vmatpush1.bf16.msra.mxu0 %v2177_v0  ;;  %1130 = vmatprep.subr.bf16.mxu1 %v2134_v36 }
  0xe7   :  { %1268 = vmatprep.subr.bf16.mxu0 %v2134_v36 }
  0xe9   :  { %1132 = vmatpush1.bf16.msra.mxu1 %v2178_v4 }
  0xea   :  { %1270 = vmatpush1.bf16.msra.mxu0 %v1772_v57  ;;  %1133 = vmatprep.subr.bf16.mxu1 %v2134_v36  ;;  %v2179_v57 = vld [vmem:[#allocation26_spill] sm:$0xff] }
  0xeb   :  { %1271 = vmatprep.subr.bf16.mxu0 %v2134_v36 }
  0xed   :  { %1135 = vmatpush1.bf16.msra.mxu1 %v1134_v9 }
  0xee   :  { %1273 = vmatpush1.bf16.msra.mxu0 %v1792_v56  ;;  %1136 = vmatprep.subr.bf16.mxu1 %v2134_v36 }
  0xef   :  { %1274 = vmatprep.subr.bf16.mxu0 %v2134_v36 }
  0xf1   :  { %1138 = vmatpush1.bf16.msra.mxu1 %v1137_v12 }
  0xf2   :  { %1276 = vmatpush1.bf16.msra.mxu0 %v1804_v50  ;;  %1139 = vmatprep.subr.bf16.mxu1 %v2134_v36 }
  0xf3   :  { %1277 = vmatprep.subr.bf16.mxu0 %v2134_v36 }
  0xf5   :  { %1141 = vmatpush1.bf16.msra.mxu1 %v1140_v18 }
  0xf6   :  { %1279 = vmatpush1.bf16.msra.mxu0 %v1814_v6  ;;  %1142 = vmatprep.subr.bf16.mxu1 %v2134_v36  ;;  %v1015_v6 = vld [vmem:[%s2077_s2] ss:$0 sm:$0xff] }
  0xf7   :  { %1280 = vmatprep.subr.bf16.mxu0 %v2134_v36 }
  0xf9   :  { %1144 = vmatpush1.bf16.msra.mxu1 %v1143_v21 }
  0xfa   :  { %1282 = vmatpush1.bf16.msra.mxu0 %v1824_v32  ;;  %1145 = vmatprep.subr.bf16.mxu1 %v2134_v36 }
  0xfb   :  { %1283 = vmatprep.subr.bf16.mxu0 %v2134_v36 }
  0xfd   :  { %1147 = vmatpush1.bf16.msra.mxu1 %v1146_v24 }
  0xfe   :  { %1285 = vmatpush1.bf16.msra.mxu0 %v1834_v1  ;;  %1148 = vmatprep.subr.bf16.mxu1 %v2134_v36 }
 0x101   :  { %984 = vmatmul.mubr.f32.vlgmr.msra.gmra.mrb[0].mxu0 %v1862_v8  ;;  %1150 = vmatpush1.bf16.msra.mxu1 %v1149_v25 }
 0x102   :  { %989 = vmatprep.mubr.f32.mxu0 %v1874_v10 }
 0x104   :  { %587 = vmatmul.mubr.f32.vlgmr.msra.gmra.mrb[0].mxu1 %v1867_v16 }
 0x105   :  { %991 = vmatmul.mubr.f32.gmra.mrb[2].mxu0 %v1864_v15  ;;  %593 = vmatprep.mubr.f32.mxu1 %v1881_v19 }
 0x108   :  { %596 = vmatmul.mubr.f32.gmra.mrb[2].mxu1 %v2179_v57 }
 0x1d4   :  { %v985_v56 = vpop.f32.mrb[0].mxu0 }
 0x1d5   :  { %v987_v50 = vpop.f32.mrb[1].mxu0 }
 0x1d7   :  { %v588_v36 = vpop.f32.mrb[0].mxu1 }
 0x1d8   :  { %v1286_v32 = vadd.f32 %v1015_v6, %v588_v36  ;;  %v992_v1 = vpop.f32.mrb[2].mxu0  ;;  %v590_v51 = vpop.f32.mrb[1].mxu1 }
 0x1d9   :  { %v994_v42 = vpop.f32.mrb[3].mxu0 }
 0x1da   :  { %v1287_v8 = vadd.f32 %v1286_v32, %v985_v56 }
 0x1db   :  { %v597_v16 = vpop.f32.mrb[2].mxu1 }
 0x1dc   :  { %997 = vst.msk [vmem:[#allocation2] sm:$0xff] %vm996_vm6, %v1287_v8  ;;  %v1288_v15 = vadd.f32 %v1015_v6, %v597_v16  ;;  %v599_v10 = vpop.f32.mrb[3].mxu1 }
 0x1de   :  { %v1289_v19 = vadd.f32 %v1288_v15, %v992_v1 }
 0x1e0   :  { %998 = vst.msk [vmem:[#allocation2 + $0x8] sm:$0xff] %vm996_vm6, %v1289_v19 }
 0x1e1   :  { %1323 = shalt.err (!%p1320_p4)
}
 0x1e2   :  { %s1324_s26 = scalar_lea.hbm %s2078_s3, 256 }
 0x1e3   :  { %p1325_p5 = scmp.ne.s32.totalorder %s2078_s3, %s1324_s26  ;;  %p1328_p6 = scmp.lt.u32.totalorder %s1324_s26, %s2078_s3 }
 0x1e5   :  { %p1330_p7 = pnand %p1328_p6, %p1325_p5 }
 0x1e7   :  { %1333 = shalt.err (!%p1330_p7)
}
 0x1e8   :  { %s1340_s4 = smov 128   ;;  %s1341_s5 = smov 8  }
 0x1e9   :  { %1010 = dma.vmem_to_hbm [thread:$0]  %s1005_s23, 256, %s2078_s3, [#allocation3], %s1340_s4, %s1340_s4, %s1341_s5  }
 0x1ea   :  { %1334 = dma.done.wait [#allocation3], 256  }
 0x1eb   :  { %1335 = vsyncadd [#allocation3], 4294967040 }
 0x1ec   :  { %1014 = vsyncpa [#allocation3], 1 }

// kernel: tpu_custom_call.1
= control target key start
LH: loop header
LB: loop body
LE: loop exit
PB: predicated region body
PF: predicated region fallthrough
CT: control target
= control target key end

     0   :  { %6 = vsyncpa [#allocation3], 0  ;;  %s341_s0 = inlined_call_operand.hbm [shape: f32[8,128], index: 0, kind: input, shape index: {}]   ;;  %s342_s1 = inlined_call_operand.hbm [shape: f32[8,128], index: 1, kind: output, shape index: {}]  }
   0x1   :  { %7 = vsyncpa [#allocation4], 0  ;;  %s262_s6 = smov 0  }
   0x2 LB: > { %s145_s7 = sadd.s32 4294967295, %s248_s6   ;;  %p146_p0 = scmp.ge.s32.totalorder %s248_s6, 1  ;;  %s248_s6 = sphi %s262_s6, %s13_s6  }
   0x3   : > { %p60_p1 = scmp.lt.s32.totalorder %s248_s6, 3  ;;  %p276_p3 = scmp.eq.s32.totalorder %s145_s7, 0 }
   0x4   : > { %s250_s10 = smov [#allocation2]   ;;  %s180_s15 = scalar_lea.hbm %s341_s0, 128 }
   0x5   : > { %p270_p2 = pnand %p146_p0, %p60_p1  ;;  %s73_s11 = sshll.u32 %s250_s10, 4  ;;  %s74_s11 = int_to_ptr.vmem [resolvable:$true] %s73_s11 }
   0x6   : > { %s347_s9 = scalar_select %p276_p3, 1, 0 }
   0x7   : > { %s346_s8 = scalar_select %p270_p2, 1, 0 }
   0x8   : > { %p162_p4 = pneg %p270_p2  ;;  %p181_p6 = scmp.ne.s32.totalorder %s341_s0, %s180_s15 }
   0x9   : > { %p187_p10 = scmp.lt.u32.totalorder %s180_s15, %s341_s0 }
   0xa   : > { %p284_p5 = pnand %p276_p3, %p162_p4 }
   0xc   : > { %p182_p7 = pneg %p284_p5 }
   0xe   : > { %p183_p8 = pnand %p182_p7, %p181_p6 }
  0x10   : > { %p184_p9 = pneg %p183_p8 }
  0x12   : > { %p189_p11 = pnand %p187_p10, %p184_p9 }
  0x14   : > { %192 = shalt.err (!%p189_p11)
}
  0x15   : > { %s193_s20 = scalar_lea.vmem %s74_s11, 128  ;;  %p201_p1 = scmp.lt.s32.totalorder %s74_s11, %s74_s11 }
  0x16   : > { %p194_p12 = scmp.ne.s32.totalorder %s74_s11, %s193_s20  ;;  %p202_p4 = scmp.lt.s32.totalorder %s193_s20, %s193_s20 }
  0x18   : > { %p196_p13 = pnand %p194_p12, %p182_p7  ;;  %p203_p3 = por %p202_p4, %p201_p1 }
  0x1a   : > { %p197_p0 = pneg %p196_p13 }
  0x1c   : > { %p204_p2 = pnand %p203_p3, %p197_p0 }
  0x1e   : > { %207 = shalt.err (!%p204_p2)
}
  0x1f   : > { %165 = dma.hbm_to_vmem [thread:$0]  (!%p284_p5), %s341_s0, 128, %s74_s11, [#allocation3]  }
  0x20   : > { %p349_p6 = scmp.ne.s32.totalorder %s346_s8, 0 }
  0x21   : > { %p350_p8 = scmp.ne.s32.totalorder (!%p349_p6), %s347_s9, 0 }
  0x22   : > { %86 = sbr.rel (%p349_p6) target bundleno = 67 (0x43), region = 24 }
  0x29   : > { %239 = dma.done.wait (%p350_p8), [#allocation3], 128  }
  0x2a   : > { %241 = vsyncadd (%p350_p8), [#allocation3], 4294967168  ;;  %s251_s23 = smov [#allocation5]   ;;  %v96_v0 = vld [vmem:[#allocation2] sm:$0xff]  ;;  %p312_p2 = scmp.eq.s32.totalorder %s145_s7, 1 }
  0x2b   : > { %s106_s24 = sshll.u32 %s251_s23, 4  ;;  %v97_v1 = vmul.f32 2.0, %v96_v0  ;;  %s107_s24 = int_to_ptr.vmem [resolvable:$true] %s106_s24 }
  0x2c   : > { %s208_s26 = scalar_lea.vmem %s107_s24, 128  ;;  %p215_p9 = scmp.lt.s32.totalorder %s107_s24, %s107_s24 }
  0x2d   : > { %98 = vst [vmem:[#allocation5] sm:$0xff] %v97_v1  ;;  %p209_p3 = scmp.ne.s32.totalorder %s107_s24, %s208_s26  ;;  %p216_p10 = scmp.lt.s32.totalorder %s208_s26, %s208_s26 }
  0x2f   : > { %p210_p5 = pnand %p209_p3, %p312_p2  ;;  %p217_p11 = por %p216_p10, %p215_p9 }
  0x31   : > { %p211_p7 = pneg %p210_p5 }
  0x33   : > { %p218_p12 = pnand %p217_p11, %p211_p7 }
  0x35   : > { %221 = shalt.err (!%p218_p12)
}
  0x36   : > { %s222_s29 = scalar_lea.hbm %s342_s1, 128 }
  0x37   : > { %p223_p13 = scmp.ne.s32.totalorder %s342_s1, %s222_s29  ;;  %p228_p4 = scmp.lt.u32.totalorder %s222_s29, %s342_s1 }
  0x39   : > { %p224_p0 = pnand %p223_p13, %p312_p2 }
  0x3b   : > { %p225_p1 = pneg %p224_p0 }
  0x3d   : > { %p230_p6 = pnand %p228_p4, %p225_p1 }
  0x3f   : > { %233 = shalt.err (!%p230_p6)
}
  0x40   : > { %159 = dma.vmem_to_hbm [thread:$0]  (%p312_p2), %s107_s24, 128, %s342_s1, [#allocation4]  }
  0x41   : > { %243 = dma.done.wait (%p312_p2), [#allocation4], 128  }
  0x42   : > { %245 = vsyncadd (%p312_p2), [#allocation4], 4294967168 }
  0x43 PF: > { %s13_s6 = sadd.s32 1, %s248_s6  }
  0x44   : > { %p10_p8 = scmp.ge.s32.totalorder %s13_s6, 4  }
  0x46   :  { %12 = sbr.rel (!%p10_p8) target bundleno = 2 (0x2), region = 53 }
  0x4d   :  { %119 = vsyncpa [#allocation3], 1 }
  0x4e   :  { %121 = vsyncpa [#allocation3 + $0x1], 1 }
  0x4f   :  { %122 = vsyncpa [#allocation4], 1 }
  0x50   :  { %124 = vsyncpa [#allocation4 + $0x1], 1 }

// kernel: _lambda_.5
= control target key start
LH: loop header
LB: loop body
LE: loop exit
PB: predicated region body
PF: predicated region fallthrough
CT: control target
= control target key end

     0   :  { %10 = vsyncpa [#allocation3], 0  ;;  %s3580_s0 = inlined_call_operand.vmem [shape: f32[2,4,64], index: 0, kind: input, shape index: {}]   ;;  %s3581_s1 = inlined_call_operand.vmem [shape: f32[1,64], index: 1, kind: input, shape index: {}]   ;;  %s3582_s2 = inlined_call_operand.vmem [shape: f32[1,64], index: 2, kind: input, shape index: {}]   ;;  %s3583_s3 = inlined_call_operand.vmem [shape: f32[192,64], index: 3, kind: input, shape index: {}]   ;;  %s3584_s4 = inlined_call_operand.vmem [shape: f32[1,64], index: 4, kind: input, shape index: {}]   ;;  %s3585_s5 = inlined_call_operand.hbm [shape: f32[2,4,64], index: 5, kind: output, shape index: {}]  }
   0x1   :  { %12 = vsyncpa [#allocation3 + $0x1], 0  ;;  %s2862_s18 = smov 0   ;;  %s2864_s19 = smov 0  }
   0x2   :  { %s2866_s20 = smov 0   ;;  %s2868_s21 = smov 0  }
   0x3 LB: > { %s2883_s22 = sadd.s32 4294967295, %s2826_s21   ;;  %s1987_s23 = sadd.s32 4294967294, %s2826_s21   ;;  %s2826_s21 = sphi %s2868_s21, %s3591_s21   ;;  %s2822_s20 = sphi %s2866_s20, %s3590_s20   ;;  %s2818_s19 = sphi %s2864_s19, %s3589_s19   ;;  %s2814_s18 = sphi %s2862_s18, %s3588_s18  }
   0x4   : > { %s2887_s24 = sadd.s32 1, %s2826_s21   ;;  %s135_s25 = sadd.s32 1, %s2822_s20 }
   0x5   : > { %s132_s26 = ssub.s32 %s2826_s21, %s2887_s24  ;;  %p145_p0 = scmp.ne.s32.totalorder %s2822_s20, %s2818_s19 }
   0x6   : > { %p133_p1 = scmp.eq.s32.totalorder %s132_s26, 0  ;;  %p146_p2 = scmp.eq.s32.totalorder %s2883_s22, 1 }
   0x7   : > { %p151_p3 = scmp.ne.s32.totalorder %s2818_s19, %s2814_s18  ;;  %p152_p4 = scmp.eq.s32.totalorder %s1987_s23, 1 }
   0x8   : > { %s2898_s27 = scalar_select %p133_p1, %s2822_s20, %s135_s25  }
   0x9   : > { %p2900_p5 = por %p146_p2, %p145_p0  ;;  %p2904_p6 = por %p152_p4, %p151_p3 }
   0xa   : > { %p1990_p7 = scmp.ge.s32.totalorder %s2826_s21, 1  ;;  %p189_p8 = scmp.lt.s32.totalorder %s2826_s21, 3 }
   0xc   : > { %p190_p9 = pnand %p1990_p7, %p189_p8 }
   0xd   : > { %p216_p10 = scmp.lt.s32.totalorder (!%p190_p9), %s2883_s22, 1  ;;  %vm223_vm0 = vcmask (!%p190_p9), 519168   ;;  %v260_v7 = vld [vmem:[%s3583_s3 + $0x40] sm:$0xff] (!%p190_p9)  ;;  %v261_v8 = vld [vmem:[%s3583_s3 + $0x48] sm:$0xff] (!%p190_p9)  ;;  %v262_v13 = vld [vmem:[%s3583_s3 + $0x50] sm:$0xff] (!%p190_p9)  ;;  %v2828_v34 = vmov (!%p190_p9), 0.0|0.0  }
   0xe   : > { %193 = sbr.rel (%p190_p9) target bundleno = 718 (0x2ce), region = 40  ;;  %v290_v9 = vand.u32 (!%p190_p9), 4294901760, %v260_v7  ;;  %v293_v10 = vand.u32 (!%p190_p9), 4294901760, %v261_v8  ;;  %v263_v14 = vld [vmem:[%s3583_s3 + $0x58] sm:$0xff] (!%p190_p9)  ;;  %v296_v17 = vand.u32 (!%p190_p9), 4294901760, %v262_v13  ;;  %v264_v23 = vld [vmem:[%s3583_s3 + $0x60] sm:$0xff] (!%p190_p9)  ;;  %2516 = vmatprep.subr.bf16.mxu1 (!%p190_p9), %v2828_v34  ;;  %2504 = vmatprep.subr.bf16.mxu0 (!%p190_p9), %v2828_v34 }
   0xf   : > { %v299_v18 = vand.u32 (!%p190_p9), 4294901760, %v263_v14  ;;  %v265_v24 = vld [vmem:[%s3583_s3 + $0x68] sm:$0xff] (!%p190_p9)  ;;  %v302_v29 = vand.u32 (!%p190_p9), 4294901760, %v264_v23  ;;  %v266_v37 = vld [vmem:[%s3583_s3 + $0x70] sm:$0xff] (!%p190_p9)  ;;  %v267_v38 = vld [vmem:[%s3583_s3 + $0x78] sm:$0xff] (!%p190_p9)  ;;  %vm2829_vm1 = vmmov (!%p190_p9), 0  }
  0x10   : > { %v2927_v11 = vsub.f32 (!%p190_p9), %v260_v7, %v290_v9  ;;  %v2929_v12 = vsub.f32 (!%p190_p9), %v261_v8, %v293_v10  ;;  %v2945_v21 = vsub.f32 (!%p190_p9), %v262_v13, %v296_v17  ;;  %v305_v30 = vand.u32 (!%p190_p9), 4294901760, %v265_v24  ;;  %s213_s14 = sand.u32 (!%p190_p9), 1, %s2818_s19   ;;  %s1997_s23 = sshll.u32 (!%p190_p9), %s2883_s22, 6 }
  0x11   : > { %v2947_v22 = vsub.f32 (!%p190_p9), %v263_v14, %v299_v18  ;;  %v2965_v35 = vsub.f32 (!%p190_p9), %v264_v23, %v302_v29  ;;  %v308_v41 = vand.u32 (!%p190_p9), 4294901760, %v266_v37  ;;  %v311_v42 = vand.u32 (!%p190_p9), 4294901760, %v267_v38  ;;  %s1991_s15 = sshll.u32 (!%p190_p9), %s213_s14, 2  ;;  %s3537_s7 = scalar_lea.hbm (!%p190_p9), %s3585_s5, %s1997_s23 }
  0x12   : > { %v375_v15 = vand.u32 (!%p190_p9), 4294901760, %v2927_v11  ;;  %v382_v16 = vand.u32 (!%p190_p9), 4294901760, %v2929_v12  ;;  %v389_v27 = vand.u32 (!%p190_p9), 4294901760, %v2945_v21  ;;  %v2967_v36 = vsub.f32 (!%p190_p9), %v265_v24, %v305_v30  ;;  %s215_s25 = scalar_lea.vmem (!%p190_p9), [#allocation2], %s1991_s15  ;;  %s1915_s8 = scalar_lea.sflag (!%p190_p9), [#allocation3], %s213_s14 }
  0x13   : > { %v396_v28 = vand.u32 (!%p190_p9), 4294901760, %v2947_v22  ;;  %v403_v43 = vand.u32 (!%p190_p9), 4294901760, %v2965_v35  ;;  %v2978_v46 = vsub.f32 (!%p190_p9), %v266_v37, %v308_v41  ;;  %v2980_v47 = vsub.f32 (!%p190_p9), %v267_v38, %v311_v42  ;;  %v3076_v37 = vld [vmem:[%s3583_s3 + $0x10] sm:$0xff] (!%p190_p9)  ;;  %v3081_v38 = vld [vmem:[%s3583_s3 + $0x18] sm:$0xff] (!%p190_p9)  ;;  %s1928_s26 = sshll.u32 (!%p190_p9), %s215_s25, 4  ;;  %s3539_s26 = int_to_ptr.vmem [resolvable:$true] %s1928_s26 }
  0x14   : > { %v376_v19 = vsub.f32 (!%p190_p9), %v2927_v11, %v375_v15  ;;  %v383_v20 = vsub.f32 (!%p190_p9), %v2929_v12, %v382_v16  ;;  %v390_v32 = vsub.f32 (!%p190_p9), %v2945_v21, %v389_v27  ;;  %v410_v44 = vand.u32 (!%p190_p9), 4294901760, %v2967_v36 }
  0x15   : > { %s217_s30 = scalar_select %p216_p10, %s2883_s22, 1  ;;  %v397_v33 = vsub.f32 %v2947_v22, %v396_v28  ;;  %v404_v48 = vsub.f32 %v2965_v35, %v403_v43  ;;  %v417_v50 = vand.u32 4294901760, %v2978_v46  ;;  %v424_v51 = vand.u32 4294901760, %v2980_v47 }
  0x16   : > { %v377_v25 = vand.u32 4294901760, %v376_v19  ;;  %v384_v26 = vand.u32 4294901760, %v383_v20  ;;  %v391_v39 = vand.u32 4294901760, %v390_v32  ;;  %v411_v49 = vsub.f32 %v2967_v36, %v410_v44  ;;  %s2831_s22 = smov [#allocation2]  }
  0x17   : > { %s1992_s6 = sshll.u32 %s217_s30, 2  ;;  %v398_v40 = vand.u32 4294901760, %v397_v33  ;;  %v2987_v52 = vpack.c.bf16 %v293_v10, %v290_v9  ;;  %v405_v53 = vand.u32 4294901760, %v404_v48  ;;  %v418_v55 = vsub.f32 %v2978_v46, %v417_v50  ;;  %s2768_s10 = sshll.u32 %s2831_s22, 4  ;;  %s2769_s10 = int_to_ptr.vmem [resolvable:$false] %s2768_s10 }
  0x18   : > { %s219_s9 = scalar_lea.vmem %s3580_s0, %s1992_s6  ;;  %v2517_v31 = vpack.c.bf16 %v384_v26, %v377_v25  ;;  %v412_v54 = vand.u32 4294901760, %v411_v49  ;;  %v425_v56 = vsub.f32 %v2980_v47, %v424_v51  ;;  %v2992_v58 = vpack.c.bf16 %v299_v18, %v296_v17  ;;  %s2770_s11 = scalar_lea.vmem %s2769_s10, 128 }
  0x19   : > { %v220_v0 = vld [vmem:[%s219_s9] sm:$0xf]  ;;  %v2520_v45 = vpack.c.bf16 %v398_v40, %v391_v39  ;;  %2506 = vmatpush3.bf16.msra.mxu0 %v2987_v52  ;;  %v2830_v59 = vmov 0.0   ;;  %v419_v60 = vand.u32 4294901760, %v418_v55  ;;  %v3001_v63 = vpack.c.bf16 %v305_v30, %v302_v29  ;;  %v3067_v30 = vld [vmem:[%s3583_s3 + $0x8] sm:$0xff]  ;;  %s2764_s9 = scalar_lea.vmem %s3539_s26, 64  ;;  %p2771_p0 = scmp.lt.s32.totalorder %s3539_s26, %s2769_s10 }
  0x1a   : > { %v224_v1 = vsel %vm223_vm0, %v220_v0, 0.0  ;;  %2518 = vmatpush3.bf16.msra.mxu1 %v2517_v31  ;;  %v2523_v57 = vpack.c.bf16 %v412_v54, %v405_v53  ;;  %2197 = vmatprep.mubr.msk.f32.mxu1 %vm2829_vm1, %v2830_v59  ;;  %v426_v61 = vand.u32 4294901760, %v425_v56  ;;  %v3029_v7 = vpack.c.bf16 %v396_v28, %v389_v27  ;;  %v3062_v29 = vld [vmem:[%s3583_s3] sm:$0xff]  ;;  %v3135_v54 = vld [vmem:[%s3583_s3 + $0x30] sm:$0xff]  ;;  %p2765_p11 = scmp.ne.s32.totalorder %s3539_s26, %s2764_s9  ;;  %p2772_p1 = scmp.lt.s32.totalorder %s2770_s11, %s2764_s9 }
  0x1b   : > { %225 = vadd.xlane.f32.xlu0 %v224_v1  ;;  %2519 = vmatprep.subr.bf16.mxu1 %v2828_v34  ;;  %v2529_v1 = vpack.c.bf16 %v2929_v12, %v2927_v11  ;;  %v3031_v8 = vpack.c.bf16 %v410_v44, %v403_v43  ;;  %v3033_v9 = vpack.c.bf16 %v424_v51, %v417_v50  ;;  %v1993_v11 = vld [vmem:[%s3581_s1] ss:$0 sm:$0xff]  ;;  %vm280_vm2 = vcmask 1040384   ;;  %v3110_v44 = vld [vmem:[%s3583_s3 + $0x28] sm:$0xff] }
  0x1c   : > { %2507 = vmatprep.subr.bf16.mxu0 %v2828_v34  ;;  %2178 = vmatprep.mubr.msk.f32.mxu0 %vm2829_vm1, %v2830_v59  ;;  %v2526_v62 = vpack.c.bf16 %v426_v61, %v419_v60  ;;  %vm282_vm3 = vcmask 1044480   ;;  %vm286_vm4 = vcmask 523264   ;;  %v829_v32 = vand.u32 4294901760, %v3062_v29  ;;  %v3105_v43 = vld [vmem:[%s3583_s3 + $0x20] sm:$0xff]  ;;  %p2766_p12 = pnand %p2765_p11, %p2900_p5  ;;  %p2773_p2 = por %p2772_p1, %p2771_p0 }
  0x1d   : > { %2509 = vmatpush3.bf16.msra.mxu0 %v2992_v58  ;;  %v832_v33 = vand.u32 4294901760, %v3067_v30  ;;  %v841_v51 = vand.u32 4294901760, %v3105_v43  ;;  %v844_v53 = vand.u32 4294901760, %v3110_v44  ;;  %v847_v61 = vand.u32 4294901760, %v3135_v54 }
  0x1e   : > { %2521 = vmatpush3.bf16.msra.mxu1 %v2520_v45  ;;  %2510 = vmatprep.subr.bf16.mxu0 %v2828_v34  ;;  %v3090_v39 = vsub.f32 %v3062_v29, %v829_v32  ;;  %p2767_p13 = pneg %p2766_p12 }
  0x1f   : > { %2522 = vmatprep.subr.bf16.mxu1 %v2828_v34  ;;  %v3095_v40 = vsub.f32 %v3067_v30, %v832_v33  ;;  %v3164_v60 = vsub.f32 %v3110_v44, %v844_v53 }
  0x20   : > { %v914_v45 = vand.u32 4294901760, %v3090_v39  ;;  %p2774_p3 = pnand %p2773_p2, %p2767_p13 }
  0x21   : > { %2512 = vmatpush3.bf16.msra.mxu0 %v3001_v63  ;;  %v921_v48 = vand.u32 4294901760, %v3095_v40  ;;  %v2601_v30 = vpack.c.bf16 %v3095_v40, %v3090_v39 }
  0x22   : > { %2524 = vmatpush3.bf16.msra.mxu1 %v2523_v57  ;;  %2513 = vmatprep.subr.bf16.mxu0 %v2828_v34  ;;  %v3159_v57 = vsub.f32 %v3105_v43, %v841_v51  ;;  %v3299_v43 = vld [vmem:[%s3583_s3 + $0x98] sm:$0xff] }
  0x23   : > { %2525 = vmatprep.subr.bf16.mxu1 %v2828_v34 }
  0x26   : > { %2527 = vmatpush3.bf16.msra.mxu1 %v2526_v62 }
  0x27   : > { %2540 = vmatprep.subr.bf16.mxu1 %v2828_v34 }
  0xa8   : > { %v226_v2 = vpop.xlane.xlu0 %225 }
  0xa9   : > { %v228_v3 = vmul.f32 0.015625, %v226_v2  ;;  %v2532_v2 = vpack.c.bf16 %v2947_v22, %v2945_v21 }
  0xab   : > { %v2916_v4 = vsub.f32 %v220_v0, %v228_v3  ;;  %v3007_v0 = vpack.c.bf16 %v311_v42, %v308_v41  ;;  %v2535_v3 = vpack.c.bf16 %v2967_v36, %v2965_v35  ;;  %v835_v41 = vand.u32 4294901760, %v3076_v37  ;;  %v3140_v35 = vld [vmem:[%s3583_s3 + $0x38] sm:$0xff] }
  0xac   : > { %v838_v42 = vand.u32 4294901760, %v3081_v38  ;;  %v915_v36 = vsub.f32 %v3090_v39, %v914_v45  ;;  %v850_v62 = vand.u32 4294901760, %v3140_v35 }
  0xad   : > { %v230_v5 = vmul.f32 %v2916_v4, %v2916_v4  ;;  %2515 = vmatpush3.bf16.msra.mxu0 %v3007_v0  ;;  %v3117_v49 = vsub.f32 %v3076_v37, %v835_v41 }
  0xae   : > { %2528 = vmatprep.subr.bf16.mxu0 %v2828_v34  ;;  %v3122_v50 = vsub.f32 %v3081_v38, %v838_v42 }
  0xaf   : > { %v231_v6 = vsel %vm223_vm0, %v230_v5, 0.0  ;;  %v2538_v5 = vpack.c.bf16 %v2980_v47, %v2978_v46  ;;  %v928_v55 = vand.u32 4294901760, %v3117_v49  ;;  %v916_v46 = vand.u32 4294901760, %v915_v36  ;;  %v3325_v36 = vld [vmem:[%s3583_s3 + $0xa0] sm:$0xff] }
  0xb0   : > { %232 = vadd.xlane.f32.xlu0 %v231_v6  ;;  %v3023_v6 = vpack.c.bf16 %v382_v16, %v375_v15  ;;  %v1994_v15 = vld [vmem:[%s3582_s2] ss:$0 sm:$0xff]  ;;  %v935_v56 = vand.u32 4294901760, %v3122_v50 }
 0x13d   : > { %v233_v10 = vpop.xlane.xlu0 %232 }
 0x13e   : > { %v234_v13 = vmul.f32 0.015625, %v233_v10  ;;  %v3188_v10 = vsub.f32 %v3140_v35, %v850_v62  ;;  %v2607_v35 = vpack.c.bf16 %v3164_v60, %v3159_v57 }
 0x140   : > { %v235_v14 = vadd.f32 1e-05, %v234_v13 }
 0x142   : > { %2762 = vrsqrt.f32 %v235_v14 }
 0x14c   : > { %v2763_v17 = vpop.eup %2762 }
 0x14d   : > { %v237_v12 = vmul.f32 %v2763_v17, %v2916_v4 }
 0x14f   : > { %v244_v16 = vmul.f32 %v1993_v11, %v237_v12  ;;  %v963_v12 = vand.u32 4294901760, %v3188_v10 }
 0x151   : > { %v251_v18 = vadd.f32 %v1994_v15, %v244_v16 }
 0x153   : > { %v278_v19 = vrot.slane %v251_v18, 7  ;;  %v964_v18 = vsub.f32 %v3188_v10, %v963_v12 }
 0x155   : > { %v281_v20 = vsel %vm280_vm2, 0.0, %v278_v19  ;;  %v3225_v19 = vpack.c.bf16 %v832_v33, %v829_v32  ;;  %v3282_v32 = vld [vmem:[%s3583_s3 + $0x88] sm:$0xff] }
 0x156   : > { %v3042_v21 = vsel %vm282_vm3, %v281_v20, 0.0  ;;  %v1372_v38 = vand.u32 4294901760, %v3282_v32 }
 0x157   : > { %v285_v22 = vrot.slane %v3042_v21, 1  ;;  %v1365_v23 = vrot.slane %v3042_v21, 2 }
 0x159   : > { %v287_v24 = vsel %vm286_vm4, %v285_v22, 0  ;;  %v3048_v4 = vsel %vm286_vm4, %v1365_v23, 0  ;;  %v965_v23 = vand.u32 4294901760, %v964_v18 }
 0x15a   : > { %v3050_v25 = vand.u32 4294901760, %v287_v24 }
 0x15c   : > { %2198 = vmatmul.mubr.f32.vlgmr.msra.gmra.mrb[0].mxu1 %v3050_v25  ;;  %v363_v26 = vsub.f32 %v287_v24, %v3050_v25 }
 0x15d   : > { %2542 = vmatpush3.bf16.msra.mxu1 %v2987_v52  ;;  %2235 = vmatprep.mubr.msk.f32.mxu1 %vm2829_vm1, %v2830_v59 }
 0x15e   : > { %2543 = vmatprep.subr.bf16.mxu1 %v2828_v34  ;;  %v364_v27 = vand.u32 4294901760, %v363_v26 }
 0x160   : > { %v365_v28 = vsub.f32 %v363_v26, %v364_v27 }
 0x161   : > { %2545 = vmatpush3.bf16.msra.mxu1 %v2992_v58 }
 0x162   : > { %2546 = vmatprep.subr.bf16.mxu1 %v2828_v34  ;;  %v366_v31 = vand.u32 4294901760, %v365_v28  ;;  %v3263_v28 = vpack.c.bf16 %v850_v62, %v847_v61 }
 0x164   : > { %2179 = vmatmul.mubr.f32.vlgmr.msra.gmra.mrb[0].mxu0 %v366_v31  ;;  %v3277_v31 = vld [vmem:[%s3583_s3 + $0x80] sm:$0xff] }
 0x165   : > { %2530 = vmatpush3.bf16.msra.mxu0 %v2529_v1  ;;  %2548 = vmatpush3.bf16.msra.mxu1 %v3001_v63  ;;  %v936_v1 = vsub.f32 %v3122_v50, %v935_v56  ;;  %v1369_v37 = vand.u32 4294901760, %v3277_v31 }
 0x166   : > { %2531 = vmatprep.subr.bf16.mxu0 %v2828_v34  ;;  %2549 = vmatprep.subr.bf16.mxu1 %v2828_v34 }
 0x167   : > { %2216 = vmatprep.mubr.msk.f32.mxu0 %vm2829_vm1, %v2830_v59  ;;  %v937_v13 = vand.u32 4294901760, %v936_v1  ;;  %v3308_v44 = vsub.f32 %v3277_v31, %v1369_v37  ;;  %v1381_v1 = vand.u32 4294901760, %v3325_v36 }
 0x169   : > { %2533 = vmatpush3.bf16.msra.mxu0 %v2532_v2  ;;  %2551 = vmatpush3.bf16.msra.mxu1 %v3007_v0  ;;  %v942_v2 = vand.u32 4294901760, %v3159_v57  ;;  %v3379_v39 = vsub.f32 %v3325_v36, %v1381_v1 }
 0x16a   : > { %2534 = vmatprep.subr.bf16.mxu0 %v2828_v34  ;;  %2564 = vmatprep.subr.bf16.mxu1 %v2828_v34 }
 0x16b   : > { %v943_v14 = vsub.f32 %v3159_v57, %v942_v2 }
 0x16c   : > { %2236 = vmatmul.mubr.f32.vlgmr.msra.gmra.mrb[2].mxu1 %v364_v27 }
 0x16d   : > { %2536 = vmatpush3.bf16.msra.mxu0 %v2535_v3  ;;  %2566 = vmatpush3.bf16.msra.mxu1 %v2987_v52  ;;  %v922_v52 = vsub.f32 %v3095_v40, %v921_v48  ;;  %v949_v3 = vand.u32 4294901760, %v3164_v60 }
 0x16e   : > { %2537 = vmatprep.subr.bf16.mxu0 %v2828_v34  ;;  %2567 = vmatprep.subr.bf16.mxu1 %v2828_v34 }
 0x16f   : > { %2273 = vmatprep.mubr.msk.f32.mxu1 %vm2829_vm1, %v2830_v59  ;;  %v923_v47 = vand.u32 4294901760, %v922_v52  ;;  %v950_v17 = vsub.f32 %v3164_v60, %v949_v3  ;;  %v3330_v52 = vld [vmem:[%s3583_s3 + $0xa8] sm:$0xff] }
 0x171   : > { %2539 = vmatpush3.bf16.msra.mxu0 %v2538_v5  ;;  %2569 = vmatpush3.bf16.msra.mxu1 %v2992_v58  ;;  %v929_v58 = vsub.f32 %v3117_v49, %v928_v55  ;;  %v3183_v5 = vsub.f32 %v3135_v54, %v847_v61  ;;  %v951_v15 = vand.u32 4294901760, %v950_v17  ;;  %v1378_v54 = vand.u32 4294901760, %v3299_v43 }
 0x172   : > { %2552 = vmatprep.subr.bf16.mxu0 %v2828_v34  ;;  %2570 = vmatprep.subr.bf16.mxu1 %v2828_v34  ;;  %v1454_v61 = vand.u32 4294901760, %v3308_v44 }
 0x173   : > { %v956_v11 = vand.u32 4294901760, %v3183_v5 }
 0x174   : > { %2217 = vmatmul.mubr.f32.vlgmr.msra.gmra.mrb[2].mxu0 %v363_v26  ;;  %v1455_v17 = vsub.f32 %v3308_v44, %v1454_v61 }
 0x175   : > { %2554 = vmatpush3.bf16.msra.mxu0 %v3023_v6  ;;  %2572 = vmatpush3.bf16.msra.mxu1 %v3001_v63  ;;  %v2589_v63 = vpack.c.bf16 %v923_v47, %v916_v46  ;;  %v930_v6 = vand.u32 4294901760, %v929_v58  ;;  %v957_v16 = vsub.f32 %v3183_v5, %v956_v11  ;;  %v3342_v47 = vsub.f32 %v3299_v43, %v1378_v54 }
 0x176   : > { %2555 = vmatprep.subr.bf16.mxu0 %v2828_v34  ;;  %2573 = vmatprep.subr.bf16.mxu1 %v2828_v34  ;;  %v2610_v58 = vpack.c.bf16 %v3188_v10, %v3183_v5  ;;  %v1456_v18 = vand.u32 4294901760, %v1455_v17  ;;  %v2634_v60 = vpack.c.bf16 %v963_v12, %v956_v11  ;;  %v2649_v5 = vpack.c.bf16 %v1372_v38, %v1369_v37 }
 0x177   : > { %2254 = vmatprep.mubr.msk.f32.mxu0 %vm2829_vm1, %v2830_v59  ;;  %v958_v22 = vand.u32 4294901760, %v957_v16  ;;  %v2628_v16 = vpack.c.bf16 %v935_v56, %v928_v55 }
 0x179   : > { %2557 = vmatpush3.bf16.msra.mxu0 %v3029_v7  ;;  %2575 = vmatpush3.bf16.msra.mxu1 %v3007_v0  ;;  %v2592_v7 = vpack.c.bf16 %v937_v13, %v930_v6  ;;  %v944_v0 = vand.u32 4294901760, %v943_v14  ;;  %v3354_v6 = vld [vmem:[%s3583_s3 + $0xb0] sm:$0xff]  ;;  %v3359_v13 = vld [vmem:[%s3583_s3 + $0xb8] sm:$0xff]  ;;  %v2625_v14 = vpack.c.bf16 %v921_v48, %v914_v45 }
 0x17a   : > { %2558 = vmatprep.subr.bf16.mxu0 %v2828_v34  ;;  %2588 = vmatprep.subr.bf16.mxu1 %v2828_v34  ;;  %v1387_v45 = vand.u32 4294901760, %v3354_v6  ;;  %v1390_v48 = vand.u32 4294901760, %v3359_v13 }
 0x17b   : > { %v2595_v20 = vpack.c.bf16 %v951_v15, %v944_v0  ;;  %v1475_v15 = vand.u32 4294901760, %v3342_v47 }
 0x17c   : > { %2274 = vmatmul.mubr.f32.vlgmr.msra.gmra.mrb[4].mxu1 %v3050_v25  ;;  %v3407_v55 = vsub.f32 %v3354_v6, %v1387_v45  ;;  %v3412_v56 = vsub.f32 %v3359_v13, %v1390_v48 }
 0x17d   : > { %2560 = vmatpush3.bf16.msra.mxu0 %v3031_v8  ;;  %2590 = vmatpush3.bf16.msra.mxu1 %v2589_v63  ;;  %v826_v8 = vsel %vm286_vm4, %v3042_v21, 0  ;;  %v2598_v21 = vpack.c.bf16 %v965_v23, %v958_v22  ;;  %v1384_v63 = vand.u32 4294901760, %v3330_v52  ;;  %v2631_v22 = vpack.c.bf16 %v949_v3, %v942_v2 }
 0x17e   : > { %2561 = vmatprep.subr.bf16.mxu0 %v2828_v34  ;;  %2591 = vmatprep.subr.bf16.mxu1 %v2828_v34  ;;  %v3229_v24 = vand.u32 4294901760, %v826_v8  ;;  %v1503_v57 = vand.u32 4294901760, %v3412_v56 }
 0x17f   : > { %2311 = vmatprep.mubr.msk.f32.mxu1 %vm2829_vm1, %v2830_v59  ;;  %v3384_v40 = vsub.f32 %v3330_v52, %v1384_v63 }
 0x180   : > { %v3242_v26 = vsub.f32 %v826_v8, %v3229_v24 }
 0x181   : > { %2563 = vmatpush3.bf16.msra.mxu0 %v3033_v9  ;;  %2593 = vmatpush3.bf16.msra.mxu1 %v2592_v7  ;;  %v3237_v9 = vpack.c.bf16 %v838_v42, %v835_v41  ;;  %v2604_v41 = vpack.c.bf16 %v3122_v50, %v3117_v49  ;;  %v3294_v42 = vld [vmem:[%s3583_s3 + $0x90] sm:$0xff]  ;;  %v1482_v49 = vand.u32 4294901760, %v3379_v39  ;;  %v1489_v50 = vand.u32 4294901760, %v3384_v40 }
 0x182   : > { %2576 = vmatprep.subr.bf16.mxu0 %v2828_v34  ;;  %2594 = vmatprep.subr.bf16.mxu1 %v2828_v34  ;;  %v903_v27 = vand.u32 4294901760, %v3242_v26 }
 0x184   : > { %2255 = vmatmul.mubr.f32.vlgmr.msra.gmra.mrb[4].mxu0 %v3050_v25  ;;  %v3251_v25 = vpack.c.bf16 %v844_v53, %v841_v51  ;;  %v904_v29 = vsub.f32 %v3242_v26, %v903_v27  ;;  %v3313_v51 = vsub.f32 %v3282_v32, %v1372_v38  ;;  %v1375_v53 = vand.u32 4294901760, %v3294_v42 }
 0x185   : > { %2578 = vmatpush3.bf16.msra.mxu0 %v3225_v19  ;;  %2596 = vmatpush3.bf16.msra.mxu1 %v2595_v20  ;;  %v1476_v20 = vsub.f32 %v3342_v47, %v1475_v15 }
 0x186   : > { %2579 = vmatprep.subr.bf16.mxu0 %v2828_v34  ;;  %2597 = vmatprep.subr.bf16.mxu1 %v2828_v34  ;;  %v905_v33 = vand.u32 4294901760, %v904_v29  ;;  %v1461_v62 = vand.u32 4294901760, %v3313_v51  ;;  %v3337_v46 = vsub.f32 %v3294_v42, %v1375_v53  ;;  %v2652_v31 = vpack.c.bf16 %v1378_v54, %v1375_v53 }
 0x187   : > { %2292 = vmatprep.mubr.msk.f32.mxu0 %vm2829_vm1, %v2830_v59  ;;  %v2673_v42 = vpack.c.bf16 %v3313_v51, %v3308_v44  ;;  %v2679_v54 = vpack.c.bf16 %v3384_v40, %v3379_v39  ;;  %v2703_v44 = vpack.c.bf16 %v1489_v50, %v1482_v49 }
 0x188   : > { %v1462_v7 = vsub.f32 %v3313_v51, %v1461_v62  ;;  %v1468_v0 = vand.u32 4294901760, %v3337_v46  ;;  %v2676_v53 = vpack.c.bf16 %v3342_v47, %v3337_v46  ;;  %v2697_v36 = vpack.c.bf16 %v1461_v62, %v1454_v61 }
 0x189   : > { %2581 = vmatpush3.bf16.msra.mxu0 %v3237_v9  ;;  %2599 = vmatpush3.bf16.msra.mxu1 %v2598_v21  ;;  %v1477_v21 = vand.u32 4294901760, %v1476_v20 }
 0x18a   : > { %2582 = vmatprep.subr.bf16.mxu0 %v2828_v34  ;;  %2612 = vmatprep.subr.bf16.mxu1 %v2828_v34  ;;  %v1463_v8 = vand.u32 4294901760, %v1462_v7  ;;  %v2700_v52 = vpack.c.bf16 %v1475_v15, %v1468_v0 }
 0x18c   : > { %2312 = vmatmul.mubr.f32.vlgmr.msra.gmra.mrb[6].mxu1 %v3229_v24  ;;  %v2661_v23 = vpack.c.bf16 %v1463_v8, %v1456_v18 }
 0x18d   : > { %2584 = vmatpush3.bf16.msra.mxu0 %v3251_v25  ;;  %2614 = vmatpush3.bf16.msra.mxu1 %v3225_v19 }
 0x18e   : > { %2585 = vmatprep.subr.bf16.mxu0 %v2828_v34  ;;  %2615 = vmatprep.subr.bf16.mxu1 %v2828_v34 }
 0x18f   : > { %2349 = vmatprep.mubr.msk.f32.mxu1 %vm2829_vm1, %v2830_v59 }
 0x191   : > { %2587 = vmatpush3.bf16.msra.mxu0 %v3263_v28  ;;  %2617 = vmatpush3.bf16.msra.mxu1 %v3237_v9 }
 0x192   : > { %2600 = vmatprep.subr.bf16.mxu0 %v2828_v34  ;;  %2618 = vmatprep.subr.bf16.mxu1 %v2828_v34 }
 0x194   : > { %2293 = vmatmul.mubr.f32.vlgmr.msra.gmra.mrb[6].mxu0 %v905_v33  ;;  %v3455_v33 = vand.u32 4294901760, %v3048_v4 }
 0x195   : > { %2602 = vmatpush3.bf16.msra.mxu0 %v2601_v30  ;;  %2620 = vmatpush3.bf16.msra.mxu1 %v3251_v25  ;;  %v1504_v30 = vsub.f32 %v3412_v56, %v1503_v57 }
 0x196   : > { %2603 = vmatprep.subr.bf16.mxu0 %v2828_v34  ;;  %2621 = vmatprep.subr.bf16.mxu1 %v2828_v34  ;;  %v1442_v37 = vsub.f32 %v3048_v4, %v3455_v33  ;;  %v2658_v4 = vpack.c.bf16 %v1390_v48, %v1387_v45 }
 0x197   : > { %2330 = vmatprep.mubr.msk.f32.mxu0 %vm2829_vm1, %v2830_v59  ;;  %v1505_v12 = vand.u32 4294901760, %v1504_v30 }
 0x198   : > { %v1443_v38 = vand.u32 4294901760, %v1442_v37 }
 0x199   : > { %2605 = vmatpush3.bf16.msra.mxu0 %v2604_v41  ;;  %2623 = vmatpush3.bf16.msra.mxu1 %v3263_v28 }
 0x19a   : > { %2606 = vmatprep.subr.bf16.mxu0 %v2828_v34  ;;  %2636 = vmatprep.subr.bf16.mxu1 %v2828_v34  ;;  %v1444_v41 = vsub.f32 %v1442_v37, %v1443_v38 }
 0x19c   : > { %2350 = vmatmul.mubr.f32.vlgmr.msra.gmra.mrb[8].mxu1 %v903_v27  ;;  %v1496_v27 = vand.u32 4294901760, %v3407_v55  ;;  %v1445_v43 = vand.u32 4294901760, %v1444_v41 }
 0x19d   : > { %2608 = vmatpush3.bf16.msra.mxu0 %v2607_v35  ;;  %2638 = vmatpush3.bf16.msra.mxu1 %v3225_v19  ;;  %v1469_v19 = vsub.f32 %v3337_v46, %v1468_v0  ;;  %v2682_v35 = vpack.c.bf16 %v3412_v56, %v3407_v55 }
 0x19e   : > { %2609 = vmatprep.subr.bf16.mxu0 %v2828_v34  ;;  %2639 = vmatprep.subr.bf16.mxu1 %v2828_v34  ;;  %v1497_v29 = vsub.f32 %v3407_v55, %v1496_v27  ;;  %v2706_v51 = vpack.c.bf16 %v1503_v57, %v1496_v27 }
 0x19f   : > { %2387 = vmatprep.mubr.msk.f32.mxu1 %vm2829_vm1, %v2830_v59 }
 0x1a0   : > { %v1498_v11 = vand.u32 4294901760, %v1497_v29 }
 0x1a1   : > { %2611 = vmatpush3.bf16.msra.mxu0 %v2610_v58  ;;  %2641 = vmatpush3.bf16.msra.mxu1 %v3237_v9  ;;  %v1470_v9 = vand.u32 4294901760, %v1469_v19 }
 0x1a2   : > { %2624 = vmatprep.subr.bf16.mxu0 %v2828_v34  ;;  %2642 = vmatprep.subr.bf16.mxu1 %v2828_v34  ;;  %v2670_v32 = vpack.c.bf16 %v1505_v12, %v1498_v11 }
 0x1a3   : > { %v2664_v2 = vpack.c.bf16 %v1477_v21, %v1470_v9 }
 0x1a4   : > { %2331 = vmatmul.mubr.f32.vlgmr.msra.gmra.mrb[8].mxu0 %v3242_v26  ;;  %v1483_v26 = vsub.f32 %v3379_v39, %v1482_v49 }
 0x1a5   : > { %2626 = vmatpush3.bf16.msra.mxu0 %v2625_v14  ;;  %2644 = vmatpush3.bf16.msra.mxu1 %v3251_v25  ;;  %v1490_v25 = vsub.f32 %v3384_v40, %v1489_v50 }
 0x1a6   : > { %2627 = vmatprep.subr.bf16.mxu0 %v2828_v34  ;;  %2645 = vmatprep.subr.bf16.mxu1 %v2828_v34  ;;  %v1484_v3 = vand.u32 4294901760, %v1483_v26 }
 0x1a7   : > { %2368 = vmatprep.mubr.msk.f32.mxu0 %vm2829_vm1, %v2830_v59 }
 0x1a9   : > { %2629 = vmatpush3.bf16.msra.mxu0 %v2628_v16  ;;  %2647 = vmatpush3.bf16.msra.mxu1 %v3263_v28  ;;  %v1491_v28 = vand.u32 4294901760, %v1490_v25 }
 0x1aa   : > { %2630 = vmatprep.subr.bf16.mxu0 %v2828_v34  ;;  %2660 = vmatprep.subr.bf16.mxu1 %v2828_v34 }
 0x1ab   : > { %v2667_v10 = vpack.c.bf16 %v1491_v28, %v1484_v3 }
 0x1ac   : > { %2388 = vmatmul.mubr.f32.vlgmr.msra.gmra.mrb[10].mxu1 %v3229_v24 }
 0x1ad   : > { %2632 = vmatpush3.bf16.msra.mxu0 %v2631_v22  ;;  %2662 = vmatpush3.bf16.msra.mxu1 %v2661_v23 }
 0x1ae   : > { %2633 = vmatprep.subr.bf16.mxu0 %v2828_v34  ;;  %2663 = vmatprep.subr.bf16.mxu1 %v2828_v34 }
 0x1af   : > { %2425 = vmatprep.mubr.msk.f32.mxu1 %vm2829_vm1, %v2830_v59 }
 0x1b1   : > { %2635 = vmatpush3.bf16.msra.mxu0 %v2634_v60  ;;  %2665 = vmatpush3.bf16.msra.mxu1 %v2664_v2 }
 0x1b2   : > { %2648 = vmatprep.subr.bf16.mxu0 %v2828_v34  ;;  %2666 = vmatprep.subr.bf16.mxu1 %v2828_v34 }
 0x1b4   : > { %2369 = vmatmul.mubr.f32.vlgmr.msra.gmra.mrb[10].mxu0 %v3229_v24  ;;  %v2655_v24 = vpack.c.bf16 %v1384_v63, %v1381_v1 }
 0x1b5   : > { %2650 = vmatpush3.bf16.msra.mxu0 %v2649_v5  ;;  %2668 = vmatpush3.bf16.msra.mxu1 %v2667_v10 }
 0x1b6   : > { %2651 = vmatprep.subr.bf16.mxu0 %v2828_v34  ;;  %2669 = vmatprep.subr.bf16.mxu1 %v2828_v34 }
 0x1b7   : > { %2406 = vmatprep.mubr.msk.f32.mxu0 %vm2829_vm1, %v2830_v59 }
 0x1b9   : > { %2653 = vmatpush3.bf16.msra.mxu0 %v2652_v31  ;;  %2671 = vmatpush3.bf16.msra.mxu1 %v2670_v32 }
 0x1ba   : > { %2654 = vmatprep.subr.bf16.mxu0 %v2828_v34  ;;  %2684 = vmatprep.subr.bf16.mxu1 %v2828_v34 }
 0x1bc   : > { %2426 = vmatmul.mubr.f32.vlgmr.msra.gmra.mrb[12].mxu1 %v3455_v33 }
 0x1bd   : > { %2656 = vmatpush3.bf16.msra.mxu0 %v2655_v24  ;;  %2686 = vmatpush3.bf16.msra.mxu1 %v2649_v5 }
 0x1be   : > { %2657 = vmatprep.subr.bf16.mxu0 %v2828_v34  ;;  %2687 = vmatprep.subr.bf16.mxu1 %v2828_v34 }
 0x1bf   : > { %2463 = vmatprep.mubr.msk.f32.mxu1 %vm2829_vm1, %v2830_v59 }
 0x1c1   : > { %2659 = vmatpush3.bf16.msra.mxu0 %v2658_v4  ;;  %2689 = vmatpush3.bf16.msra.mxu1 %v2652_v31 }
 0x1c2   : > { %2672 = vmatprep.subr.bf16.mxu0 %v2828_v34  ;;  %2690 = vmatprep.subr.bf16.mxu1 %v2828_v34 }
 0x1c4   : > { %2407 = vmatmul.mubr.f32.vlgmr.msra.gmra.mrb[12].mxu0 %v1445_v43 }
 0x1c5   : > { %2674 = vmatpush3.bf16.msra.mxu0 %v2673_v42  ;;  %2692 = vmatpush3.bf16.msra.mxu1 %v2655_v24 }
 0x1c6   : > { %2675 = vmatprep.subr.bf16.mxu0 %v2828_v34  ;;  %2693 = vmatprep.subr.bf16.mxu1 %v2828_v34 }
 0x1c7   : > { %2444 = vmatprep.mubr.msk.f32.mxu0 %vm2829_vm1, %v2830_v59 }
 0x1c9   : > { %2677 = vmatpush3.bf16.msra.mxu0 %v2676_v53  ;;  %2695 = vmatpush3.bf16.msra.mxu1 %v2658_v4 }
 0x1ca   : > { %2678 = vmatprep.subr.bf16.mxu0 %v2828_v34  ;;  %2708 = vmatprep.subr.bf16.mxu1 %v2828_v34 }
 0x1cc   : > { %2464 = vmatmul.mubr.f32.vlgmr.msra.gmra.mrb[14].mxu1 %v1443_v38  ;;  %v1995_v38 = vld [vmem:[%s3584_s4] ss:$0 sm:$0xff] }
 0x1cd   : > { %2680 = vmatpush3.bf16.msra.mxu0 %v2679_v54  ;;  %2710 = vmatpush3.bf16.msra.mxu1 %v2649_v5 }
 0x1ce   : > { %2681 = vmatprep.subr.bf16.mxu0 %v2828_v34  ;;  %2711 = vmatprep.subr.bf16.mxu1 %v2828_v34 }
 0x1cf   : > { %2501 = vmatprep.mubr.msk.f32.mxu1 %vm2829_vm1, %v2830_v59 }
 0x1d1   : > { %2683 = vmatpush3.bf16.msra.mxu0 %v2682_v35  ;;  %2713 = vmatpush3.bf16.msra.mxu1 %v2652_v31 }
 0x1d2   : > { %2696 = vmatprep.subr.bf16.mxu0 %v2828_v34  ;;  %2714 = vmatprep.subr.bf16.mxu1 %v2828_v34 }
 0x1d4   : > { %2445 = vmatmul.mubr.f32.vlgmr.msra.gmra.mrb[14].mxu0 %v1442_v37 }
 0x1d5   : > { %2698 = vmatpush3.bf16.msra.mxu0 %v2697_v36  ;;  %2716 = vmatpush3.bf16.msra.mxu1 %v2655_v24 }
 0x1d6   : > { %2699 = vmatprep.subr.bf16.mxu0 %v2828_v34  ;;  %2717 = vmatprep.subr.bf16.mxu1 %v2828_v34 }
 0x1d7   : > { %2482 = vmatprep.mubr.msk.f32.mxu0 %vm2829_vm1, %v2830_v59 }
 0x1d9   : > { %2701 = vmatpush3.bf16.msra.mxu0 %v2700_v52  ;;  %2719 = vmatpush3.bf16.msra.mxu1 %v2658_v4 }
 0x1da   : > { %2702 = vmatprep.subr.bf16.mxu0 %v2828_v34 }
 0x1dc   : > { %2502 = vmatmul.mubr.f32.vlgmr.msra.gmra.mrb[16].mxu1 %v3455_v33 }
 0x1dd   : > { %2704 = vmatpush3.bf16.msra.mxu0 %v2703_v44 }
 0x1de   : > { %2705 = vmatprep.subr.bf16.mxu0 %v2828_v34 }
 0x1e1   : > { %2707 = vmatpush3.bf16.msra.mxu0 %v2706_v51 }
 0x1e4   : > { %2483 = vmatmul.mubr.f32.vlgmr.msra.gmra.mrb[16].mxu0 %v3455_v33 }
 0x22f   : > { %v479_v59 = vpop.f32.mrb[0].mxu1 }
 0x230   : > { %v2199_v61 = vpop.f32.mrb[1].mxu1 }
 0x237   : > { %v368_v62 = vpop.f32.mrb[0].mxu0 }
 0x238   : > { %v480_v46 = vadd.f32 %v479_v59, %v368_v62  ;;  %v2180_v47 = vpop.f32.mrb[1].mxu0 }
 0x23f   : > { %v648_v58 = vpop.f32.mrb[2].mxu1 }
 0x240   : > { %v2237_v1 = vpop.f32.mrb[3].mxu1 }
 0x247   : > { %v567_v63 = vpop.f32.mrb[2].mxu0 }
 0x248   : > { %v568_v6 = vadd.f32 %v567_v63, %v480_v46  ;;  %v2218_v13 = vpop.f32.mrb[3].mxu0 }
 0x24a   : > { %v649_v14 = vadd.f32 %v648_v58, %v568_v6 }
 0x24f   : > { %v822_v17 = vpop.f32.mrb[4].mxu1 }
 0x250   : > { %v2275_v7 = vpop.f32.mrb[5].mxu1 }
 0x257   : > { %v743_v0 = vpop.f32.mrb[4].mxu0 }
 0x258   : > { %v744_v15 = vadd.f32 %v743_v0, %v649_v14  ;;  %v2256_v39 = vpop.f32.mrb[5].mxu0 }
 0x25a   : > { %v823_v34 = vadd.f32 %v822_v17, %v744_v15 }
 0x25f   : > { %v1018_v40 = vpop.f32.mrb[6].mxu1 }
 0x260   : > { %v2313_v45 = vpop.f32.mrb[7].mxu1 }
 0x267   : > { %v907_v48 = vpop.f32.mrb[6].mxu0 }
 0x268   : > { %v908_v16 = vadd.f32 %v907_v48, %v823_v34  ;;  %v2294_v18 = vpop.f32.mrb[7].mxu0 }
 0x26a   : > { %v1019_v8 = vadd.f32 %v1018_v40, %v908_v16 }
 0x26f   : > { %v1187_v19 = vpop.f32.mrb[8].mxu1 }
 0x270   : > { %v2351_v20 = vpop.f32.mrb[9].mxu1 }
 0x277   : > { %v1106_v49 = vpop.f32.mrb[8].mxu0 }
 0x278   : > { %v1107_v50 = vadd.f32 %v1106_v49, %v1019_v8  ;;  %v2332_v55 = vpop.f32.mrb[9].mxu0 }
 0x27a   : > { %v1188_v56 = vadd.f32 %v1187_v19, %v1107_v50 }
 0x27f   : > { %v1361_v22 = vpop.f32.mrb[10].mxu1 }
 0x280   : > { %v2389_v23 = vpop.f32.mrb[11].mxu1 }
 0x287   : > { %v1282_v9 = vpop.f32.mrb[10].mxu0 }
 0x288   : > { %v1283_v21 = vadd.f32 %v1282_v9, %v1188_v56  ;;  %v2370_v26 = vpop.f32.mrb[11].mxu0 }
 0x28a   : > { %v1362_v25 = vadd.f32 %v1361_v22, %v1283_v21 }
 0x28f   : > { %v1558_v27 = vpop.f32.mrb[12].mxu1 }
 0x290   : > { %v2427_v57 = vpop.f32.mrb[13].mxu1 }
 0x297   : > { %v1447_v60 = vpop.f32.mrb[12].mxu0 }
 0x298   : > { %v1559_v2 = vadd.f32 %v1558_v27, %v1447_v60  ;;  %v2408_v3 = vpop.f32.mrb[13].mxu0 }
 0x29f   : > { %v1727_v28 = vpop.f32.mrb[14].mxu1 }
 0x2a0   : > { %v2465_v29 = vpop.f32.mrb[15].mxu1 }
 0x2a7   : > { %v1646_v30 = vpop.f32.mrb[14].mxu0 }
 0x2a8   : > { %v1647_v5 = vadd.f32 %v1646_v30, %v1559_v2  ;;  %v2446_v10 = vpop.f32.mrb[15].mxu0 }
 0x2aa   : > { %v1728_v11 = vadd.f32 %v1727_v28, %v1647_v5 }
 0x2af   : > { %v1901_v12 = vpop.f32.mrb[16].mxu1 }
 0x2b0   : > { %v2503_v33 = vpop.f32.mrb[17].mxu1 }
 0x2b7   : > { %v1822_v31 = vpop.f32.mrb[16].mxu0 }
 0x2b8   : > { %v1823_v32 = vadd.f32 %v1822_v31, %v1728_v11  ;;  %v2484_v37 = vpop.f32.mrb[17].mxu0 }
 0x2ba   : > { %v1902_v24 = vadd.f32 %v1901_v12, %v1823_v32 }
 0x2bc   : > { %v1905_v4 = vadd.f32 %v1902_v24, %v1362_v25 }
 0x2be   : > { %v1912_v41 = vadd.f32 %v1995_v38, %v1905_v4 }
 0x2c0   : > { %1913 = vst.msk [vmem:[%s215_s25] sm:$0xf] %vm223_vm0, %v1912_v41 }
 0x2c1   : > { %2777 = shalt.err (!%p2774_p3)
}
 0x2c2   : > { %s2778_s12 = scalar_lea.hbm %s3537_s7, 64  ;;  %s2782_s15 = scalar_lea.hbm %s3585_s5, 128 }
 0x2c3   : > { %p2779_p4 = scmp.ne.s32.totalorder %s3537_s7, %s2778_s12  ;;  %p2783_p9 = scmp.lt.u32.totalorder %s3537_s7, %s3585_s5 }
 0x2c4   : > { %p2784_p10 = scmp.lt.u32.totalorder %s2782_s15, %s2778_s12  ;;  %p2786_p12 = scmp.lt.u32.totalorder %s2778_s12, %s3537_s7 }
 0x2c5   : > { %p2780_p7 = pnand %p2779_p4, %p2900_p5 }
 0x2c6   : > { %p2785_p11 = por %p2784_p10, %p2783_p9 }
 0x2c7   : > { %p2781_p8 = pneg %p2780_p7 }
 0x2c8   : > { %p2787_p13 = por %p2786_p12, %p2785_p11 }
 0x2ca   : > { %p2788_p0 = pnand %p2787_p13, %p2781_p8 }
 0x2cc   : > { %2791 = shalt.err (!%p2788_p0)
}
 0x2cd   : > { %2720 = dma.vmem_to_hbm [thread:$0]  (%p2900_p5), %s3539_s26, 64, %s3537_s7, %s1915_s8  }
 0x2ce PF: > { %p2726_p1 = scmp.ge.s32.totalorder %s2826_s21, 2  ;;  %s1940_s23 = sand.u32 1, %s2814_s18  }
 0x2cf   : > { %s1941_s25 = scalar_lea.sflag [#allocation3], %s1940_s23 }
 0x2d0   : > { %p2723_p2 = pnand %p2726_p1, %p2904_p6 }
 0x2d2   : > { %2809 = dma.done.wait (!%p2723_p2), %s1941_s25, 64  }
 0x2d3   : > { %2811 = vsyncadd (!%p2723_p2), %s1941_s25, 4294967232  ;;  %p15_p3 = scmp.ge.s32.totalorder %s2887_s24, 4   ;;  %s3588_s18 = smov %s2818_s19 }
 0x2d4   : > { %s3589_s19 = smov %s2822_s20  ;;  %s3590_s20 = smov %s2898_s27 }
 0x2d5   : > { %s3591_s21 = smov %s2887_s24  ;;  %17 = sbr.rel (!%p15_p3) target bundleno = 3 (0x3), region = 75 }
 0x2dc   :  { %1946 = vsyncpa [#allocation3], 1 }
 0x2dd   :  { %1948 = vsyncpa [#allocation3 + $0x1], 1 }

// kernel: _lambda_.3
= control target key start
LH: loop header
LB: loop body
LE: loop exit
PB: predicated region body
PF: predicated region fallthrough
CT: control target
= control target key end

     0   :  { %s8762_s0 = inlined_call_operand.vmem [shape: f32[2,16,16], index: 0, kind: input, shape index: {}]   ;;  %s8763_s1 = inlined_call_operand.vmem [shape: f32[1,16], index: 1, kind: input, shape index: {}]   ;;  %s8764_s2 = inlined_call_operand.vmem [shape: f32[1,16], index: 2, kind: input, shape index: {}]   ;;  %s8765_s3 = inlined_call_operand.vmem [shape: f32[48,16], index: 3, kind: input, shape index: {}]   ;;  %s8766_s4 = inlined_call_operand.vmem [shape: f32[1,16], index: 4, kind: input, shape index: {}]   ;;  %s8767_s5 = inlined_call_operand.vmem [shape: f32[16,16], index: 5, kind: input, shape index: {}]   ;;  %s8768_s6 = inlined_call_operand.vmem [shape: f32[1,16], index: 6, kind: input, shape index: {}]   ;;  %s8769_s7 = inlined_call_operand.vmem [shape: f32[48,32], index: 7, kind: input, shape index: {}]   ;;  %s8770_s8 = inlined_call_operand.vmem [shape: f32[1,32], index: 8, kind: input, shape index: {}]   ;;  %s8771_s9 = inlined_call_operand.vmem [shape: f32[1,32], index: 9, kind: input, shape index: {}]   ;;  %s8772_s10 = inlined_call_operand.vmem [shape: f32[1,32], index: 10, kind: input, shape index: {}]   ;;  %s8773_s11 = inlined_call_operand.vmem [shape: f32[96,32], index: 11, kind: input, shape index: {}]   ;;  %s8774_s12 = inlined_call_operand.vmem [shape: f32[1,32], index: 12, kind: input, shape index: {}]   ;;  %s8775_s13 = inlined_call_operand.vmem [shape: f32[32,32], index: 13, kind: input, shape index: {}]   ;;  %s8776_s14 = inlined_call_operand.vmem [shape: f32[1,32], index: 14, kind: input, shape index: {}]   ;;  %s8777_s15 = inlined_call_operand.hbm [shape: f32[2,16,32], index: 15, kind: output, shape index: {0}]   ;;  %s8778_s16 = inlined_call_operand.vmem [shape: f32[2,8,32], index: 16, kind: output, shape index: {1}]  }
   0x1   :  { %8779 = sst [smem:[#allocation6_spill]] %s8762_s0 }
   0x2   :  { %8780 = sst [smem:[#allocation7_spill]] %s8763_s1 }
   0x3   :  { %8781 = sst [smem:[#allocation8_spill]] %s8764_s2 }
   0x4   :  { %8782 = sst [smem:[#allocation9_spill]] %s8765_s3 }
   0x5   :  { %8783 = sst [smem:[#allocation10_spill]] %s8766_s4 }
   0x6   :  { %8784 = sst [smem:[#allocation11_spill]] %s8767_s5 }
   0x7   :  { %22 = vsyncpa [#allocation4], 0 }
   0x8   :  { %24 = vsyncpa [#allocation4 + $0x1], 0  ;;  %s8194_s21 = smov 0   ;;  %s8196_s22 = smov 0  }
   0x9   :  { %s8198_s23 = smov 0   ;;  %s8200_s24 = smov 0  }
   0xa LB: > { %s8215_s25 = sadd.s32 4294967295, %s8103_s24   ;;  %s6607_s26 = sadd.s32 4294967294, %s8103_s24   ;;  %s8103_s24 = sphi %s8200_s24, %s8796_s24   ;;  %s8099_s23 = sphi %s8198_s23, %s8795_s23   ;;  %s8095_s22 = sphi %s8196_s22, %s8794_s22   ;;  %s8091_s21 = sphi %s8194_s21, %s8793_s21  }
   0xb   : > { %s8219_s27 = sadd.s32 1, %s8103_s24   ;;  %s357_s28 = sadd.s32 1, %s8099_s23 }
   0xc   : > { %s354_s29 = ssub.s32 %s8103_s24, %s8219_s27  ;;  %p367_p0 = scmp.ne.s32.totalorder %s8099_s23, %s8095_s22 }
   0xd   : > { %p355_p1 = scmp.eq.s32.totalorder %s354_s29, 0  ;;  %p368_p2 = scmp.eq.s32.totalorder %s8215_s25, 1 }
   0xe   : > { %p373_p3 = scmp.ne.s32.totalorder %s8095_s22, %s8091_s21  ;;  %p374_p4 = scmp.eq.s32.totalorder %s6607_s26, 1 }
   0xf   : > { %s8230_s30 = scalar_select %p355_p1, %s8099_s23, %s357_s28  }
  0x10   : > { %p8232_p5 = por %p368_p2, %p367_p0  ;;  %p8236_p6 = por %p374_p4, %p373_p3 }
  0x11   : > { %p6610_p7 = scmp.ge.s32.totalorder %s8103_s24, 1  ;;  %p468_p8 = scmp.lt.s32.totalorder %s8103_s24, 3 }
  0x13   : > { %p469_p9 = pnand %p6610_p7, %p468_p8 }
  0x14   : > { %p522_p10 = scmp.lt.s32.totalorder (!%p469_p9), %s8215_s25, 1  ;;  %vm547_vm0 = vcmask (!%p469_p9), 130048   ;;  %s8787_s28 = sld [smem:[#allocation6_spill]] (!%p469_p9)  ;;  %vm605_vm1 = vcmask (!%p469_p9), 1040384   ;;  %vm615_vm2 = vcmask (!%p469_p9), 1046528   ;;  %vm1633_vm3 = vcmask (!%p469_p9), 1045504  }
  0x15   : > { %472 = sbr.rel (%p469_p9) target bundleno = 2285 (0x8ed), region = 80  ;;  %s8788_s3 = sld [smem:[#allocation9_spill]] (!%p469_p9)  ;;  %vm4257_vm8 = vcmask (!%p469_p9), 261120  }
  0x16   : > { %s8789_s1 = sld [smem:[#allocation7_spill]] (!%p469_p9)  ;;  %s8790_s2 = sld [smem:[#allocation8_spill]] (!%p469_p9) }
  0x17   : > { %s8791_s5 = sld [smem:[#allocation11_spill]] (!%p469_p9)  ;;  %s8792_s4 = sld [smem:[#allocation10_spill]] (!%p469_p9) }
  0x18   : > { %s513_s20 = sand.u32 (!%p469_p9), 1, %s8095_s22  }
  0x19   : > { %s6611_s26 = sshll.u32 (!%p469_p9), %s513_s20, 4 }
  0x1b   : > { %v537_v14 = vld [vmem:[%s8788_s3 + $0x10] sm:$0xff] (!%p469_p9)  ;;  %v538_v15 = vld [vmem:[%s8788_s3 + $0x18] sm:$0xff] (!%p469_p9) }
  0x1c   : > { %s8244_s18 = scalar_select %p522_p10, %s8215_s25, 1  ;;  %v626_v16 = vand.u32 4294901760, %v537_v14  ;;  %v629_v17 = vand.u32 4294901760, %v538_v15  ;;  %v6617_v37 = vld [vmem:[%s8789_s1] ss:$0 sm:$0xff] }
  0x1d   : > { %v6618_v39 = vld [vmem:[%s8790_s2] ss:$0 sm:$0xff] }
  0x1e   : > { %s6633_s19 = sshll.u32 %s8244_s18, 4  ;;  %v714_v18 = vsub.f32 %v537_v14, %v626_v16  ;;  %v721_v19 = vsub.f32 %v538_v15, %v629_v17  ;;  %v8268_v22 = vpack.c.bf16 %v629_v17, %v626_v16 }
  0x1f   : > { %s526_s29 = scalar_lea.vmem %s8787_s28, %s6633_s19  ;;  %s515_s28 = scalar_lea.vmem [#allocation3], %s6611_s26 }
  0x20   : > { %v8250_v0 = vld [vmem:[%s526_s29] sm:$0xff]  ;;  %v8252_v1 = vld [vmem:[%s526_s29 + $0x8] sm:$0xff]  ;;  %v715_v20 = vand.u32 4294901760, %v714_v18  ;;  %v722_v21 = vand.u32 4294901760, %v721_v19  ;;  %7506 = vmatprep.subr.bf16.mxu1 %v8268_v22  ;;  %v7513_v28 = vpack.c.bf16 %v721_v19, %v714_v18  ;;  %s6518_s29 = sshll.u32 %s515_s28, 4  ;;  %s8710_s29 = int_to_ptr.vmem [resolvable:$true] %s6518_s29 }
  0x21   : > { %v560_v2 = vsel %vm547_vm0, %v8250_v0, 0.0  ;;  %v563_v3 = vsel %vm547_vm0, %v8252_v1, 0.0  ;;  %7508 = vmatpush3.bf16.msra.mxu1 %v8268_v22  ;;  %s8041_s26 = scalar_lea.vmem %s8710_s29, 256 }
  0x22   : > { %561 = vadd.xlane.f32.xlu0 %v560_v2  ;;  %v716_v23 = vsub.f32 %v714_v18, %v715_v20  ;;  %v723_v24 = vsub.f32 %v721_v19, %v722_v21  ;;  %v8272_v29 = vpack.c.bf16 %v722_v21, %v715_v20  ;;  %p8042_p11 = scmp.ne.s32.totalorder %s8710_s29, %s8041_s26 }
  0x24   : > { %v717_v25 = vand.u32 4294901760, %v716_v23  ;;  %v724_v26 = vand.u32 4294901760, %v723_v24  ;;  %p8043_p12 = pnand %p8042_p11, %p8232_p5 }
  0x26   : > { %564 = vadd.xlane.f32.xlu0 %v563_v3  ;;  %v7509_v27 = vpack.c.bf16 %v724_v26, %v717_v25  ;;  %p8044_p13 = pneg %p8043_p12 }
  0x28   : > { %7510 = vmatprep.subr.bf16.mxu0 %v7509_v27 }
  0x29   : > { %7512 = vmatpush3.bf16.msra.mxu0 %v7509_v27 }
  0x2a   : > { %7514 = vmatprep.subr.bf16.mxu0 %v7513_v28 }
  0xaf   : > { %v562_v4 = vpop.xlane.xlu0 %561 }
  0xb0   : > { %v567_v5 = vmul.f32 0.0625, %v562_v4 }
  0xb2   : > { %v569_v6 = vsub.f32 %v8250_v0, %v567_v5 }
  0xb3   : > { %v565_v7 = vpop.xlane.xlu0 %564 }
  0xb4   : > { %v568_v8 = vmul.f32 0.0625, %v565_v7  ;;  %v571_v9 = vmul.f32 %v569_v6, %v569_v6 }
  0xb6   : > { %v570_v10 = vsub.f32 %v8252_v1, %v568_v8  ;;  %v573_v11 = vsel %vm547_vm0, %v571_v9, 0.0 }
  0xb7   : > { %574 = vadd.xlane.f32.xlu1 %v573_v11  ;;  %v535_v11 = vld [vmem:[%s8788_s3] sm:$0xff] }
  0xb8   : > { %v572_v12 = vmul.f32 %v570_v10, %v570_v10 }
  0xba   : > { %v576_v13 = vsel %vm547_vm0, %v572_v12, 0.0  ;;  %v536_v12 = vld [vmem:[%s8788_s3 + $0x8] sm:$0xff] }
  0xbb   : > { %577 = vadd.xlane.f32.xlu1 %v576_v13  ;;  %v1132_v13 = vand.u32 4294901760, %v535_v11  ;;  %v1135_v14 = vand.u32 4294901760, %v536_v12 }
  0xbd   : > { %v1220_v16 = vsub.f32 %v535_v11, %v1132_v13  ;;  %v1227_v17 = vsub.f32 %v536_v12, %v1135_v14  ;;  %v7529_v24 = vpack.c.bf16 %v1135_v14, %v1132_v13 }
  0xbf   : > { %v1221_v19 = vand.u32 4294901760, %v1220_v16  ;;  %v1228_v20 = vand.u32 4294901760, %v1227_v17 }
  0xc1   : > { %v1222_v25 = vsub.f32 %v1220_v16, %v1221_v19  ;;  %v1229_v26 = vsub.f32 %v1227_v17, %v1228_v20 }
 0x144   : > { %v575_v30 = vpop.xlane.xlu1 %574 }
 0x145   : > { %v579_v31 = vmul.f32 0.0625, %v575_v30  ;;  %v1230_v30 = vand.u32 4294901760, %v1229_v26 }
 0x147   : > { %v581_v32 = vadd.f32 1e-05, %v579_v31 }
 0x148   : > { %v578_v33 = vpop.xlane.xlu1 %577 }
 0x149   : > { %8033 = vrsqrt.f32 %v581_v32  ;;  %v580_v34 = vmul.f32 0.0625, %v578_v33 }
 0x14b   : > { %v582_v35 = vadd.f32 1e-05, %v580_v34 }
 0x14d   : > { %8035 = vrsqrt.f32 %v582_v35 }
 0x153   : > { %v8034_v36 = vpop.eup %8033 }
 0x154   : > { %v585_v38 = vmul.f32 %v8034_v36, %v569_v6 }
 0x156   : > { %v593_v40 = vmul.f32 %v6617_v37, %v585_v38  ;;  %v7537_v38 = vpack.c.bf16 %v1227_v17, %v1220_v16 }
 0x157   : > { %v8036_v41 = vpop.eup %8035 }
 0x158   : > { %v601_v42 = vadd.f32 %v6618_v39, %v593_v40  ;;  %v586_v43 = vmul.f32 %v8036_v41, %v570_v10  ;;  %v540_v40 = vld [vmem:[%s8788_s3 + $0x28] sm:$0xff] }
 0x15a   : > { %v606_v44 = vrot.slane %v601_v42, 7  ;;  %v594_v45 = vmul.f32 %v6617_v37, %v586_v43  ;;  %v1647_v42 = vand.u32 4294901760, %v540_v40 }
 0x15c   : > { %v602_v46 = vadd.f32 %v6618_v39, %v594_v45  ;;  %v611_v48 = vsel %vm605_vm1, 0.0, %v606_v44  ;;  %v539_v39 = vld [vmem:[%s8788_s3 + $0x20] sm:$0xff]  ;;  %v1739_v45 = vsub.f32 %v540_v40, %v1647_v42  ;;  %s6634_s3 = sshll.u32 %s8215_s25, 8  ;;  %s8716_s25 = scalar_lea.sflag [#allocation4], %s513_s20 }
 0x15d   : > { %v616_v51 = vrot.slane %v611_v48, 1  ;;  %v1634_v58 = vrot.slane %v611_v48, 2  ;;  %v1127_v15 = vsel %vm547_vm0, %v611_v48, 0  ;;  %v1644_v41 = vand.u32 4294901760, %v539_v39  ;;  %s8708_s2 = scalar_lea.hbm %s8777_s15, %s6634_s3  ;;  %s8106_s3 = smov [#allocation3]  }
 0x15e   : > { %v607_v47 = vrot.slane %v602_v46, 7  ;;  %v8303_v18 = vand.u32 4294901760, %v1127_v15  ;;  %v1740_v48 = vand.u32 4294901760, %v1739_v45  ;;  %s8045_s19 = sshll.u32 %s8106_s3, 4  ;;  %s8046_s19 = int_to_ptr.vmem [resolvable:$false] %s8045_s19 }
 0x15f   : > { %s8047_s1 = scalar_lea.vmem %s8046_s19, 512  ;;  %p8048_p0 = scmp.lt.s32.totalorder %s8710_s29, %s8046_s19 }
 0x160   : > { %v608_v49 = vsel %vm605_vm1, %v606_v44, %v607_v47  ;;  %v612_v50 = vsel %vm605_vm1, %v607_v47, 0.0  ;;  %v1199_v21 = vsub.f32 %v1127_v15, %v8303_v18  ;;  %v1732_v44 = vsub.f32 %v539_v39, %v1644_v41  ;;  %p8049_p1 = scmp.lt.s32.totalorder %s8047_s1, %s8041_s26 }
 0x161   : > { %v617_v52 = vrot.slane %v608_v49, 1  ;;  %v619_v53 = vrot.slane %v612_v50, 1  ;;  %v1637_v54 = vrot.slane %v612_v50, 2  ;;  %v1635_v55 = vrot.slane %v608_v49, 2 }
 0x162   : > { %v1129_v23 = vsel %vm547_vm0, %v608_v49, 0  ;;  %v1733_v47 = vand.u32 4294901760, %v1732_v44  ;;  %p8050_p2 = por %p8049_p1, %p8048_p0 }
 0x163   : > { %v618_v56 = vsel %vm615_vm2, %v616_v51, %v617_v52  ;;  %v620_v57 = vsel %vm615_vm2, %v617_v52, %v619_v53  ;;  %v8288_v63 = vsel %vm1633_vm3, %v1634_v58, %v1635_v55  ;;  %v8291_v2 = vsel %vm1633_vm3, %v1635_v55, %v1637_v54 }
 0x164   : > { %v621_v59 = vsel %vm547_vm0, %v618_v56, 0  ;;  %v623_v60 = vsel %vm547_vm0, %v620_v57, 0  ;;  %v8309_v27 = vand.u32 4294901760, %v1129_v23  ;;  %v1639_v43 = vsel %vm547_vm0, %v8288_v63, 0  ;;  %p8051_p3 = pnand %p8050_p2, %p8044_p13 }
 0x165   : > { %v692_v61 = vand.u32 4294901760, %v621_v59  ;;  %v702_v62 = vand.u32 4294901760, %v623_v60  ;;  %v1710_v46 = vand.u32 4294901760, %v1639_v43  ;;  %v1641_v50 = vsel %vm547_vm0, %v8291_v2, 0 }
 0x166   : > { %v1209_v31 = vsub.f32 %v1129_v23, %v8309_v27  ;;  %v7553_v51 = vpack.c.bf16 %v1647_v42, %v1644_v41  ;;  %v1734_v52 = vsub.f32 %v1732_v44, %v1733_v47  ;;  %v1741_v53 = vsub.f32 %v1739_v45, %v1740_v48 }
 0x167   : > { %6958 = vmatprep.mubr.f32.mxu0 %v692_v61  ;;  %v693_v3 = vsub.f32 %v621_v59, %v692_v61  ;;  %v703_v4 = vsub.f32 %v623_v60, %v702_v62  ;;  %v1711_v49 = vsub.f32 %v1639_v43, %v1710_v46  ;;  %v1720_v54 = vand.u32 4294901760, %v1641_v50 }
 0x168   : > { %6959 = vmatmul.mubr.f32.vlgmr.msra.gmra.mrb[0].mxu0 %v702_v62  ;;  %v1210_v34 = vand.u32 4294901760, %v1209_v31  ;;  %v1735_v56 = vand.u32 4294901760, %v1734_v52  ;;  %v1742_v57 = vand.u32 4294901760, %v1741_v53 }
 0x169   : > { %7516 = vmatpush3.bf16.msra.mxu0 %v7513_v28  ;;  %6965 = vmatprep.mubr.f32.mxu0 %v693_v3  ;;  %v694_v5 = vand.u32 4294901760, %v693_v3  ;;  %v704_v6 = vand.u32 4294901760, %v703_v4  ;;  %v1200_v28 = vand.u32 4294901760, %v1199_v21  ;;  %v1712_v55 = vand.u32 4294901760, %v1711_v49 }
 0x16a   : > { %7518 = vmatprep.subr.bf16.mxu0 %v8268_v22  ;;  %v1211_v36 = vsub.f32 %v1209_v31, %v1210_v34  ;;  %v1721_v58 = vsub.f32 %v1641_v50, %v1720_v54  ;;  %v7557_v60 = vpack.c.bf16 %v1742_v57, %v1735_v56  ;;  %v2681_v50 = vld [vmem:[%s8769_s7 + $0x10] sm:$0xff] }
 0x16b   : > { %v695_v7 = vsub.f32 %v693_v3, %v694_v5  ;;  %v705_v8 = vsub.f32 %v703_v4, %v704_v6  ;;  %v1201_v32 = vsub.f32 %v1199_v21, %v1200_v28  ;;  %v1713_v59 = vsub.f32 %v1711_v49, %v1712_v55 }
 0x16c   : > { %v1212_v37 = vand.u32 4294901760, %v1211_v36  ;;  %v7561_v3 = vpack.c.bf16 %v1739_v45, %v1732_v44  ;;  %v2707_v52 = vand.u32 4294901760, %v2681_v50 }
 0x16d   : > { %v696_v9 = vand.u32 4294901760, %v695_v7  ;;  %v706_v10 = vand.u32 4294901760, %v705_v8  ;;  %v1202_v35 = vand.u32 4294901760, %v1201_v32  ;;  %v542_v7 = vld [vmem:[%s8791_s5] sm:$0xff]  ;;  %v543_v8 = vld [vmem:[%s8791_s5 + $0x8] sm:$0xff] }
 0x16f   : > { %6951 = vmatprep.mubr.f32.mxu1 %v696_v9  ;;  %v2174_v9 = vand.u32 4294901760, %v542_v7 }
 0x170   : > { %6952 = vmatmul.mubr.f32.vlgmr.msra.gmra.mrb[0].mxu1 %v706_v10  ;;  %6966 = vmatmul.mubr.f32.vlgmr.msra.gmra.mrb[0].mxu0 %v703_v4  ;;  %v7569_v4 = vpack.c.bf16 %v1740_v48, %v1733_v47  ;;  %v2177_v10 = vand.u32 4294901760, %v543_v8 }
 0x171   : > { %7520 = vmatpush3.bf16.msra.mxu0 %v8268_v22  ;;  %6972 = vmatprep.mubr.f32.mxu0 %v694_v5  ;;  %v2262_v12 = vsub.f32 %v542_v7, %v2174_v9 }
 0x172   : > { %7522 = vmatprep.subr.bf16.mxu0 %v8272_v29  ;;  %v8335_v11 = vpack.c.bf16 %v2177_v10, %v2174_v9  ;;  %v2269_v13 = vsub.f32 %v543_v8, %v2177_v10 }
 0x173   : > { %v2263_v14 = vand.u32 4294901760, %v2262_v12 }
 0x174   : > { %7578 = vmatprep.subr.bf16.mxu1 %v8335_v11  ;;  %v2270_v15 = vand.u32 4294901760, %v2269_v13 }
 0x175   : > { %7580 = vmatpush3.bf16.msra.mxu1 %v8335_v11  ;;  %v2264_v16 = vsub.f32 %v2262_v12, %v2263_v14 }
 0x176   : > { %v2271_v17 = vsub.f32 %v2269_v13, %v2270_v15  ;;  %v7593_v23 = vpack.c.bf16 %v2270_v15, %v2263_v14 }
 0x178   : > { %6973 = vmatmul.mubr.f32.vlgmr.msra.gmra.mrb[0].mxu0 %v704_v6 }
 0x179   : > { %7524 = vmatpush3.bf16.msra.mxu0 %v8272_v29  ;;  %6979 = vmatprep.mubr.f32.mxu0 %v692_v61  ;;  %v1223_v29 = vand.u32 4294901760, %v1222_v25  ;;  %v545_v25 = vand.u32 2147483647, %v8250_v0 }
 0x17a   : > { %7526 = vmatprep.subr.bf16.mxu0 %v8268_v22 }
 0x17b   : > { %v7533_v33 = vpack.c.bf16 %v1230_v30, %v1223_v29 }
 0x180   : > { %6980 = vmatmul.mubr.f32.vlgmr.msra.gmra.mrb[0].mxu0 %v702_v62 }
 0x181   : > { %7528 = vmatpush3.bf16.msra.mxu0 %v8268_v22  ;;  %6986 = vmatprep.mubr.f32.mxu0 %v692_v61  ;;  %v7545_v22 = vpack.c.bf16 %v1228_v20, %v1221_v19  ;;  %v1722_v61 = vand.u32 4294901760, %v1721_v58  ;;  %v2265_v19 = vand.u32 4294901760, %v2264_v16  ;;  %v2272_v20 = vand.u32 4294901760, %v2271_v17 }
 0x182   : > { %7530 = vmatprep.subr.bf16.mxu0 %v7529_v24 }
 0x183   : > { %v1723_v63 = vsub.f32 %v1721_v58, %v1722_v61 }
 0x185   : > { %v1724_v2 = vand.u32 4294901760, %v1723_v63 }
 0x188   : > { %6987 = vmatmul.mubr.f32.vlgmr.msra.gmra.mrb[0].mxu0 %v702_v62  ;;  %v1714_v62 = vand.u32 4294901760, %v1713_v59 }
 0x189   : > { %7532 = vmatpush3.bf16.msra.mxu0 %v7529_v24  ;;  %6993 = vmatprep.mubr.f32.mxu0 %v1202_v35 }
 0x18a   : > { %7534 = vmatprep.subr.bf16.mxu0 %v7533_v33 }
 0x190   : > { %6994 = vmatmul.mubr.f32.vlgmr.msra.gmra.mrb[0].mxu0 %v1212_v37 }
 0x191   : > { %7536 = vmatpush3.bf16.msra.mxu0 %v7533_v33  ;;  %7000 = vmatprep.mubr.f32.mxu0 %v8303_v18 }
 0x192   : > { %7538 = vmatprep.subr.bf16.mxu0 %v7537_v38 }
 0x198   : > { %7001 = vmatmul.mubr.f32.vlgmr.msra.gmra.mrb[0].mxu0 %v8309_v27 }
 0x199   : > { %7540 = vmatpush3.bf16.msra.mxu0 %v7537_v38  ;;  %7007 = vmatprep.mubr.f32.mxu0 %v1199_v21  ;;  %v7581_v21 = vpack.c.bf16 %v2272_v20, %v2265_v19 }
 0x19a   : > { %7542 = vmatprep.subr.bf16.mxu0 %v7529_v24 }
 0x19b   : > { %7582 = vmatprep.subr.bf16.mxu1 %v7581_v21 }
 0x1a0   : > { %7008 = vmatmul.mubr.f32.vlgmr.msra.gmra.mrb[0].mxu0 %v1209_v31 }
 0x1a1   : > { %7544 = vmatpush3.bf16.msra.mxu0 %v7529_v24  ;;  %7014 = vmatprep.mubr.f32.mxu0 %v1200_v28  ;;  %v6619_v28 = vld [vmem:[%s8792_s4] ss:$0 sm:$0xff] }
 0x1a2   : > { %7546 = vmatprep.subr.bf16.mxu0 %v7545_v22 }
 0x1a8   : > { %7015 = vmatmul.mubr.f32.vlgmr.msra.gmra.mrb[0].mxu0 %v1210_v34 }
 0x1a9   : > { %7548 = vmatpush3.bf16.msra.mxu0 %v7545_v22  ;;  %7021 = vmatprep.mubr.f32.mxu0 %v8303_v18 }
 0x1aa   : > { %7550 = vmatprep.subr.bf16.mxu0 %v7529_v24 }
 0x1b0   : > { %7022 = vmatmul.mubr.f32.vlgmr.msra.gmra.mrb[0].mxu0 %v8309_v27 }
 0x1b1   : > { %7552 = vmatpush3.bf16.msra.mxu0 %v7529_v24  ;;  %7028 = vmatprep.mubr.f32.mxu0 %v8303_v18  ;;  %v7585_v18 = vpack.c.bf16 %v2269_v13, %v2262_v12  ;;  %v546_v24 = vand.u32 2147483647, %v8252_v1 }
 0x1b2   : > { %7554 = vmatprep.subr.bf16.mxu0 %v7553_v51 }
 0x1b3   : > { %v551_v26 = vsel %vm547_vm0, %v546_v24, 0.0 }
 0x1b4   : > { %552 = vadd.xlane.f32.xlu1 %v551_v26 }
 0x1b8   : > { %7029 = vmatmul.mubr.f32.vlgmr.msra.gmra.mrb[0].mxu0 %v8309_v27  ;;  %v548_v27 = vsel %vm547_vm0, %v545_v25, 0.0 }
 0x1b9   : > { %7556 = vmatpush3.bf16.msra.mxu0 %v7553_v51  ;;  %7035 = vmatprep.mubr.f32.mxu0 %v1714_v62 }
 0x1ba   : > { %7558 = vmatprep.subr.bf16.mxu0 %v7557_v60  ;;  %549 = vadd.xlane.f32.xlu0 %v548_v27 }
 0x1c0   : > { %7036 = vmatmul.mubr.f32.vlgmr.msra.gmra.mrb[0].mxu0 %v1724_v2 }
 0x1c1   : > { %7560 = vmatpush3.bf16.msra.mxu0 %v7557_v60  ;;  %7042 = vmatprep.mubr.f32.mxu0 %v1710_v46 }
 0x1c2   : > { %7562 = vmatprep.subr.bf16.mxu0 %v7561_v3 }
 0x1c8   : > { %7043 = vmatmul.mubr.f32.vlgmr.msra.gmra.mrb[0].mxu0 %v1720_v54 }
 0x1c9   : > { %7564 = vmatpush3.bf16.msra.mxu0 %v7561_v3  ;;  %7049 = vmatprep.mubr.f32.mxu0 %v1711_v49 }
 0x1ca   : > { %7566 = vmatprep.subr.bf16.mxu0 %v7553_v51 }
 0x1d0   : > { %7050 = vmatmul.mubr.f32.vlgmr.msra.gmra.mrb[0].mxu0 %v1721_v58 }
 0x1d1   : > { %7568 = vmatpush3.bf16.msra.mxu0 %v7553_v51  ;;  %7056 = vmatprep.mubr.f32.mxu0 %v1712_v55  ;;  %v2795_v55 = vsub.f32 %v2681_v50, %v2707_v52 }
 0x1d2   : > { %7570 = vmatprep.subr.bf16.mxu0 %v7569_v4 }
 0x1d3   : > { %v2796_v57 = vand.u32 4294901760, %v2795_v55 }
 0x1d5   : > { %v2797_v59 = vsub.f32 %v2795_v55, %v2796_v57 }
 0x1d7   : > { %v2798_v62 = vand.u32 4294901760, %v2797_v59 }
 0x1d8   : > { %7057 = vmatmul.mubr.f32.vlgmr.msra.gmra.mrb[0].mxu0 %v1722_v61 }
 0x1d9   : > { %7572 = vmatpush3.bf16.msra.mxu0 %v7569_v4  ;;  %7063 = vmatprep.mubr.f32.mxu0 %v1710_v46 }
 0x1da   : > { %7574 = vmatprep.subr.bf16.mxu0 %v7553_v51 }
 0x1e0   : > { %7064 = vmatmul.mubr.f32.vlgmr.msra.gmra.mrb[0].mxu0 %v1720_v54 }
 0x1e1   : > { %7576 = vmatpush3.bf16.msra.mxu0 %v7553_v51  ;;  %7070 = vmatprep.mubr.f32.mxu0 %v1710_v46  ;;  %v2682_v51 = vld [vmem:[%s8769_s7 + $0x18] sm:$0xff] }
 0x1e2   : > { %v2710_v53 = vand.u32 4294901760, %v2682_v51 }
 0x1e4   : > { %v2802_v56 = vsub.f32 %v2682_v51, %v2710_v53 }
 0x1e6   : > { %v2803_v58 = vand.u32 4294901760, %v2802_v56  ;;  %v7609_v61 = vpack.c.bf16 %v2802_v56, %v2795_v55 }
 0x1e8   : > { %7071 = vmatmul.mubr.f32.vlgmr.msra.gmra.mrb[0].mxu0 %v1720_v54  ;;  %v8358_v54 = vpack.c.bf16 %v2710_v53, %v2707_v52  ;;  %v2804_v60 = vsub.f32 %v2802_v56, %v2803_v58  ;;  %v8362_v3 = vpack.c.bf16 %v2803_v58, %v2796_v57 }
 0x1ea   : > { %v2805_v63 = vand.u32 4294901760, %v2804_v60 }
 0x1ec   : > { %v7605_v2 = vpack.c.bf16 %v2805_v63, %v2798_v62 }
 0x241   : > { %v553_v4 = vpop.xlane.xlu1 %552 }
 0x242   : > { %vm555_vm6 = vcmp.gt.f32.partialorder %v553_v4, 0.0 }
 0x243   : > { %v6953_v5 = vpop.f32.mrb[0].mxu1 }
 0x244   : > { %v698_v6 = vpop.f32.mrb[1].mxu1 }
 0x2bb   : > { %v7072_v29 = vpop.f32.mrb[0].mxu0 }
 0x2bc   : > { %v7865_v30 = vadd.f32 %v7072_v29, %v6953_v5  ;;  %v2135_v31 = vpop.f32.mrb[1].mxu0  ;;  %v550_v5 = vpop.xlane.xlu0 %549 }
 0x2bd   : > { %v7866_v32 = vadd.f32 %v2135_v31, %v698_v6  ;;  %v6620_v6 = vld [vmem:[%s8768_s6] ss:$0 sm:$0xff]  ;;  %vm554_vm7 = vcmp.gt.f32.partialorder %v550_v5, 0.0 }
 0x2be   : > { %v2154_v33 = vadd.f32 %v7865_v30, %v6619_v28 }
 0x2bf   : > { %v2153_v34 = vadd.f32 %v7866_v32, %v6619_v28 }
 0x2c0   : > { %vm2156_vm4 = vcmp.gt.f32.partialorder %v2154_v33, 0.0  ;;  %v2158_v35 = vmul.f32 0.01, %v2154_v33 }
 0x2c1   : > { %vm2155_vm5 = vcmp.gt.f32.partialorder %v2153_v34, 0.0  ;;  %v2157_v36 = vmul.f32 0.01, %v2153_v34 }
 0x2c2   : > { %v2160_v37 = vsel %vm2156_vm4, %v2154_v33, %v2158_v35 }
 0x2c3   : > { %v2171_v38 = vsel %vm547_vm0, %v2160_v37, 0  ;;  %v2159_v22 = vsel %vm2155_vm5, %v2153_v34, %v2157_v36 }
 0x2c4   : > { %v2250_v39 = vand.u32 4294901760, %v2171_v38  ;;  %v2168_v40 = vsel %vm547_vm0, %v2159_v22, 0 }
 0x2c5   : > { %v2240_v41 = vand.u32 4294901760, %v2168_v40 }
 0x2c6   : > { %v2251_v42 = vsub.f32 %v2171_v38, %v2250_v39 }
 0x2c7   : > { %v2241_v43 = vsub.f32 %v2168_v40, %v2240_v41 }
 0x2c8   : > { %v2252_v44 = vand.u32 4294901760, %v2251_v42 }
 0x2c9   : > { %v2242_v45 = vand.u32 4294901760, %v2241_v43 }
 0x2ca   : > { %v2253_v46 = vsub.f32 %v2251_v42, %v2252_v44 }
 0x2cb   : > { %v2243_v47 = vsub.f32 %v2241_v43, %v2242_v45 }
 0x2cc   : > { %v2254_v49 = vand.u32 4294901760, %v2253_v46 }
 0x2cd   : > { %v2244_v48 = vand.u32 4294901760, %v2243_v47 }
 0x2cf   : > { %7077 = vmatprep.mubr.f32.mxu1 %v2244_v48 }
 0x2d0   : > { %7078 = vmatmul.mubr.f32.vlgmr.msra.gmra.mrb[2].mxu1 %v2254_v49 }
 0x2d1   : > { %7584 = vmatpush3.bf16.msra.mxu1 %v7581_v21  ;;  %7084 = vmatprep.mubr.f32.mxu1 %v2240_v41 }
 0x2d2   : > { %7586 = vmatprep.subr.bf16.mxu1 %v7585_v18 }
 0x2d8   : > { %7085 = vmatmul.mubr.f32.vlgmr.msra.gmra.mrb[2].mxu1 %v2250_v39 }
 0x2d9   : > { %7588 = vmatpush3.bf16.msra.mxu1 %v7585_v18  ;;  %7091 = vmatprep.mubr.f32.mxu1 %v2241_v43  ;;  %v2679_v43 = vld [vmem:[%s8769_s7] sm:$0xff] }
 0x2da   : > { %7590 = vmatprep.subr.bf16.mxu1 %v8335_v11 }
 0x2e0   : > { %7092 = vmatmul.mubr.f32.vlgmr.msra.gmra.mrb[2].mxu1 %v2251_v42 }
 0x2e1   : > { %7592 = vmatpush3.bf16.msra.mxu1 %v8335_v11  ;;  %7098 = vmatprep.mubr.f32.mxu1 %v2242_v45  ;;  %v3213_v45 = vand.u32 4294901760, %v2679_v43 }
 0x2e2   : > { %7594 = vmatprep.subr.bf16.mxu1 %v7593_v23 }
 0x2e3   : > { %v3301_v48 = vsub.f32 %v2679_v43, %v3213_v45 }
 0x2e5   : > { %v3302_v51 = vand.u32 4294901760, %v3301_v48 }
 0x2e7   : > { %v3303_v58 = vsub.f32 %v3301_v48, %v3302_v51 }
 0x2e8   : > { %7099 = vmatmul.mubr.f32.vlgmr.msra.gmra.mrb[2].mxu1 %v2252_v44  ;;  %v2680_v44 = vld [vmem:[%s8769_s7 + $0x8] sm:$0xff] }
 0x2e9   : > { %7596 = vmatpush3.bf16.msra.mxu1 %v7593_v23  ;;  %7105 = vmatprep.mubr.f32.mxu1 %v2240_v41  ;;  %v3216_v46 = vand.u32 4294901760, %v2680_v44  ;;  %v3304_v62 = vand.u32 4294901760, %v3303_v58  ;;  %v4241_v58 = vld [vmem:[%s8773_s11 + $0x20] sm:$0xff] }
 0x2ea   : > { %7598 = vmatprep.subr.bf16.mxu1 %v8335_v11 }
 0x2eb   : > { %v3308_v49 = vsub.f32 %v2680_v44, %v3216_v46  ;;  %v7625_v57 = vpack.c.bf16 %v3216_v46, %v3213_v45 }
 0x2ed   : > { %v3309_v52 = vand.u32 4294901760, %v3308_v49 }
 0x2ef   : > { %v3310_v59 = vsub.f32 %v3308_v49, %v3309_v52 }
 0x2f0   : > { %7106 = vmatmul.mubr.f32.vlgmr.msra.gmra.mrb[2].mxu1 %v2250_v39 }
 0x2f1   : > { %7600 = vmatpush3.bf16.msra.mxu1 %v8335_v11  ;;  %7112 = vmatprep.mubr.f32.mxu1 %v2240_v41  ;;  %v8105_v11 = vmov 0.0   ;;  %v3311_v63 = vand.u32 4294901760, %v3310_v59  ;;  %v4242_v59 = vld [vmem:[%s8773_s11 + $0x28] sm:$0xff] }
 0x2f2   : > { %7602 = vmatprep.subr.bf16.mxu1 %v8358_v54  ;;  %v6616_v12 = vsel %vm555_vm6, 1.0, %v8105_v11  ;;  %v6615_v14 = vsel %vm554_vm7, 1.0, %v8105_v11 }
 0x2f8   : > { %7113 = vmatmul.mubr.f32.vlgmr.msra.gmra.mrb[2].mxu1 %v2250_v39 }
 0x2f9   : > { %7604 = vmatpush3.bf16.msra.mxu1 %v8358_v54 }
 0x2fa   : > { %7606 = vmatprep.subr.bf16.mxu1 %v7605_v2 }
 0x3cb   : > { %v7114_v7 = vpop.f32.mrb[2].mxu1 }
 0x3cc   : > { %v7867_v8 = vadd.f32 %v7114_v7, %v6620_v6  ;;  %v2665_v9 = vpop.f32.mrb[3].mxu1 }
 0x3cd   : > { %v7868_v10 = vadd.f32 %v6620_v6, %v2665_v9  ;;  %v2683_v9 = vld [vmem:[%s8769_s7 + $0x20] sm:$0xff] }
 0x3ce   : > { %v2676_v13 = vadd.f32 %v7867_v8, %v8252_v1  ;;  %v7633_v8 = vpack.c.bf16 %v3308_v49, %v3301_v48 }
 0x3cf   : > { %v2675_v15 = vadd.f32 %v7868_v10, %v8250_v0  ;;  %v2684_v10 = vld [vmem:[%s8769_s7 + $0x28] sm:$0xff] }
 0x3d0   : > { %v2678_v16 = vmul.f32 %v6616_v12, %v2676_v13  ;;  %v3724_v12 = vand.u32 4294901760, %v2683_v9  ;;  %v3727_v13 = vand.u32 4294901760, %v2684_v10 }
 0x3d1   : > { %v2677_v17 = vmul.f32 %v6615_v14, %v2675_v15 }
 0x3d2   : > { %v2689_v18 = vrot.slane %v2678_v16, 7  ;;  %v3812_v15 = vsub.f32 %v2683_v9, %v3724_v12  ;;  %v3819_v16 = vsub.f32 %v2684_v10, %v3727_v13 }
 0x3d3   : > { %v2688_v19 = vrot.slane %v2677_v17, 7 }
 0x3d4   : > { %v2694_v20 = vsel %vm605_vm1, %v2689_v18, 0.0 }
 0x3d5   : > { %v2700_v21 = vrot.slane %v2694_v20, 1  ;;  %v3717_v23 = vrot.slane %v2694_v20, 2  ;;  %v2690_v24 = vsel %vm605_vm1, %v2688_v19, %v2689_v18  ;;  %v2693_v25 = vsel %vm605_vm1, 0.0, %v2688_v19 }
 0x3d6   : > { %v2697_v26 = vrot.slane %v2693_v25, 1  ;;  %v2698_v27 = vrot.slane %v2690_v24, 1  ;;  %v3714_v28 = vrot.slane %v2693_v25, 2  ;;  %v3715_v1 = vrot.slane %v2690_v24, 2 }
 0x3d7   : > { %v3208_v47 = vsel %vm547_vm0, %v2693_v25, 0  ;;  %v3210_v53 = vsel %vm547_vm0, %v2690_v24, 0  ;;  %v3813_v18 = vand.u32 4294901760, %v3812_v15  ;;  %v3820_v19 = vand.u32 4294901760, %v3819_v16 }
 0x3d8   : > { %v2701_v29 = vsel %vm615_vm2, %v2698_v27, %v2700_v21  ;;  %v2699_v0 = vsel %vm615_vm2, %v2697_v26, %v2698_v27  ;;  %v8377_v30 = vsel %vm1633_vm3, %v3715_v1, %v3717_v23  ;;  %v8382_v34 = vsel %vm1633_vm3, %v3714_v28, %v3715_v1 }
 0x3d9   : > { %v2702_v31 = vsel %vm547_vm0, %v2699_v0, 0  ;;  %v2704_v33 = vsel %vm547_vm0, %v2701_v29, 0  ;;  %v8394_v50 = vand.u32 4294901760, %v3208_v47  ;;  %v8400_v56 = vand.u32 4294901760, %v3210_v53 }
 0x3da   : > { %v2773_v32 = vand.u32 4294901760, %v2702_v31  ;;  %v2783_v35 = vand.u32 4294901760, %v2704_v33  ;;  %v3719_v14 = vsel %vm547_vm0, %v8382_v34, 0  ;;  %v3721_v21 = vsel %vm547_vm0, %v8377_v30, 0 }
 0x3db   : > { %v3280_v55 = vsub.f32 %v3208_v47, %v8394_v50  ;;  %v3790_v17 = vand.u32 4294901760, %v3719_v14  ;;  %v7649_v23 = vpack.c.bf16 %v3727_v13, %v3724_v12  ;;  %v3814_v24 = vsub.f32 %v3812_v15, %v3813_v18 }
 0x3dc   : > { %v2774_v36 = vsub.f32 %v2702_v31, %v2773_v32  ;;  %v2784_v37 = vsub.f32 %v2704_v33, %v2783_v35  ;;  %v3821_v25 = vsub.f32 %v3819_v16, %v3820_v19  ;;  %v3800_v26 = vand.u32 4294901760, %v3721_v21 }
 0x3dd   : > { %v3281_v60 = vand.u32 4294901760, %v3280_v55  ;;  %v3791_v20 = vsub.f32 %v3719_v14, %v3790_v17  ;;  %v3815_v28 = vand.u32 4294901760, %v3814_v24 }
 0x3de   : > { %v2775_v38 = vand.u32 4294901760, %v2774_v36  ;;  %v2785_v22 = vand.u32 4294901760, %v2784_v37  ;;  %v3822_v1 = vand.u32 4294901760, %v3821_v25  ;;  %v3801_v29 = vsub.f32 %v3721_v21, %v3800_v26 }
 0x3df   : > { %v3792_v27 = vand.u32 4294901760, %v3791_v20 }
 0x3e0   : > { %v2776_v39 = vsub.f32 %v2774_v36, %v2775_v38  ;;  %v2786_v40 = vsub.f32 %v2784_v37, %v2785_v22  ;;  %v7653_v31 = vpack.c.bf16 %v3822_v1, %v3815_v28 }
 0x3e1   : > { %v3793_v0 = vsub.f32 %v3791_v20, %v3792_v27 }
 0x3e2   : > { %v2777_v41 = vand.u32 4294901760, %v2776_v39  ;;  %v2787_v42 = vand.u32 4294901760, %v2786_v40 }
 0x3e3   : > { %v3794_v33 = vand.u32 4294901760, %v3793_v0 }
 0x3e4   : > { %7119 = vmatprep.mubr.f32.mxu1 %v2777_v41 }
 0x3e5   : > { %7120 = vmatmul.mubr.f32.vlgmr.msra.gmra.mrb[4].mxu1 %v2787_v42 }
 0x3e6   : > { %7608 = vmatpush3.bf16.msra.mxu1 %v7605_v2  ;;  %7126 = vmatprep.mubr.f32.mxu1 %v2773_v32  ;;  %v3282_v2 = vsub.f32 %v3280_v55, %v3281_v60 }
 0x3e7   : > { %7610 = vmatprep.subr.bf16.mxu1 %v7609_v61 }
 0x3e8   : > { %v3283_v5 = vand.u32 4294901760, %v3282_v2  ;;  %v4243_v2 = vld [vmem:[%s8773_s11 + $0x30] sm:$0xff] }
 0x3ed   : > { %7127 = vmatmul.mubr.f32.vlgmr.msra.gmra.mrb[4].mxu1 %v2783_v35 }
 0x3ee   : > { %7612 = vmatpush3.bf16.msra.mxu1 %v7609_v61  ;;  %7133 = vmatprep.mubr.f32.mxu1 %v2774_v36  ;;  %v3290_v61 = vsub.f32 %v3210_v53, %v8400_v56  ;;  %v7665_v36 = vpack.c.bf16 %v3820_v19, %v3813_v18 }
 0x3ef   : > { %7614 = vmatprep.subr.bf16.mxu1 %v8358_v54 }
 0x3f0   : > { %v3291_v4 = vand.u32 4294901760, %v3290_v61 }
 0x3f2   : > { %v3292_v6 = vsub.f32 %v3290_v61, %v3291_v4 }
 0x3f4   : > { %v3293_v7 = vand.u32 4294901760, %v3292_v6 }
 0x3f5   : > { %7134 = vmatmul.mubr.f32.vlgmr.msra.gmra.mrb[4].mxu1 %v2784_v37  ;;  %v6621_v37 = vld [vmem:[%s8770_s8] ss:$0 sm:$0xff] }
 0x3f6   : > { %7616 = vmatpush3.bf16.msra.mxu1 %v8358_v54  ;;  %7140 = vmatprep.mubr.f32.mxu1 %v2775_v38 }
 0x3f7   : > { %7618 = vmatprep.subr.bf16.mxu1 %v8362_v3 }
 0x3fd   : > { %7141 = vmatmul.mubr.f32.vlgmr.msra.gmra.mrb[4].mxu1 %v2785_v22 }
 0x3fe   : > { %7620 = vmatpush3.bf16.msra.mxu1 %v8362_v3  ;;  %7147 = vmatprep.mubr.f32.mxu1 %v2773_v32  ;;  %v7629_v3 = vpack.c.bf16 %v3311_v63, %v3304_v62 }
 0x3ff   : > { %7622 = vmatprep.subr.bf16.mxu1 %v8358_v54 }
 0x405   : > { %7148 = vmatmul.mubr.f32.vlgmr.msra.gmra.mrb[4].mxu1 %v2783_v35 }
 0x406   : > { %7624 = vmatpush3.bf16.msra.mxu1 %v8358_v54  ;;  %7154 = vmatprep.mubr.f32.mxu1 %v2773_v32  ;;  %v7641_v54 = vpack.c.bf16 %v3309_v52, %v3302_v51  ;;  %v3802_v32 = vand.u32 4294901760, %v3801_v29 }
 0x407   : > { %7626 = vmatprep.subr.bf16.mxu1 %v7625_v57 }
 0x408   : > { %v3803_v30 = vsub.f32 %v3801_v29, %v3802_v32 }
 0x40a   : > { %v3804_v34 = vand.u32 4294901760, %v3803_v30 }
 0x40d   : > { %7155 = vmatmul.mubr.f32.vlgmr.msra.gmra.mrb[4].mxu1 %v2783_v35  ;;  %v7657_v35 = vpack.c.bf16 %v3819_v16, %v3812_v15 }
 0x40e   : > { %7628 = vmatpush3.bf16.msra.mxu1 %v7625_v57  ;;  %7161 = vmatprep.mubr.f32.mxu1 %v3283_v5 }
 0x40f   : > { %7630 = vmatprep.subr.bf16.mxu1 %v7629_v3 }
 0x415   : > { %7162 = vmatmul.mubr.f32.vlgmr.msra.gmra.mrb[4].mxu1 %v3293_v7  ;;  %v4340_v7 = vand.u32 4294901760, %v4243_v2 }
 0x416   : > { %7632 = vmatpush3.bf16.msra.mxu1 %v7629_v3  ;;  %7168 = vmatprep.mubr.f32.mxu1 %v8394_v50  ;;  %v4244_v3 = vld [vmem:[%s8773_s11 + $0x38] sm:$0xff] }
 0x417   : > { %7634 = vmatprep.subr.bf16.mxu1 %v7633_v8  ;;  %v4438_v9 = vsub.f32 %v4243_v2, %v4340_v7 }
 0x419   : > { %v4439_v13 = vand.u32 4294901760, %v4438_v9 }
 0x41b   : > { %v4440_v21 = vsub.f32 %v4438_v9, %v4439_v13 }
 0x41d   : > { %7169 = vmatmul.mubr.f32.vlgmr.msra.gmra.mrb[4].mxu1 %v8400_v56  ;;  %v4441_v24 = vand.u32 4294901760, %v4440_v21 }
 0x41e   : > { %7636 = vmatpush3.bf16.msra.mxu1 %v7633_v8  ;;  %7175 = vmatprep.mubr.f32.mxu1 %v3280_v55  ;;  %v4343_v8 = vand.u32 4294901760, %v4244_v3 }
 0x41f   : > { %7638 = vmatprep.subr.bf16.mxu1 %v7625_v57 }
 0x420   : > { %v8462_v10 = vpack.c.bf16 %v4343_v8, %v4340_v7  ;;  %v4445_v12 = vsub.f32 %v4244_v3, %v4343_v8 }
 0x422   : > { %v4446_v14 = vand.u32 4294901760, %v4445_v12  ;;  %v8475_v28 = vpack.c.bf16 %v4445_v12, %v4438_v9 }
 0x424   : > { %v7709_v15 = vpack.c.bf16 %v4446_v14, %v4439_v13 }
 0x425   : > { %7176 = vmatmul.mubr.f32.vlgmr.msra.gmra.mrb[4].mxu1 %v3290_v61  ;;  %v4337_v61 = vand.u32 4294901760, %v4242_v59 }
 0x426   : > { %7640 = vmatpush3.bf16.msra.mxu1 %v7625_v57  ;;  %7182 = vmatprep.mubr.f32.mxu1 %v3281_v60  ;;  %v4334_v60 = vand.u32 4294901760, %v4241_v58 }
 0x427   : > { %7642 = vmatprep.subr.bf16.mxu1 %v7641_v54  ;;  %v4431_v63 = vsub.f32 %v4242_v59, %v4337_v61 }
 0x428   : > { %v4424_v62 = vsub.f32 %v4241_v58, %v4334_v60 }
 0x429   : > { %v4432_v6 = vand.u32 4294901760, %v4431_v63 }
 0x42a   : > { %v4425_v5 = vand.u32 4294901760, %v4424_v62 }
 0x42c   : > { %v4426_v16 = vsub.f32 %v4424_v62, %v4425_v5 }
 0x42d   : > { %7183 = vmatmul.mubr.f32.vlgmr.msra.gmra.mrb[4].mxu1 %v3291_v4  ;;  %v8459_v4 = vpack.c.bf16 %v4337_v61, %v4334_v60 }
 0x42e   : > { %7644 = vmatpush3.bf16.msra.mxu1 %v7641_v54  ;;  %7189 = vmatprep.mubr.f32.mxu1 %v8394_v50  ;;  %v7705_v54 = vpack.c.bf16 %v4432_v6, %v4425_v5  ;;  %v4427_v18 = vand.u32 4294901760, %v4426_v16 }
 0x42f   : > { %7646 = vmatprep.subr.bf16.mxu1 %v7625_v57 }
 0x430   : > { %7706 = vmatprep.subr.bf16.mxu0 %v7705_v54 }
 0x431   : > { %7708 = vmatpush3.bf16.msra.mxu0 %v7705_v54 }
 0x432   : > { %7710 = vmatprep.subr.bf16.mxu0 %v7709_v15 }
 0x435   : > { %7190 = vmatmul.mubr.f32.vlgmr.msra.gmra.mrb[4].mxu1 %v8400_v56  ;;  %7712 = vmatpush3.bf16.msra.mxu0 %v7709_v15 }
 0x436   : > { %7648 = vmatpush3.bf16.msra.mxu1 %v7625_v57  ;;  %7196 = vmatprep.mubr.f32.mxu1 %v8394_v50 }
 0x437   : > { %7650 = vmatprep.subr.bf16.mxu1 %v7649_v23  ;;  %7714 = vmatprep.subr.bf16.mxu0 %v8459_v4 }
 0x43d   : > { %7197 = vmatmul.mubr.f32.vlgmr.msra.gmra.mrb[4].mxu1 %v8400_v56 }
 0x43e   : > { %7652 = vmatpush3.bf16.msra.mxu1 %v7649_v23  ;;  %7203 = vmatprep.mubr.f32.mxu1 %v3794_v33 }
 0x43f   : > { %7654 = vmatprep.subr.bf16.mxu1 %v7653_v31 }
 0x445   : > { %7204 = vmatmul.mubr.f32.vlgmr.msra.gmra.mrb[4].mxu1 %v3804_v34  ;;  %v6624_v34 = vld [vmem:[%s8771_s9] ss:$0 sm:$0xff] }
 0x446   : > { %7656 = vmatpush3.bf16.msra.mxu1 %v7653_v31  ;;  %7210 = vmatprep.mubr.f32.mxu1 %v3790_v17 }
 0x447   : > { %7658 = vmatprep.subr.bf16.mxu1 %v7657_v35 }
 0x44d   : > { %7211 = vmatmul.mubr.f32.vlgmr.msra.gmra.mrb[4].mxu1 %v3800_v26 }
 0x44e   : > { %7660 = vmatpush3.bf16.msra.mxu1 %v7657_v35  ;;  %7217 = vmatprep.mubr.f32.mxu1 %v3791_v20 }
 0x44f   : > { %7662 = vmatprep.subr.bf16.mxu1 %v7649_v23 }
 0x455   : > { %7218 = vmatmul.mubr.f32.vlgmr.msra.gmra.mrb[4].mxu1 %v3801_v29 }
 0x456   : > { %7664 = vmatpush3.bf16.msra.mxu1 %v7649_v23  ;;  %7224 = vmatprep.mubr.f32.mxu1 %v3792_v27  ;;  %v8473_v27 = vpack.c.bf16 %v4431_v63, %v4424_v62 }
 0x457   : > { %7666 = vmatprep.subr.bf16.mxu1 %v7665_v36 }
 0x45d   : > { %7225 = vmatmul.mubr.f32.vlgmr.msra.gmra.mrb[4].mxu1 %v3802_v32 }
 0x45e   : > { %7668 = vmatpush3.bf16.msra.mxu1 %v7665_v36  ;;  %7231 = vmatprep.mubr.f32.mxu1 %v3790_v17 }
 0x45f   : > { %7670 = vmatprep.subr.bf16.mxu1 %v7649_v23 }
 0x465   : > { %7232 = vmatmul.mubr.f32.vlgmr.msra.gmra.mrb[4].mxu1 %v3800_v26 }
 0x466   : > { %7672 = vmatpush3.bf16.msra.mxu1 %v7649_v23  ;;  %7238 = vmatprep.mubr.f32.mxu1 %v3790_v17  ;;  %v4433_v17 = vsub.f32 %v4431_v63, %v4432_v6  ;;  %v4447_v23 = vsub.f32 %v4445_v12, %v4446_v14 }
 0x467   : > { %7674 = vmatprep.subr.bf16.mxu1 %v8459_v4 }
 0x468   : > { %v4434_v19 = vand.u32 4294901760, %v4433_v17  ;;  %v4448_v25 = vand.u32 4294901760, %v4447_v23 }
 0x46a   : > { %v8468_v20 = vpack.c.bf16 %v4434_v19, %v4427_v18 }
 0x46d   : > { %7239 = vmatmul.mubr.f32.vlgmr.msra.gmra.mrb[4].mxu1 %v3800_v26  ;;  %v8471_v26 = vpack.c.bf16 %v4448_v25, %v4441_v24 }
 0x46e   : > { %7676 = vmatpush3.bf16.msra.mxu1 %v8459_v4 }
 0x46f   : > { %7678 = vmatprep.subr.bf16.mxu1 %v8462_v10 }
 0x472   : > { %7680 = vmatpush3.bf16.msra.mxu1 %v8462_v10 }
 0x473   : > { %7682 = vmatprep.subr.bf16.mxu1 %v8468_v20 }
 0x540   : > { %v7240_v38 = vpop.f32.mrb[4].mxu1 }
 0x541   : > { %v8423_v22 = vadd.f32 %v7240_v38, %v6621_v37  ;;  %v4215_v39 = vpop.f32.mrb[5].mxu1 }
 0x542   : > { %v8425_v40 = vadd.f32 %v6621_v37, %v4215_v39  ;;  %v6625_v37 = vld [vmem:[%s8772_s10] ss:$0 sm:$0xff] }
 0x543   : > { %v4273_v41 = vsel %vm4257_vm8, %v8423_v22, 0.0  ;;  %v4256_v52 = vand.u32 2147483647, %v8423_v22 }
 0x544   : > { %4274 = vadd.xlane.f32.xlu1 %v4273_v41  ;;  %v4270_v42 = vsel %vm4257_vm8, %v8425_v40, 0.0  ;;  %v4255_v55 = vand.u32 2147483647, %v8425_v40 }
 0x545   : > { %4271 = vadd.xlane.f32.xlu0 %v4270_v42  ;;  %v4261_v56 = vsel %vm4257_vm8, %v4256_v52, 0.0 }
 0x546   : > { %v4258_v57 = vsel %vm4257_vm8, %v4255_v55, 0.0 }
 0x5d1   : > { %v4275_v43 = vpop.xlane.xlu1 %4274 }
 0x5d2   : > { %v4278_v44 = vmul.f32 0.03125, %v4275_v43  ;;  %v4272_v45 = vpop.xlane.xlu0 %4271  ;;  %v4237_v43 = vld [vmem:[%s8773_s11] sm:$0xff] }
 0x5d3   : > { %v4277_v46 = vmul.f32 0.03125, %v4272_v45 }
 0x5d4   : > { %v8432_v47 = vsub.f32 %v8423_v22, %v4278_v44  ;;  %v4238_v44 = vld [vmem:[%s8773_s11 + $0x8] sm:$0xff] }
 0x5d5   : > { %v8435_v48 = vsub.f32 %v8425_v40, %v4277_v46 }
 0x5d6   : > { %v4282_v49 = vmul.f32 %v8432_v47, %v8432_v47 }
 0x5d7   : > { %v4281_v50 = vmul.f32 %v8435_v48, %v8435_v48 }
 0x5d8   : > { %v4286_v51 = vsel %vm4257_vm8, %v4282_v49, 0.0  ;;  %v4866_v49 = vand.u32 4294901760, %v4237_v43 }
 0x5d9   : > { %4287 = vadd.xlane.f32.xlu1 %v4286_v51  ;;  %v4283_v53 = vsel %vm4257_vm8, %v4281_v50, 0.0  ;;  %v4869_v50 = vand.u32 4294901760, %v4238_v44 }
 0x5da   : > { %4284 = vadd.xlane.f32.xlu0 %v4283_v53  ;;  %v8513_v62 = vsub.f32 %v4237_v43, %v4866_v49 }
 0x5db   : > { %v8515_v63 = vsub.f32 %v4238_v44, %v4869_v50  ;;  %v8543_v25 = vpack.c.bf16 %v4869_v50, %v4866_v49 }
 0x5dc   : > { %v4957_v13 = vand.u32 4294901760, %v8513_v62 }
 0x5dd   : > { %4262 = vadd.xlane.f32.xlu1 %v4261_v56  ;;  %v4240_v56 = vld [vmem:[%s8773_s11 + $0x18] sm:$0xff]  ;;  %v4964_v14 = vand.u32 4294901760, %v8515_v63 }
 0x5de   : > { %4259 = vadd.xlane.f32.xlu0 %v4258_v57  ;;  %v4875_v5 = vand.u32 4294901760, %v4240_v56 }
 0x5e0   : > { %v8536_v19 = vsub.f32 %v4240_v56, %v4875_v5 }
 0x666   : > { %v4288_v1 = vpop.xlane.xlu1 %4287 }
 0x667   : > { %v4290_v29 = vmul.f32 0.03125, %v4288_v1  ;;  %v4285_v0 = vpop.xlane.xlu0 %4284  ;;  %v4958_v1 = vsub.f32 %v8513_v62, %v4957_v13 }
 0x668   : > { %v4289_v31 = vmul.f32 0.03125, %v4285_v0 }
 0x669   : > { %v4292_v32 = vadd.f32 1e-05, %v4290_v29  ;;  %v4965_v29 = vsub.f32 %v8515_v63, %v4964_v14 }
 0x66a   : > { %v4291_v33 = vadd.f32 1e-05, %v4289_v31 }
 0x66b   : > { %8037 = vrsqrt.f32 %v4292_v32 }
 0x66c   : > { %8039 = vrsqrt.f32 %v4291_v33 }
 0x675   : > { %v8038_v30 = vpop.eup %8037 }
 0x676   : > { %v8040_v35 = vpop.eup %8039  ;;  %v4296_v36 = vmul.f32 %v8038_v30, %v8432_v47  ;;  %v4978_v30 = vand.u32 4294901760, %v8536_v19 }
 0x677   : > { %v4295_v38 = vmul.f32 %v8040_v35, %v8435_v48  ;;  %v4239_v48 = vld [vmem:[%s8773_s11 + $0x10] sm:$0xff] }
 0x678   : > { %v4304_v39 = vmul.f32 %v6624_v34, %v4296_v36  ;;  %v4872_v61 = vand.u32 4294901760, %v4239_v48  ;;  %v4979_v43 = vsub.f32 %v8536_v19, %v4978_v30 }
 0x679   : > { %v4303_v41 = vmul.f32 %v6624_v34, %v4295_v38  ;;  %v4966_v38 = vand.u32 4294901760, %v4965_v29 }
 0x67a   : > { %v4312_v42 = vadd.f32 %v6625_v37, %v4304_v39  ;;  %v8534_v18 = vsub.f32 %v4239_v48, %v4872_v61  ;;  %v4980_v49 = vand.u32 4294901760, %v4979_v43  ;;  %v7737_v48 = vpack.c.bf16 %v8515_v63, %v8513_v62  ;;  %v4247_v62 = vld [vmem:[%s8773_s11 + $0x50] sm:$0xff]  ;;  %v4250_v43 = vld [vmem:[%s8775_s13] sm:$0xff] }
 0x67b   : > { %v4311_v45 = vadd.f32 %v6625_v37, %v4303_v41  ;;  %v4959_v37 = vand.u32 4294901760, %v4958_v1  ;;  %v8566_v41 = vpack.c.bf16 %v4875_v5, %v4872_v61 }
 0x67c   : > { %v4316_v46 = vrot.slane %v4312_v42, 7  ;;  %v4971_v33 = vand.u32 4294901760, %v8534_v18 }
 0x67d   : > { %v4315_v47 = vrot.slane %v4311_v45, 7  ;;  %v7729_v45 = vpack.c.bf16 %v4966_v38, %v4959_v37 }
 0x67e   : > { %v8492_v51 = vsel %vm605_vm1, %v4316_v46, 0.0  ;;  %v4972_v42 = vsub.f32 %v8534_v18, %v4971_v33 }
 0x67f   : > { %v8498_v52 = vsel %vm605_vm1, %v4315_v47, %v4316_v46  ;;  %v8501_v53 = vsel %vm605_vm1, 0.0, %v4315_v47  ;;  %v4327_v55 = vrot.slane %v8492_v51, 1 }
 0x680   : > { %v4324_v57 = vrot.slane %v8501_v53, 1  ;;  %v4325_v58 = vrot.slane %v8498_v52, 1  ;;  %v4861_v59 = vsel %vm4257_vm8, %v8501_v53, 0  ;;  %v4863_v6 = vsel %vm4257_vm8, %v8498_v52, 0 }
 0x681   : > { %v8511_v60 = vand.u32 4294901760, %v4861_v59  ;;  %v8528_v15 = vand.u32 4294901760, %v4863_v6  ;;  %v4973_v47 = vand.u32 4294901760, %v4972_v42 }
 0x682   : > { %v4326_v2 = vsel %vm615_vm2, %v4324_v57, %v4325_v58  ;;  %v4328_v3 = vsel %vm615_vm2, %v4325_v58, %v4327_v55  ;;  %v5396_v55 = vrot.slane %v8492_v51, 2  ;;  %v7757_v58 = vpack.c.bf16 %v4978_v30, %v4971_v33  ;;  %v4248_v51 = vld [vmem:[%s8773_s11 + $0x58] sm:$0xff] }
 0x683   : > { %v4329_v7 = vsel %vm4257_vm8, %v4326_v2, 0  ;;  %v4331_v8 = vsel %vm4257_vm8, %v4328_v3, 0  ;;  %v8524_v54 = vsub.f32 %v4861_v59, %v8511_v60  ;;  %v8552_v0 = vsub.f32 %v4863_v6, %v8528_v15 }
 0x684   : > { %v4402_v9 = vand.u32 4294901760, %v4329_v7  ;;  %v4412_v12 = vand.u32 4294901760, %v4331_v8  ;;  %v7733_v50 = vpack.c.bf16 %v4980_v49, %v4973_v47  ;;  %v5409_v3 = vand.u32 4294901760, %v4247_v62  ;;  %v4252_v47 = vld [vmem:[%s8775_s13 + $0x10] sm:$0xff]  ;;  %v4253_v49 = vld [vmem:[%s8775_s13 + $0x18] sm:$0xff] }
 0x685   : > { %v4936_v21 = vand.u32 4294901760, %v8524_v54  ;;  %v4946_v39 = vand.u32 4294901760, %v8552_v0  ;;  %v5412_v5 = vand.u32 4294901760, %v4248_v51 }
 0x686   : > { %7293 = vmatprep.mubr.f32.mxu0 %v4402_v9  ;;  %v8530_v16 = vsub.f32 %v4331_v8, %v4412_v12  ;;  %v8532_v17 = vsub.f32 %v4329_v7, %v4402_v9 }
 0x687   : > { %7294 = vmatmul.mubr.f32.vlgmr.msra.gmra.mrb[2].mxu0 %v4412_v12  ;;  %v4937_v34 = vsub.f32 %v8524_v54, %v4936_v21  ;;  %v4947_v46 = vsub.f32 %v8552_v0, %v4946_v39  ;;  %v7773_v29 = vpack.c.bf16 %v5412_v5, %v5409_v3 }
 0x688   : > { %7716 = vmatpush3.bf16.msra.mxu0 %v8459_v4  ;;  %7304 = vmatprep.mubr.f32.mxu0 %v4402_v9  ;;  %v4404_v23 = vand.u32 4294901760, %v8532_v17  ;;  %v4414_v24 = vand.u32 4294901760, %v8530_v16 }
 0x689   : > { %7718 = vmatprep.subr.bf16.mxu0 %v8462_v10  ;;  %v4938_v44 = vand.u32 4294901760, %v4937_v34 }
 0x68a   : > { %v4405_v31 = vsub.f32 %v8532_v17, %v4404_v23  ;;  %v4415_v32 = vsub.f32 %v8530_v16, %v4414_v24 }
 0x68c   : > { %7720 = vmatpush3.bf16.msra.mxu0 %v8462_v10  ;;  %v4406_v35 = vand.u32 4294901760, %v4405_v31  ;;  %v4416_v36 = vand.u32 4294901760, %v4415_v32 }
 0x68d   : > { %7722 = vmatprep.subr.bf16.mxu0 %v8543_v25 }
 0x68e   : > { %7249 = vmatprep.mubr.f32.mxu1 %v4406_v35 }
 0x68f   : > { %7250 = vmatmul.mubr.f32.vlgmr.msra.gmra.mrb[6].mxu1 %v4416_v36  ;;  %7305 = vmatmul.mubr.f32.vlgmr.msra.gmra.mrb[2].mxu0 %v4412_v12 }
 0x690   : > { %7724 = vmatpush3.bf16.msra.mxu0 %v8543_v25  ;;  %7684 = vmatpush3.bf16.msra.mxu1 %v8468_v20  ;;  %v4948_v20 = vand.u32 4294901760, %v4947_v46 }
 0x691   : > { %7260 = vmatprep.mubr.f32.mxu1 %v4402_v9  ;;  %7315 = vmatprep.mubr.f32.mxu0 %v4938_v44  ;;  %v4251_v44 = vld [vmem:[%s8775_s13 + $0x8] sm:$0xff] }
 0x692   : > { %7726 = vmatprep.subr.bf16.mxu0 %v8566_v41  ;;  %7686 = vmatprep.subr.bf16.mxu1 %v8471_v26  ;;  %v5962_v46 = vand.u32 4294901760, %v4251_v44 }
 0x694   : > { %7728 = vmatpush3.bf16.msra.mxu0 %v8566_v41  ;;  %7688 = vmatpush3.bf16.msra.mxu1 %v8471_v26  ;;  %v7741_v26 = vpack.c.bf16 %v8536_v19, %v8534_v18 }
 0x695   : > { %7730 = vmatprep.subr.bf16.mxu0 %v7729_v45  ;;  %7690 = vmatprep.subr.bf16.mxu1 %v8473_v27 }
 0x697   : > { %7261 = vmatmul.mubr.f32.vlgmr.msra.gmra.mrb[6].mxu1 %v4412_v12  ;;  %7316 = vmatmul.mubr.f32.vlgmr.msra.gmra.mrb[2].mxu0 %v4948_v20  ;;  %v5965_v20 = vand.u32 4294901760, %v4252_v47 }
 0x698   : > { %7732 = vmatpush3.bf16.msra.mxu0 %v7729_v45  ;;  %7692 = vmatpush3.bf16.msra.mxu1 %v8473_v27  ;;  %v5393_v27 = vrot.slane %v8501_v53, 2  ;;  %v4246_v53 = vld [vmem:[%s8773_s11 + $0x48] sm:$0xff]  ;;  %v5959_v45 = vand.u32 4294901760, %v4250_v43 }
 0x699   : > { %7271 = vmatprep.mubr.f32.mxu1 %v8532_v17  ;;  %7326 = vmatprep.mubr.f32.mxu0 %v8511_v60  ;;  %v5406_v59 = vand.u32 4294901760, %v4246_v53 }
 0x69a   : > { %7734 = vmatprep.subr.bf16.mxu0 %v7733_v50  ;;  %7694 = vmatprep.subr.bf16.mxu1 %v8475_v28 }
 0x69b   : > { %v5500_v6 = vsub.f32 %v4246_v53, %v5406_v59 }
 0x69c   : > { %7736 = vmatpush3.bf16.msra.mxu0 %v7733_v50  ;;  %7696 = vmatpush3.bf16.msra.mxu1 %v8475_v28  ;;  %v5394_v28 = vrot.slane %v8498_v52, 2  ;;  %v4245_v52 = vld [vmem:[%s8773_s11 + $0x40] sm:$0xff]  ;;  %v5968_v50 = vand.u32 4294901760, %v4253_v49 }
 0x69d   : > { %7738 = vmatprep.subr.bf16.mxu0 %v7737_v48  ;;  %7698 = vmatprep.subr.bf16.mxu1 %v8459_v4  ;;  %v5403_v57 = vand.u32 4294901760, %v4245_v52  ;;  %v5501_v9 = vand.u32 4294901760, %v5500_v6 }
 0x69e   : > { %v5397_v63 = vsel %vm1633_vm3, %v5394_v28, %v5396_v55  ;;  %v6063_v55 = vsub.f32 %v4252_v47, %v5965_v20 }
 0x69f   : > { %7272 = vmatmul.mubr.f32.vlgmr.msra.gmra.mrb[6].mxu1 %v8530_v16  ;;  %7327 = vmatmul.mubr.f32.vlgmr.msra.gmra.mrb[2].mxu0 %v8528_v15  ;;  %v8640_v2 = vsub.f32 %v4245_v52, %v5403_v57  ;;  %v5400_v8 = vsel %vm4257_vm8, %v5397_v63, 0  ;;  %v7769_v17 = vpack.c.bf16 %v5406_v59, %v5403_v57  ;;  %v5502_v19 = vsub.f32 %v5500_v6, %v5501_v9 }
 0x6a0   : > { %7740 = vmatpush3.bf16.msra.mxu0 %v7737_v48  ;;  %7700 = vmatpush3.bf16.msra.mxu1 %v8459_v4  ;;  %v5395_v4 = vsel %vm1633_vm3, %v5393_v27, %v5394_v28  ;;  %v8646_v12 = vand.u32 4294901760, %v5400_v8  ;;  %v8675_v48 = vpack.c.bf16 %v5962_v46, %v5959_v45  ;;  %v6056_v27 = vsub.f32 %v4251_v44, %v5962_v46 }
 0x6a1   : > { %7282 = vmatprep.mubr.f32.mxu1 %v4404_v23  ;;  %7337 = vmatprep.mubr.f32.mxu0 %v8524_v54  ;;  %v5398_v56 = vsel %vm4257_vm8, %v5395_v4, 0  ;;  %v5494_v54 = vand.u32 4294901760, %v8640_v2  ;;  %v5503_v31 = vand.u32 4294901760, %v5502_v19  ;;  %v8677_v28 = vpack.c.bf16 %v5968_v50, %v5965_v20 }
 0x6a2   : > { %7742 = vmatprep.subr.bf16.mxu0 %v7741_v26  ;;  %7702 = vmatprep.subr.bf16.mxu1 %v8462_v10  ;;  %v8628_v61 = vand.u32 4294901760, %v5398_v56  ;;  %v6064_v59 = vand.u32 4294901760, %v6063_v55 }
 0x6a3   : > { %v5495_v18 = vsub.f32 %v8640_v2, %v5494_v54 }
 0x6a4   : > { %7744 = vmatpush3.bf16.msra.mxu0 %v7741_v26  ;;  %7704 = vmatpush3.bf16.msra.mxu1 %v8462_v10  ;;  %v7753_v10 = vpack.c.bf16 %v4964_v14, %v4957_v13  ;;  %v5472_v7 = vsub.f32 %v5398_v56, %v8628_v61  ;;  %v5507_v13 = vsub.f32 %v4247_v62, %v5409_v3 }
 0x6a5   : > { %7746 = vmatprep.subr.bf16.mxu0 %v8543_v25  ;;  %v5514_v14 = vsub.f32 %v4248_v51, %v5412_v5  ;;  %v6049_v26 = vsub.f32 %v4250_v43, %v5959_v45  ;;  %7818 = vmatprep.subr.bf16.mxu1 %v8675_v48  ;;  %v6070_v56 = vsub.f32 %v4253_v49, %v5968_v50 }
 0x6a6   : > { %v5473_v16 = vand.u32 4294901760, %v5472_v7  ;;  %v5508_v23 = vand.u32 4294901760, %v5507_v13  ;;  %v6065_v51 = vsub.f32 %v6063_v55, %v6064_v59 }
 0x6a7   : > { %7283 = vmatmul.mubr.f32.vlgmr.msra.gmra.mrb[6].mxu1 %v4414_v24  ;;  %7338 = vmatmul.mubr.f32.vlgmr.msra.gmra.mrb[2].mxu0 %v8552_v0  ;;  %v5515_v24 = vand.u32 4294901760, %v5514_v14  ;;  %v5496_v0 = vand.u32 4294901760, %v5495_v18  ;;  %v6050_v4 = vand.u32 4294901760, %v6049_v26 }
 0x6a8   : > { %7748 = vmatpush3.bf16.msra.mxu0 %v8543_v25  ;;  %7348 = vmatprep.mubr.f32.mxu0 %v4936_v21  ;;  %v5482_v21 = vsub.f32 %v5400_v8, %v8646_v12  ;;  %v5474_v1 = vsub.f32 %v5472_v7, %v5473_v16  ;;  %v5509_v32 = vsub.f32 %v5507_v13, %v5508_v23 }
 0x6a9   : > { %7750 = vmatprep.subr.bf16.mxu0 %v8566_v41  ;;  %v7777_v30 = vpack.c.bf16 %v5503_v31, %v5496_v0  ;;  %v7805_v42 = vpack.c.bf16 %v5515_v24, %v5508_v23  ;;  %7820 = vmatpush3.bf16.msra.mxu1 %v8675_v48  ;;  %v6051_v52 = vsub.f32 %v6049_v26, %v6050_v4 }
 0x6aa   : > { %v5475_v33 = vand.u32 4294901760, %v5474_v1  ;;  %v5510_v35 = vand.u32 4294901760, %v5509_v32  ;;  %7822 = vmatprep.subr.bf16.mxu1 %v8677_v28 }
 0x6ab   : > { %v6052_v57 = vand.u32 4294901760, %v6051_v52 }
 0x6ac   : > { %7752 = vmatpush3.bf16.msra.mxu0 %v8566_v41 }
 0x6ad   : > { %7754 = vmatprep.subr.bf16.mxu0 %v7753_v10  ;;  %7824 = vmatpush3.bf16.msra.mxu1 %v8677_v28 }
 0x6af   : > { %7349 = vmatmul.mubr.f32.vlgmr.msra.gmra.mrb[2].mxu0 %v4946_v39  ;;  %v7785_v39 = vpack.c.bf16 %v5500_v6, %v8640_v2  ;;  %v6066_v2 = vand.u32 4294901760, %v6065_v51  ;;  %v7833_v6 = vpack.c.bf16 %v6056_v27, %v6049_v26 }
 0x6b0   : > { %7756 = vmatpush3.bf16.msra.mxu0 %v7753_v10  ;;  %7359 = vmatprep.mubr.f32.mxu0 %v8511_v60  ;;  %v6057_v10 = vand.u32 4294901760, %v6056_v27 }
 0x6b1   : > { %7758 = vmatprep.subr.bf16.mxu0 %v7757_v58 }
 0x6b2   : > { %v6058_v53 = vsub.f32 %v6056_v27, %v6057_v10  ;;  %v7849_v8 = vpack.c.bf16 %v6057_v10, %v6050_v4 }
 0x6b4   : > { %7760 = vmatpush3.bf16.msra.mxu0 %v7757_v58  ;;  %v6059_v58 = vand.u32 4294901760, %v6058_v53 }
 0x6b5   : > { %7762 = vmatprep.subr.bf16.mxu0 %v8543_v25 }
 0x6b6   : > { %v7825_v62 = vpack.c.bf16 %v6059_v58, %v6052_v57 }
 0x6b7   : > { %7360 = vmatmul.mubr.f32.vlgmr.msra.gmra.mrb[2].mxu0 %v8528_v15 }
 0x6b8   : > { %7764 = vmatpush3.bf16.msra.mxu0 %v8543_v25  ;;  %7370 = vmatprep.mubr.f32.mxu0 %v8511_v60  ;;  %v5483_v25 = vand.u32 4294901760, %v5482_v21  ;;  %v5516_v60 = vsub.f32 %v5514_v14, %v5515_v24 }
 0x6b9   : > { %7766 = vmatprep.subr.bf16.mxu0 %v8566_v41  ;;  %7826 = vmatprep.subr.bf16.mxu1 %v7825_v62 }
 0x6ba   : > { %v5484_v34 = vsub.f32 %v5482_v21, %v5483_v25  ;;  %v5517_v36 = vand.u32 4294901760, %v5516_v60 }
 0x6bc   : > { %7768 = vmatpush3.bf16.msra.mxu0 %v8566_v41  ;;  %v5485_v37 = vand.u32 4294901760, %v5484_v34  ;;  %v7781_v38 = vpack.c.bf16 %v5517_v36, %v5510_v35  ;;  %v7801_v41 = vpack.c.bf16 %v5501_v9, %v5494_v54 }
 0x6bd   : > { %7770 = vmatprep.subr.bf16.mxu0 %v7769_v17 }
 0x6bf   : > { %7371 = vmatmul.mubr.f32.vlgmr.msra.gmra.mrb[2].mxu0 %v8528_v15  ;;  %v7789_v15 = vpack.c.bf16 %v5514_v14, %v5507_v13  ;;  %v6626_v13 = vld [vmem:[%s8774_s12] ss:$0 sm:$0xff] }
 0x6c0   : > { %7772 = vmatpush3.bf16.msra.mxu0 %v7769_v17  ;;  %7381 = vmatprep.mubr.f32.mxu0 %v5475_v33 }
 0x6c1   : > { %7774 = vmatprep.subr.bf16.mxu0 %v7773_v29 }
 0x6c4   : > { %7776 = vmatpush3.bf16.msra.mxu0 %v7773_v29 }
 0x6c5   : > { %7778 = vmatprep.subr.bf16.mxu0 %v7777_v30 }
 0x6c7   : > { %7382 = vmatmul.mubr.f32.vlgmr.msra.gmra.mrb[2].mxu0 %v5485_v37 }
 0x6c8   : > { %7780 = vmatpush3.bf16.msra.mxu0 %v7777_v30  ;;  %7392 = vmatprep.mubr.f32.mxu0 %v8628_v61 }
 0x6c9   : > { %7782 = vmatprep.subr.bf16.mxu0 %v7781_v38 }
 0x6cc   : > { %7784 = vmatpush3.bf16.msra.mxu0 %v7781_v38 }
 0x6cd   : > { %7786 = vmatprep.subr.bf16.mxu0 %v7785_v39 }
 0x6cf   : > { %7393 = vmatmul.mubr.f32.vlgmr.msra.gmra.mrb[2].mxu0 %v8646_v12 }
 0x6d0   : > { %7788 = vmatpush3.bf16.msra.mxu0 %v7785_v39  ;;  %7403 = vmatprep.mubr.f32.mxu0 %v5472_v7  ;;  %v7837_v7 = vpack.c.bf16 %v6070_v56, %v6063_v55  ;;  %v4263_v39 = vpop.xlane.xlu1 %4262 }
 0x6d1   : > { %7790 = vmatprep.subr.bf16.mxu0 %v7789_v15  ;;  %vm4265_vm11 = vcmp.gt.f32.partialorder %v4263_v39, 0.0 }
 0x6d2   : > { %v6623_v47 = vsel %vm4265_vm11, 1.0, %v8105_v11 }
 0x6d4   : > { %7792 = vmatpush3.bf16.msra.mxu0 %v7789_v15  ;;  %v6627_v15 = vld [vmem:[%s8776_s14] ss:$0 sm:$0xff] }
 0x6d5   : > { %7794 = vmatprep.subr.bf16.mxu0 %v7769_v17 }
 0x6d7   : > { %7404 = vmatmul.mubr.f32.vlgmr.msra.gmra.mrb[2].mxu0 %v5482_v21 }
 0x6d8   : > { %7796 = vmatpush3.bf16.msra.mxu0 %v7769_v17  ;;  %7414 = vmatprep.mubr.f32.mxu0 %v5473_v16 }
 0x6d9   : > { %7798 = vmatprep.subr.bf16.mxu0 %v7773_v29 }
 0x6dc   : > { %7800 = vmatpush3.bf16.msra.mxu0 %v7773_v29 }
 0x6dd   : > { %7802 = vmatprep.subr.bf16.mxu0 %v7801_v41 }
 0x6df   : > { %7415 = vmatmul.mubr.f32.vlgmr.msra.gmra.mrb[2].mxu0 %v5483_v25 }
 0x6e0   : > { %7804 = vmatpush3.bf16.msra.mxu0 %v7801_v41  ;;  %7425 = vmatprep.mubr.f32.mxu0 %v8628_v61  ;;  %v4260_v41 = vpop.xlane.xlu0 %4259 }
 0x6e1   : > { %7806 = vmatprep.subr.bf16.mxu0 %v7805_v42  ;;  %vm4264_vm12 = vcmp.gt.f32.partialorder %v4260_v41, 0.0 }
 0x6e2   : > { %v6622_v20 = vsel %vm4264_vm12, 1.0, %v8105_v11 }
 0x6e4   : > { %7808 = vmatpush3.bf16.msra.mxu0 %v7805_v42 }
 0x6e5   : > { %7810 = vmatprep.subr.bf16.mxu0 %v7769_v17 }
 0x6e7   : > { %7426 = vmatmul.mubr.f32.vlgmr.msra.gmra.mrb[2].mxu0 %v8646_v12 }
 0x6e8   : > { %7812 = vmatpush3.bf16.msra.mxu0 %v7769_v17  ;;  %7436 = vmatprep.mubr.f32.mxu0 %v8628_v61  ;;  %v6071_v61 = vand.u32 4294901760, %v6070_v56 }
 0x6e9   : > { %7814 = vmatprep.subr.bf16.mxu0 %v7773_v29 }
 0x6ea   : > { %v6072_v63 = vsub.f32 %v6070_v56, %v6071_v61  ;;  %v7853_v54 = vpack.c.bf16 %v6071_v61, %v6064_v59 }
 0x6ec   : > { %7816 = vmatpush3.bf16.msra.mxu0 %v7773_v29  ;;  %v6073_v3 = vand.u32 4294901760, %v6072_v63 }
 0x6ee   : > { %v7829_v5 = vpack.c.bf16 %v6073_v3, %v6066_v2 }
 0x6ef   : > { %7437 = vmatmul.mubr.f32.vlgmr.msra.gmra.mrb[2].mxu0 %v8646_v12 }
 0x77a   : > { %v7284_v9 = vpop.f32.mrb[6].mxu1 }
 0x77b   : > { %v4679_v12 = vpop.f32.mrb[7].mxu1 }
 0x7c2   : > { %v7438_v14 = vpop.f32.mrb[2].mxu0 }
 0x7c3   : > { %v7869_v16 = vadd.f32 %v7438_v14, %v7284_v9  ;;  %v5920_v17 = vpop.f32.mrb[3].mxu0 }
 0x7c4   : > { %v7870_v18 = vadd.f32 %v5920_v17, %v4679_v12 }
 0x7c5   : > { %v5939_v19 = vadd.f32 %v7869_v16, %v6626_v13 }
 0x7c6   : > { %v5938_v21 = vadd.f32 %v7870_v18, %v6626_v13 }
 0x7c7   : > { %vm5941_vm9 = vcmp.gt.f32.partialorder %v5939_v19, 0.0  ;;  %v5943_v23 = vmul.f32 0.01, %v5939_v19 }
 0x7c8   : > { %vm5940_vm10 = vcmp.gt.f32.partialorder %v5938_v21, 0.0  ;;  %v5942_v24 = vmul.f32 0.01, %v5938_v21 }
 0x7c9   : > { %v5945_v1 = vsel %vm5941_vm9, %v5939_v19, %v5943_v23 }
 0x7ca   : > { %v5956_v29 = vsel %vm4257_vm8, %v5945_v1, 0  ;;  %v5944_v0 = vsel %vm5940_vm10, %v5938_v21, %v5942_v24 }
 0x7cb   : > { %v6037_v31 = vand.u32 4294901760, %v5956_v29  ;;  %v5953_v25 = vsel %vm4257_vm8, %v5944_v0, 0 }
 0x7cc   : > { %v6027_v32 = vand.u32 4294901760, %v5953_v25 }
 0x7cd   : > { %v6038_v60 = vsub.f32 %v5956_v29, %v6037_v31 }
 0x7ce   : > { %v6028_v33 = vsub.f32 %v5953_v25, %v6027_v32 }
 0x7cf   : > { %v6039_v30 = vand.u32 4294901760, %v6038_v60 }
 0x7d0   : > { %v6029_v34 = vand.u32 4294901760, %v6028_v33 }
 0x7d1   : > { %v6040_v35 = vsub.f32 %v6038_v60, %v6039_v30 }
 0x7d2   : > { %v6030_v36 = vsub.f32 %v6028_v33, %v6029_v34 }
 0x7d3   : > { %v6041_v38 = vand.u32 4294901760, %v6040_v35 }
 0x7d4   : > { %v6031_v37 = vand.u32 4294901760, %v6030_v36 }
 0x7d6   : > { %7447 = vmatprep.mubr.f32.mxu1 %v6031_v37 }
 0x7d7   : > { %7448 = vmatmul.mubr.f32.vlgmr.msra.gmra.mrb[8].mxu1 %v6041_v38 }
 0x7d8   : > { %7828 = vmatpush3.bf16.msra.mxu1 %v7825_v62  ;;  %7458 = vmatprep.mubr.f32.mxu1 %v6027_v32 }
 0x7d9   : > { %7830 = vmatprep.subr.bf16.mxu1 %v7829_v5 }
 0x7dc   : > { %7832 = vmatpush3.bf16.msra.mxu1 %v7829_v5 }
 0x7dd   : > { %7834 = vmatprep.subr.bf16.mxu1 %v7833_v6 }
 0x7df   : > { %7459 = vmatmul.mubr.f32.vlgmr.msra.gmra.mrb[8].mxu1 %v6037_v31 }
 0x7e0   : > { %7836 = vmatpush3.bf16.msra.mxu1 %v7833_v6  ;;  %7469 = vmatprep.mubr.f32.mxu1 %v6028_v33 }
 0x7e1   : > { %7838 = vmatprep.subr.bf16.mxu1 %v7837_v7 }
 0x7e4   : > { %7840 = vmatpush3.bf16.msra.mxu1 %v7837_v7 }
 0x7e5   : > { %7842 = vmatprep.subr.bf16.mxu1 %v8675_v48 }
 0x7e7   : > { %7470 = vmatmul.mubr.f32.vlgmr.msra.gmra.mrb[8].mxu1 %v6038_v60 }
 0x7e8   : > { %7844 = vmatpush3.bf16.msra.mxu1 %v8675_v48  ;;  %7480 = vmatprep.mubr.f32.mxu1 %v6029_v34 }
 0x7e9   : > { %7846 = vmatprep.subr.bf16.mxu1 %v8677_v28 }
 0x7ec   : > { %7848 = vmatpush3.bf16.msra.mxu1 %v8677_v28 }
 0x7ed   : > { %7850 = vmatprep.subr.bf16.mxu1 %v7849_v8 }
 0x7ef   : > { %7481 = vmatmul.mubr.f32.vlgmr.msra.gmra.mrb[8].mxu1 %v6039_v30 }
 0x7f0   : > { %7852 = vmatpush3.bf16.msra.mxu1 %v7849_v8  ;;  %7491 = vmatprep.mubr.f32.mxu1 %v6027_v32 }
 0x7f1   : > { %7854 = vmatprep.subr.bf16.mxu1 %v7853_v54 }
 0x7f4   : > { %7856 = vmatpush3.bf16.msra.mxu1 %v7853_v54 }
 0x7f5   : > { %7858 = vmatprep.subr.bf16.mxu1 %v8675_v48 }
 0x7f7   : > { %7492 = vmatmul.mubr.f32.vlgmr.msra.gmra.mrb[8].mxu1 %v6037_v31 }
 0x7f8   : > { %7860 = vmatpush3.bf16.msra.mxu1 %v8675_v48  ;;  %7502 = vmatprep.mubr.f32.mxu1 %v6027_v32 }
 0x7f9   : > { %7862 = vmatprep.subr.bf16.mxu1 %v8677_v28 }
 0x7fc   : > { %7864 = vmatpush3.bf16.msra.mxu1 %v8677_v28 }
 0x7ff   : > { %7503 = vmatmul.mubr.f32.vlgmr.msra.gmra.mrb[8].mxu1 %v6037_v31 }
 0x8d2   : > { %v7504_v42 = vpop.f32.mrb[8].mxu1 }
 0x8d3   : > { %v7871_v43 = vadd.f32 %v7504_v42, %v6627_v15  ;;  %v6476_v44 = vpop.f32.mrb[9].mxu1 }
 0x8d4   : > { %v7872_v45 = vadd.f32 %v6627_v15, %v6476_v44 }
 0x8d5   : > { %v6487_v46 = vadd.f32 %v7871_v43, %v8423_v22 }
 0x8d6   : > { %v6486_v49 = vadd.f32 %v7872_v45, %v8425_v40 }
 0x8d7   : > { %v6489_v50 = vmul.f32 %v6623_v47, %v6487_v46 }
 0x8d8   : > { %v6488_v48 = vmul.f32 %v6622_v20, %v6486_v49 }
 0x8d9   : > { %6491 = vst.msk [vmem:[%s515_s28 + $0x8] sm:$0xff] %vm4257_vm8, %v6489_v50  ;;  %6493 = vst.msk [vmem:[#allocation2 + $0x8] sm:$0xff] %vm4257_vm8, %v6489_v50 }
 0x8da   : > { %6490 = vst.msk [vmem:[%s515_s28] sm:$0xff] %vm4257_vm8, %v6488_v48  ;;  %6492 = vst.msk [vmem:[#allocation2] sm:$0xff] %vm4257_vm8, %v6488_v48 }
 0x8db   : > { %8054 = shalt.err (!%p8051_p3)
}
 0x8dc   : > { %s8055_s20 = scalar_lea.hbm %s8708_s2, 256  ;;  %s8059_s3 = scalar_lea.hbm %s8777_s15, 512 }
 0x8dd   : > { %p8056_p4 = scmp.ne.s32.totalorder %s8708_s2, %s8055_s20  ;;  %p8060_p9 = scmp.lt.u32.totalorder %s8708_s2, %s8777_s15 }
 0x8de   : > { %p8061_p10 = scmp.lt.u32.totalorder %s8059_s3, %s8055_s20  ;;  %p8063_p12 = scmp.lt.u32.totalorder %s8055_s20, %s8708_s2 }
 0x8df   : > { %p8057_p7 = pnand %p8056_p4, %p8232_p5 }
 0x8e0   : > { %p8062_p11 = por %p8061_p10, %p8060_p9 }
 0x8e1   : > { %p8058_p8 = pneg %p8057_p7 }
 0x8e2   : > { %p8064_p13 = por %p8063_p12, %p8062_p11 }
 0x8e4   : > { %p8065_p0 = pnand %p8064_p13, %p8058_p8 }
 0x8e6   : > { %8068 = shalt.err (!%p8065_p0)
}
 0x8e7   : > { %s8107_s26 = smov 128   ;;  %s8108_s1 = smov 8   ;;  %v6494_v11 = vld [vmem:[#allocation2] ss:$2 sm:$0xff]  ;;  %v6496_v22 = vld [vmem:[#allocation2 + $0x1] ss:$2 sm:$0xff] }
 0x8e8   : > { %7991 = dma.vmem_to_hbm [thread:$0]  (%p8232_p5), %s8710_s29, 256, %s8708_s2, %s8716_s25, %s8107_s26, %s8107_s26, %s8108_s1   ;;  %v6497_v40 = vadd.f32 %v6496_v22, %v6494_v11 }
 0x8e9   : > { %s6614_s4 = sshll.u32 %s8244_s18, 3 }
 0x8ea   : > { %s530_s20 = scalar_lea.vmem %s8778_s16, %s6614_s4  ;;  %v6498_v26 = vmul.f32 0.5, %v6497_v40 }
 0x8ec   : > { %6499 = vst.msk [vmem:[%s530_s20] sm:$0xff] %vm4257_vm8, %v6498_v26 }
 0x8ed PF: > { %p7997_p1 = scmp.ge.s32.totalorder %s8103_s24, 2  ;;  %s6536_s3 = sand.u32 1, %s8091_s21  }
 0x8ee   : > { %s6537_s0 = scalar_lea.sflag [#allocation4], %s6536_s3 }
 0x8ef   : > { %p7994_p2 = pnand %p7997_p1, %p8236_p6 }
 0x8f1   : > { %8086 = dma.done.wait (!%p7994_p2), %s6537_s0, 256  }
 0x8f2   : > { %8088 = vsyncadd (!%p7994_p2), %s6537_s0, 4294967040  ;;  %p27_p5 = scmp.ge.s32.totalorder %s8219_s27, 4   ;;  %s8793_s21 = smov %s8095_s22 }
 0x8f3   : > { %s8794_s22 = smov %s8099_s23  ;;  %s8795_s23 = smov %s8230_s30 }
 0x8f4   : > { %s8796_s24 = smov %s8219_s27  ;;  %29 = sbr.rel (!%p27_p5) target bundleno = 10 (0xa), region = 128 }
 0x8fb   :  { %6549 = vsyncpa [#allocation4], 1 }
 0x8fc   :  { %6551 = vsyncpa [#allocation4 + $0x1], 1 }

// kernel: _lambda_.4
= control target key start
LH: loop header
LB: loop body
LE: loop exit
PB: predicated region body
PF: predicated region fallthrough
CT: control target
= control target key end

     0   :  { %s10175_s0 = inlined_call_operand.vmem [shape: f32[2,8,32], index: 0, kind: input, shape index: {}]   ;;  %s10176_s1 = inlined_call_operand.vmem [shape: f32[1,32], index: 1, kind: input, shape index: {}]   ;;  %s10177_s2 = inlined_call_operand.vmem [shape: f32[1,32], index: 2, kind: input, shape index: {}]   ;;  %s10178_s3 = inlined_call_operand.vmem [shape: f32[96,32], index: 3, kind: input, shape index: {}]   ;;  %s10179_s4 = inlined_call_operand.vmem [shape: f32[1,32], index: 4, kind: input, shape index: {}]   ;;  %s10180_s5 = inlined_call_operand.vmem [shape: f32[32,32], index: 5, kind: input, shape index: {}]   ;;  %s10181_s6 = inlined_call_operand.vmem [shape: f32[1,32], index: 6, kind: input, shape index: {}]   ;;  %s10182_s7 = inlined_call_operand.vmem [shape: f32[96,64], index: 7, kind: input, shape index: {}]   ;;  %s10183_s8 = inlined_call_operand.vmem [shape: f32[1,64], index: 8, kind: input, shape index: {}]   ;;  %s10184_s9 = inlined_call_operand.vmem [shape: f32[1,64], index: 9, kind: input, shape index: {}]   ;;  %s10185_s10 = inlined_call_operand.vmem [shape: f32[1,64], index: 10, kind: input, shape index: {}]   ;;  %s10186_s11 = inlined_call_operand.vmem [shape: f32[192,64], index: 11, kind: input, shape index: {}]   ;;  %s10187_s12 = inlined_call_operand.vmem [shape: f32[1,64], index: 12, kind: input, shape index: {}]   ;;  %s10188_s13 = inlined_call_operand.vmem [shape: f32[64,64], index: 13, kind: input, shape index: {}]   ;;  %s10189_s14 = inlined_call_operand.vmem [shape: f32[1,64], index: 14, kind: input, shape index: {}]   ;;  %s10190_s15 = inlined_call_operand.hbm [shape: f32[2,8,64], index: 15, kind: output, shape index: {0}]   ;;  %s10191_s16 = inlined_call_operand.vmem [shape: f32[2,4,64], index: 16, kind: output, shape index: {1}]  }
   0x1   :  { %10195 = sst [smem:[#allocation9_spill]] %s10175_s0 }
   0x2   :  { %10196 = sst [smem:[#allocation10_spill]] %s10176_s1 }
   0x3   :  { %10197 = sst [smem:[#allocation11_spill]] %s10177_s2 }
   0x4   :  { %22 = vsyncpa [#allocation4], 0 }
   0x5   :  { %24 = vsyncpa [#allocation4 + $0x1], 0  ;;  %s8543_s21 = smov 0   ;;  %s8545_s22 = smov 0  }
   0x6   :  { %s8547_s23 = smov 0   ;;  %s8549_s24 = smov 0  }
   0x7 LB: > { %10198 = sst [smem:[#allocation6_spill]] %s8448_s23  ;;  %s8564_s25 = sadd.s32 4294967295, %s8452_s24   ;;  %s8452_s24 = sphi %s8549_s24, %s10206_s24   ;;  %s8448_s23 = sphi %s8547_s23, %s10208_s23   ;;  %s8444_s22 = sphi %s8545_s22, %s10210_s22   ;;  %s8440_s21 = sphi %s8543_s21, %s10209_s21  }
   0x8   : > { %s6438_s26 = sadd.s32 4294967294, %s8452_s24   ;;  %s8568_s27 = sadd.s32 1, %s8452_s24  }
   0x9   : > { %10199 = sst [smem:[#allocation7_spill]] %s8568_s27  ;;  %s357_s28 = sadd.s32 1, %s8448_s23 }
   0xa   : > { %s354_s29 = ssub.s32 %s8452_s24, %s8568_s27  ;;  %p367_p0 = scmp.ne.s32.totalorder %s8448_s23, %s8444_s22 }
   0xb   : > { %p355_p1 = scmp.eq.s32.totalorder %s354_s29, 0  ;;  %p368_p2 = scmp.eq.s32.totalorder %s8564_s25, 1 }
   0xc   : > { %p373_p3 = scmp.ne.s32.totalorder %s8444_s22, %s8440_s21  ;;  %p374_p4 = scmp.eq.s32.totalorder %s6438_s26, 1 }
   0xd   : > { %s8579_s30 = scalar_select %p355_p1, %s8448_s23, %s357_s28  }
   0xe   : > { %p8581_p5 = por %p368_p2, %p367_p0  ;;  %p8585_p6 = por %p374_p4, %p373_p3 }
   0xf   : > { %10200 = sst [smem:[#allocation8_spill]] %s8579_s30  ;;  %p6441_p7 = scmp.ge.s32.totalorder %s8452_s24, 1 }
  0x10   : > { %p467_p8 = scmp.lt.s32.totalorder %s8452_s24, 3 }
  0x12   : > { %p468_p9 = pnand %p6441_p7, %p467_p8 }
  0x13   : > { %p520_p10 = scmp.lt.s32.totalorder (!%p468_p9), %s8564_s25, 1  ;;  %vm550_vm0 = vcmask (!%p468_p9), 261120   ;;  %s10203_s28 = sld [smem:[#allocation9_spill]] (!%p468_p9)  ;;  %v535_v7 = vld [vmem:[%s10178_s3 + $0x20] sm:$0xff] (!%p468_p9)  ;;  %v536_v8 = vld [vmem:[%s10178_s3 + $0x28] sm:$0xff] (!%p468_p9)  ;;  %v537_v13 = vld [vmem:[%s10178_s3 + $0x30] sm:$0xff] (!%p468_p9) }
  0x14   : > { %471 = sbr.rel (%p468_p9) target bundleno = 2161 (0x871), region = 80  ;;  %v600_v9 = vand.u32 (!%p468_p9), 4294901760, %v535_v7  ;;  %v603_v10 = vand.u32 (!%p468_p9), 4294901760, %v536_v8  ;;  %v538_v14 = vld [vmem:[%s10178_s3 + $0x38] sm:$0xff] (!%p468_p9)  ;;  %v606_v17 = vand.u32 (!%p468_p9), 4294901760, %v537_v13  ;;  %v8454_v28 = vmov (!%p468_p9), 0.0|0.0  }
  0x15   : > { %v609_v18 = vand.u32 (!%p468_p9), 4294901760, %v538_v14  ;;  %7810 = vmatprep.subr.bf16.mxu1 (!%p468_p9), %v8454_v28  ;;  %7804 = vmatprep.subr.bf16.mxu0 (!%p468_p9), %v8454_v28  ;;  %vm8455_vm1 = vmmov (!%p468_p9), 0   ;;  %v8456_v32 = vmov (!%p468_p9), 0.0   ;;  %s10204_s1 = sld [smem:[#allocation10_spill]] (!%p468_p9)  ;;  %s10205_s2 = sld [smem:[#allocation11_spill]] (!%p468_p9)  ;;  %v8666_v50 = vld [vmem:[%s10178_s3] sm:$0xff] (!%p468_p9) }
  0x16   : > { %v8611_v11 = vsub.f32 (!%p468_p9), %v535_v7, %v600_v9  ;;  %v8613_v12 = vsub.f32 (!%p468_p9), %v536_v8, %v603_v10  ;;  %v8625_v21 = vsub.f32 (!%p468_p9), %v537_v13, %v606_v17  ;;  %v8631_v27 = vpack.c.bf16 (!%p468_p9), %v603_v10, %v600_v9  ;;  %6905 = vmatprep.mubr.msk.f32.mxu1 (!%p468_p9), %vm8455_vm1, %v8456_v32  ;;  %v8671_v51 = vld [vmem:[%s10178_s3 + $0x8] sm:$0xff] (!%p468_p9)  ;;  %v8686_v59 = vld [vmem:[%s10178_s3 + $0x10] sm:$0xff] (!%p468_p9)  ;;  %v8691_v60 = vld [vmem:[%s10178_s3 + $0x18] sm:$0xff] (!%p468_p9)  ;;  %s511_s30 = sand.u32 (!%p468_p9), 1, %s8444_s22  }
  0x17   : > { %v8627_v22 = vsub.f32 (!%p468_p9), %v538_v14, %v609_v18  ;;  %6894 = vmatprep.mubr.msk.f32.mxu0 (!%p468_p9), %vm8455_vm1, %v8456_v32  ;;  %v8645_v36 = vpack.c.bf16 (!%p468_p9), %v609_v18, %v606_v17  ;;  %vm588_vm2 = vcmask (!%p468_p9), 1040384   ;;  %v1087_v53 = vand.u32 (!%p468_p9), 4294901760, %v8666_v50  ;;  %s6442_s20 = sshll.u32 (!%p468_p9), %s511_s30, 3 }
  0x18   : > { %v681_v15 = vand.u32 (!%p468_p9), 4294901760, %v8611_v11  ;;  %v688_v16 = vand.u32 (!%p468_p9), 4294901760, %v8613_v12  ;;  %v695_v25 = vand.u32 (!%p468_p9), 4294901760, %v8625_v21  ;;  %7806 = vmatpush3.bf16.msra.mxu0 (!%p468_p9), %v8631_v27  ;;  %v7817_v37 = vpack.c.bf16 (!%p468_p9), %v8613_v12, %v8611_v11  ;;  %s513_s26 = scalar_lea.vmem (!%p468_p9), [#allocation3], %s6442_s20 }
  0x19   : > { %v702_v26 = vand.u32 (!%p468_p9), 4294901760, %v8627_v22  ;;  %7807 = vmatprep.subr.bf16.mxu0 (!%p468_p9), %v8454_v28  ;;  %v7820_v38 = vpack.c.bf16 (!%p468_p9), %v8627_v22, %v8625_v21  ;;  %vm593_vm3 = vcmask (!%p468_p9), 1046528   ;;  %v1090_v56 = vand.u32 (!%p468_p9), 4294901760, %v8671_v51 }
  0x1a   : > { %v682_v19 = vsub.f32 (!%p468_p9), %v8611_v11, %v681_v15  ;;  %v689_v20 = vsub.f32 (!%p468_p9), %v8613_v12, %v688_v16  ;;  %v696_v30 = vsub.f32 (!%p468_p9), %v8625_v21, %v695_v25  ;;  %v8653_v39 = vpack.c.bf16 (!%p468_p9), %v688_v16, %v681_v15  ;;  %v8768_v21 = vld [vmem:[%s10178_s3 + $0x48] sm:$0xff] (!%p468_p9) }
  0x1b   : > { %s8593_s18 = scalar_select %p520_p10, %s8564_s25, 1  ;;  %v703_v31 = vsub.f32 %v8627_v22, %v702_v26  ;;  %v8655_v40 = vpack.c.bf16 %v702_v26, %v695_v25  ;;  %v6446_v45 = vld [vmem:[%s10204_s1] ss:$0 sm:$0xff]  ;;  %v8697_v62 = vsub.f32 %v8666_v50, %v1087_v53  ;;  %vm1571_vm4 = vcmask 1045504  }
  0x1c   : > { %v683_v23 = vand.u32 4294901760, %v682_v19  ;;  %v690_v24 = vand.u32 4294901760, %v689_v20  ;;  %v697_v33 = vand.u32 4294901760, %v696_v30  ;;  %7809 = vmatpush3.bf16.msra.mxu0 %v8645_v36  ;;  %v6447_v47 = vld [vmem:[%s10205_s2] ss:$0 sm:$0xff]  ;;  %vm4101_vm7 = vcmask 523264  }
  0x1d   : > { %s6443_s19 = sshll.u32 %s8593_s18, 3  ;;  %v704_v34 = vand.u32 4294901760, %v703_v31  ;;  %7816 = vmatprep.subr.bf16.mxu0 %v8454_v28  ;;  %v1581_v31 = vand.u32 4294901760, %v8768_v21  ;;  %s8457_s1 = smov [#allocation3]  }
  0x1e   : > { %s523_s29 = scalar_lea.vmem %s10203_s28, %s6443_s19  ;;  %v7811_v29 = vpack.c.bf16 %v690_v24, %v683_v23  ;;  %s6457_s19 = sshll.u32 %s8564_s25, 7 }
  0x1f   : > { %v8599_v0 = vld [vmem:[%s523_s29] sm:$0xff]  ;;  %v7814_v35 = vpack.c.bf16 %v704_v34, %v697_v33  ;;  %v8782_v34 = vld [vmem:[%s10178_s3 + $0x50] sm:$0xff]  ;;  %s6352_s28 = sshll.u32 %s513_s26, 4  ;;  %s10127_s27 = scalar_lea.hbm %s10190_s15, %s6457_s19  ;;  %s10129_s28 = int_to_ptr.vmem [resolvable:$true] %s6352_s28 }
  0x20   : > { %v557_v1 = vsel %vm550_vm0, %v8599_v0, 0.0  ;;  %7812 = vmatpush3.bf16.msra.mxu1 %v7811_v29  ;;  %v8763_v29 = vld [vmem:[%s10178_s3 + $0x40] sm:$0xff]  ;;  %s6335_s25 = scalar_lea.sflag [#allocation4], %s511_s30  ;;  %s8390_s20 = scalar_lea.vmem %s10129_s28, 128 }
  0x21   : > { %558 = vadd.xlane.f32.xlu0 %v557_v1  ;;  %7813 = vmatprep.subr.bf16.mxu1 %v8454_v28  ;;  %v8703_v1 = vsub.f32 %v8671_v51, %v1090_v56  ;;  %v1578_v30 = vand.u32 4294901760, %v8763_v29  ;;  %p8391_p11 = scmp.ne.s32.totalorder %s10129_s28, %s8390_s20  ;;  %s8394_s2 = sshll.u32 %s8457_s1, 4  ;;  %s8395_s2 = int_to_ptr.vmem [resolvable:$false] %s8394_s2 }
  0x22   : > { %s8396_s19 = scalar_lea.vmem %s8395_s2, 256  ;;  %p8397_p0 = scmp.lt.s32.totalorder %s10129_s28, %s8395_s2 }
  0x23   : > { %v1175_v7 = vand.u32 4294901760, %v8703_v1  ;;  %p8392_p12 = pnand %p8391_p11, %p8581_p5  ;;  %p8398_p1 = scmp.lt.s32.totalorder %s8396_s19, %s8390_s20 }
  0x24   : > { %7815 = vmatpush3.bf16.msra.mxu1 %v7814_v35  ;;  %v8787_v35 = vld [vmem:[%s10178_s3 + $0x58] sm:$0xff] }
  0x25   : > { %7822 = vmatprep.subr.bf16.mxu1 %v8454_v28  ;;  %v1176_v13 = vsub.f32 %v8703_v1, %v1175_v7  ;;  %p8393_p13 = pneg %p8392_p12  ;;  %p8399_p2 = por %p8398_p1, %p8397_p0 }
  0x27   : > { %v1177_v18 = vand.u32 4294901760, %v1176_v13  ;;  %p8400_p3 = pnand %p8399_p2, %p8393_p13 }
  0xae   : > { %v559_v2 = vpop.xlane.xlu0 %558 }
  0xaf   : > { %v561_v3 = vmul.f32 0.03125, %v559_v2  ;;  %v1093_v2 = vand.u32 4294901760, %v8686_v59 }
  0xb1   : > { %v562_v4 = vsub.f32 %v8599_v0, %v561_v3  ;;  %v1096_v3 = vand.u32 4294901760, %v8691_v60  ;;  %v8719_v8 = vsub.f32 %v8686_v59, %v1093_v2 }
  0xb3   : > { %v563_v5 = vmul.f32 %v562_v4, %v562_v4  ;;  %v8724_v9 = vsub.f32 %v8691_v60, %v1096_v3  ;;  %v1182_v14 = vand.u32 4294901760, %v8719_v8 }
  0xb5   : > { %v564_v6 = vsel %vm550_vm0, %v563_v5, 0.0  ;;  %v1189_v15 = vand.u32 4294901760, %v8724_v9  ;;  %v1183_v19 = vsub.f32 %v8719_v8, %v1182_v14 }
  0xb6   : > { %565 = vadd.xlane.f32.xlu0 %v564_v6  ;;  %v1168_v6 = vand.u32 4294901760, %v8697_v62 }
  0xb7   : > { %v1190_v20 = vsub.f32 %v8724_v9, %v1189_v15  ;;  %v1184_v25 = vand.u32 4294901760, %v1183_v19 }
  0xb8   : > { %v1169_v12 = vsub.f32 %v8697_v62, %v1168_v6 }
  0xb9   : > { %v1191_v26 = vand.u32 4294901760, %v1190_v20 }
  0xba   : > { %v1170_v17 = vand.u32 4294901760, %v1169_v12 }
  0xbb   : > { %v7850_v22 = vpack.c.bf16 %v1191_v26, %v1184_v25  ;;  %v546_v25 = vld [vmem:[%s10180_s5 + $0x10] sm:$0xff]  ;;  %v547_v26 = vld [vmem:[%s10180_s5 + $0x18] sm:$0xff] }
  0xbc   : > { %v7847_v24 = vpack.c.bf16 %v1177_v18, %v1170_v17  ;;  %v544_v17 = vld [vmem:[%s10180_s5] sm:$0xff]  ;;  %v545_v18 = vld [vmem:[%s10180_s5 + $0x8] sm:$0xff] }
  0xbd   : > { %v2083_v19 = vand.u32 4294901760, %v544_v17  ;;  %v2086_v20 = vand.u32 4294901760, %v545_v18 }
 0x143   : > { %v566_v41 = vpop.xlane.xlu0 %565 }
 0x144   : > { %v567_v42 = vmul.f32 0.03125, %v566_v41  ;;  %v1587_v41 = vand.u32 4294901760, %v8787_v35 }
 0x146   : > { %v568_v43 = vadd.f32 1e-05, %v567_v42  ;;  %v7844_v42 = vpack.c.bf16 %v1096_v3, %v1093_v2  ;;  %v7865_v2 = vpack.c.bf16 %v1175_v7, %v1168_v6  ;;  %v7877_v7 = vpack.c.bf16 %v1581_v31, %v1578_v30 }
 0x148   : > { %8386 = vrsqrt.f32 %v568_v43 }
 0x152   : > { %v8387_v44 = vpop.eup %8386 }
 0x153   : > { %v570_v46 = vmul.f32 %v8387_v44, %v562_v4 }
 0x155   : > { %v577_v48 = vmul.f32 %v6446_v45, %v570_v46  ;;  %v8829_v46 = vsub.f32 %v8787_v35, %v1587_v41 }
 0x157   : > { %v584_v49 = vadd.f32 %v6447_v47, %v577_v48  ;;  %v7853_v48 = vpack.c.bf16 %v8703_v1, %v8697_v62  ;;  %v7868_v62 = vpack.c.bf16 %v1189_v15, %v1182_v14 }
 0x159   : > { %v586_v52 = vrot.slane %v584_v49, 7 }
 0x15b   : > { %v8675_v54 = vsel %vm588_vm2, 0.0, %v586_v52  ;;  %v8678_v55 = vsel %vm588_vm2, %v586_v52, 0.0 }
 0x15c   : > { %v594_v57 = vrot.slane %v8675_v54, 1  ;;  %v595_v58 = vrot.slane %v8678_v55, 1  ;;  %v1084_v23 = vsel %vm550_vm0, %v8675_v54, 0  ;;  %v1572_v49 = vrot.slane %v8675_v54, 2 }
 0x15d   : > { %v1573_v50 = vrot.slane %v8678_v55, 2  ;;  %v7856_v54 = vpack.c.bf16 %v8724_v9, %v8719_v8 }
 0x15e   : > { %v596_v61 = vsel %vm593_vm3, %v594_v57, %v595_v58 }
 0x15f   : > { %v597_v63 = vsel %vm550_vm0, %v596_v61, 0  ;;  %v1574_v55 = vsel %vm1571_vm4, %v1572_v49, %v1573_v50 }
 0x160   : > { %v8707_v4 = vand.u32 4294901760, %v597_v63 }
 0x162   : > { %v669_v5 = vsub.f32 %v597_v63, %v8707_v4  ;;  %6906 = vmatmul.mubr.f32.vlgmr.msra.gmra.mrb[0].mxu1 %v8707_v4  ;;  %v1575_v63 = vsel %vm550_vm0, %v1574_v55, 0 }
 0x163   : > { %7824 = vmatpush3.bf16.msra.mxu1 %v8631_v27  ;;  %6927 = vmatprep.mubr.msk.f32.mxu1 %vm8455_vm1, %v8456_v32 }
 0x164   : > { %7825 = vmatprep.subr.bf16.mxu1 %v8454_v28  ;;  %v670_v10 = vand.u32 4294901760, %v669_v5 }
 0x166   : > { %v671_v11 = vsub.f32 %v669_v5, %v670_v10 }
 0x167   : > { %7827 = vmatpush3.bf16.msra.mxu1 %v8645_v36 }
 0x168   : > { %7834 = vmatprep.subr.bf16.mxu1 %v8454_v28  ;;  %v672_v16 = vand.u32 4294901760, %v671_v11 }
 0x16a   : > { %6928 = vmatmul.mubr.f32.vlgmr.msra.gmra.mrb[2].mxu1 %v670_v10  ;;  %6895 = vmatmul.mubr.f32.vlgmr.msra.gmra.mrb[0].mxu0 %v672_v16  ;;  %v1646_v10 = vand.u32 4294901760, %v1575_v63 }
 0x16b   : > { %7818 = vmatpush3.bf16.msra.mxu0 %v7817_v37  ;;  %7836 = vmatpush3.bf16.msra.mxu1 %v8631_v27  ;;  %v8758_v27 = vand.u32 4294901760, %v1084_v23  ;;  %v8801_v37 = vsub.f32 %v8763_v29, %v1578_v30 }
 0x16c   : > { %7819 = vmatprep.subr.bf16.mxu0 %v8454_v28  ;;  %7837 = vmatprep.subr.bf16.mxu1 %v8454_v28  ;;  %v1647_v6 = vsub.f32 %v1575_v63, %v1646_v10 }
 0x16d   : > { %6916 = vmatprep.mubr.msk.f32.mxu0 %vm8455_vm1, %v8456_v32  ;;  %6949 = vmatprep.mubr.msk.f32.mxu1 %vm8455_vm1, %v8456_v32  ;;  %v8777_v33 = vsub.f32 %v1084_v23, %v8758_v27  ;;  %v1659_v43 = vand.u32 4294901760, %v8801_v37  ;;  %v8939_v23 = vsub.f32 %v544_v17, %v2083_v19 }
 0x16e   : > { %v1648_v8 = vand.u32 4294901760, %v1647_v6 }
 0x16f   : > { %7821 = vmatpush3.bf16.msra.mxu0 %v7820_v38  ;;  %7839 = vmatpush3.bf16.msra.mxu1 %v8645_v36  ;;  %v7841_v36 = vpack.c.bf16 %v1090_v56, %v1087_v53  ;;  %v8806_v38 = vsub.f32 %v8768_v21, %v1581_v31  ;;  %v1660_v51 = vsub.f32 %v8801_v37, %v1659_v43  ;;  %v1680_v56 = vand.u32 4294901760, %v8829_v46 }
 0x170   : > { %7828 = vmatprep.subr.bf16.mxu0 %v8454_v28  ;;  %7846 = vmatprep.subr.bf16.mxu1 %v8454_v28  ;;  %v1649_v11 = vsub.f32 %v1647_v6, %v1648_v8  ;;  %v2089_v21 = vand.u32 4294901760, %v546_v25 }
 0x171   : > { %v1666_v44 = vand.u32 4294901760, %v8806_v38  ;;  %v1661_v58 = vand.u32 4294901760, %v1660_v51  ;;  %v1681_v61 = vsub.f32 %v8829_v46, %v1680_v56  ;;  %v7889_v12 = vpack.c.bf16 %v8806_v38, %v8801_v37 }
 0x172   : > { %6917 = vmatmul.mubr.f32.vlgmr.msra.gmra.mrb[2].mxu0 %v669_v5  ;;  %6950 = vmatmul.mubr.f32.vlgmr.msra.gmra.mrb[4].mxu1 %v8707_v4  ;;  %v1650_v13 = vand.u32 4294901760, %v1649_v11  ;;  %v549_v51 = vand.u32 2147483647, %v8599_v0 }
 0x173   : > { %7830 = vmatpush3.bf16.msra.mxu0 %v8653_v39  ;;  %7848 = vmatpush3.bf16.msra.mxu1 %v7847_v24  ;;  %v1584_v39 = vand.u32 4294901760, %v8782_v34  ;;  %v1667_v52 = vsub.f32 %v8806_v38, %v1666_v44  ;;  %v1682_v5 = vand.u32 4294901760, %v1681_v61  ;;  %v7901_v15 = vpack.c.bf16 %v1666_v44, %v1659_v43 }
 0x174   : > { %7831 = vmatprep.subr.bf16.mxu0 %v8454_v28  ;;  %7849 = vmatprep.subr.bf16.mxu1 %v8454_v28  ;;  %v8941_v24 = vsub.f32 %v545_v18, %v2086_v20 }
 0x175   : > { %6938 = vmatprep.mubr.msk.f32.mxu0 %vm8455_vm1, %v8456_v32  ;;  %6971 = vmatprep.mubr.msk.f32.mxu1 %vm8455_vm1, %v8456_v32  ;;  %v8824_v45 = vsub.f32 %v8782_v34, %v1584_v39  ;;  %v1668_v59 = vand.u32 4294901760, %v1667_v52  ;;  %v7880_v9 = vpack.c.bf16 %v1587_v41, %v1584_v39  ;;  %v551_v52 = vsel %vm550_vm0, %v549_v51, 0.0 }
 0x176   : > { %v2171_v29 = vand.u32 4294901760, %v8941_v24  ;;  %552 = vadd.xlane.f32.xlu1 %v551_v52 }
 0x177   : > { %7833 = vmatpush3.bf16.msra.mxu0 %v8655_v40  ;;  %7851 = vmatpush3.bf16.msra.mxu1 %v7850_v22  ;;  %v1157_v40 = vand.u32 4294901760, %v8777_v33  ;;  %v1673_v53 = vand.u32 4294901760, %v8824_v45  ;;  %v7883_v3 = vpack.c.bf16 %v1668_v59, %v1661_v58  ;;  %v7892_v14 = vpack.c.bf16 %v8829_v46, %v8824_v45 }
 0x178   : > { %7840 = vmatprep.subr.bf16.mxu0 %v8454_v28  ;;  %7858 = vmatprep.subr.bf16.mxu1 %v8454_v28  ;;  %v2092_v22 = vand.u32 4294901760, %v547_v26  ;;  %v2172_v31 = vsub.f32 %v8941_v24, %v2171_v29 }
 0x179   : > { %v1158_v47 = vsub.f32 %v8777_v33, %v1157_v40  ;;  %v1674_v60 = vsub.f32 %v8824_v45, %v1673_v53  ;;  %v7904_v16 = vpack.c.bf16 %v1680_v56, %v1673_v53  ;;  %v8962_v45 = vpack.c.bf16 %v2086_v20, %v2083_v19 }
 0x17a   : > { %6939 = vmatmul.mubr.f32.vlgmr.msra.gmra.mrb[4].mxu0 %v8707_v4  ;;  %6972 = vmatmul.mubr.f32.vlgmr.msra.gmra.mrb[6].mxu1 %v8758_v27  ;;  %v8955_v34 = vsub.f32 %v547_v26, %v2092_v22  ;;  %v8967_v46 = vpack.c.bf16 %v2092_v22, %v2089_v21 }
 0x17b   : > { %7842 = vmatpush3.bf16.msra.mxu0 %v7841_v36  ;;  %7860 = vmatpush3.bf16.msra.mxu1 %v7841_v36  ;;  %v1159_v57 = vand.u32 4294901760, %v1158_v47  ;;  %v1675_v4 = vand.u32 4294901760, %v1674_v60  ;;  %v7925_v47 = vpack.c.bf16 %v8941_v24, %v8939_v23  ;;  %v2574_v24 = vld [vmem:[%s10182_s7 + $0x28] sm:$0xff] }
 0x17c   : > { %7843 = vmatprep.subr.bf16.mxu0 %v8454_v28  ;;  %7861 = vmatprep.subr.bf16.mxu1 %v8454_v28  ;;  %v2185_v38 = vand.u32 4294901760, %v8955_v34 }
 0x17d   : > { %6960 = vmatprep.mubr.msk.f32.mxu0 %vm8455_vm1, %v8456_v32  ;;  %6993 = vmatprep.mubr.msk.f32.mxu1 %vm8455_vm1, %v8456_v32  ;;  %v7886_v1 = vpack.c.bf16 %v1682_v5, %v1675_v4 }
 0x17f   : > { %7845 = vmatpush3.bf16.msra.mxu0 %v7844_v42  ;;  %7863 = vmatpush3.bf16.msra.mxu1 %v7844_v42 }
 0x180   : > { %7852 = vmatprep.subr.bf16.mxu0 %v8454_v28  ;;  %7870 = vmatprep.subr.bf16.mxu1 %v8454_v28 }
 0x182   : > { %6961 = vmatmul.mubr.f32.vlgmr.msra.gmra.mrb[6].mxu0 %v1159_v57  ;;  %6994 = vmatmul.mubr.f32.vlgmr.msra.gmra.mrb[8].mxu1 %v1157_v40  ;;  %v2186_v40 = vsub.f32 %v8955_v34, %v2185_v38 }
 0x183   : > { %7854 = vmatpush3.bf16.msra.mxu0 %v7853_v48  ;;  %7872 = vmatpush3.bf16.msra.mxu1 %v7841_v36  ;;  %v2173_v36 = vand.u32 4294901760, %v2172_v31 }
 0x184   : > { %7855 = vmatprep.subr.bf16.mxu0 %v8454_v28  ;;  %7873 = vmatprep.subr.bf16.mxu1 %v8454_v28  ;;  %v2187_v43 = vand.u32 4294901760, %v2186_v40 }
 0x185   : > { %6982 = vmatprep.mubr.msk.f32.mxu0 %vm8455_vm1, %v8456_v32  ;;  %7015 = vmatprep.mubr.msk.f32.mxu1 %vm8455_vm1, %v8456_v32 }
 0x187   : > { %7857 = vmatpush3.bf16.msra.mxu0 %v7856_v54  ;;  %7875 = vmatpush3.bf16.msra.mxu1 %v7844_v42 }
 0x188   : > { %7864 = vmatprep.subr.bf16.mxu0 %v8454_v28  ;;  %7882 = vmatprep.subr.bf16.mxu1 %v8454_v28 }
 0x18a   : > { %6983 = vmatmul.mubr.f32.vlgmr.msra.gmra.mrb[8].mxu0 %v8777_v33  ;;  %7016 = vmatmul.mubr.f32.vlgmr.msra.gmra.mrb[10].mxu1 %v8758_v27  ;;  %v8953_v33 = vsub.f32 %v546_v25, %v2089_v21 }
 0x18b   : > { %7866 = vmatpush3.bf16.msra.mxu0 %v7865_v2  ;;  %7884 = vmatpush3.bf16.msra.mxu1 %v7883_v3 }
 0x18c   : > { %7867 = vmatprep.subr.bf16.mxu0 %v8454_v28  ;;  %7885 = vmatprep.subr.bf16.mxu1 %v8454_v28  ;;  %v2178_v37 = vand.u32 4294901760, %v8953_v33  ;;  %v7928_v48 = vpack.c.bf16 %v8955_v34, %v8953_v33  ;;  %v2598_v34 = vand.u32 4294901760, %v2574_v24 }
 0x18d   : > { %7004 = vmatprep.mubr.msk.f32.mxu0 %vm8455_vm1, %v8456_v32  ;;  %7037 = vmatprep.mubr.msk.f32.mxu1 %vm8455_vm1, %v8456_v32 }
 0x18e   : > { %v2179_v41 = vsub.f32 %v8953_v33, %v2178_v37  ;;  %v8977_v50 = vpack.c.bf16 %v2185_v38, %v2178_v37 }
 0x18f   : > { %7869 = vmatpush3.bf16.msra.mxu0 %v7868_v62  ;;  %7887 = vmatpush3.bf16.msra.mxu1 %v7886_v1 }
 0x190   : > { %7876 = vmatprep.subr.bf16.mxu0 %v8454_v28  ;;  %7894 = vmatprep.subr.bf16.mxu1 %v8454_v28  ;;  %v2180_v42 = vand.u32 4294901760, %v2179_v41 }
 0x192   : > { %7005 = vmatmul.mubr.f32.vlgmr.msra.gmra.mrb[10].mxu0 %v8758_v27  ;;  %7038 = vmatmul.mubr.f32.vlgmr.msra.gmra.mrb[12].mxu1 %v1646_v10  ;;  %v2164_v27 = vand.u32 4294901760, %v8939_v23  ;;  %v7922_v44 = vpack.c.bf16 %v2187_v43, %v2180_v42 }
 0x193   : > { %7878 = vmatpush3.bf16.msra.mxu0 %v7877_v7  ;;  %7896 = vmatpush3.bf16.msra.mxu1 %v7877_v7 }
 0x194   : > { %7879 = vmatprep.subr.bf16.mxu0 %v8454_v28  ;;  %7897 = vmatprep.subr.bf16.mxu1 %v8454_v28  ;;  %v2165_v30 = vsub.f32 %v8939_v23, %v2164_v27  ;;  %v8975_v49 = vpack.c.bf16 %v2171_v29, %v2164_v27  ;;  %v2573_v23 = vld [vmem:[%s10182_s7 + $0x20] sm:$0xff] }
 0x195   : > { %7026 = vmatprep.mubr.msk.f32.mxu0 %vm8455_vm1, %v8456_v32  ;;  %7059 = vmatprep.mubr.msk.f32.mxu1 %vm8455_vm1, %v8456_v32  ;;  %v2595_v33 = vand.u32 4294901760, %v2573_v23 }
 0x196   : > { %v2166_v35 = vand.u32 4294901760, %v2165_v30 }
 0x197   : > { %7881 = vmatpush3.bf16.msra.mxu0 %v7880_v9  ;;  %7899 = vmatpush3.bf16.msra.mxu1 %v7880_v9 }
 0x198   : > { %7888 = vmatprep.subr.bf16.mxu0 %v8454_v28  ;;  %7906 = vmatprep.subr.bf16.mxu1 %v8454_v28  ;;  %v7919_v39 = vpack.c.bf16 %v2173_v36, %v2166_v35 }
 0x19a   : > { %7027 = vmatmul.mubr.f32.vlgmr.msra.gmra.mrb[12].mxu0 %v1650_v13  ;;  %7060 = vmatmul.mubr.f32.vlgmr.msra.gmra.mrb[14].mxu1 %v1648_v8 }
 0x19b   : > { %7890 = vmatpush3.bf16.msra.mxu0 %v7889_v12  ;;  %7908 = vmatpush3.bf16.msra.mxu1 %v7877_v7 }
 0x19c   : > { %7891 = vmatprep.subr.bf16.mxu0 %v8454_v28  ;;  %7909 = vmatprep.subr.bf16.mxu1 %v8454_v28 }
 0x19d   : > { %7048 = vmatprep.mubr.msk.f32.mxu0 %vm8455_vm1, %v8456_v32  ;;  %7081 = vmatprep.mubr.msk.f32.mxu1 %vm8455_vm1, %v8456_v32 }
 0x19f   : > { %7893 = vmatpush3.bf16.msra.mxu0 %v7892_v14  ;;  %7911 = vmatpush3.bf16.msra.mxu1 %v7880_v9 }
 0x1a0   : > { %7900 = vmatprep.subr.bf16.mxu0 %v8454_v28  ;;  %7918 = vmatprep.subr.bf16.mxu1 %v8454_v28 }
 0x1a2   : > { %7049 = vmatmul.mubr.f32.vlgmr.msra.gmra.mrb[14].mxu0 %v1647_v6  ;;  %7082 = vmatmul.mubr.f32.vlgmr.msra.gmra.mrb[16].mxu1 %v1646_v10 }
 0x1a3   : > { %7902 = vmatpush3.bf16.msra.mxu0 %v7901_v15  ;;  %7070 = vmatprep.mubr.msk.f32.mxu0 %vm8455_vm1, %v8456_v32 }
 0x1a4   : > { %7903 = vmatprep.subr.bf16.mxu0 %v8454_v28  ;;  %7103 = vmatprep.mubr.msk.f32.mxu1 %vm8455_vm1, %v8456_v32 }
 0x1a5   : > { %7920 = vmatpush3.bf16.msra.mxu1 %v7919_v39 }
 0x1a6   : > { %7921 = vmatprep.subr.bf16.mxu1 %v8454_v28 }
 0x1a7   : > { %7905 = vmatpush3.bf16.msra.mxu0 %v7904_v16 }
 0x1a8   : > { %7912 = vmatprep.subr.bf16.mxu0 %v8454_v28 }
 0x1a9   : > { %7923 = vmatpush3.bf16.msra.mxu1 %v7922_v44 }
 0x1aa   : > { %7071 = vmatmul.mubr.f32.vlgmr.msra.gmra.mrb[16].mxu0 %v1646_v10  ;;  %7930 = vmatprep.subr.bf16.mxu1 %v8454_v28 }
 0x1ab   : > { %7092 = vmatprep.mubr.msk.f32.mxu0 %vm8455_vm1, %v8456_v32  ;;  %7914 = vmatpush3.bf16.msra.mxu0 %v8962_v45 }
 0x1ac   : > { %7915 = vmatprep.subr.bf16.mxu0 %v8454_v28 }
 0x1af   : > { %7917 = vmatpush3.bf16.msra.mxu0 %v8967_v46 }
 0x1b0   : > { %7924 = vmatprep.subr.bf16.mxu0 %v8454_v28 }
 0x235   : > { %v765_v53 = vpop.f32.mrb[0].mxu1 }
 0x236   : > { %v6907_v56 = vpop.f32.mrb[1].mxu1 }
 0x237   : > { %v6448_v56 = vld [vmem:[%s10179_s4] ss:$0 sm:$0xff] }
 0x23d   : > { %v922_v57 = vpop.f32.mrb[2].mxu1  ;;  %v674_v54 = vpop.f32.mrb[0].mxu0 }
 0x23e   : > { %v766_v55 = vadd.f32 %v765_v53, %v674_v54  ;;  %v6929_v58 = vpop.f32.mrb[3].mxu1  ;;  %v6896_v59 = vpop.f32.mrb[1].mxu0 }
 0x245   : > { %v845_v60 = vpop.f32.mrb[2].mxu0  ;;  %v1080_v61 = vpop.f32.mrb[4].mxu1 }
 0x246   : > { %v846_v63 = vadd.f32 %v845_v60, %v766_v55  ;;  %v6918_v2 = vpop.f32.mrb[3].mxu0  ;;  %v6951_v3 = vpop.f32.mrb[5].mxu1 }
 0x248   : > { %v923_v4 = vadd.f32 %v922_v57, %v846_v63 }
 0x24d   : > { %v1005_v5 = vpop.f32.mrb[4].mxu0  ;;  %v1252_v10 = vpop.f32.mrb[6].mxu1 }
 0x24e   : > { %v1006_v62 = vadd.f32 %v1005_v5, %v923_v4  ;;  %v6940_v1 = vpop.f32.mrb[5].mxu0  ;;  %v6973_v6 = vpop.f32.mrb[7].mxu1 }
 0x250   : > { %v1081_v7 = vadd.f32 %v1080_v61, %v1006_v62 }
 0x255   : > { %v1161_v8 = vpop.f32.mrb[6].mxu0  ;;  %v1409_v9 = vpop.f32.mrb[8].mxu1 }
 0x256   : > { %v1162_v11 = vadd.f32 %v1161_v8, %v1081_v7  ;;  %v6962_v12 = vpop.f32.mrb[7].mxu0  ;;  %v6995_v13 = vpop.f32.mrb[9].mxu1 }
 0x258   : > { %v1253_v14 = vadd.f32 %v1252_v10, %v1162_v11 }
 0x25d   : > { %v1332_v15 = vpop.f32.mrb[8].mxu0  ;;  %v1567_v16 = vpop.f32.mrb[10].mxu1 }
 0x25e   : > { %v1333_v17 = vadd.f32 %v1332_v15, %v1253_v14  ;;  %v6984_v18 = vpop.f32.mrb[9].mxu0  ;;  %v7017_v19 = vpop.f32.mrb[11].mxu1 }
 0x260   : > { %v1410_v20 = vadd.f32 %v1409_v9, %v1333_v17  ;;  %v9046_v17 = vpack.c.bf16 %v2598_v34, %v2595_v33 }
 0x265   : > { %v1492_v25 = vpop.f32.mrb[10].mxu0  ;;  %v1743_v26 = vpop.f32.mrb[12].mxu1 }
 0x266   : > { %v1493_v27 = vadd.f32 %v1492_v25, %v1410_v20  ;;  %v7006_v29 = vpop.f32.mrb[11].mxu0  ;;  %v7039_v21 = vpop.f32.mrb[13].mxu1 }
 0x268   : > { %v1568_v22 = vadd.f32 %v1567_v16, %v1493_v27 }
 0x26d   : > { %v1652_v30 = vpop.f32.mrb[12].mxu0  ;;  %v1900_v31 = vpop.f32.mrb[14].mxu1 }
 0x26e   : > { %v1744_v35 = vadd.f32 %v1743_v26, %v1652_v30  ;;  %v7028_v36 = vpop.f32.mrb[13].mxu0  ;;  %v7061_v37 = vpop.f32.mrb[15].mxu1 }
 0x275   : > { %v1823_v38 = vpop.f32.mrb[14].mxu0  ;;  %v2058_v39 = vpop.f32.mrb[16].mxu1 }
 0x276   : > { %v1824_v41 = vadd.f32 %v1823_v38, %v1744_v35  ;;  %v7050_v40 = vpop.f32.mrb[15].mxu0  ;;  %v7083_v42 = vpop.f32.mrb[17].mxu1 }
 0x278   : > { %v1901_v43 = vadd.f32 %v1900_v31, %v1824_v41 }
 0x27d   : > { %v1983_v44 = vpop.f32.mrb[16].mxu0 }
 0x27e   : > { %v1984_v51 = vadd.f32 %v1983_v44, %v1901_v43  ;;  %v7072_v52 = vpop.f32.mrb[17].mxu0 }
 0x280   : > { %v2059_v53 = vadd.f32 %v2058_v39, %v1984_v51  ;;  %v553_v51 = vpop.xlane.xlu1 %552 }
 0x281   : > { %vm554_vm6 = vcmp.gt.f32.partialorder %v553_v51, 0.0 }
 0x282   : > { %v2062_v57 = vadd.f32 %v2059_v53, %v1568_v22  ;;  %v6449_v22 = vld [vmem:[%s10181_s6] ss:$0 sm:$0xff] }
 0x284   : > { %v2069_v54 = vadd.f32 %v6448_v56, %v2062_v57 }
 0x286   : > { %vm2070_vm5 = vcmp.gt.f32.partialorder %v2069_v54, 0.0  ;;  %v2071_v55 = vmul.f32 0.01, %v2069_v54 }
 0x288   : > { %v2072_v58 = vsel %vm2070_vm5, %v2069_v54, %v2071_v55  ;;  %v6445_v54 = vsel %vm554_vm6, 1.0, %v8456_v32 }
 0x289   : > { %v2080_v59 = vsel %vm550_vm0, %v2072_v58, 0 }
 0x28a   : > { %v2151_v60 = vand.u32 4294901760, %v2080_v59 }
 0x28c   : > { %v2152_v61 = vsub.f32 %v2080_v59, %v2151_v60  ;;  %7104 = vmatmul.mubr.f32.vlgmr.msra.gmra.mrb[18].mxu1 %v2151_v60  ;;  %v9071_v59 = vld [vmem:[%s10182_s7] sm:$0xff] }
 0x28d   : > { %7932 = vmatpush3.bf16.msra.mxu1 %v8962_v45  ;;  %7125 = vmatprep.mubr.msk.f32.mxu1 %vm8455_vm1, %v8456_v32 }
 0x28e   : > { %7933 = vmatprep.subr.bf16.mxu1 %v8454_v28  ;;  %v2153_v63 = vand.u32 4294901760, %v2152_v61 }
 0x290   : > { %v2154_v2 = vsub.f32 %v2152_v61, %v2153_v63 }
 0x291   : > { %7935 = vmatpush3.bf16.msra.mxu1 %v8967_v46 }
 0x292   : > { %7942 = vmatprep.subr.bf16.mxu1 %v8454_v28  ;;  %v2155_v3 = vand.u32 4294901760, %v2154_v2 }
 0x294   : > { %7126 = vmatmul.mubr.f32.vlgmr.msra.gmra.mrb[20].mxu1 %v2153_v63  ;;  %7093 = vmatmul.mubr.f32.vlgmr.msra.gmra.mrb[18].mxu0 %v2155_v3  ;;  %v3082_v63 = vand.u32 4294901760, %v9071_v59 }
 0x295   : > { %7926 = vmatpush3.bf16.msra.mxu0 %v7925_v47  ;;  %7944 = vmatpush3.bf16.msra.mxu1 %v8962_v45  ;;  %v9023_v45 = vsub.f32 %v2573_v23, %v2595_v33  ;;  %v2575_v47 = vld [vmem:[%s10182_s7 + $0x30] sm:$0xff] }
 0x296   : > { %7927 = vmatprep.subr.bf16.mxu0 %v8454_v28  ;;  %7945 = vmatprep.subr.bf16.mxu1 %v8454_v28  ;;  %v2601_v4 = vand.u32 4294901760, %v2575_v47  ;;  %v9091_v33 = vld [vmem:[%s10182_s7 + $0x10] sm:$0xff] }
 0x297   : > { %7114 = vmatprep.mubr.msk.f32.mxu0 %vm8455_vm1, %v8456_v32  ;;  %7147 = vmatprep.mubr.msk.f32.mxu1 %vm8455_vm1, %v8456_v32 }
 0x298   : > { %v9037_v1 = vsub.f32 %v2575_v47, %v2601_v4 }
 0x299   : > { %7929 = vmatpush3.bf16.msra.mxu0 %v7928_v48  ;;  %7947 = vmatpush3.bf16.msra.mxu1 %v8967_v46  ;;  %v9025_v46 = vsub.f32 %v2574_v24, %v2598_v34  ;;  %v2576_v48 = vld [vmem:[%s10182_s7 + $0x38] sm:$0xff] }
 0x29a   : > { %7936 = vmatprep.subr.bf16.mxu0 %v8454_v28  ;;  %7954 = vmatprep.subr.bf16.mxu1 %v8454_v28  ;;  %v2604_v5 = vand.u32 4294901760, %v2576_v48  ;;  %v2690_v9 = vand.u32 4294901760, %v9037_v1  ;;  %v9096_v34 = vld [vmem:[%s10182_s7 + $0x18] sm:$0xff] }
 0x29b   : > { %v7961_v20 = vpack.c.bf16 %v9025_v46, %v9023_v45 }
 0x29c   : > { %7115 = vmatmul.mubr.f32.vlgmr.msra.gmra.mrb[20].mxu0 %v2152_v61  ;;  %7148 = vmatmul.mubr.f32.vlgmr.msra.gmra.mrb[22].mxu1 %v2151_v60  ;;  %v9039_v6 = vsub.f32 %v2576_v48, %v2604_v5  ;;  %v2691_v13 = vsub.f32 %v9037_v1, %v2690_v9  ;;  %v9051_v19 = vpack.c.bf16 %v2604_v5, %v2601_v4  ;;  %v3088_v4 = vand.u32 4294901760, %v9091_v33 }
 0x29d   : > { %7938 = vmatpush3.bf16.msra.mxu0 %v8975_v49  ;;  %7136 = vmatprep.mubr.msk.f32.mxu0 %vm8455_vm1, %v8456_v32  ;;  %v2676_v49 = vand.u32 4294901760, %v9023_v45  ;;  %v9102_v48 = vsub.f32 %v9071_v59, %v3082_v63  ;;  %v3091_v5 = vand.u32 4294901760, %v9096_v34 }
 0x29e   : > { %7939 = vmatprep.subr.bf16.mxu0 %v8454_v28  ;;  %7169 = vmatprep.mubr.msk.f32.mxu1 %vm8455_vm1, %v8456_v32  ;;  %v2697_v11 = vand.u32 4294901760, %v9039_v6  ;;  %v2692_v15 = vand.u32 4294901760, %v2691_v13  ;;  %v7964_v25 = vpack.c.bf16 %v9039_v6, %v9037_v1  ;;  %v9176_v1 = vld [vmem:[%s10182_s7 + $0x48] sm:$0xff] }
 0x29f   : > { %v2677_v10 = vsub.f32 %v9023_v45, %v2676_v49 }
 0x2a0   : > { %v2698_v14 = vsub.f32 %v9039_v6, %v2697_v11  ;;  %v9061_v27 = vpack.c.bf16 %v2697_v11, %v2690_v9  ;;  %v9124_v9 = vsub.f32 %v9091_v33, %v3088_v4  ;;  %v9129_v11 = vsub.f32 %v9096_v34, %v3091_v5 }
 0x2a1   : > { %7941 = vmatpush3.bf16.msra.mxu0 %v8977_v50  ;;  %v2683_v50 = vand.u32 4294901760, %v9025_v46  ;;  %v2678_v7 = vand.u32 4294901760, %v2677_v10 }
 0x2a2   : > { %7948 = vmatprep.subr.bf16.mxu0 %v8454_v28  ;;  %v2699_v16 = vand.u32 4294901760, %v2698_v14 }
 0x2a3   : > { %v2684_v62 = vsub.f32 %v9025_v46, %v2683_v50  ;;  %v9059_v26 = vpack.c.bf16 %v2683_v50, %v2676_v49 }
 0x2a4   : > { %7137 = vmatmul.mubr.f32.vlgmr.msra.gmra.mrb[22].mxu0 %v2151_v60  ;;  %v7958_v18 = vpack.c.bf16 %v2699_v16, %v2692_v15  ;;  %v9076_v60 = vld [vmem:[%s10182_s7 + $0x8] sm:$0xff]  ;;  %v3177_v16 = vand.u32 4294901760, %v9124_v9 }
 0x2a5   : > { %7158 = vmatprep.mubr.msk.f32.mxu0 %vm8455_vm1, %v8456_v32  ;;  %v2685_v8 = vand.u32 4294901760, %v2684_v62  ;;  %7950 = vmatpush3.bf16.msra.mxu0 %v9046_v17 }
 0x2a6   : > { %7951 = vmatprep.subr.bf16.mxu0 %v8454_v28 }
 0x2a7   : > { %v7955_v12 = vpack.c.bf16 %v2685_v8, %v2678_v7  ;;  %v3163_v7 = vand.u32 4294901760, %v9102_v48 }
 0x2a9   : > { %7956 = vmatpush3.bf16.msra.mxu1 %v7955_v12  ;;  %7953 = vmatpush3.bf16.msra.mxu0 %v9051_v19  ;;  %v3164_v14 = vsub.f32 %v9102_v48, %v3163_v7 }
 0x2aa   : > { %7957 = vmatprep.subr.bf16.mxu1 %v8454_v28  ;;  %7960 = vmatprep.subr.bf16.mxu0 %v8454_v28 }
 0x2ad   : > { %7959 = vmatpush3.bf16.msra.mxu1 %v7958_v18  ;;  %v3184_v18 = vand.u32 4294901760, %v9129_v11 }
 0x2ae   : > { %7966 = vmatprep.subr.bf16.mxu1 %v8454_v28 }
 0x35f   : > { %v2248_v29 = vpop.f32.mrb[18].mxu1 }
 0x360   : > { %v7105_v21 = vpop.f32.mrb[19].mxu1 }
 0x361   : > { %v3165_v21 = vand.u32 4294901760, %v3164_v14 }
 0x367   : > { %v2405_v30 = vpop.f32.mrb[20].mxu1  ;;  %v2157_v31 = vpop.f32.mrb[18].mxu0 }
 0x368   : > { %v2158_v35 = vadd.f32 %v6449_v22, %v2157_v31  ;;  %v7127_v36 = vpop.f32.mrb[21].mxu1  ;;  %v7094_v37 = vpop.f32.mrb[19].mxu0  ;;  %v3185_v31 = vsub.f32 %v9129_v11, %v3184_v18 }
 0x369   : > { %v9171_v36 = vld [vmem:[%s10182_s7 + $0x40] sm:$0xff] }
 0x36a   : > { %v2249_v38 = vadd.f32 %v2248_v29, %v2158_v35 }
 0x36f   : > { %v2328_v39 = vpop.f32.mrb[20].mxu0  ;;  %v2563_v41 = vpop.f32.mrb[22].mxu1 }
 0x370   : > { %v2329_v40 = vadd.f32 %v2328_v39, %v2249_v38  ;;  %v7116_v42 = vpop.f32.mrb[21].mxu0  ;;  %v7149_v43 = vpop.f32.mrb[23].mxu1  ;;  %v9190_v38 = vld [vmem:[%s10182_s7 + $0x50] sm:$0xff] }
 0x371   : > { %v3578_v42 = vand.u32 4294901760, %v9190_v38 }
 0x372   : > { %v2406_v44 = vadd.f32 %v2405_v30, %v2329_v40  ;;  %v3178_v30 = vsub.f32 %v9124_v9, %v3177_v16 }
 0x377   : > { %v2488_v52 = vpop.f32.mrb[22].mxu0 }
 0x378   : > { %v2489_v53 = vadd.f32 %v2488_v52, %v2406_v44  ;;  %v7138_v56 = vpop.f32.mrb[23].mxu0  ;;  %v7988_v44 = vpack.c.bf16 %v3091_v5, %v3088_v4 }
 0x37a   : > { %v2564_v57 = vadd.f32 %v2563_v41, %v2489_v53  ;;  %v9232_v53 = vsub.f32 %v9190_v38, %v3578_v42 }
 0x37c   : > { %v2567_v55 = vadd.f32 %v2564_v57, %v8599_v0  ;;  %v3085_v0 = vand.u32 4294901760, %v9076_v60 }
 0x37e   : > { %v2568_v58 = vmul.f32 %v6445_v54, %v2567_v55  ;;  %v9108_v50 = vsub.f32 %v9076_v60, %v3085_v0  ;;  %v7985_v39 = vpack.c.bf16 %v3085_v0, %v3082_v63 }
 0x380   : > { %v2583_v61 = vrot.slane %v2568_v58, 7  ;;  %v3170_v8 = vand.u32 4294901760, %v9108_v50  ;;  %v7997_v58 = vpack.c.bf16 %v9108_v50, %v9102_v48  ;;  %v8012_v48 = vpack.c.bf16 %v3184_v18, %v3177_v16 }
 0x382   : > { %v9080_v2 = vsel %vm588_vm2, 0.0, %v2583_v61  ;;  %v9083_v3 = vsel %vm588_vm2, %v2583_v61, 0.0  ;;  %v3171_v15 = vsub.f32 %v9108_v50, %v3170_v8  ;;  %v3667_v61 = vand.u32 4294901760, %v9232_v53 }
 0x383   : > { %v2589_v23 = vrot.slane %v9080_v2, 1  ;;  %v2590_v24 = vrot.slane %v9083_v3, 1  ;;  %v3079_v45 = vsel %vm550_vm0, %v9080_v2, 0  ;;  %v3566_v54 = vrot.slane %v9080_v2, 2 }
 0x384   : > { %v3172_v22 = vand.u32 4294901760, %v3171_v15  ;;  %v9166_v35 = vand.u32 4294901760, %v3079_v45  ;;  %v3567_v55 = vrot.slane %v9083_v3, 2  ;;  %v8000_v3 = vpack.c.bf16 %v9129_v11, %v9124_v9 }
 0x385   : > { %v2591_v47 = vsel %vm593_vm3, %v2589_v23, %v2590_v24  ;;  %v3668_v33 = vsub.f32 %v9232_v53, %v3667_v61 }
 0x386   : > { %v2592_v49 = vsel %vm550_vm0, %v2591_v47, 0  ;;  %v7991_v46 = vpack.c.bf16 %v3172_v22, %v3165_v21  ;;  %v9185_v37 = vsub.f32 %v3079_v45, %v9166_v35  ;;  %v3568_v0 = vsel %vm1571_vm4, %v3566_v54, %v3567_v55 }
 0x387   : > { %v9112_v10 = vand.u32 4294901760, %v2592_v49  ;;  %v3569_v47 = vsel %vm550_vm0, %v3568_v0, 0  ;;  %v3669_v5 = vand.u32 4294901760, %v3668_v33 }
 0x389   : > { %v2664_v62 = vsub.f32 %v2592_v49, %v9112_v10  ;;  %7170 = vmatmul.mubr.f32.vlgmr.msra.gmra.mrb[24].mxu1 %v9112_v10  ;;  %v8009_v49 = vpack.c.bf16 %v3170_v8, %v3163_v7 }
 0x38a   : > { %7968 = vmatpush3.bf16.msra.mxu1 %v9046_v17  ;;  %7191 = vmatprep.mubr.msk.f32.mxu1 %vm8455_vm1, %v8456_v32 }
 0x38b   : > { %7969 = vmatprep.subr.bf16.mxu1 %v8454_v28  ;;  %v2665_v12 = vand.u32 4294901760, %v2664_v62 }
 0x38d   : > { %v2666_v13 = vsub.f32 %v2664_v62, %v2665_v12 }
 0x38e   : > { %7971 = vmatpush3.bf16.msra.mxu1 %v9051_v19 }
 0x38f   : > { %7978 = vmatprep.subr.bf16.mxu1 %v8454_v28  ;;  %v2667_v29 = vand.u32 4294901760, %v2666_v13 }
 0x391   : > { %7192 = vmatmul.mubr.f32.vlgmr.msra.gmra.mrb[26].mxu1 %v2665_v12  ;;  %7159 = vmatmul.mubr.f32.vlgmr.msra.gmra.mrb[24].mxu0 %v2667_v29 }
 0x392   : > { %7962 = vmatpush3.bf16.msra.mxu0 %v7961_v20  ;;  %7980 = vmatpush3.bf16.msra.mxu1 %v9046_v17  ;;  %v3179_v17 = vand.u32 4294901760, %v3178_v30  ;;  %v3186_v20 = vand.u32 4294901760, %v3185_v31 }
 0x393   : > { %7963 = vmatprep.subr.bf16.mxu0 %v8454_v28  ;;  %7981 = vmatprep.subr.bf16.mxu1 %v8454_v28 }
 0x394   : > { %7180 = vmatprep.mubr.msk.f32.mxu0 %vm8455_vm1, %v8456_v32  ;;  %7213 = vmatprep.mubr.msk.f32.mxu1 %vm8455_vm1, %v8456_v32  ;;  %v7994_v6 = vpack.c.bf16 %v3186_v20, %v3179_v17 }
 0x396   : > { %7965 = vmatpush3.bf16.msra.mxu0 %v7964_v25  ;;  %7983 = vmatpush3.bf16.msra.mxu1 %v9051_v19  ;;  %v3572_v19 = vand.u32 4294901760, %v9171_v36  ;;  %v3575_v25 = vand.u32 4294901760, %v9176_v1 }
 0x397   : > { %7972 = vmatprep.subr.bf16.mxu0 %v8454_v28  ;;  %7990 = vmatprep.subr.bf16.mxu1 %v8454_v28 }
 0x398   : > { %v9209_v41 = vsub.f32 %v9171_v36, %v3572_v19  ;;  %v9214_v40 = vsub.f32 %v9176_v1, %v3575_v25  ;;  %v8021_v8 = vpack.c.bf16 %v3575_v25, %v3572_v19 }
 0x399   : > { %7181 = vmatmul.mubr.f32.vlgmr.msra.gmra.mrb[26].mxu0 %v2664_v62  ;;  %7214 = vmatmul.mubr.f32.vlgmr.msra.gmra.mrb[28].mxu1 %v9112_v10  ;;  %v3640_v62 = vand.u32 4294901760, %v3569_v47 }
 0x39a   : > { %7974 = vmatpush3.bf16.msra.mxu0 %v9059_v26  ;;  %7992 = vmatpush3.bf16.msra.mxu1 %v7991_v46  ;;  %v9195_v26 = vld [vmem:[%s10182_s7 + $0x58] sm:$0xff]  ;;  %v3653_v51 = vand.u32 4294901760, %v9209_v41  ;;  %v3660_v52 = vand.u32 4294901760, %v9214_v40  ;;  %v8033_v13 = vpack.c.bf16 %v9214_v40, %v9209_v41 }
 0x39b   : > { %7975 = vmatprep.subr.bf16.mxu0 %v8454_v28  ;;  %7993 = vmatprep.subr.bf16.mxu1 %v8454_v28  ;;  %v3581_v43 = vand.u32 4294901760, %v9195_v26  ;;  %v3641_v7 = vsub.f32 %v3569_v47, %v3640_v62 }
 0x39c   : > { %7202 = vmatprep.mubr.msk.f32.mxu0 %vm8455_vm1, %v8456_v32  ;;  %7235 = vmatprep.mubr.msk.f32.mxu1 %vm8455_vm1, %v8456_v32  ;;  %v3654_v59 = vsub.f32 %v9209_v41, %v3653_v51  ;;  %v3661_v60 = vsub.f32 %v9214_v40, %v3660_v52  ;;  %v8045_v16 = vpack.c.bf16 %v3660_v52, %v3653_v51 }
 0x39d   : > { %v9237_v56 = vsub.f32 %v9195_v26, %v3581_v43  ;;  %v3642_v9 = vand.u32 4294901760, %v3641_v7  ;;  %v8024_v11 = vpack.c.bf16 %v3581_v43, %v3578_v42 }
 0x39e   : > { %7977 = vmatpush3.bf16.msra.mxu0 %v9061_v27  ;;  %7995 = vmatpush3.bf16.msra.mxu1 %v7994_v6  ;;  %v3152_v27 = vand.u32 4294901760, %v9185_v37  ;;  %v3655_v23 = vand.u32 4294901760, %v3654_v59  ;;  %v3662_v24 = vand.u32 4294901760, %v3661_v60 }
 0x39f   : > { %7984 = vmatprep.subr.bf16.mxu0 %v8454_v28  ;;  %8002 = vmatprep.subr.bf16.mxu1 %v8454_v28  ;;  %v3674_v63 = vand.u32 4294901760, %v9237_v56  ;;  %v3643_v12 = vsub.f32 %v3641_v7, %v3642_v9  ;;  %v8036_v15 = vpack.c.bf16 %v9237_v56, %v9232_v53 }
 0x3a0   : > { %v3153_v57 = vsub.f32 %v9185_v37, %v3152_v27  ;;  %v8027_v4 = vpack.c.bf16 %v3662_v24, %v3655_v23 }
 0x3a1   : > { %7203 = vmatmul.mubr.f32.vlgmr.msra.gmra.mrb[28].mxu0 %v9112_v10  ;;  %7236 = vmatmul.mubr.f32.vlgmr.msra.gmra.mrb[30].mxu1 %v9166_v35  ;;  %v3675_v34 = vsub.f32 %v9237_v56, %v3674_v63  ;;  %v3644_v14 = vand.u32 4294901760, %v3643_v12  ;;  %v8048_v18 = vpack.c.bf16 %v3674_v63, %v3667_v61 }
 0x3a2   : > { %7986 = vmatpush3.bf16.msra.mxu0 %v7985_v39  ;;  %8004 = vmatpush3.bf16.msra.mxu1 %v7985_v39  ;;  %v3154_v2 = vand.u32 4294901760, %v3153_v57 }
 0x3a3   : > { %7987 = vmatprep.subr.bf16.mxu0 %v8454_v28  ;;  %8005 = vmatprep.subr.bf16.mxu1 %v8454_v28  ;;  %v3676_v10 = vand.u32 4294901760, %v3675_v34 }
 0x3a4   : > { %7224 = vmatprep.mubr.msk.f32.mxu0 %vm8455_vm1, %v8456_v32  ;;  %7257 = vmatprep.mubr.msk.f32.mxu1 %vm8455_vm1, %v8456_v32 }
 0x3a5   : > { %v8030_v50 = vpack.c.bf16 %v3676_v10, %v3669_v5 }
 0x3a6   : > { %7989 = vmatpush3.bf16.msra.mxu0 %v7988_v44  ;;  %8007 = vmatpush3.bf16.msra.mxu1 %v7988_v44 }
 0x3a7   : > { %7996 = vmatprep.subr.bf16.mxu0 %v8454_v28  ;;  %8014 = vmatprep.subr.bf16.mxu1 %v8454_v28 }
 0x3a9   : > { %7225 = vmatmul.mubr.f32.vlgmr.msra.gmra.mrb[30].mxu0 %v3154_v2  ;;  %7258 = vmatmul.mubr.f32.vlgmr.msra.gmra.mrb[32].mxu1 %v3152_v27 }
 0x3aa   : > { %7998 = vmatpush3.bf16.msra.mxu0 %v7997_v58  ;;  %8016 = vmatpush3.bf16.msra.mxu1 %v7985_v39 }
 0x3ab   : > { %7999 = vmatprep.subr.bf16.mxu0 %v8454_v28  ;;  %8017 = vmatprep.subr.bf16.mxu1 %v8454_v28 }
 0x3ac   : > { %7246 = vmatprep.mubr.msk.f32.mxu0 %vm8455_vm1, %v8456_v32  ;;  %7279 = vmatprep.mubr.msk.f32.mxu1 %vm8455_vm1, %v8456_v32 }
 0x3ae   : > { %8001 = vmatpush3.bf16.msra.mxu0 %v8000_v3  ;;  %8019 = vmatpush3.bf16.msra.mxu1 %v7988_v44 }
 0x3af   : > { %8008 = vmatprep.subr.bf16.mxu0 %v8454_v28  ;;  %8026 = vmatprep.subr.bf16.mxu1 %v8454_v28 }
 0x3b1   : > { %7247 = vmatmul.mubr.f32.vlgmr.msra.gmra.mrb[32].mxu0 %v9185_v37  ;;  %7280 = vmatmul.mubr.f32.vlgmr.msra.gmra.mrb[34].mxu1 %v9166_v35 }
 0x3b2   : > { %8010 = vmatpush3.bf16.msra.mxu0 %v8009_v49  ;;  %8028 = vmatpush3.bf16.msra.mxu1 %v8027_v4 }
 0x3b3   : > { %8011 = vmatprep.subr.bf16.mxu0 %v8454_v28  ;;  %8029 = vmatprep.subr.bf16.mxu1 %v8454_v28 }
 0x3b4   : > { %7268 = vmatprep.mubr.msk.f32.mxu0 %vm8455_vm1, %v8456_v32  ;;  %7301 = vmatprep.mubr.msk.f32.mxu1 %vm8455_vm1, %v8456_v32 }
 0x3b6   : > { %8013 = vmatpush3.bf16.msra.mxu0 %v8012_v48  ;;  %8031 = vmatpush3.bf16.msra.mxu1 %v8030_v50 }
 0x3b7   : > { %8020 = vmatprep.subr.bf16.mxu0 %v8454_v28  ;;  %8038 = vmatprep.subr.bf16.mxu1 %v8454_v28 }
 0x3b9   : > { %7269 = vmatmul.mubr.f32.vlgmr.msra.gmra.mrb[34].mxu0 %v9166_v35  ;;  %7302 = vmatmul.mubr.f32.vlgmr.msra.gmra.mrb[36].mxu1 %v3640_v62 }
 0x3ba   : > { %8022 = vmatpush3.bf16.msra.mxu0 %v8021_v8  ;;  %8040 = vmatpush3.bf16.msra.mxu1 %v8021_v8 }
 0x3bb   : > { %8023 = vmatprep.subr.bf16.mxu0 %v8454_v28  ;;  %8041 = vmatprep.subr.bf16.mxu1 %v8454_v28 }
 0x3bc   : > { %7290 = vmatprep.mubr.msk.f32.mxu0 %vm8455_vm1, %v8456_v32  ;;  %7323 = vmatprep.mubr.msk.f32.mxu1 %vm8455_vm1, %v8456_v32 }
 0x3be   : > { %8025 = vmatpush3.bf16.msra.mxu0 %v8024_v11  ;;  %8043 = vmatpush3.bf16.msra.mxu1 %v8024_v11 }
 0x3bf   : > { %8032 = vmatprep.subr.bf16.mxu0 %v8454_v28  ;;  %8050 = vmatprep.subr.bf16.mxu1 %v8454_v28 }
 0x3c1   : > { %7291 = vmatmul.mubr.f32.vlgmr.msra.gmra.mrb[36].mxu0 %v3644_v14  ;;  %7324 = vmatmul.mubr.f32.vlgmr.msra.gmra.mrb[38].mxu1 %v3642_v9 }
 0x3c2   : > { %8034 = vmatpush3.bf16.msra.mxu0 %v8033_v13  ;;  %8052 = vmatpush3.bf16.msra.mxu1 %v8021_v8 }
 0x3c3   : > { %8035 = vmatprep.subr.bf16.mxu0 %v8454_v28  ;;  %8053 = vmatprep.subr.bf16.mxu1 %v8454_v28 }
 0x3c4   : > { %7312 = vmatprep.mubr.msk.f32.mxu0 %vm8455_vm1, %v8456_v32  ;;  %7345 = vmatprep.mubr.msk.f32.mxu1 %vm8455_vm1, %v8456_v32 }
 0x3c6   : > { %8037 = vmatpush3.bf16.msra.mxu0 %v8036_v15  ;;  %8055 = vmatpush3.bf16.msra.mxu1 %v8024_v11 }
 0x3c7   : > { %8044 = vmatprep.subr.bf16.mxu0 %v8454_v28  ;;  %8068 = vmatprep.subr.bf16.mxu1 %v8454_v28 }
 0x3c9   : > { %7313 = vmatmul.mubr.f32.vlgmr.msra.gmra.mrb[38].mxu0 %v3641_v7  ;;  %7346 = vmatmul.mubr.f32.vlgmr.msra.gmra.mrb[40].mxu1 %v3640_v62  ;;  %v6450_v7 = vld [vmem:[%s10183_s8] ss:$0 sm:$0xff] }
 0x3ca   : > { %8046 = vmatpush3.bf16.msra.mxu0 %v8045_v16  ;;  %7334 = vmatprep.mubr.msk.f32.mxu0 %vm8455_vm1, %v8456_v32 }
 0x3cb   : > { %8047 = vmatprep.subr.bf16.mxu0 %v8454_v28  ;;  %7383 = vmatprep.mubr.msk.f32.mxu1 %vm8455_vm1, %v8456_v32 }
 0x3ce   : > { %8049 = vmatpush3.bf16.msra.mxu0 %v8048_v18 }
 0x3cf   : > { %8056 = vmatprep.subr.bf16.mxu0 %v8454_v28 }
 0x3d1   : > { %7335 = vmatmul.mubr.f32.vlgmr.msra.gmra.mrb[40].mxu0 %v3640_v62 }
 0x3d2   : > { %7364 = vmatprep.mubr.msk.f32.mxu0 %vm8455_vm1, %v8456_v32 }
 0x45c   : > { %v2760_v29 = vpop.f32.mrb[24].mxu1 }
 0x45d   : > { %v7171_v21 = vpop.f32.mrb[25].mxu1 }
 0x45e   : > { %v4074_v21 = vld [vmem:[%s10186_s11 + $0x40] sm:$0xff] }
 0x464   : > { %v2917_v22 = vpop.f32.mrb[26].mxu1  ;;  %v2669_v30 = vpop.f32.mrb[24].mxu0 }
 0x465   : > { %v2761_v31 = vadd.f32 %v2760_v29, %v2669_v30  ;;  %v7193_v45 = vpop.f32.mrb[27].mxu1  ;;  %v7160_v46 = vpop.f32.mrb[25].mxu0  ;;  %v4149_v30 = vand.u32 4294901760, %v4074_v21 }
 0x467   : > { %v9362_v45 = vsub.f32 %v4074_v21, %v4149_v30 }
 0x46c   : > { %v2840_v17 = vpop.f32.mrb[26].mxu0  ;;  %v3075_v20 = vpop.f32.mrb[28].mxu1 }
 0x46d   : > { %v2841_v35 = vadd.f32 %v2840_v17, %v2761_v31  ;;  %v7182_v36 = vpop.f32.mrb[27].mxu0  ;;  %v7215_v1 = vpop.f32.mrb[29].mxu1  ;;  %v4076_v17 = vld [vmem:[%s10186_s11 + $0x50] sm:$0xff] }
 0x46e   : > { %v4155_v1 = vand.u32 4294901760, %v4076_v17 }
 0x46f   : > { %v2918_v6 = vadd.f32 %v2917_v22, %v2841_v35  ;;  %v4075_v22 = vld [vmem:[%s10186_s11 + $0x48] sm:$0xff]  ;;  %v4234_v35 = vand.u32 4294901760, %v9362_v45 }
 0x470   : > { %v4152_v31 = vand.u32 4294901760, %v4075_v22 }
 0x472   : > { %v9364_v46 = vsub.f32 %v4075_v22, %v4152_v31 }
 0x474   : > { %v3000_v19 = vpop.f32.mrb[28].mxu0  ;;  %v3247_v25 = vpop.f32.mrb[30].mxu1  ;;  %v4241_v36 = vand.u32 4294901760, %v9364_v46 }
 0x475   : > { %v3001_v37 = vadd.f32 %v3000_v19, %v2918_v6  ;;  %v7204_v38 = vpop.f32.mrb[29].mxu0  ;;  %v7237_v26 = vpop.f32.mrb[31].mxu1  ;;  %v4235_v19 = vsub.f32 %v9362_v45, %v4234_v35 }
 0x476   : > { %v4078_v26 = vld [vmem:[%s10186_s11 + $0x60] sm:$0xff]  ;;  %v9448_v21 = vpack.c.bf16 %v4241_v36, %v4234_v35 }
 0x477   : > { %v3076_v39 = vadd.f32 %v3075_v20, %v3001_v37  ;;  %v4077_v20 = vld [vmem:[%s10186_s11 + $0x58] sm:$0xff]  ;;  %v9380_v37 = vsub.f32 %v4076_v17, %v4155_v1 }
 0x478   : > { %v4158_v6 = vand.u32 4294901760, %v4077_v20 }
 0x47a   : > { %v9382_v38 = vsub.f32 %v4077_v20, %v4158_v6 }
 0x47c   : > { %v3156_v41 = vpop.f32.mrb[30].mxu0  ;;  %v3404_v40 = vpop.f32.mrb[32].mxu1 }
 0x47d   : > { %v3157_v42 = vadd.f32 %v3156_v41, %v3076_v39  ;;  %v7226_v43 = vpop.f32.mrb[31].mxu0  ;;  %v7259_v27 = vpop.f32.mrb[33].mxu1  ;;  %v4079_v39 = vld [vmem:[%s10186_s11 + $0x68] sm:$0xff]  ;;  %v4236_v41 = vand.u32 4294901760, %v4235_v19  ;;  %v6452_v19 = vld [vmem:[%s10184_s9] ss:$0 sm:$0xff] }
 0x47e   : > { %v4255_v43 = vand.u32 4294901760, %v9382_v38  ;;  %v4161_v27 = vand.u32 4294901760, %v4078_v26 }
 0x47f   : > { %v3248_v44 = vadd.f32 %v3247_v25, %v3157_v42  ;;  %v4242_v25 = vsub.f32 %v9364_v46, %v4241_v36  ;;  %v4248_v42 = vand.u32 4294901760, %v9380_v37 }
 0x481   : > { %v9450_v22 = vpack.c.bf16 %v4255_v43, %v4248_v42 }
 0x484   : > { %v3327_v51 = vpop.f32.mrb[32].mxu0  ;;  %v3562_v52 = vpop.f32.mrb[34].mxu1 }
 0x485   : > { %v3328_v53 = vadd.f32 %v3327_v51, %v3248_v44  ;;  %v7248_v56 = vpop.f32.mrb[33].mxu0  ;;  %v7281_v57 = vpop.f32.mrb[35].mxu1  ;;  %v4164_v44 = vand.u32 4294901760, %v4079_v39 }
 0x486   : > { %v9394_v56 = vsub.f32 %v4078_v26, %v4161_v27 }
 0x487   : > { %v3405_v54 = vadd.f32 %v3404_v40, %v3328_v53  ;;  %v4243_v40 = vand.u32 4294901760, %v4242_v25  ;;  %v4256_v53 = vsub.f32 %v9382_v38, %v4255_v43  ;;  %v9396_v57 = vsub.f32 %v4079_v39, %v4164_v44 }
 0x489   : > { %v8069_v51 = vpack.c.bf16 %v4243_v40, %v4236_v41 }
 0x48b   : > { %8070 = vmatpush3.bf16.msra.mxu1 %v8069_v51 }
 0x48c   : > { %v3487_v55 = vpop.f32.mrb[34].mxu0  ;;  %v3737_v58 = vpop.f32.mrb[36].mxu1  ;;  %8071 = vmatprep.subr.bf16.mxu1 %v8454_v28 }
 0x48d   : > { %v3488_v59 = vadd.f32 %v3487_v55, %v3405_v54  ;;  %v7270_v60 = vpop.f32.mrb[35].mxu0  ;;  %v7303_v61 = vpop.f32.mrb[37].mxu1  ;;  %v4080_v54 = vld [vmem:[%s10186_s11 + $0x70] sm:$0xff]  ;;  %v4081_v55 = vld [vmem:[%s10186_s11 + $0x78] sm:$0xff] }
 0x48e   : > { %v4167_v60 = vand.u32 4294901760, %v4080_v54  ;;  %v4170_v61 = vand.u32 4294901760, %v4081_v55 }
 0x48f   : > { %v3563_v63 = vadd.f32 %v3562_v52, %v3488_v59  ;;  %v4249_v52 = vsub.f32 %v9380_v37, %v4248_v42  ;;  %v4257_v59 = vand.u32 4294901760, %v4256_v53  ;;  %v9486_v53 = vld [vmem:[%s10186_s11] sm:$0xff] }
 0x494   : > { %v3646_v2 = vpop.f32.mrb[36].mxu0  ;;  %v3894_v3 = vpop.f32.mrb[38].mxu1 }
 0x495   : > { %v3738_v0 = vadd.f32 %v3737_v58, %v3646_v2  ;;  %v7292_v23 = vpop.f32.mrb[37].mxu0  ;;  %v7325_v24 = vpop.f32.mrb[39].mxu1  ;;  %v4250_v58 = vand.u32 4294901760, %v4249_v52  ;;  %v4269_v2 = vand.u32 4294901760, %v9396_v57 }
 0x496   : > { %v9409_v23 = vsub.f32 %v4081_v55, %v4170_v61 }
 0x49c   : > { %v3817_v33 = vpop.f32.mrb[38].mxu0  ;;  %v4052_v34 = vpop.f32.mrb[40].mxu1 }
 0x49d   : > { %v3818_v47 = vadd.f32 %v3817_v33, %v3738_v0  ;;  %v7314_v49 = vpop.f32.mrb[39].mxu0  ;;  %v7347_v4 = vpop.f32.mrb[41].mxu1  ;;  %v9407_v0 = vsub.f32 %v4080_v54, %v4167_v60  ;;  %v4270_v33 = vsub.f32 %v9396_v57, %v4269_v2  ;;  %v9491_v54 = vld [vmem:[%s10186_s11 + $0x8] sm:$0xff] }
 0x49f   : > { %v3895_v5 = vadd.f32 %v3894_v3, %v3818_v47  ;;  %v8072_v3 = vpack.c.bf16 %v4257_v59, %v4250_v58  ;;  %v4283_v47 = vand.u32 4294901760, %v9409_v23  ;;  %v4271_v4 = vand.u32 4294901760, %v4270_v33  ;;  %v9529_v33 = vld [vmem:[%s10186_s11 + $0x20] sm:$0xff] }
 0x4a0   : > { %v4688_v58 = vand.u32 4294901760, %v9486_v53  ;;  %v4691_v59 = vand.u32 4294901760, %v9491_v54 }
 0x4a1   : > { %8073 = vmatpush3.bf16.msra.mxu1 %v8072_v3 }
 0x4a2   : > { %8074 = vmatprep.subr.bf16.mxu1 %v8454_v28 }
 0x4a4   : > { %v3977_v10 = vpop.f32.mrb[40].mxu0 }
 0x4a5   : > { %v3978_v62 = vadd.f32 %v3977_v10, %v3895_v5  ;;  %v7336_v48 = vpop.f32.mrb[41].mxu0  ;;  %v9416_v5 = vpack.c.bf16 %v4152_v31, %v4149_v30 }
 0x4a7   : > { %v4053_v50 = vadd.f32 %v4052_v34, %v3978_v62  ;;  %v4276_v34 = vand.u32 4294901760, %v9407_v0  ;;  %v4284_v62 = vsub.f32 %v9409_v23, %v4283_v47  ;;  %8058 = vmatpush3.bf16.msra.mxu0 %v9416_v5 }
 0x4a8   : > { %8059 = vmatprep.subr.bf16.mxu0 %v8454_v28 }
 0x4a9   : > { %v4056_v8 = vadd.f32 %v4053_v50, %v3563_v63  ;;  %v4262_v63 = vand.u32 4294901760, %v9394_v56  ;;  %v4277_v10 = vsub.f32 %v9407_v0, %v4276_v34  ;;  %v9421_v50 = vpack.c.bf16 %v4158_v6, %v4155_v1 }
 0x4aa   : > { %v9454_v31 = vpack.c.bf16 %v4283_v47, %v4276_v34  ;;  %v9534_v34 = vld [vmem:[%s10186_s11 + $0x28] sm:$0xff] }
 0x4ab   : > { %v9344_v9 = vadd.f32 %v6450_v7, %v4056_v8  ;;  %v4263_v24 = vsub.f32 %v9394_v56, %v4262_v63  ;;  %v4278_v7 = vand.u32 4294901760, %v4277_v10  ;;  %v4285_v8 = vand.u32 4294901760, %v4284_v62  ;;  %8061 = vmatpush3.bf16.msra.mxu0 %v9421_v50 }
 0x4ac   : > { %8062 = vmatprep.subr.bf16.mxu0 %v8454_v28  ;;  %v9452_v30 = vpack.c.bf16 %v4269_v2, %v4262_v63  ;;  %v9514_v63 = vsub.f32 %v9486_v53, %v4688_v58  ;;  %v9519_v2 = vsub.f32 %v9491_v54, %v4691_v59  ;;  %v4700_v62 = vand.u32 4294901760, %v9529_v33 }
 0x4ad   : > { %v4108_v11 = vsel %vm4101_vm7, %v9344_v9, 0.0  ;;  %v4100_v12 = vand.u32 2147483647, %v9344_v9  ;;  %v4264_v49 = vand.u32 4294901760, %v4263_v24 }
 0x4ae   : > { %4109 = vadd.xlane.f32.xlu1 %v4108_v11  ;;  %v8078_v11 = vpack.c.bf16 %v4285_v8, %v4278_v7  ;;  %v4773_v47 = vand.u32 4294901760, %v9514_v63  ;;  %v9559_v7 = vld [vmem:[%s10186_s11 + $0x30] sm:$0xff] }
 0x4af   : > { %v4102_v13 = vsel %vm4101_vm7, %v4100_v12, 0.0  ;;  %v8075_v48 = vpack.c.bf16 %v4271_v4, %v4264_v49  ;;  %v9426_v12 = vpack.c.bf16 %v4164_v44, %v4161_v27  ;;  %v4780_v49 = vand.u32 4294901760, %v9519_v2 }
 0x4b1   : > { %8076 = vmatpush3.bf16.msra.mxu1 %v8075_v48  ;;  %8064 = vmatpush3.bf16.msra.mxu0 %v9426_v12  ;;  %v4703_v48 = vand.u32 4294901760, %v9534_v34 }
 0x4b2   : > { %4103 = vadd.xlane.f32.xlu1 %v4102_v13  ;;  %8077 = vmatprep.subr.bf16.mxu1 %v8454_v28  ;;  %v9432_v13 = vpack.c.bf16 %v4170_v61, %v4167_v60  ;;  %v9500_v60 = vld [vmem:[%s10186_s11 + $0x10] sm:$0xff]  ;;  %v9505_v61 = vld [vmem:[%s10186_s11 + $0x18] sm:$0xff] }
 0x4b3   : > { %8065 = vmatprep.subr.bf16.mxu0 %v8454_v28  ;;  %v4694_v3 = vand.u32 4294901760, %v9500_v60  ;;  %v4697_v24 = vand.u32 4294901760, %v9505_v61 }
 0x4b5   : > { %8079 = vmatpush3.bf16.msra.mxu1 %v8078_v11  ;;  %8067 = vmatpush3.bf16.msra.mxu0 %v9432_v13  ;;  %v9541_v4 = vsub.f32 %v9500_v60, %v4694_v3  ;;  %v9546_v10 = vsub.f32 %v9505_v61, %v4697_v24 }
 0x4b6   : > { %8092 = vmatprep.subr.bf16.mxu1 %v8454_v28  ;;  %8080 = vmatprep.subr.bf16.mxu0 %v8454_v28 }
 0x4b7   : > { %v4787_v8 = vand.u32 4294901760, %v9541_v4  ;;  %v4794_v11 = vand.u32 4294901760, %v9546_v10 }
 0x53b   : > { %v4110_v14 = vpop.xlane.xlu1 %4109 }
 0x53c   : > { %v4112_v15 = vmul.f32 0.015625, %v4110_v14  ;;  %v8081_v14 = vpack.c.bf16 %v9364_v46, %v9362_v45  ;;  %v6453_v46 = vld [vmem:[%s10185_s10] ss:$0 sm:$0xff] }
 0x53e   : > { %v9351_v16 = vsub.f32 %v9344_v9, %v4112_v15  ;;  %v8084_v15 = vpack.c.bf16 %v9382_v38, %v9380_v37 }
 0x540   : > { %v4114_v18 = vmul.f32 %v9351_v16, %v9351_v16 }
 0x542   : > { %v4115_v29 = vsel %vm4101_vm7, %v4114_v18, 0.0  ;;  %v8087_v18 = vpack.c.bf16 %v9396_v57, %v9394_v56  ;;  %v9564_v56 = vld [vmem:[%s10186_s11 + $0x38] sm:$0xff]  ;;  %v4774_v57 = vsub.f32 %v9514_v63, %v4773_v47 }
 0x543   : > { %4116 = vadd.xlane.f32.xlu0 %v4115_v29  ;;  %v8090_v29 = vpack.c.bf16 %v9409_v23, %v9407_v0 }
 0x544   : > { %v4775_v0 = vand.u32 4294901760, %v4774_v57 }
 0x5d0   : > { %v4117_v17 = vpop.xlane.xlu0 %4116 }
 0x5d1   : > { %v4118_v20 = vmul.f32 0.015625, %v4117_v17  ;;  %v4709_v17 = vand.u32 4294901760, %v9564_v56 }
 0x5d3   : > { %v4119_v1 = vadd.f32 1e-05, %v4118_v20 }
 0x5d5   : > { %8388 = vrsqrt.f32 %v4119_v1 }
 0x5df   : > { %v8389_v6 = vpop.eup %8388 }
 0x5e0   : > { %v4121_v45 = vmul.f32 %v8389_v6, %v9351_v16 }
 0x5e2   : > { %v4128_v35 = vmul.f32 %v6452_v19, %v4121_v45  ;;  %v9612_v19 = vsub.f32 %v9564_v56, %v4709_v17 }
 0x5e4   : > { %v4135_v36 = vadd.f32 %v6453_v46, %v4128_v35 }
 0x5e6   : > { %v4137_v25 = vrot.slane %v4135_v36, 7 }
 0x5e8   : > { %v9464_v37 = vsel %vm588_vm2, 0.0, %v4137_v25  ;;  %v4140_v38 = vsel %vm588_vm2, %v4137_v25, 0.0  ;;  %v4822_v25 = vand.u32 4294901760, %v9612_v19 }
 0x5e9   : > { %v4143_v26 = vrot.slane %v9464_v37, 1  ;;  %v4144_v39 = vrot.slane %v4140_v38, 1  ;;  %v5224_v41 = vrot.slane %v9464_v37, 2  ;;  %v5225_v40 = vrot.slane %v4140_v38, 2 }
 0x5eb   : > { %v4145_v16 = vsel %vm593_vm3, %v4143_v26, %v4144_v39  ;;  %v9472_v43 = vsel %vm1571_vm4, %v5224_v41, %v5225_v40  ;;  %v4823_v39 = vsub.f32 %v9612_v19, %v4822_v25  ;;  %v9649_v41 = vpack.c.bf16 %v4691_v59, %v4688_v58  ;;  %v9701_v58 = vld [vmem:[%s10186_s11 + $0x80] sm:$0xff]  ;;  %v9706_v59 = vld [vmem:[%s10186_s11 + $0x88] sm:$0xff] }
 0x5ec   : > { %v4146_v42 = vsel %vm4101_vm7, %v4145_v16, 0  ;;  %v5230_v61 = vand.u32 4294901760, %v9701_v58 }
 0x5ed   : > { %v9474_v27 = vand.u32 4294901760, %v4146_v42 }
 0x5ef   : > { %v4222_v44 = vsub.f32 %v4146_v42, %v9474_v27  ;;  %7384 = vmatmul.mubr.f32.vlgmr.msra.gmra.mrb[42].mxu1 %v9474_v27  ;;  %v4824_v42 = vand.u32 4294901760, %v4823_v39  ;;  %v8180_v39 = vpack.c.bf16 %v4794_v11, %v4787_v8 }
 0x5f0   : > { %8094 = vmatpush3.bf16.msra.mxu1 %v9416_v5  ;;  %7421 = vmatprep.mubr.msk.f32.mxu1 %vm8455_vm1, %v8456_v32 }
 0x5f1   : > { %8095 = vmatprep.subr.bf16.mxu1 %v8454_v28  ;;  %v4223_v51 = vand.u32 4294901760, %v4222_v44 }
 0x5f3   : > { %v4224_v52 = vsub.f32 %v4222_v44, %v4223_v51 }
 0x5f4   : > { %8097 = vmatpush3.bf16.msra.mxu1 %v9421_v50 }
 0x5f5   : > { %8098 = vmatprep.subr.bf16.mxu1 %v8454_v28  ;;  %v4225_v55 = vand.u32 4294901760, %v4224_v52 }
 0x5f7   : > { %7365 = vmatmul.mubr.f32.vlgmr.msra.gmra.mrb[42].mxu0 %v4225_v55  ;;  %v8153_v55 = vpack.c.bf16 %v9519_v2, %v9514_v63 }
 0x5f8   : > { %8082 = vmatpush3.bf16.msra.mxu0 %v8081_v14  ;;  %8100 = vmatpush3.bf16.msra.mxu1 %v9426_v12  ;;  %v9583_v14 = vsub.f32 %v9529_v33, %v4700_v62  ;;  %v9718_v33 = vld [vmem:[%s10186_s11 + $0x90] sm:$0xff] }
 0x5f9   : > { %8083 = vmatprep.subr.bf16.mxu0 %v8454_v28  ;;  %8101 = vmatprep.subr.bf16.mxu1 %v8454_v28 }
 0x5fa   : > { %7402 = vmatprep.mubr.msk.f32.mxu0 %vm8455_vm1, %v8456_v32  ;;  %v4801_v20 = vand.u32 4294901760, %v9583_v14 }
 0x5fc   : > { %8085 = vmatpush3.bf16.msra.mxu0 %v8084_v15  ;;  %8103 = vmatpush3.bf16.msra.mxu1 %v9432_v13  ;;  %v9588_v15 = vsub.f32 %v9534_v34, %v4703_v48  ;;  %v4802_v46 = vsub.f32 %v9583_v14, %v4801_v20  ;;  %v9723_v34 = vld [vmem:[%s10186_s11 + $0x98] sm:$0xff] }
 0x5fd   : > { %8086 = vmatprep.subr.bf16.mxu0 %v8454_v28  ;;  %8116 = vmatprep.subr.bf16.mxu1 %v8454_v28  ;;  %v5239_v56 = vand.u32 4294901760, %v9723_v34 }
 0x5fe   : > { %v4808_v1 = vand.u32 4294901760, %v9588_v15  ;;  %v8159_v57 = vpack.c.bf16 %v9588_v15, %v9583_v14 }
 0x5ff   : > { %7422 = vmatmul.mubr.f32.vlgmr.msra.gmra.mrb[44].mxu1 %v4223_v51 }
 0x600   : > { %8088 = vmatpush3.bf16.msra.mxu0 %v8087_v18  ;;  %8118 = vmatpush3.bf16.msra.mxu1 %v9416_v5  ;;  %v4781_v5 = vsub.f32 %v9519_v2, %v4780_v49  ;;  %v4706_v18 = vand.u32 4294901760, %v9559_v7  ;;  %v4809_v35 = vsub.f32 %v9588_v15, %v4808_v1 }
 0x601   : > { %8089 = vmatprep.subr.bf16.mxu0 %v8454_v28  ;;  %8119 = vmatprep.subr.bf16.mxu1 %v8454_v28 }
 0x602   : > { %7459 = vmatprep.mubr.msk.f32.mxu1 %vm8455_vm1, %v8456_v32  ;;  %v4782_v23 = vand.u32 4294901760, %v4781_v5  ;;  %v9607_v6 = vsub.f32 %v9559_v7, %v4706_v18  ;;  %v4810_v38 = vand.u32 4294901760, %v4809_v35  ;;  %v9687_v53 = vpack.c.bf16 %v4709_v17, %v4706_v18  ;;  %v9749_v5 = vld [vmem:[%s10186_s11 + $0xa0] sm:$0xff]  ;;  %v9754_v18 = vld [vmem:[%s10186_s11 + $0xa8] sm:$0xff] }
 0x603   : > { %v5236_v7 = vand.u32 4294901760, %v9718_v33  ;;  %v8177_v35 = vpack.c.bf16 %v4780_v49, %v4773_v47 }
 0x604   : > { %8091 = vmatpush3.bf16.msra.mxu0 %v8090_v29  ;;  %8121 = vmatpush3.bf16.msra.mxu1 %v9421_v50  ;;  %v4788_v50 = vsub.f32 %v9541_v4, %v4787_v8  ;;  %v4795_v29 = vsub.f32 %v9546_v10, %v4794_v11  ;;  %v4815_v36 = vand.u32 4294901760, %v9607_v6 }
 0x605   : > { %8104 = vmatprep.subr.bf16.mxu0 %v8454_v28  ;;  %8122 = vmatprep.subr.bf16.mxu1 %v8454_v28 }
 0x606   : > { %v4796_v45 = vand.u32 4294901760, %v4795_v29  ;;  %v4816_v26 = vsub.f32 %v9607_v6, %v4815_v36  ;;  %v8162_v29 = vpack.c.bf16 %v9612_v19, %v9607_v6  ;;  %v8186_v15 = vpack.c.bf16 %v4822_v25, %v4815_v36 }
 0x607   : > { %7403 = vmatmul.mubr.f32.vlgmr.msra.gmra.mrb[44].mxu0 %v4222_v44  ;;  %v5227_v6 = vsel %vm4101_vm7, %v9472_v43, 0  ;;  %v8204_v43 = vpack.c.bf16 %v5239_v56, %v5236_v7 }
 0x608   : > { %8106 = vmatpush3.bf16.msra.mxu0 %v9448_v21  ;;  %8124 = vmatpush3.bf16.msra.mxu1 %v9426_v12  ;;  %v8141_v12 = vpack.c.bf16 %v4782_v23, %v4775_v0  ;;  %v4789_v21 = vand.u32 4294901760, %v4788_v50  ;;  %v4817_v16 = vand.u32 4294901760, %v4816_v26  ;;  %v9761_v23 = vsub.f32 %v9718_v33, %v5236_v7 }
 0x609   : > { %8107 = vmatprep.subr.bf16.mxu0 %v8454_v28  ;;  %8125 = vmatprep.subr.bf16.mxu1 %v8454_v28  ;;  %v9766_v50 = vsub.f32 %v9723_v34, %v5239_v56 }
 0x60a   : > { %7440 = vmatprep.mubr.msk.f32.mxu0 %vm8455_vm1, %v8456_v32 }
 0x60b   : > { %v5336_v26 = vand.u32 4294901760, %v9766_v50  ;;  %v8228_v56 = vpack.c.bf16 %v9766_v50, %v9761_v23 }
 0x60c   : > { %8109 = vmatpush3.bf16.msra.mxu0 %v9450_v22  ;;  %8127 = vmatpush3.bf16.msra.mxu1 %v9432_v13  ;;  %v8144_v22 = vpack.c.bf16 %v4796_v45, %v4789_v21  ;;  %v4803_v13 = vand.u32 4294901760, %v4802_v46  ;;  %v5245_v21 = vand.u32 4294901760, %v9754_v18  ;;  %v9778_v45 = vld [vmem:[%s10186_s11 + $0xb0] sm:$0xff]  ;;  %v9783_v46 = vld [vmem:[%s10186_s11 + $0xb8] sm:$0xff] }
 0x60d   : > { %8110 = vmatprep.subr.bf16.mxu0 %v8454_v28  ;;  %8140 = vmatprep.subr.bf16.mxu1 %v8454_v28  ;;  %v5248_v47 = vand.u32 4294901760, %v9778_v45  ;;  %v5251_v49 = vand.u32 4294901760, %v9783_v46 }
 0x60e   : > { %v8147_v40 = vpack.c.bf16 %v4810_v38, %v4803_v13  ;;  %v5329_v38 = vand.u32 4294901760, %v9761_v23  ;;  %v9808_v2 = vsub.f32 %v9754_v18, %v5245_v21 }
 0x60f   : > { %7460 = vmatmul.mubr.f32.vlgmr.msra.gmra.mrb[46].mxu1 %v9474_v27  ;;  %v9831_v8 = vsub.f32 %v9778_v45, %v5248_v47  ;;  %v9836_v11 = vsub.f32 %v9783_v46, %v5251_v49  ;;  %v4093_v46 = vld [vmem:[%s10188_s13 + $0x10] sm:$0xff] }
 0x610   : > { %8112 = vmatpush3.bf16.msra.mxu0 %v9452_v30  ;;  %8142 = vmatpush3.bf16.msra.mxu1 %v8141_v12  ;;  %v4685_v30 = vsel %vm4101_vm7, %v9464_v37, 0  ;;  %v8150_v37 = vpack.c.bf16 %v4824_v42, %v4817_v16  ;;  %v5242_v12 = vand.u32 4294901760, %v9749_v5  ;;  %v5337_v16 = vsub.f32 %v9766_v50, %v5336_v26 }
 0x611   : > { %8113 = vmatprep.subr.bf16.mxu0 %v8454_v28  ;;  %8143 = vmatprep.subr.bf16.mxu1 %v8454_v28  ;;  %v9653_v44 = vand.u32 4294901760, %v4685_v30  ;;  %v8183_v42 = vpack.c.bf16 %v4808_v1, %v4801_v20  ;;  %v5364_v14 = vand.u32 4294901760, %v9836_v11  ;;  %v8234_v18 = vpack.c.bf16 %v9836_v11, %v9831_v8 }
 0x612   : > { %7497 = vmatprep.mubr.msk.f32.mxu1 %vm8455_vm1, %v8456_v32  ;;  %v9803_v63 = vsub.f32 %v9749_v5, %v5242_v12 }
 0x613   : > { %v9666_v51 = vsub.f32 %v4685_v30, %v9653_v44 }
 0x614   : > { %8115 = vmatpush3.bf16.msra.mxu0 %v9454_v31  ;;  %8145 = vmatpush3.bf16.msra.mxu1 %v8144_v22  ;;  %v9661_v31 = vpack.c.bf16 %v4697_v24, %v4694_v3  ;;  %v5233_v3 = vand.u32 4294901760, %v9706_v59  ;;  %v8156_v24 = vpack.c.bf16 %v9546_v10, %v9541_v4  ;;  %v5343_v4 = vand.u32 4294901760, %v9803_v63 }
 0x615   : > { %8128 = vmatprep.subr.bf16.mxu0 %v8454_v28  ;;  %8146 = vmatprep.subr.bf16.mxu1 %v8454_v28  ;;  %v4762_v52 = vand.u32 4294901760, %v9666_v51  ;;  %v5350_v10 = vand.u32 4294901760, %v9808_v2  ;;  %v8231_v5 = vpack.c.bf16 %v9808_v2, %v9803_v63 }
 0x616   : > { %v8201_v19 = vpack.c.bf16 %v5233_v3, %v5230_v61 }
 0x617   : > { %7441 = vmatmul.mubr.f32.vlgmr.msra.gmra.mrb[46].mxu0 %v9474_v27  ;;  %v9675_v27 = vpack.c.bf16 %v4703_v48, %v4700_v62  ;;  %v4763_v54 = vsub.f32 %v9666_v51, %v4762_v52  ;;  %v9732_v62 = vsub.f32 %v9701_v58, %v5230_v61  ;;  %v9737_v48 = vsub.f32 %v9706_v59, %v5233_v3 }
 0x618   : > { %8130 = vmatpush3.bf16.msra.mxu0 %v9649_v41  ;;  %8148 = vmatpush3.bf16.msra.mxu1 %v8147_v40  ;;  %v5330_v40 = vsub.f32 %v9761_v23, %v5329_v38  ;;  %v8210_v3 = vpack.c.bf16 %v5251_v49, %v5248_v47 }
 0x619   : > { %8131 = vmatprep.subr.bf16.mxu0 %v8454_v28  ;;  %8149 = vmatprep.subr.bf16.mxu1 %v8454_v28  ;;  %v4764_v60 = vand.u32 4294901760, %v4763_v54  ;;  %v5315_v17 = vand.u32 4294901760, %v9732_v62  ;;  %v5322_v0 = vand.u32 4294901760, %v9737_v48  ;;  %v5357_v54 = vand.u32 4294901760, %v9831_v8 }
 0x61a   : > { %7478 = vmatprep.mubr.msk.f32.mxu0 %vm8455_vm1, %v8456_v32  ;;  %v8225_v34 = vpack.c.bf16 %v9737_v48, %v9732_v62 }
 0x61b   : > { %v5316_v22 = vsub.f32 %v9732_v62, %v5315_v17  ;;  %v5323_v13 = vsub.f32 %v9737_v48, %v5322_v0  ;;  %v8255_v62 = vpack.c.bf16 %v5350_v10, %v5343_v4  ;;  %v8258_v48 = vpack.c.bf16 %v5364_v14, %v5357_v54 }
 0x61c   : > { %8133 = vmatpush3.bf16.msra.mxu0 %v9661_v31  ;;  %8151 = vmatpush3.bf16.msra.mxu1 %v8150_v37  ;;  %v5331_v37 = vand.u32 4294901760, %v5330_v40  ;;  %v4096_v40 = vld [vmem:[%s10188_s13 + $0x28] sm:$0xff] }
 0x61d   : > { %8134 = vmatprep.subr.bf16.mxu0 %v8454_v28  ;;  %8164 = vmatprep.subr.bf16.mxu1 %v8454_v28  ;;  %v5317_v30 = vand.u32 4294901760, %v5316_v22 }
 0x61f   : > { %7498 = vmatmul.mubr.f32.vlgmr.msra.gmra.mrb[48].mxu1 %v9653_v44 }
 0x620   : > { %8136 = vmatpush3.bf16.msra.mxu0 %v9675_v27  ;;  %8166 = vmatpush3.bf16.msra.mxu1 %v9649_v41 }
 0x621   : > { %8137 = vmatprep.subr.bf16.mxu0 %v8454_v28  ;;  %8167 = vmatprep.subr.bf16.mxu1 %v8454_v28 }
 0x622   : > { %7535 = vmatprep.mubr.msk.f32.mxu1 %vm8455_vm1, %v8456_v32 }
 0x624   : > { %8139 = vmatpush3.bf16.msra.mxu0 %v9687_v53  ;;  %8169 = vmatpush3.bf16.msra.mxu1 %v9661_v31 }
 0x625   : > { %8152 = vmatprep.subr.bf16.mxu0 %v8454_v28  ;;  %8170 = vmatprep.subr.bf16.mxu1 %v8454_v28 }
 0x627   : > { %7479 = vmatmul.mubr.f32.vlgmr.msra.gmra.mrb[48].mxu0 %v4764_v60  ;;  %v5365_v60 = vsub.f32 %v9836_v11, %v5364_v14  ;;  %v4098_v14 = vld [vmem:[%s10188_s13 + $0x38] sm:$0xff] }
 0x628   : > { %8154 = vmatpush3.bf16.msra.mxu0 %v8153_v55  ;;  %8172 = vmatpush3.bf16.msra.mxu1 %v9675_v27  ;;  %v5358_v55 = vsub.f32 %v9831_v8, %v5357_v54  ;;  %v4097_v54 = vld [vmem:[%s10188_s13 + $0x30] sm:$0xff] }
 0x629   : > { %8155 = vmatprep.subr.bf16.mxu0 %v8454_v28  ;;  %8173 = vmatprep.subr.bf16.mxu1 %v8454_v28 }
 0x62a   : > { %7516 = vmatprep.mubr.msk.f32.mxu0 %vm8455_vm1, %v8456_v32  ;;  %v5359_v25 = vand.u32 4294901760, %v5358_v55 }
 0x62c   : > { %8157 = vmatpush3.bf16.msra.mxu0 %v8156_v24  ;;  %8175 = vmatpush3.bf16.msra.mxu1 %v9687_v53  ;;  %v5366_v24 = vand.u32 4294901760, %v5365_v60 }
 0x62d   : > { %8158 = vmatprep.subr.bf16.mxu0 %v8454_v28  ;;  %8188 = vmatprep.subr.bf16.mxu1 %v8454_v28 }
 0x62e   : > { %v8222_v58 = vpack.c.bf16 %v5366_v24, %v5359_v25 }
 0x62f   : > { %7536 = vmatmul.mubr.f32.vlgmr.msra.gmra.mrb[50].mxu1 %v4762_v52  ;;  %v5351_v52 = vsub.f32 %v9808_v2, %v5350_v10 }
 0x630   : > { %8160 = vmatpush3.bf16.msra.mxu0 %v8159_v57  ;;  %8190 = vmatpush3.bf16.msra.mxu1 %v9649_v41  ;;  %v5324_v41 = vand.u32 4294901760, %v5323_v13  ;;  %v9880_v57 = vand.u32 4294901760, %v5227_v6 }
 0x631   : > { %8161 = vmatprep.subr.bf16.mxu0 %v8454_v28  ;;  %8191 = vmatprep.subr.bf16.mxu1 %v8454_v28 }
 0x632   : > { %7573 = vmatprep.mubr.msk.f32.mxu1 %vm8455_vm1, %v8456_v32  ;;  %v5303_v59 = vsub.f32 %v5227_v6, %v9880_v57 }
 0x634   : > { %8163 = vmatpush3.bf16.msra.mxu0 %v8162_v29  ;;  %8193 = vmatpush3.bf16.msra.mxu1 %v9661_v31  ;;  %v8213_v31 = vpack.c.bf16 %v5324_v41, %v5317_v30  ;;  %v5304_v61 = vand.u32 4294901760, %v5303_v59  ;;  %v8249_v29 = vpack.c.bf16 %v5322_v0, %v5315_v17  ;;  %v4091_v17 = vld [vmem:[%s10188_s13] sm:$0xff]  ;;  %v4092_v0 = vld [vmem:[%s10188_s13 + $0x8] sm:$0xff] }
 0x635   : > { %8176 = vmatprep.subr.bf16.mxu0 %v8454_v28  ;;  %8194 = vmatprep.subr.bf16.mxu1 %v8454_v28  ;;  %v5787_v23 = vand.u32 4294901760, %v4091_v17  ;;  %v5790_v50 = vand.u32 4294901760, %v4092_v0  ;;  %v4095_v41 = vld [vmem:[%s10188_s13 + $0x20] sm:$0xff] }
 0x636   : > { %v5305_v33 = vsub.f32 %v5303_v59, %v5304_v61  ;;  %v5799_v11 = vand.u32 4294901760, %v4095_v41 }
 0x637   : > { %7517 = vmatmul.mubr.f32.vlgmr.msra.gmra.mrb[50].mxu0 %v9666_v51  ;;  %v5338_v51 = vand.u32 4294901760, %v5337_v16  ;;  %v9967_v45 = vsub.f32 %v4092_v0, %v5790_v50 }
 0x638   : > { %8178 = vmatpush3.bf16.msra.mxu0 %v8177_v35  ;;  %8196 = vmatpush3.bf16.msra.mxu1 %v9675_v27  ;;  %v5344_v27 = vsub.f32 %v9803_v63, %v5343_v4  ;;  %v5306_v7 = vand.u32 4294901760, %v5305_v33  ;;  %v4094_v35 = vld [vmem:[%s10188_s13 + $0x18] sm:$0xff]  ;;  %v10023_v33 = vpack.c.bf16 %v5790_v50, %v5787_v23 }
 0x639   : > { %8179 = vmatprep.subr.bf16.mxu0 %v8454_v28  ;;  %8197 = vmatprep.subr.bf16.mxu1 %v8454_v28  ;;  %v8216_v20 = vpack.c.bf16 %v5338_v51, %v5331_v37  ;;  %v5879_v13 = vand.u32 4294901760, %v9967_v45 }
 0x63a   : > { %7554 = vmatprep.mubr.msk.f32.mxu0 %vm8455_vm1, %v8456_v32  ;;  %v5345_v1 = vand.u32 4294901760, %v5344_v27  ;;  %v10001_v27 = vsub.f32 %v4095_v41, %v5799_v11 }
 0x63b   : > { %v5880_v49 = vsub.f32 %v9967_v45, %v5879_v13 }
 0x63c   : > { %8181 = vmatpush3.bf16.msra.mxu0 %v8180_v39  ;;  %8199 = vmatpush3.bf16.msra.mxu1 %v9687_v53  ;;  %v5352_v53 = vand.u32 4294901760, %v5351_v52  ;;  %v5900_v60 = vand.u32 4294901760, %v10001_v27 }
 0x63d   : > { %8182 = vmatprep.subr.bf16.mxu0 %v8454_v28  ;;  %8212 = vmatprep.subr.bf16.mxu1 %v8454_v28  ;;  %v5881_v4 = vand.u32 4294901760, %v5880_v49 }
 0x63e   : > { %v8219_v36 = vpack.c.bf16 %v5352_v53, %v5345_v1  ;;  %v5805_v1 = vand.u32 4294901760, %v4097_v54  ;;  %v5808_v53 = vand.u32 4294901760, %v4098_v14 }
 0x63f   : > { %7574 = vmatmul.mubr.f32.vlgmr.msra.gmra.mrb[52].mxu1 %v9653_v44 }
 0x640   : > { %8184 = vmatpush3.bf16.msra.mxu0 %v8183_v42  ;;  %8214 = vmatpush3.bf16.msra.mxu1 %v8213_v31  ;;  %v5802_v42 = vand.u32 4294901760, %v4096_v40  ;;  %v10014_v24 = vsub.f32 %v4097_v54, %v5805_v1 }
 0x641   : > { %8185 = vmatprep.subr.bf16.mxu0 %v8454_v28  ;;  %8215 = vmatprep.subr.bf16.mxu1 %v8454_v28 }
 0x642   : > { %7611 = vmatprep.mubr.msk.f32.mxu1 %vm8455_vm1, %v8456_v32  ;;  %v10003_v52 = vsub.f32 %v4096_v40, %v5802_v42 }
 0x644   : > { %8187 = vmatpush3.bf16.msra.mxu0 %v8186_v15  ;;  %8217 = vmatpush3.bf16.msra.mxu1 %v8216_v20  ;;  %v5907_v6 = vand.u32 4294901760, %v10003_v52 }
 0x645   : > { %8200 = vmatprep.subr.bf16.mxu0 %v8454_v28  ;;  %8218 = vmatprep.subr.bf16.mxu1 %v8454_v28 }
 0x647   : > { %7555 = vmatmul.mubr.f32.vlgmr.msra.gmra.mrb[52].mxu0 %v9653_v44  ;;  %v8207_v44 = vpack.c.bf16 %v5245_v21, %v5242_v12  ;;  %v8252_v12 = vpack.c.bf16 %v5336_v26, %v5329_v38  ;;  %v9965_v21 = vsub.f32 %v4091_v17, %v5787_v23  ;;  %v5793_v38 = vand.u32 4294901760, %v4093_v46 }
 0x648   : > { %8202 = vmatpush3.bf16.msra.mxu0 %v8201_v19  ;;  %8220 = vmatpush3.bf16.msra.mxu1 %v8219_v36  ;;  %v5796_v26 = vand.u32 4294901760, %v4094_v35  ;;  %v10033_v17 = vpack.c.bf16 %v5802_v42, %v5799_v11 }
 0x649   : > { %8203 = vmatprep.subr.bf16.mxu0 %v8454_v28  ;;  %8221 = vmatprep.subr.bf16.mxu1 %v8454_v28  ;;  %v5872_v22 = vand.u32 4294901760, %v9965_v21  ;;  %v9983_v39 = vsub.f32 %v4093_v46, %v5793_v38  ;;  %v10039_v46 = vpack.c.bf16 %v5808_v53, %v5805_v1 }
 0x64a   : > { %7592 = vmatprep.mubr.msk.f32.mxu0 %vm8455_vm1, %v8456_v32  ;;  %v9985_v30 = vsub.f32 %v4094_v35, %v5796_v26 }
 0x64b   : > { %v5873_v47 = vsub.f32 %v9965_v21, %v5872_v22  ;;  %v5886_v10 = vand.u32 4294901760, %v9983_v39  ;;  %v10055_v11 = vpack.c.bf16 %v5879_v13, %v5872_v22 }
 0x64c   : > { %8205 = vmatpush3.bf16.msra.mxu0 %v8204_v43  ;;  %8223 = vmatpush3.bf16.msra.mxu1 %v8222_v58  ;;  %v5893_v8 = vand.u32 4294901760, %v9985_v30  ;;  %v5908_v58 = vsub.f32 %v10003_v52, %v5907_v6 }
 0x64d   : > { %8206 = vmatprep.subr.bf16.mxu0 %v8454_v28  ;;  %8236 = vmatprep.subr.bf16.mxu1 %v8454_v28  ;;  %v5874_v16 = vand.u32 4294901760, %v5873_v47  ;;  %v5887_v37 = vsub.f32 %v9983_v39, %v5886_v10  ;;  %v8303_v47 = vpack.c.bf16 %v10003_v52, %v10001_v27 }
 0x64e   : > { %v5894_v51 = vsub.f32 %v9985_v30, %v5893_v8 }
 0x64f   : > { %7612 = vmatmul.mubr.f32.vlgmr.msra.gmra.mrb[54].mxu1 %v9880_v57  ;;  %v8285_v31 = vpack.c.bf16 %v5881_v4, %v5874_v16  ;;  %v5888_v15 = vand.u32 4294901760, %v5887_v37  ;;  %v10061_v37 = vpack.c.bf16 %v5893_v8, %v5886_v10 }
 0x650   : > { %8208 = vmatpush3.bf16.msra.mxu0 %v8207_v44  ;;  %8238 = vmatpush3.bf16.msra.mxu1 %v8201_v19  ;;  %v5895_v20 = vand.u32 4294901760, %v5894_v51  ;;  %v10063_v51 = vpack.c.bf16 %v5907_v6, %v5900_v60 }
 0x651   : > { %8209 = vmatprep.subr.bf16.mxu0 %v8454_v28  ;;  %8239 = vmatprep.subr.bf16.mxu1 %v8454_v28 }
 0x652   : > { %7649 = vmatprep.mubr.msk.f32.mxu1 %vm8455_vm1, %v8456_v32  ;;  %v8288_v25 = vpack.c.bf16 %v5895_v20, %v5888_v15 }
 0x654   : > { %8211 = vmatpush3.bf16.msra.mxu0 %v8210_v3  ;;  %8241 = vmatpush3.bf16.msra.mxu1 %v8204_v43 }
 0x655   : > { %8224 = vmatprep.subr.bf16.mxu0 %v8454_v28  ;;  %8242 = vmatprep.subr.bf16.mxu1 %v8454_v28 }
 0x657   : > { %7593 = vmatmul.mubr.f32.vlgmr.msra.gmra.mrb[54].mxu0 %v5306_v7 }
 0x658   : > { %8226 = vmatpush3.bf16.msra.mxu0 %v8225_v34  ;;  %8244 = vmatpush3.bf16.msra.mxu1 %v8207_v44 }
 0x659   : > { %8227 = vmatprep.subr.bf16.mxu0 %v8454_v28  ;;  %8245 = vmatprep.subr.bf16.mxu1 %v8454_v28 }
 0x65a   : > { %7630 = vmatprep.mubr.msk.f32.mxu0 %vm8455_vm1, %v8456_v32 }
 0x65c   : > { %8229 = vmatpush3.bf16.msra.mxu0 %v8228_v56  ;;  %8247 = vmatpush3.bf16.msra.mxu1 %v8210_v3 }
 0x65d   : > { %8230 = vmatprep.subr.bf16.mxu0 %v8454_v28  ;;  %8260 = vmatprep.subr.bf16.mxu1 %v8454_v28 }
 0x65f   : > { %7650 = vmatmul.mubr.f32.vlgmr.msra.gmra.mrb[56].mxu1 %v5304_v61 }
 0x660   : > { %8232 = vmatpush3.bf16.msra.mxu0 %v8231_v5  ;;  %8262 = vmatpush3.bf16.msra.mxu1 %v8201_v19 }
 0x661   : > { %8233 = vmatprep.subr.bf16.mxu0 %v8454_v28  ;;  %8263 = vmatprep.subr.bf16.mxu1 %v8454_v28 }
 0x662   : > { %7687 = vmatprep.mubr.msk.f32.mxu1 %vm8455_vm1, %v8456_v32 }
 0x664   : > { %8235 = vmatpush3.bf16.msra.mxu0 %v8234_v18  ;;  %8265 = vmatpush3.bf16.msra.mxu1 %v8204_v43  ;;  %v5901_v43 = vsub.f32 %v10001_v27, %v5900_v60 }
 0x665   : > { %8248 = vmatprep.subr.bf16.mxu0 %v8454_v28  ;;  %8266 = vmatprep.subr.bf16.mxu1 %v8454_v28 }
 0x666   : > { %v5902_v61 = vand.u32 4294901760, %v5901_v43 }
 0x667   : > { %7631 = vmatmul.mubr.f32.vlgmr.msra.gmra.mrb[56].mxu0 %v5303_v59  ;;  %v5914_v59 = vand.u32 4294901760, %v10014_v24 }
 0x668   : > { %8250 = vmatpush3.bf16.msra.mxu0 %v8249_v29  ;;  %8268 = vmatpush3.bf16.msra.mxu1 %v8207_v44 }
 0x669   : > { %8251 = vmatprep.subr.bf16.mxu0 %v8454_v28  ;;  %8269 = vmatprep.subr.bf16.mxu1 %v8454_v28  ;;  %v5915_v34 = vsub.f32 %v10014_v24, %v5914_v59 }
 0x66a   : > { %7668 = vmatprep.mubr.msk.f32.mxu0 %vm8455_vm1, %v8456_v32 }
 0x66b   : > { %v5916_v5 = vand.u32 4294901760, %v5915_v34 }
 0x66c   : > { %8253 = vmatpush3.bf16.msra.mxu0 %v8252_v12  ;;  %8271 = vmatpush3.bf16.msra.mxu1 %v8210_v3  ;;  %v5909_v3 = vand.u32 4294901760, %v5908_v58 }
 0x66d   : > { %8254 = vmatprep.subr.bf16.mxu0 %v8454_v28  ;;  %8284 = vmatprep.subr.bf16.mxu1 %v8454_v28 }
 0x66e   : > { %v8291_v56 = vpack.c.bf16 %v5909_v3, %v5902_v61 }
 0x66f   : > { %7688 = vmatmul.mubr.f32.vlgmr.msra.gmra.mrb[58].mxu1 %v9880_v57 }
 0x670   : > { %8256 = vmatpush3.bf16.msra.mxu0 %v8255_v62  ;;  %7725 = vmatprep.mubr.msk.f32.mxu1 %vm8455_vm1, %v8456_v32  ;;  %v10030_v62 = vpack.c.bf16 %v5796_v26, %v5793_v38  ;;  %v8297_v38 = vpack.c.bf16 %v9967_v45, %v9965_v21 }
 0x671   : > { %8257 = vmatprep.subr.bf16.mxu0 %v8454_v28  ;;  %8286 = vmatpush3.bf16.msra.mxu1 %v8285_v31 }
 0x672   : > { %8287 = vmatprep.subr.bf16.mxu1 %v8454_v28 }
 0x674   : > { %8259 = vmatpush3.bf16.msra.mxu0 %v8258_v48 }
 0x675   : > { %8272 = vmatprep.subr.bf16.mxu0 %v8454_v28  ;;  %8289 = vmatpush3.bf16.msra.mxu1 %v8288_v25 }
 0x676   : > { %8290 = vmatprep.subr.bf16.mxu1 %v8454_v28 }
 0x677   : > { %7669 = vmatmul.mubr.f32.vlgmr.msra.gmra.mrb[58].mxu0 %v9880_v57  ;;  %v10016_v57 = vsub.f32 %v4098_v14, %v5808_v53 }
 0x678   : > { %7706 = vmatprep.mubr.msk.f32.mxu0 %vm8455_vm1, %v8456_v32  ;;  %8274 = vmatpush3.bf16.msra.mxu0 %v10023_v33 }
 0x679   : > { %v5921_v44 = vand.u32 4294901760, %v10016_v57  ;;  %8292 = vmatpush3.bf16.msra.mxu1 %v8291_v56  ;;  %8275 = vmatprep.subr.bf16.mxu0 %v8454_v28  ;;  %v8306_v16 = vpack.c.bf16 %v10016_v57, %v10014_v24 }
 0x67a   : > { %8293 = vmatprep.subr.bf16.mxu1 %v8454_v28 }
 0x67b   : > { %v5922_v7 = vsub.f32 %v10016_v57, %v5921_v44  ;;  %v10065_v20 = vpack.c.bf16 %v5921_v44, %v5914_v59 }
 0x67c   : > { %8277 = vmatpush3.bf16.msra.mxu0 %v10030_v62 }
 0x67d   : > { %v5923_v18 = vand.u32 4294901760, %v5922_v7  ;;  %8278 = vmatprep.subr.bf16.mxu0 %v8454_v28 }
 0x67f   : > { %v8294_v48 = vpack.c.bf16 %v5923_v18, %v5916_v5 }
 0x680   : > { %8280 = vmatpush3.bf16.msra.mxu0 %v10033_v17 }
 0x681   : > { %8295 = vmatpush3.bf16.msra.mxu1 %v8294_v48  ;;  %8281 = vmatprep.subr.bf16.mxu0 %v8454_v28 }
 0x682   : > { %8308 = vmatprep.subr.bf16.mxu1 %v8454_v28 }
 0x684   : > { %8283 = vmatpush3.bf16.msra.mxu0 %v10039_v46 }
 0x685   : > { %8296 = vmatprep.subr.bf16.mxu0 %v8454_v28 }
 0x6c2   : > { %v4338_v63 = vpop.f32.mrb[42].mxu1 }
 0x6c3   : > { %v7385_v2 = vpop.f32.mrb[43].mxu1 }
 0x6c4   : > { %v8300_v2 = vpack.c.bf16 %v9985_v30, %v9983_v39  ;;  %v6455_v39 = vld [vmem:[%s10189_s14] ss:$0 sm:$0xff] }
 0x6ca   : > { %v4227_v55 = vpop.f32.mrb[42].mxu0 }
 0x6cb   : > { %v4339_v19 = vadd.f32 %v4338_v63, %v4227_v55  ;;  %v7366_v36 = vpop.f32.mrb[43].mxu0 }
 0x6d2   : > { %v4507_v29 = vpop.f32.mrb[44].mxu1 }
 0x6d3   : > { %v7423_v12 = vpop.f32.mrb[45].mxu1 }
 0x6da   : > { %v4426_v0 = vpop.f32.mrb[44].mxu0 }
 0x6db   : > { %v4427_v23 = vadd.f32 %v4426_v0, %v4339_v19  ;;  %v7404_v50 = vpop.f32.mrb[45].mxu0 }
 0x6dd   : > { %v4508_v35 = vadd.f32 %v4507_v29, %v4427_v23 }
 0x6e2   : > { %v4681_v26 = vpop.f32.mrb[46].mxu1 }
 0x6e3   : > { %v7461_v63 = vpop.f32.mrb[47].mxu1 }
 0x6ea   : > { %v4602_v49 = vpop.f32.mrb[46].mxu0 }
 0x6eb   : > { %v4603_v41 = vadd.f32 %v4602_v49, %v4508_v35  ;;  %v7442_v40 = vpop.f32.mrb[47].mxu0 }
 0x6ed   : > { %v4682_v4 = vadd.f32 %v4681_v26, %v4603_v41  ;;  %v6454_v26 = vld [vmem:[%s10187_s12] ss:$0 sm:$0xff] }
 0x6f2   : > { %v4877_v42 = vpop.f32.mrb[48].mxu1 }
 0x6f3   : > { %v7499_v31 = vpop.f32.mrb[49].mxu1 }
 0x6fa   : > { %v4766_v54 = vpop.f32.mrb[48].mxu0 }
 0x6fb   : > { %v4767_v14 = vadd.f32 %v4766_v54, %v4682_v4  ;;  %v7480_v15 = vpop.f32.mrb[49].mxu0 }
 0x6fd   : > { %v4878_v1 = vadd.f32 %v4877_v42, %v4767_v14 }
 0x702   : > { %v5046_v53 = vpop.f32.mrb[50].mxu1 }
 0x703   : > { %v7537_v55 = vpop.f32.mrb[51].mxu1 }
 0x70a   : > { %v4965_v22 = vpop.f32.mrb[50].mxu0 }
 0x70b   : > { %v4966_v13 = vadd.f32 %v4965_v22, %v4878_v1  ;;  %v7518_v19 = vpop.f32.mrb[51].mxu0 }
 0x70d   : > { %v5047_v36 = vadd.f32 %v5046_v53, %v4966_v13 }
 0x712   : > { %v5220_v25 = vpop.f32.mrb[52].mxu1 }
 0x713   : > { %v7575_v43 = vpop.f32.mrb[53].mxu1 }
 0x71a   : > { %v5141_v58 = vpop.f32.mrb[52].mxu0 }
 0x71b   : > { %v5142_v61 = vadd.f32 %v5141_v58, %v5047_v36  ;;  %v7556_v10 = vpop.f32.mrb[53].mxu0 }
 0x71d   : > { %v5221_v8 = vadd.f32 %v5220_v25, %v5142_v61 }
 0x722   : > { %v5419_v60 = vpop.f32.mrb[54].mxu1 }
 0x723   : > { %v7613_v6 = vpop.f32.mrb[55].mxu1 }
 0x72a   : > { %v5308_v3 = vpop.f32.mrb[54].mxu0 }
 0x72b   : > { %v5420_v34 = vadd.f32 %v5419_v60, %v5308_v3  ;;  %v7594_v7 = vpop.f32.mrb[55].mxu0 }
 0x732   : > { %v5588_v59 = vpop.f32.mrb[56].mxu1 }
 0x733   : > { %v7651_v44 = vpop.f32.mrb[57].mxu1 }
 0x73a   : > { %v5507_v56 = vpop.f32.mrb[56].mxu0 }
 0x73b   : > { %v5508_v5 = vadd.f32 %v5507_v56, %v5420_v34  ;;  %v7632_v18 = vpop.f32.mrb[57].mxu0 }
 0x73d   : > { %v5589_v29 = vadd.f32 %v5588_v59, %v5508_v5 }
 0x742   : > { %v5762_v12 = vpop.f32.mrb[58].mxu1 }
 0x743   : > { %v7689_v48 = vpop.f32.mrb[59].mxu1 }
 0x74a   : > { %v5683_v0 = vpop.f32.mrb[58].mxu0 }
 0x74b   : > { %v5684_v23 = vadd.f32 %v5683_v0, %v5589_v29  ;;  %v7670_v50 = vpop.f32.mrb[59].mxu0 }
 0x74d   : > { %v5763_v35 = vadd.f32 %v5762_v12, %v5684_v23 }
 0x74f   : > { %v5766_v63 = vadd.f32 %v5763_v35, %v5221_v8 }
 0x751   : > { %v5773_v49 = vadd.f32 %v6454_v26, %v5766_v63 }
 0x753   : > { %vm5774_vm8 = vcmp.gt.f32.partialorder %v5773_v49, 0.0  ;;  %v5775_v41 = vmul.f32 0.01, %v5773_v49 }
 0x755   : > { %v5776_v40 = vsel %vm5774_vm8, %v5773_v49, %v5775_v41 }
 0x756   : > { %v5784_v4 = vsel %vm4101_vm7, %v5776_v40, 0 }
 0x757   : > { %v5859_v42 = vand.u32 4294901760, %v5784_v4 }
 0x759   : > { %v5860_v31 = vsub.f32 %v5784_v4, %v5859_v42  ;;  %7726 = vmatmul.mubr.f32.vlgmr.msra.gmra.mrb[60].mxu1 %v5859_v42 }
 0x75a   : > { %8310 = vmatpush3.bf16.msra.mxu1 %v10023_v33  ;;  %7763 = vmatprep.mubr.msk.f32.mxu1 %vm8455_vm1, %v8456_v32 }
 0x75b   : > { %8311 = vmatprep.subr.bf16.mxu1 %v8454_v28  ;;  %v5861_v54 = vand.u32 4294901760, %v5860_v31 }
 0x75d   : > { %v5862_v14 = vsub.f32 %v5860_v31, %v5861_v54 }
 0x75e   : > { %8313 = vmatpush3.bf16.msra.mxu1 %v10030_v62 }
 0x75f   : > { %8314 = vmatprep.subr.bf16.mxu1 %v8454_v28  ;;  %v5863_v15 = vand.u32 4294901760, %v5862_v14 }
 0x761   : > { %7707 = vmatmul.mubr.f32.vlgmr.msra.gmra.mrb[60].mxu0 %v5863_v15 }
 0x762   : > { %8298 = vmatpush3.bf16.msra.mxu0 %v8297_v38  ;;  %8316 = vmatpush3.bf16.msra.mxu1 %v10033_v17 }
 0x763   : > { %8299 = vmatprep.subr.bf16.mxu0 %v8454_v28  ;;  %8317 = vmatprep.subr.bf16.mxu1 %v8454_v28 }
 0x764   : > { %7744 = vmatprep.mubr.msk.f32.mxu0 %vm8455_vm1, %v8456_v32 }
 0x766   : > { %8301 = vmatpush3.bf16.msra.mxu0 %v8300_v2  ;;  %8319 = vmatpush3.bf16.msra.mxu1 %v10039_v46 }
 0x767   : > { %8302 = vmatprep.subr.bf16.mxu0 %v8454_v28  ;;  %8332 = vmatprep.subr.bf16.mxu1 %v8454_v28 }
 0x769   : > { %7764 = vmatmul.mubr.f32.vlgmr.msra.gmra.mrb[62].mxu1 %v5861_v54 }
 0x76a   : > { %8304 = vmatpush3.bf16.msra.mxu0 %v8303_v47  ;;  %8334 = vmatpush3.bf16.msra.mxu1 %v10023_v33  ;;  %v4104_v47 = vpop.xlane.xlu1 %4103 }
 0x76b   : > { %8305 = vmatprep.subr.bf16.mxu0 %v8454_v28  ;;  %8335 = vmatprep.subr.bf16.mxu1 %v8454_v28  ;;  %vm4105_vm9 = vcmp.gt.f32.partialorder %v4104_v47, 0.0 }
 0x76c   : > { %7801 = vmatprep.mubr.msk.f32.mxu1 %vm8455_vm1, %v8456_v32  ;;  %v6451_v1 = vsel %vm4105_vm9, 1.0, %v8456_v32 }
 0x76e   : > { %8307 = vmatpush3.bf16.msra.mxu0 %v8306_v16  ;;  %8337 = vmatpush3.bf16.msra.mxu1 %v10030_v62 }
 0x76f   : > { %8320 = vmatprep.subr.bf16.mxu0 %v8454_v28  ;;  %8338 = vmatprep.subr.bf16.mxu1 %v8454_v28 }
 0x771   : > { %7745 = vmatmul.mubr.f32.vlgmr.msra.gmra.mrb[62].mxu0 %v5860_v31 }
 0x772   : > { %8322 = vmatpush3.bf16.msra.mxu0 %v10055_v11  ;;  %8340 = vmatpush3.bf16.msra.mxu1 %v10033_v17 }
 0x773   : > { %8323 = vmatprep.subr.bf16.mxu0 %v8454_v28  ;;  %8341 = vmatprep.subr.bf16.mxu1 %v8454_v28 }
 0x774   : > { %7782 = vmatprep.mubr.msk.f32.mxu0 %vm8455_vm1, %v8456_v32 }
 0x776   : > { %8325 = vmatpush3.bf16.msra.mxu0 %v10061_v37  ;;  %8343 = vmatpush3.bf16.msra.mxu1 %v10039_v46 }
 0x777   : > { %8326 = vmatprep.subr.bf16.mxu0 %v8454_v28 }
 0x779   : > { %7802 = vmatmul.mubr.f32.vlgmr.msra.gmra.mrb[64].mxu1 %v5859_v42 }
 0x77a   : > { %8328 = vmatpush3.bf16.msra.mxu0 %v10063_v51 }
 0x77b   : > { %8329 = vmatprep.subr.bf16.mxu0 %v8454_v28 }
 0x77e   : > { %8331 = vmatpush3.bf16.msra.mxu0 %v10065_v20 }
 0x781   : > { %7783 = vmatmul.mubr.f32.vlgmr.msra.gmra.mrb[64].mxu0 %v5859_v42 }
 0x82c   : > { %v5976_v21 = vpop.f32.mrb[60].mxu1 }
 0x82d   : > { %v7727_v45 = vpop.f32.mrb[61].mxu1 }
 0x834   : > { %v5865_v30 = vpop.f32.mrb[60].mxu0 }
 0x835   : > { %v5866_v27 = vadd.f32 %v6455_v39, %v5865_v30  ;;  %v7708_v52 = vpop.f32.mrb[61].mxu0 }
 0x837   : > { %v5977_v24 = vadd.f32 %v5976_v21, %v5866_v27 }
 0x83c   : > { %v6145_v57 = vpop.f32.mrb[62].mxu1 }
 0x83d   : > { %v7765_v33 = vpop.f32.mrb[63].mxu1 }
 0x844   : > { %v6064_v62 = vpop.f32.mrb[62].mxu0 }
 0x845   : > { %v6065_v17 = vadd.f32 %v6064_v62, %v5977_v24  ;;  %v7746_v28 = vpop.f32.mrb[63].mxu0 }
 0x847   : > { %v6146_v46 = vadd.f32 %v6145_v57, %v6065_v17 }
 0x84c   : > { %v6319_v38 = vpop.f32.mrb[64].mxu1 }
 0x84d   : > { %v7803_v2 = vpop.f32.mrb[65].mxu1 }
 0x854   : > { %v6240_v16 = vpop.f32.mrb[64].mxu0 }
 0x855   : > { %v6241_v11 = vadd.f32 %v6240_v16, %v6146_v46  ;;  %v7784_v37 = vpop.f32.mrb[65].mxu0 }
 0x857   : > { %v6320_v51 = vadd.f32 %v6319_v38, %v6241_v11 }
 0x859   : > { %v6323_v20 = vadd.f32 %v6320_v51, %v9344_v9 }
 0x85b   : > { %v6324_v53 = vmul.f32 %v6451_v1, %v6323_v20 }
 0x85d   : > { %6326 = vst.msk [vmem:[#allocation2] sm:$0xff] %vm4101_vm7, %v6324_v53  ;;  %6325 = vst.msk [vmem:[%s513_s26] sm:$0xff] %vm4101_vm7, %v6324_v53 }
 0x85e   : > { %8403 = shalt.err (!%p8400_p3)
}
 0x85f   : > { %s8404_s30 = scalar_lea.hbm %s10127_s27, 128  ;;  %s8408_s1 = scalar_lea.hbm %s10190_s15, 256 }
 0x860   : > { %p8405_p4 = scmp.ne.s32.totalorder %s10127_s27, %s8404_s30  ;;  %p8409_p9 = scmp.lt.u32.totalorder %s10127_s27, %s10190_s15 }
 0x861   : > { %p8410_p10 = scmp.lt.u32.totalorder %s8408_s1, %s8404_s30  ;;  %p8412_p12 = scmp.lt.u32.totalorder %s8404_s30, %s10127_s27 }
 0x862   : > { %p8406_p7 = pnand %p8405_p4, %p8581_p5 }
 0x863   : > { %p8411_p11 = por %p8410_p10, %p8409_p9 }
 0x864   : > { %p8407_p8 = pneg %p8406_p7 }
 0x865   : > { %p8413_p13 = por %p8412_p12, %p8411_p11 }
 0x867   : > { %p8414_p0 = pnand %p8413_p13, %p8407_p8 }
 0x869   : > { %8417 = shalt.err (!%p8414_p0)
}
 0x86a   : > { %8344 = dma.vmem_to_hbm [thread:$0]  (%p8581_p5), %s10129_s28, 128, %s10127_s27, %s6335_s25   ;;  %v6327_v32 = vld [vmem:[#allocation2] ss:$2 sm:$0xf]  ;;  %vm6332_vm10 = vcmask 519168  }
 0x86b   : > { %s6444_s20 = sshll.u32 %s8593_s18, 2  ;;  %v6329_v9 = vld [vmem:[#allocation2 + $0x1] ss:$2 sm:$0xf] }
 0x86c   : > { %v6330_v55 = vadd.f32 %v6329_v9, %v6327_v32  ;;  %s527_s29 = scalar_lea.vmem %s10191_s16, %s6444_s20 }
 0x86e   : > { %v6331_v22 = vmul.f32 0.5, %v6330_v55 }
 0x870   : > { %6333 = vst.msk [vmem:[%s527_s29] sm:$0xf] %vm6332_vm10, %v6331_v22 }
 0x871 PF: > { %p8350_p1 = scmp.ge.s32.totalorder %s8452_s24, 2  ;;  %s6367_s0 = sand.u32 1, %s8440_s21  }
 0x872   : > { %s6368_s28 = scalar_lea.sflag [#allocation4], %s6367_s0 }
 0x873   : > { %p8347_p2 = pnand %p8350_p1, %p8585_p6 }
 0x875   : > { %8435 = dma.done.wait (!%p8347_p2), %s6368_s28, 128  }
 0x876   : > { %8437 = vsyncadd (!%p8347_p2), %s6368_s28, 4294967168  ;;  %s10206_s24 = sld [smem:[#allocation7_spill]]  ;;  %s10207_s18 = sld [smem:[#allocation6_spill]] }
 0x877   : > { %s10208_s23 = sld [smem:[#allocation8_spill]]  ;;  %s10209_s21 = smov %s8444_s22 }
 0x87c   : > { %p27_p5 = scmp.ge.s32.totalorder %s10206_s24, 4   ;;  %s10210_s22 = smov %s10207_s18 }
 0x87e   :  { %29 = sbr.rel (!%p27_p5) target bundleno = 7 (0x7), region = 128 }
 0x885   :  { %6380 = vsyncpa [#allocation4], 1 }
 0x886   :  { %6382 = vsyncpa [#allocation4 + $0x1], 1 }

</bundles_post_ra>
